<compile_context>
chip_gen: v6e
topology: v6e:2x2x1
jax: 0.10.0
libtpu: 0.0.40
codegen_flags: <defaults>
</compile_context>

<pallas_src>
import functools

import jax
import jax.numpy as jnp
from jax import lax
from jax.experimental import pallas as pl
from jax.experimental.pallas import tpu as pltpu

F32 = jnp.float32
BF16 = jnp.bfloat16

_COMPILER_PARAMS = pltpu.CompilerParams(
    dimension_semantics=("parallel",),
    vmem_limit_bytes=32 * 1024 * 1024,
)


# ------------------------------------------------------------------
# Pallas kernels
# ------------------------------------------------------------------
def _nb1d_kernel(x_ref, w1_ref, w2_ref, w3_ref, w4_ref, sh_ref, msk_ref,
                 o_ref, buf_a, buf_b, *, H, W, C, d):
    """Fused non_bottleneck_1d block for one batch element.

    x_ref  : (H*W, C) f32 input activation (row index = h*W + w).
    wN_ref : (3, C, C) bf16 conv weights [tap, Cin, Cout]; BN scale folded
             into conv2 / conv4 weights.
    sh_ref : (4, 1, C) f32 additive shifts (bias [+ folded BN shift]).
    msk_ref: (4, H*W, 1) f32 {0,1} W-boundary masks:
             [left(dw=1), right(dw=1), left(dw=d), right(dw=d)].
    o_ref  : (H*W, C) f32 output.
    buf_a / buf_b : ((H+2d)*W, C) f32 VMEM ping-pong buffers with d zero
             "halo" image rows above and below the interior.
    """
    L = H * W
    base = d * W                       # rows of top halo padding

    # Zero the halo rows once; every later store only touches [base, base+L).
    zpad = jnp.zeros((base, C), F32)
    buf_a[pl.ds(0, base), :] = zpad
    buf_a[pl.ds(base + L, base), :] = zpad
    buf_b[pl.ds(0, base), :] = zpad
    buf_b[pl.ds(base + L, base), :] = zpad

    # Activation -> interior of buf_a.
    buf_a[pl.ds(base, L), :] = x_ref[...]

    def hconv(src, w_ref, dh):
        # (3,1) conv along H: taps are +-dh*W row shifts; halo rows are zero
        # so no masking is needed.  Taps landing entirely in the halo are
        # skipped at trace time.
        acc = jnp.dot(src[pl.ds(base, L), :].astype(BF16), w_ref[1],
                      preferred_element_type=F32)
        if dh < H:
            acc = acc + jnp.dot(src[pl.ds(base - dh * W, L), :].astype(BF16),
                                w_ref[0], preferred_element_type=F32)
            acc = acc + jnp.dot(src[pl.ds(base + dh * W, L), :].astype(BF16),
                                w_ref[2], preferred_element_type=F32)
        return acc

    def wconv(src, w_ref, dw, m_left, m_right):
        # (1,3) conv along W: taps are +-dw row shifts in the flat layout;
        # contributions that would wrap across an image row are zeroed with
        # the per-tap masks (so no W padding / no masked stores needed).
        acc = jnp.dot(src[pl.ds(base, L), :].astype(BF16), w_ref[1],
                      preferred_element_type=F32)
        if dw < W:
            xl = src[pl.ds(base - dw, L), :] * m_left
            acc = acc + jnp.dot(xl.astype(BF16), w_ref[0],
                                preferred_element_type=F32)
            xr = src[pl.ds(base + dw, L), :] * m_right
            acc = acc + jnp.dot(xr.astype(BF16), w_ref[2],
                                preferred_element_type=F32)
        return acc

    # conv3x1_1 + bias + ReLU
    y = hconv(buf_a, w1_ref, 1)
    buf_b[pl.ds(base, L), :] = jnp.maximum(y + sh_ref[0], 0.0)

    # conv1x3_1 + (bias, BN1 folded) + ReLU
    y = wconv(buf_b, w2_ref, 1, msk_ref[0], msk_ref[1])
    buf_a[pl.ds(base, L), :] = jnp.maximum(y + sh_ref[1], 0.0)

    # conv3x1_2 (dilated) + bias + ReLU
    y = hconv(buf_a, w3_ref, d)
    buf_b[pl.ds(base, L), :] = jnp.maximum(y + sh_ref[2], 0.0)

    # conv1x3_2 (dilated) + (bias, BN2 folded) + residual + ReLU
    # TODO(synk): Dropout2d(p=0.1) is stochastic; eval-mode identity here.
    y = wconv(buf_b, w4_ref, d, msk_ref[2], msk_ref[3])
    o_ref[...] = jnp.maximum(y + sh_ref[3] + x_ref[...], 0.0)


def _down_kernel(t0, t1, t2, t3, t4, t5, t6, t7, t8,
                 w_ref, csh_ref, ps_ref, psh_ref, o_ref):
    """Fused DownsamplerBlock tile.

    3x3/s2 conv as 9 accumulating taps + bias + folded BN + ReLU, 2x2 maxpool
    (taps 4,5,7,8) + folded BN + ReLU, and the channel concat, all in one
    kernel writing a lane-dense (TM, Cout) output tile.
    """
    taps = (t0, t1, t2, t3, t4, t5, t6, t7, t8)
    acc = jnp.dot(taps[0][...].astype(BF16), w_ref[0],
                  preferred_element_type=F32)
    for t in range(1, 9):
        acc = acc + jnp.dot(taps[t][...].astype(BF16), w_ref[t],
                            preferred_element_type=F32)
    conv = jnp.maximum(acc + csh_ref[...], 0.0)
    mx = jnp.maximum(jnp.maximum(t4[...], t5[...]),
                     jnp.maximum(t7[...], t8[...]))
    pool = jnp.maximum(mx * ps_ref[...] + psh_ref[...], 0.0)
    o_ref[...] = jnp.concatenate([conv, pool], axis=-1)


# ------------------------------------------------------------------
# Pallas wrappers
# ------------------------------------------------------------------
def _pick_tm(m):
    # Largest tile that divides M while keeping >= 2 grid steps (v7x 2 TCs).
    for tm in (1024, 512, 256, 128, 64, 32, 16, 8):
        if m % tm == 0 and m // tm >= 2:
            return tm
    return m


def downsampler_forward(x, p):
    """x: (N, H, W, Cin) NHWC -> (N, H//2, W//2, Cout)."""
    N, H, W, cin = x.shape
    cout = p['cout']
    cconv = cout - cin
    ho, wo = H // 2, W // 2
    m = N * ho * wo

    xp = jnp.pad(x, ((0, 0), (1, 1), (1, 1), (0, 0)))
    taps = [xp[:, kh:kh + 2 * ho:2, kw:kw + 2 * wo:2, :].reshape(m, cin)
            for kh in range(3) for kw in range(3)]

    tm = _pick_tm(m)
    in_specs = ([pl.BlockSpec((tm, cin), lambda i: (i, 0)) for _ in range(9)]
                + [pl.BlockSpec((9, cin, cconv), lambda i: (0, 0, 0)),
                   pl.BlockSpec((1, cconv), lambda i: (0, 0)),
                   pl.BlockSpec((1, cin), lambda i: (0, 0)),
                   pl.BlockSpec((1, cin), lambda i: (0, 0))])
    out = pl.pallas_call(
        _down_kernel,
        out_shape=jax.ShapeDtypeStruct((m, cout), F32),
        grid=(m // tm,),
        in_specs=in_specs,
        out_specs=pl.BlockSpec((tm, cout), lambda i: (i, 0)),
        compiler_params=_COMPILER_PARAMS,
    )(*taps, p['w'], p['csh'], p['ps'], p['psh'])
    return out.reshape(N, ho, wo, cout)


def nb1d_forward(x, p):
    """x: (N, H, W, C) NHWC -> same shape (one fused pallas_call)."""
    N, H, W, C = x.shape
    d = p['d']
    L = H * W
    R = (H + 2 * d) * W

    xf = x.reshape(N, L, C)
    w_idx = jnp.arange(L, dtype=jnp.int32) % W

    def wmasks(dw):
        ml = (w_idx >= dw).astype(F32).reshape(L, 1)
        mr = (w_idx < W - dw).astype(F32).reshape(L, 1)
        return ml, mr

    ml1, mr1 = wmasks(1)
    mld, mrd = wmasks(d)
    masks = jnp.stack([ml1, mr1, mld, mrd])          # (4, L, 1)

    kernel = functools.partial(_nb1d_kernel, H=H, W=W, C=C, d=d)
    wspec = pl.BlockSpec((3, C, C), lambda n: (0, 0, 0))
    out = pl.pallas_call(
        kernel,
        out_shape=jax.ShapeDtypeStruct((N, L, C), F32),
        grid=(N,),
        in_specs=[pl.BlockSpec((None, L, C), lambda n: (n, 0, 0)),
                  wspec, wspec, wspec, wspec,
                  pl.BlockSpec((4, 1, C), lambda n: (0, 0, 0)),
                  pl.BlockSpec((4, L, 1), lambda n: (0, 0, 0))],
        out_specs=pl.BlockSpec((None, L, C), lambda n: (n, 0, 0)),
        scratch_shapes=[pltpu.VMEM((R, C), F32), pltpu.VMEM((R, C), F32)],
        compiler_params=_COMPILER_PARAMS,
    )(xf, p['w1'], p['w2'], p['w3'], p['w4'], p['sh'], masks)
    return out.reshape(N, H, W, C)


# ------------------------------------------------------------------
# Parameter init (deterministic, synthetic; BN folded at build time)
# ------------------------------------------------------------------
def _init_bn(key, c):
    k1, k2, k3, k4 = jax.random.split(key, 4)
    gamma = 1.0 + 0.1 * jax.random.normal(k1, (c,), F32)
    beta = 0.1 * jax.random.normal(k2, (c,), F32)
    mean = 0.1 * jax.random.normal(k3, (c,), F32)
    var = 1.0 + 0.1 * jax.random.uniform(k4, (c,), F32)
    scale = gamma / jnp.sqrt(var + 1e-3)             # eps=0.001 as in module
    shift = beta - mean * scale
    return scale, shift


def _init_conv(key, taps, cin, cout):
    k1, k2 = jax.random.split(key)
    w = jax.random.normal(k1, (taps, cin, cout), F32) / jnp.sqrt(float(taps * cin))
    b = 0.01 * jax.random.normal(k2, (cout,), F32)
    return w, b


def init_downsampler(key, cin, cout):
    cconv = cout - cin
    k1, k2 = jax.random.split(key)
    w, b = _init_conv(k1, 9, cin, cconv)
    bn_s, bn_t = _init_bn(k2, cout)
    return dict(
        kind='down', cin=cin, cout=cout,
        # BN scale folded into the conv weight columns; bf16 for the MXU.
        w=(w * bn_s[:cconv][None, None, :]).astype(BF16),
        csh=(b * bn_s[:cconv] + bn_t[:cconv]).reshape(1, cconv),
        ps=bn_s[cconv:].reshape(1, cin),
        psh=bn_t[cconv:].reshape(1, cin))


def init_nb1d(key, c, d):
    ks = jax.random.split(key, 6)
    w1, b1 = _init_conv(ks[0], 3, c, c)
    w2, b2 = _init_conv(ks[1], 3, c, c)
    w3, b3 = _init_conv(ks[2], 3, c, c)
    w4, b4 = _init_conv(ks[3], 3, c, c)
    s1, t1 = _init_bn(ks[4], c)
    s2, t2 = _init_bn(ks[5], c)
    sh = jnp.stack([b1.reshape(1, c),
                    (b2 * s1 + t1).reshape(1, c),
                    b3.reshape(1, c),
                    (b4 * s2 + t2).reshape(1, c)])   # (4, 1, c) f32
    return dict(kind='nb', c=c, d=d,
                w1=w1.astype(BF16),
                w2=(w2 * s1[None, None, :]).astype(BF16),
                w3=w3.astype(BF16),
                w4=(w4 * s2[None, None, :]).astype(BF16),
                sh=sh)


def build_params(key):
    keys = jax.random.split(key, 15)
    params = [init_downsampler(keys[0], 16, 64)]
    for i in range(5):
        params.append(init_nb1d(keys[1 + i], 64, 1))
    params.append(init_downsampler(keys[6], 64, 128))
    for i, d in enumerate([2, 4, 8, 16, 2, 4, 8, 16]):
        params.append(init_nb1d(keys[7 + i], 128, d))
    return params


def encoder2_forward(x, params):
    for p in params:
        x = downsampler_forward(x, p) if p['kind'] == 'down' else nb1d_forward(x, p)
    return x


# ------------------------------------------------------------------
# Pure-JAX reference (same folded bf16 weights, f32 accumulation)
# ------------------------------------------------------------------
def _ref_conv(x, w_hwio, stride, dil, pad):
    return lax.conv_general_dilated(
        x.astype(BF16), w_hwio,
        window_strides=(stride, stride),
        padding=[(pad[0], pad[0]), (pad[1], pad[1])],
        rhs_dilation=dil,
        dimension_numbers=('NHWC', 'HWIO', 'NHWC'),
        preferred_element_type=F32)


def _ref_downsampler(x, p):
    cin = p['cin']
    cconv = p['cout'] - cin
    conv = _ref_conv(x, p['w'].reshape(3, 3, cin, cconv), 2, (1, 1), (1, 1))
    conv = jnp.maximum(conv + p['csh'].reshape(-1), 0.0)
    pool = jnp.maximum(jnp.maximum(x[:, 0::2, 0::2, :], x[:, 0::2, 1::2, :]),
                       jnp.maximum(x[:, 1::2, 0::2, :], x[:, 1::2, 1::2, :]))
    pool = jnp.maximum(pool * p['ps'].reshape(-1) + p['psh'].reshape(-1), 0.0)
    return jnp.concatenate([conv, pool], axis=-1)


def _ref_nb1d(x, p):
    c, d, sh = p['c'], p['d'], p['sh']
    y = jnp.maximum(_ref_conv(x, p['w1'].reshape(3, 1, c, c), 1, (1, 1), (1, 0))
                    + sh[0].reshape(-1), 0.0)
    y = jnp.maximum(_ref_conv(y, p['w2'].reshape(1, 3, c, c), 1, (1, 1), (0, 1))
                    + sh[1].reshape(-1), 0.0)
    y = jnp.maximum(_ref_conv(y, p['w3'].reshape(3, 1, c, c), 1, (d, 1), (d, 0))
                    + sh[2].reshape(-1), 0.0)
    y = (_ref_conv(y, p['w4'].reshape(1, 3, c, c), 1, (1, d), (0, d))
         + sh[3].reshape(-1))
    return jnp.maximum(y + x, 0.0)


def ref_forward(x, params):
    for p in params:
        x = _ref_downsampler(x, p) if p['kind'] == 'down' else _ref_nb1d(x, p)
    return x


# ------------------------------------------------------------------
if __name__ == "__main__":
    key = jax.random.PRNGKey(0)
    kx, kp = jax.random.split(key)
    # NHWC input; the equivalent PyTorch NCHW input shape is (2, 16, 16, 16).
    x = jax.random.normal(kx, (2, 16, 16, 16), F32)
    params = build_params(kp)

    fwd = jax.jit(lambda inp: encoder2_forward(inp, params))
    out = jax.block_until_ready(fwd(x))

    ref = jax.block_until_ready(jax.jit(lambda inp: ref_forward(inp, params))(x))

    assert out.shape == (2, 4, 4, 128), out.shape
    assert bool(jnp.all(jnp.isfinite(out)))
    max_diff = float(jnp.max(jnp.abs(out - ref)))
    assert max_diff < 3e-2, f"mismatch vs reference: {max_diff}"
    print("KERNEL_OK")
</pallas_src>

<mosaic_0001>
module attributes {stable_mosaic.version = 11 : i64} {
  func.func @_down_kernel(%arg0: i32, %arg1: memref<64x16xf32, #tpu.memory_space<vmem>>, %arg2: memref<64x16xf32, #tpu.memory_space<vmem>>, %arg3: memref<64x16xf32, #tpu.memory_space<vmem>>, %arg4: memref<64x16xf32, #tpu.memory_space<vmem>>, %arg5: memref<64x16xf32, #tpu.memory_space<vmem>>, %arg6: memref<64x16xf32, #tpu.memory_space<vmem>>, %arg7: memref<64x16xf32, #tpu.memory_space<vmem>>, %arg8: memref<64x16xf32, #tpu.memory_space<vmem>>, %arg9: memref<64x16xf32, #tpu.memory_space<vmem>>, %arg10: memref<9x16x48xbf16, #tpu.memory_space<vmem>>, %arg11: memref<1x48xf32, #tpu.memory_space<vmem>>, %arg12: memref<1x16xf32, #tpu.memory_space<vmem>>, %arg13: memref<1x16xf32, #tpu.memory_space<vmem>>, %arg14: memref<64x64xf32, #tpu.memory_space<vmem>>) attributes {dimension_semantics = [#tpu.dimension_semantics<parallel>], iteration_bounds = array<i64: 2>, scalar_prefetch = 0 : i64, scratch_operands = 0 : i64, tpu.core_type = #tpu.core_type<tc>, window_params = [{transform_indices = @transform_0, window_bounds = array<i64: 64, 16>}, {transform_indices = @transform_1, window_bounds = array<i64: 64, 16>}, {transform_indices = @transform_2, window_bounds = array<i64: 64, 16>}, {transform_indices = @transform_3, window_bounds = array<i64: 64, 16>}, {transform_indices = @transform_4, window_bounds = array<i64: 64, 16>}, {transform_indices = @transform_5, window_bounds = array<i64: 64, 16>}, {transform_indices = @transform_6, window_bounds = array<i64: 64, 16>}, {transform_indices = @transform_7, window_bounds = array<i64: 64, 16>}, {transform_indices = @transform_8, window_bounds = array<i64: 64, 16>}, {pipeline_mode = #tpu.pipeline_mode<synchronous>, transform_indices = @transform_9, window_bounds = array<i64: 9, 16, 48>}, {pipeline_mode = #tpu.pipeline_mode<synchronous>, transform_indices = @transform_10, window_bounds = array<i64: 1, 48>}, {pipeline_mode = #tpu.pipeline_mode<synchronous>, transform_indices = @transform_11, window_bounds = array<i64: 1, 16>}, {pipeline_mode = #tpu.pipeline_mode<synchronous>, transform_indices = @transform_12, window_bounds = array<i64: 1, 16>}, {transform_indices = @transform_13, window_bounds = array<i64: 64, 64>}]} {
    %c0 = arith.constant 0 : index
    %c0_0 = arith.constant 0 : index
    %0 = vector.load %arg1[%c0, %c0_0] : memref<64x16xf32, #tpu.memory_space<vmem>>, vector<64x16xf32>
    %1 = arith.truncf %0 : vector<64x16xf32> to vector<64x16xbf16>
    %c0_1 = arith.constant 0 : index
    %c0_2 = arith.constant 0 : index
    %c0_3 = arith.constant 0 : index
    %2 = vector.load %arg10[%c0_1, %c0_2, %c0_3] : memref<9x16x48xbf16, #tpu.memory_space<vmem>>, vector<1x16x48xbf16>
    %3 = vector.shape_cast %2 : vector<1x16x48xbf16> to vector<16x48xbf16>
    %cst = arith.constant dense<0.000000e+00> : vector<64x48xf32>
    %4 = tpu.matmul %1, %3, %cst {dimension_numbers = #tpu.dot_dimension_numbers<[1], [0], [0], [1], [0, 0, 1, 1], [], []>} : vector<64x16xbf16>, vector<16x48xbf16>, vector<64x48xf32> -> vector<64x48xf32>
    %c0_4 = arith.constant 0 : index
    %c0_5 = arith.constant 0 : index
    %5 = vector.load %arg2[%c0_4, %c0_5] : memref<64x16xf32, #tpu.memory_space<vmem>>, vector<64x16xf32>
    %6 = arith.truncf %5 : vector<64x16xf32> to vector<64x16xbf16>
    %c1 = arith.constant 1 : index
    %c0_6 = arith.constant 0 : index
    %c0_7 = arith.constant 0 : index
    %7 = vector.load %arg10[%c1, %c0_6, %c0_7] : memref<9x16x48xbf16, #tpu.memory_space<vmem>>, vector<1x16x48xbf16>
    %8 = vector.shape_cast %7 : vector<1x16x48xbf16> to vector<16x48xbf16>
    %cst_8 = arith.constant dense<0.000000e+00> : vector<64x48xf32>
    %9 = tpu.matmul %6, %8, %cst_8 {dimension_numbers = #tpu.dot_dimension_numbers<[1], [0], [0], [1], [0, 0, 1, 1], [], []>} : vector<64x16xbf16>, vector<16x48xbf16>, vector<64x48xf32> -> vector<64x48xf32>
    %10 = arith.addf %4, %9 : vector<64x48xf32>
    %c0_9 = arith.constant 0 : index
    %c0_10 = arith.constant 0 : index
    %11 = vector.load %arg3[%c0_9, %c0_10] : memref<64x16xf32, #tpu.memory_space<vmem>>, vector<64x16xf32>
    %12 = arith.truncf %11 : vector<64x16xf32> to vector<64x16xbf16>
    %c2 = arith.constant 2 : index
    %c0_11 = arith.constant 0 : index
    %c0_12 = arith.constant 0 : index
    %13 = vector.load %arg10[%c2, %c0_11, %c0_12] : memref<9x16x48xbf16, #tpu.memory_space<vmem>>, vector<1x16x48xbf16>
    %14 = vector.shape_cast %13 : vector<1x16x48xbf16> to vector<16x48xbf16>
    %cst_13 = arith.constant dense<0.000000e+00> : vector<64x48xf32>
    %15 = tpu.matmul %12, %14, %cst_13 {dimension_numbers = #tpu.dot_dimension_numbers<[1], [0], [0], [1], [0, 0, 1, 1], [], []>} : vector<64x16xbf16>, vector<16x48xbf16>, vector<64x48xf32> -> vector<64x48xf32>
    %16 = arith.addf %10, %15 : vector<64x48xf32>
    %c0_14 = arith.constant 0 : index
    %c0_15 = arith.constant 0 : index
    %17 = vector.load %arg4[%c0_14, %c0_15] : memref<64x16xf32, #tpu.memory_space<vmem>>, vector<64x16xf32>
    %18 = arith.truncf %17 : vector<64x16xf32> to vector<64x16xbf16>
    %c3 = arith.constant 3 : index
    %c0_16 = arith.constant 0 : index
    %c0_17 = arith.constant 0 : index
    %19 = vector.load %arg10[%c3, %c0_16, %c0_17] : memref<9x16x48xbf16, #tpu.memory_space<vmem>>, vector<1x16x48xbf16>
    %20 = vector.shape_cast %19 : vector<1x16x48xbf16> to vector<16x48xbf16>
    %cst_18 = arith.constant dense<0.000000e+00> : vector<64x48xf32>
    %21 = tpu.matmul %18, %20, %cst_18 {dimension_numbers = #tpu.dot_dimension_numbers<[1], [0], [0], [1], [0, 0, 1, 1], [], []>} : vector<64x16xbf16>, vector<16x48xbf16>, vector<64x48xf32> -> vector<64x48xf32>
    %22 = arith.addf %16, %21 : vector<64x48xf32>
    %c0_19 = arith.constant 0 : index
    %c0_20 = arith.constant 0 : index
    %23 = vector.load %arg5[%c0_19, %c0_20] : memref<64x16xf32, #tpu.memory_space<vmem>>, vector<64x16xf32>
    %24 = arith.truncf %23 : vector<64x16xf32> to vector<64x16xbf16>
    %c4 = arith.constant 4 : index
    %c0_21 = arith.constant 0 : index
    %c0_22 = arith.constant 0 : index
    %25 = vector.load %arg10[%c4, %c0_21, %c0_22] : memref<9x16x48xbf16, #tpu.memory_space<vmem>>, vector<1x16x48xbf16>
    %26 = vector.shape_cast %25 : vector<1x16x48xbf16> to vector<16x48xbf16>
    %cst_23 = arith.constant dense<0.000000e+00> : vector<64x48xf32>
    %27 = tpu.matmul %24, %26, %cst_23 {dimension_numbers = #tpu.dot_dimension_numbers<[1], [0], [0], [1], [0, 0, 1, 1], [], []>} : vector<64x16xbf16>, vector<16x48xbf16>, vector<64x48xf32> -> vector<64x48xf32>
    %28 = arith.addf %22, %27 : vector<64x48xf32>
    %c0_24 = arith.constant 0 : index
    %c0_25 = arith.constant 0 : index
    %29 = vector.load %arg6[%c0_24, %c0_25] : memref<64x16xf32, #tpu.memory_space<vmem>>, vector<64x16xf32>
    %30 = arith.truncf %29 : vector<64x16xf32> to vector<64x16xbf16>
    %c5 = arith.constant 5 : index
    %c0_26 = arith.constant 0 : index
    %c0_27 = arith.constant 0 : index
    %31 = vector.load %arg10[%c5, %c0_26, %c0_27] : memref<9x16x48xbf16, #tpu.memory_space<vmem>>, vector<1x16x48xbf16>
    %32 = vector.shape_cast %31 : vector<1x16x48xbf16> to vector<16x48xbf16>
    %cst_28 = arith.constant dense<0.000000e+00> : vector<64x48xf32>
    %33 = tpu.matmul %30, %32, %cst_28 {dimension_numbers = #tpu.dot_dimension_numbers<[1], [0], [0], [1], [0, 0, 1, 1], [], []>} : vector<64x16xbf16>, vector<16x48xbf16>, vector<64x48xf32> -> vector<64x48xf32>
    %34 = arith.addf %28, %33 : vector<64x48xf32>
    %c0_29 = arith.constant 0 : index
    %c0_30 = arith.constant 0 : index
    %35 = vector.load %arg7[%c0_29, %c0_30] : memref<64x16xf32, #tpu.memory_space<vmem>>, vector<64x16xf32>
    %36 = arith.truncf %35 : vector<64x16xf32> to vector<64x16xbf16>
    %c6 = arith.constant 6 : index
    %c0_31 = arith.constant 0 : index
    %c0_32 = arith.constant 0 : index
    %37 = vector.load %arg10[%c6, %c0_31, %c0_32] : memref<9x16x48xbf16, #tpu.memory_space<vmem>>, vector<1x16x48xbf16>
    %38 = vector.shape_cast %37 : vector<1x16x48xbf16> to vector<16x48xbf16>
    %cst_33 = arith.constant dense<0.000000e+00> : vector<64x48xf32>
    %39 = tpu.matmul %36, %38, %cst_33 {dimension_numbers = #tpu.dot_dimension_numbers<[1], [0], [0], [1], [0, 0, 1, 1], [], []>} : vector<64x16xbf16>, vector<16x48xbf16>, vector<64x48xf32> -> vector<64x48xf32>
    %40 = arith.addf %34, %39 : vector<64x48xf32>
    %c0_34 = arith.constant 0 : index
    %c0_35 = arith.constant 0 : index
    %41 = vector.load %arg8[%c0_34, %c0_35] : memref<64x16xf32, #tpu.memory_space<vmem>>, vector<64x16xf32>
    %42 = arith.truncf %41 : vector<64x16xf32> to vector<64x16xbf16>
    %c7 = arith.constant 7 : index
    %c0_36 = arith.constant 0 : index
    %c0_37 = arith.constant 0 : index
    %43 = vector.load %arg10[%c7, %c0_36, %c0_37] : memref<9x16x48xbf16, #tpu.memory_space<vmem>>, vector<1x16x48xbf16>
    %44 = vector.shape_cast %43 : vector<1x16x48xbf16> to vector<16x48xbf16>
    %cst_38 = arith.constant dense<0.000000e+00> : vector<64x48xf32>
    %45 = tpu.matmul %42, %44, %cst_38 {dimension_numbers = #tpu.dot_dimension_numbers<[1], [0], [0], [1], [0, 0, 1, 1], [], []>} : vector<64x16xbf16>, vector<16x48xbf16>, vector<64x48xf32> -> vector<64x48xf32>
    %46 = arith.addf %40, %45 : vector<64x48xf32>
    %c0_39 = arith.constant 0 : index
    %c0_40 = arith.constant 0 : index
    %47 = vector.load %arg9[%c0_39, %c0_40] : memref<64x16xf32, #tpu.memory_space<vmem>>, vector<64x16xf32>
    %48 = arith.truncf %47 : vector<64x16xf32> to vector<64x16xbf16>
    %c8 = arith.constant 8 : index
    %c0_41 = arith.constant 0 : index
    %c0_42 = arith.constant 0 : index
    %49 = vector.load %arg10[%c8, %c0_41, %c0_42] : memref<9x16x48xbf16, #tpu.memory_space<vmem>>, vector<1x16x48xbf16>
    %50 = vector.shape_cast %49 : vector<1x16x48xbf16> to vector<16x48xbf16>
    %cst_43 = arith.constant dense<0.000000e+00> : vector<64x48xf32>
    %51 = tpu.matmul %48, %50, %cst_43 {dimension_numbers = #tpu.dot_dimension_numbers<[1], [0], [0], [1], [0, 0, 1, 1], [], []>} : vector<64x16xbf16>, vector<16x48xbf16>, vector<64x48xf32> -> vector<64x48xf32>
    %52 = arith.addf %46, %51 : vector<64x48xf32>
    %c0_44 = arith.constant 0 : index
    %c0_45 = arith.constant 0 : index
    %53 = vector.load %arg11[%c0_44, %c0_45] : memref<1x48xf32, #tpu.memory_space<vmem>>, vector<1x48xf32>
    %54 = vector.broadcast %53 : vector<1x48xf32> to vector<64x48xf32>
    %55 = arith.addf %52, %54 : vector<64x48xf32>
    %cst_46 = arith.constant 0.000000e+00 : f32
    %56 = vector.broadcast %cst_46 : f32 to vector<64x48xf32>
    %57 = arith.maximumf %55, %56 : vector<64x48xf32>
    %c0_47 = arith.constant 0 : index
    %c0_48 = arith.constant 0 : index
    %58 = vector.load %arg5[%c0_47, %c0_48] : memref<64x16xf32, #tpu.memory_space<vmem>>, vector<64x16xf32>
    %c0_49 = arith.constant 0 : index
    %c0_50 = arith.constant 0 : index
    %59 = vector.load %arg6[%c0_49, %c0_50] : memref<64x16xf32, #tpu.memory_space<vmem>>, vector<64x16xf32>
    %60 = arith.maximumf %58, %59 : vector<64x16xf32>
    %c0_51 = arith.constant 0 : index
    %c0_52 = arith.constant 0 : index
    %61 = vector.load %arg8[%c0_51, %c0_52] : memref<64x16xf32, #tpu.memory_space<vmem>>, vector<64x16xf32>
    %c0_53 = arith.constant 0 : index
    %c0_54 = arith.constant 0 : index
    %62 = vector.load %arg9[%c0_53, %c0_54] : memref<64x16xf32, #tpu.memory_space<vmem>>, vector<64x16xf32>
    %63 = arith.maximumf %61, %62 : vector<64x16xf32>
    %64 = arith.maximumf %60, %63 : vector<64x16xf32>
    %c0_55 = arith.constant 0 : index
    %c0_56 = arith.constant 0 : index
    %65 = vector.load %arg12[%c0_55, %c0_56] : memref<1x16xf32, #tpu.memory_space<vmem>>, vector<1x16xf32>
    %66 = vector.broadcast %65 : vector<1x16xf32> to vector<64x16xf32>
    %67 = arith.mulf %64, %66 : vector<64x16xf32>
    %c0_57 = arith.constant 0 : index
    %c0_58 = arith.constant 0 : index
    %68 = vector.load %arg13[%c0_57, %c0_58] : memref<1x16xf32, #tpu.memory_space<vmem>>, vector<1x16xf32>
    %69 = vector.broadcast %68 : vector<1x16xf32> to vector<64x16xf32>
    %70 = arith.addf %67, %69 : vector<64x16xf32>
    %cst_59 = arith.constant 0.000000e+00 : f32
    %71 = vector.broadcast %cst_59 : f32 to vector<64x16xf32>
    %72 = arith.maximumf %70, %71 : vector<64x16xf32>
    %73 = tpu.concatenate %57, %72 in 1 : vector<64x48xf32>, vector<64x16xf32> -> vector<64x64xf32>
    %c0_60 = arith.constant 0 : index
    %c0_61 = arith.constant 0 : index
    %74 = vector.load %arg14[%c0_60, %c0_61] : memref<64x64xf32, #tpu.memory_space<vmem>>, vector<64x64xf32>
    tpu.vector_store %arg14[%c0_60, %c0_61], %73 {strides = array<i32>} : memref<64x64xf32, #tpu.memory_space<vmem>>, vector<64x64xf32>,
    return
  }
  func.func @transform_0(%arg0: i32) -> (i32, i32) {
    %c0_i32 = arith.constant 0 : i32
    %c0_i32_0 = arith.constant 0 : i32
    return %arg0, %c0_i32 : i32, i32
  }
  func.func @transform_1(%arg0: i32) -> (i32, i32) {
    %c0_i32 = arith.constant 0 : i32
    %c0_i32_0 = arith.constant 0 : i32
    return %arg0, %c0_i32 : i32, i32
  }
  func.func @transform_2(%arg0: i32) -> (i32, i32) {
    %c0_i32 = arith.constant 0 : i32
    %c0_i32_0 = arith.constant 0 : i32
    return %arg0, %c0_i32 : i32, i32
  }
  func.func @transform_3(%arg0: i32) -> (i32, i32) {
    %c0_i32 = arith.constant 0 : i32
    %c0_i32_0 = arith.constant 0 : i32
    return %arg0, %c0_i32 : i32, i32
  }
  func.func @transform_4(%arg0: i32) -> (i32, i32) {
    %c0_i32 = arith.constant 0 : i32
    %c0_i32_0 = arith.constant 0 : i32
    return %arg0, %c0_i32 : i32, i32
  }
  func.func @transform_5(%arg0: i32) -> (i32, i32) {
    %c0_i32 = arith.constant 0 : i32
    %c0_i32_0 = arith.constant 0 : i32
    return %arg0, %c0_i32 : i32, i32
  }
  func.func @transform_6(%arg0: i32) -> (i32, i32) {
    %c0_i32 = arith.constant 0 : i32
    %c0_i32_0 = arith.constant 0 : i32
    return %arg0, %c0_i32 : i32, i32
  }
  func.func @transform_7(%arg0: i32) -> (i32, i32) {
    %c0_i32 = arith.constant 0 : i32
    %c0_i32_0 = arith.constant 0 : i32
    return %arg0, %c0_i32 : i32, i32
  }
  func.func @transform_8(%arg0: i32) -> (i32, i32) {
    %c0_i32 = arith.constant 0 : i32
    %c0_i32_0 = arith.constant 0 : i32
    return %arg0, %c0_i32 : i32, i32
  }
  func.func @transform_9(%arg0: i32) -> (i32, i32, i32) {
    %c0_i32 = arith.constant 0 : i32
    %c0_i32_0 = arith.constant 0 : i32
    %c0_i32_1 = arith.constant 0 : i32
    %c0_i32_2 = arith.constant 0 : i32
    return %c0_i32, %c0_i32_0, %c0_i32_1 : i32, i32, i32
  }
  func.func @transform_10(%arg0: i32) -> (i32, i32) {
    %c0_i32 = arith.constant 0 : i32
    %c0_i32_0 = arith.constant 0 : i32
    %c0_i32_1 = arith.constant 0 : i32
    return %c0_i32, %c0_i32_0 : i32, i32
  }
  func.func @transform_11(%arg0: i32) -> (i32, i32) {
    %c0_i32 = arith.constant 0 : i32
    %c0_i32_0 = arith.constant 0 : i32
    %c0_i32_1 = arith.constant 0 : i32
    return %c0_i32, %c0_i32_0 : i32, i32
  }
  func.func @transform_12(%arg0: i32) -> (i32, i32) {
    %c0_i32 = arith.constant 0 : i32
    %c0_i32_0 = arith.constant 0 : i32
    %c0_i32_1 = arith.constant 0 : i32
    return %c0_i32, %c0_i32_0 : i32, i32
  }
  func.func @transform_13(%arg0: i32) -> (i32, i32) {
    %c0_i32 = arith.constant 0 : i32
    %c0_i32_0 = arith.constant 0 : i32
    return %arg0, %c0_i32 : i32, i32
  }
}

module attributes {stable_mosaic.version = 11 : i64} {
  func.func @_nb1d_kernel(%arg0: i32, %arg1: memref<1x64x64xf32, #tpu.memory_space<vmem>>, %arg2: memref<3x64x64xbf16, #tpu.memory_space<vmem>>, %arg3: memref<3x64x64xbf16, #tpu.memory_space<vmem>>, %arg4: memref<3x64x64xbf16, #tpu.memory_space<vmem>>, %arg5: memref<3x64x64xbf16, #tpu.memory_space<vmem>>, %arg6: memref<4x1x64xf32, #tpu.memory_space<vmem>>, %arg7: memref<4x64x1xf32, #tpu.memory_space<vmem>>, %arg8: memref<1x64x64xf32, #tpu.memory_space<vmem>>, %arg9: memref<80x64xf32, #tpu.memory_space<vmem>>, %arg10: memref<80x64xf32, #tpu.memory_space<vmem>>) attributes {dimension_semantics = [#tpu.dimension_semantics<parallel>], iteration_bounds = array<i64: 2>, scalar_prefetch = 0 : i64, scratch_operands = 2 : i64, tpu.core_type = #tpu.core_type<tc>, window_params = [{transform_indices = @transform_0, window_bounds = array<i64: 1, 64, 64>}, {pipeline_mode = #tpu.pipeline_mode<synchronous>, transform_indices = @transform_1, window_bounds = array<i64: 3, 64, 64>}, {pipeline_mode = #tpu.pipeline_mode<synchronous>, transform_indices = @transform_2, window_bounds = array<i64: 3, 64, 64>}, {pipeline_mode = #tpu.pipeline_mode<synchronous>, transform_indices = @transform_3, window_bounds = array<i64: 3, 64, 64>}, {pipeline_mode = #tpu.pipeline_mode<synchronous>, transform_indices = @transform_4, window_bounds = array<i64: 3, 64, 64>}, {pipeline_mode = #tpu.pipeline_mode<synchronous>, transform_indices = @transform_5, window_bounds = array<i64: 4, 1, 64>}, {pipeline_mode = #tpu.pipeline_mode<synchronous>, transform_indices = @transform_6, window_bounds = array<i64: 4, 64, 1>}, {transform_indices = @transform_7, window_bounds = array<i64: 1, 64, 64>}]} {
    %cst = arith.constant 0.000000e+00 : f32
    %0 = vector.broadcast %cst : f32 to vector<8x64xf32>
    %c0 = arith.constant 0 : index
    %c0_0 = arith.constant 0 : index
    %1 = vector.load %arg9[%c0, %c0_0] : memref<80x64xf32, #tpu.memory_space<vmem>>, vector<8x64xf32>
    tpu.vector_store %arg9[%c0, %c0_0], %0 {strides = array<i32>} : memref<80x64xf32, #tpu.memory_space<vmem>>, vector<8x64xf32>,
    %c72 = arith.constant 72 : index
    %c0_1 = arith.constant 0 : index
    %2 = vector.load %arg9[%c72, %c0_1] : memref<80x64xf32, #tpu.memory_space<vmem>>, vector<8x64xf32>
    tpu.vector_store %arg9[%c72, %c0_1], %0 {strides = array<i32>} : memref<80x64xf32, #tpu.memory_space<vmem>>, vector<8x64xf32>,
    %c0_2 = arith.constant 0 : index
    %c0_3 = arith.constant 0 : index
    %3 = vector.load %arg10[%c0_2, %c0_3] : memref<80x64xf32, #tpu.memory_space<vmem>>, vector<8x64xf32>
    tpu.vector_store %arg10[%c0_2, %c0_3], %0 {strides = array<i32>} : memref<80x64xf32, #tpu.memory_space<vmem>>, vector<8x64xf32>,
    %c72_4 = arith.constant 72 : index
    %c0_5 = arith.constant 0 : index
    %4 = vector.load %arg10[%c72_4, %c0_5] : memref<80x64xf32, #tpu.memory_space<vmem>>, vector<8x64xf32>
    tpu.vector_store %arg10[%c72_4, %c0_5], %0 {strides = array<i32>} : memref<80x64xf32, #tpu.memory_space<vmem>>, vector<8x64xf32>,
    %c0_6 = arith.constant 0 : index
    %c0_7 = arith.constant 0 : index
    %c0_8 = arith.constant 0 : index
    %5 = vector.load %arg1[%c0_6, %c0_7, %c0_8] : memref<1x64x64xf32, #tpu.memory_space<vmem>>, vector<1x64x64xf32>
    %6 = vector.shape_cast %5 : vector<1x64x64xf32> to vector<64x64xf32>
    %c8 = arith.constant 8 : index
    %c0_9 = arith.constant 0 : index
    %7 = vector.load %arg9[%c8, %c0_9] : memref<80x64xf32, #tpu.memory_space<vmem>>, vector<64x64xf32>
    tpu.vector_store %arg9[%c8, %c0_9], %6 {strides = array<i32>} : memref<80x64xf32, #tpu.memory_space<vmem>>, vector<64x64xf32>,
    %c8_10 = arith.constant 8 : index
    %c0_11 = arith.constant 0 : index
    %8 = vector.load %arg9[%c8_10, %c0_11] : memref<80x64xf32, #tpu.memory_space<vmem>>, vector<64x64xf32>
    %9 = arith.truncf %8 : vector<64x64xf32> to vector<64x64xbf16>
    %c1 = arith.constant 1 : index
    %c0_12 = arith.constant 0 : index
    %c0_13 = arith.constant 0 : index
    %10 = vector.load %arg2[%c1, %c0_12, %c0_13] : memref<3x64x64xbf16, #tpu.memory_space<vmem>>, vector<1x64x64xbf16>
    %11 = vector.shape_cast %10 : vector<1x64x64xbf16> to vector<64x64xbf16>
    %cst_14 = arith.constant dense<0.000000e+00> : vector<64x64xf32>
    %12 = tpu.matmul %9, %11, %cst_14 {dimension_numbers = #tpu.dot_dimension_numbers<[1], [0], [0], [1], [0, 0, 1, 1], [], []>} : vector<64x64xbf16>, vector<64x64xbf16>, vector<64x64xf32> -> vector<64x64xf32>
    %c0_15 = arith.constant 0 : index
    %c0_16 = arith.constant 0 : index
    %13 = vector.load %arg9[%c0_15, %c0_16] : memref<80x64xf32, #tpu.memory_space<vmem>>, vector<64x64xf32>
    %14 = arith.truncf %13 : vector<64x64xf32> to vector<64x64xbf16>
    %c0_17 = arith.constant 0 : index
    %c0_18 = arith.constant 0 : index
    %c0_19 = arith.constant 0 : index
    %15 = vector.load %arg2[%c0_17, %c0_18, %c0_19] : memref<3x64x64xbf16, #tpu.memory_space<vmem>>, vector<1x64x64xbf16>
    %16 = vector.shape_cast %15 : vector<1x64x64xbf16> to vector<64x64xbf16>
    %cst_20 = arith.constant dense<0.000000e+00> : vector<64x64xf32>
    %17 = tpu.matmul %14, %16, %cst_20 {dimension_numbers = #tpu.dot_dimension_numbers<[1], [0], [0], [1], [0, 0, 1, 1], [], []>} : vector<64x64xbf16>, vector<64x64xbf16>, vector<64x64xf32> -> vector<64x64xf32>
    %18 = arith.addf %12, %17 : vector<64x64xf32>
    %c16 = arith.constant 16 : index
    %c0_21 = arith.constant 0 : index
    %19 = vector.load %arg9[%c16, %c0_21] : memref<80x64xf32, #tpu.memory_space<vmem>>, vector<64x64xf32>
    %20 = arith.truncf %19 : vector<64x64xf32> to vector<64x64xbf16>
    %c2 = arith.constant 2 : index
    %c0_22 = arith.constant 0 : index
    %c0_23 = arith.constant 0 : index
    %21 = vector.load %arg2[%c2, %c0_22, %c0_23] : memref<3x64x64xbf16, #tpu.memory_space<vmem>>, vector<1x64x64xbf16>
    %22 = vector.shape_cast %21 : vector<1x64x64xbf16> to vector<64x64xbf16>
    %cst_24 = arith.constant dense<0.000000e+00> : vector<64x64xf32>
    %23 = tpu.matmul %20, %22, %cst_24 {dimension_numbers = #tpu.dot_dimension_numbers<[1], [0], [0], [1], [0, 0, 1, 1], [], []>} : vector<64x64xbf16>, vector<64x64xbf16>, vector<64x64xf32> -> vector<64x64xf32>
    %24 = arith.addf %18, %23 : vector<64x64xf32>
    %c0_25 = arith.constant 0 : index
    %c0_26 = arith.constant 0 : index
    %c0_27 = arith.constant 0 : index
    %25 = vector.load %arg6[%c0_25, %c0_26, %c0_27] : memref<4x1x64xf32, #tpu.memory_space<vmem>>, vector<1x1x64xf32>
    %26 = vector.shape_cast %25 : vector<1x1x64xf32> to vector<1x64xf32>
    %27 = vector.broadcast %26 : vector<1x64xf32> to vector<64x64xf32>
    %28 = arith.addf %24, %27 : vector<64x64xf32>
    %cst_28 = arith.constant 0.000000e+00 : f32
    %29 = vector.broadcast %cst_28 : f32 to vector<64x64xf32>
    %30 = arith.maximumf %28, %29 : vector<64x64xf32>
    %c8_29 = arith.constant 8 : index
    %c0_30 = arith.constant 0 : index
    %31 = vector.load %arg10[%c8_29, %c0_30] : memref<80x64xf32, #tpu.memory_space<vmem>>, vector<64x64xf32>
    tpu.vector_store %arg10[%c8_29, %c0_30], %30 {strides = array<i32>} : memref<80x64xf32, #tpu.memory_space<vmem>>, vector<64x64xf32>,
    %c0_31 = arith.constant 0 : index
    %c0_32 = arith.constant 0 : index
    %c0_33 = arith.constant 0 : index
    %32 = vector.load %arg7[%c0_31, %c0_32, %c0_33] : memref<4x64x1xf32, #tpu.memory_space<vmem>>, vector<1x64x1xf32>
    %33 = vector.shape_cast %32 : vector<1x64x1xf32> to vector<64x1xf32>
    %c1_34 = arith.constant 1 : index
    %c0_35 = arith.constant 0 : index
    %c0_36 = arith.constant 0 : index
    %34 = vector.load %arg7[%c1_34, %c0_35, %c0_36] : memref<4x64x1xf32, #tpu.memory_space<vmem>>, vector<1x64x1xf32>
    %35 = vector.shape_cast %34 : vector<1x64x1xf32> to vector<64x1xf32>
    %c8_37 = arith.constant 8 : index
    %c0_38 = arith.constant 0 : index
    %36 = vector.load %arg10[%c8_37, %c0_38] : memref<80x64xf32, #tpu.memory_space<vmem>>, vector<64x64xf32>
    %37 = arith.truncf %36 : vector<64x64xf32> to vector<64x64xbf16>
    %c1_39 = arith.constant 1 : index
    %c0_40 = arith.constant 0 : index
    %c0_41 = arith.constant 0 : index
    %38 = vector.load %arg3[%c1_39, %c0_40, %c0_41] : memref<3x64x64xbf16, #tpu.memory_space<vmem>>, vector<1x64x64xbf16>
    %39 = vector.shape_cast %38 : vector<1x64x64xbf16> to vector<64x64xbf16>
    %cst_42 = arith.constant dense<0.000000e+00> : vector<64x64xf32>
    %40 = tpu.matmul %37, %39, %cst_42 {dimension_numbers = #tpu.dot_dimension_numbers<[1], [0], [0], [1], [0, 0, 1, 1], [], []>} : vector<64x64xbf16>, vector<64x64xbf16>, vector<64x64xf32> -> vector<64x64xf32>
    %c7 = arith.constant 7 : index
    %c0_43 = arith.constant 0 : index
    %41 = vector.load %arg10[%c7, %c0_43] : memref<80x64xf32, #tpu.memory_space<vmem>>, vector<64x64xf32>
    %42 = vector.broadcast %33 : vector<64x1xf32> to vector<64x64xf32>
    %43 = arith.mulf %41, %42 : vector<64x64xf32>
    %44 = arith.truncf %43 : vector<64x64xf32> to vector<64x64xbf16>
    %c0_44 = arith.constant 0 : index
    %c0_45 = arith.constant 0 : index
    %c0_46 = arith.constant 0 : index
    %45 = vector.load %arg3[%c0_44, %c0_45, %c0_46] : memref<3x64x64xbf16, #tpu.memory_space<vmem>>, vector<1x64x64xbf16>
    %46 = vector.shape_cast %45 : vector<1x64x64xbf16> to vector<64x64xbf16>
    %cst_47 = arith.constant dense<0.000000e+00> : vector<64x64xf32>
    %47 = tpu.matmul %44, %46, %cst_47 {dimension_numbers = #tpu.dot_dimension_numbers<[1], [0], [0], [1], [0, 0, 1, 1], [], []>} : vector<64x64xbf16>, vector<64x64xbf16>, vector<64x64xf32> -> vector<64x64xf32>
    %48 = arith.addf %40, %47 : vector<64x64xf32>
    %c9 = arith.constant 9 : index
    %c0_48 = arith.constant 0 : index
    %49 = vector.load %arg10[%c9, %c0_48] : memref<80x64xf32, #tpu.memory_space<vmem>>, vector<64x64xf32>
    %50 = vector.broadcast %35 : vector<64x1xf32> to vector<64x64xf32>
    %51 = arith.mulf %49, %50 : vector<64x64xf32>
    %52 = arith.truncf %51 : vector<64x64xf32> to vector<64x64xbf16>
    %c2_49 = arith.constant 2 : index
    %c0_50 = arith.constant 0 : index
    %c0_51 = arith.constant 0 : index
    %53 = vector.load %arg3[%c2_49, %c0_50, %c0_51] : memref<3x64x64xbf16, #tpu.memory_space<vmem>>, vector<1x64x64xbf16>
    %54 = vector.shape_cast %53 : vector<1x64x64xbf16> to vector<64x64xbf16>
    %cst_52 = arith.constant dense<0.000000e+00> : vector<64x64xf32>
    %55 = tpu.matmul %52, %54, %cst_52 {dimension_numbers = #tpu.dot_dimension_numbers<[1], [0], [0], [1], [0, 0, 1, 1], [], []>} : vector<64x64xbf16>, vector<64x64xbf16>, vector<64x64xf32> -> vector<64x64xf32>
    %56 = arith.addf %48, %55 : vector<64x64xf32>
    %c1_53 = arith.constant 1 : index
    %c0_54 = arith.constant 0 : index
    %c0_55 = arith.constant 0 : index
    %57 = vector.load %arg6[%c1_53, %c0_54, %c0_55] : memref<4x1x64xf32, #tpu.memory_space<vmem>>, vector<1x1x64xf32>
    %58 = vector.shape_cast %57 : vector<1x1x64xf32> to vector<1x64xf32>
    %59 = vector.broadcast %58 : vector<1x64xf32> to vector<64x64xf32>
    %60 = arith.addf %56, %59 : vector<64x64xf32>
    %cst_56 = arith.constant 0.000000e+00 : f32
    %61 = vector.broadcast %cst_56 : f32 to vector<64x64xf32>
    %62 = arith.maximumf %60, %61 : vector<64x64xf32>
    %c8_57 = arith.constant 8 : index
    %c0_58 = arith.constant 0 : index
    %63 = vector.load %arg9[%c8_57, %c0_58] : memref<80x64xf32, #tpu.memory_space<vmem>>, vector<64x64xf32>
    tpu.vector_store %arg9[%c8_57, %c0_58], %62 {strides = array<i32>} : memref<80x64xf32, #tpu.memory_space<vmem>>, vector<64x64xf32>,
    %c8_59 = arith.constant 8 : index
    %c0_60 = arith.constant 0 : index
    %64 = vector.load %arg9[%c8_59, %c0_60] : memref<80x64xf32, #tpu.memory_space<vmem>>, vector<64x64xf32>
    %65 = arith.truncf %64 : vector<64x64xf32> to vector<64x64xbf16>
    %c1_61 = arith.constant 1 : index
    %c0_62 = arith.constant 0 : index
    %c0_63 = arith.constant 0 : index
    %66 = vector.load %arg4[%c1_61, %c0_62, %c0_63] : memref<3x64x64xbf16, #tpu.memory_space<vmem>>, vector<1x64x64xbf16>
    %67 = vector.shape_cast %66 : vector<1x64x64xbf16> to vector<64x64xbf16>
    %cst_64 = arith.constant dense<0.000000e+00> : vector<64x64xf32>
    %68 = tpu.matmul %65, %67, %cst_64 {dimension_numbers = #tpu.dot_dimension_numbers<[1], [0], [0], [1], [0, 0, 1, 1], [], []>} : vector<64x64xbf16>, vector<64x64xbf16>, vector<64x64xf32> -> vector<64x64xf32>
    %c0_65 = arith.constant 0 : index
    %c0_66 = arith.constant 0 : index
    %69 = vector.load %arg9[%c0_65, %c0_66] : memref<80x64xf32, #tpu.memory_space<vmem>>, vector<64x64xf32>
    %70 = arith.truncf %69 : vector<64x64xf32> to vector<64x64xbf16>
    %c0_67 = arith.constant 0 : index
    %c0_68 = arith.constant 0 : index
    %c0_69 = arith.constant 0 : index
    %71 = vector.load %arg4[%c0_67, %c0_68, %c0_69] : memref<3x64x64xbf16, #tpu.memory_space<vmem>>, vector<1x64x64xbf16>
    %72 = vector.shape_cast %71 : vector<1x64x64xbf16> to vector<64x64xbf16>
    %cst_70 = arith.constant dense<0.000000e+00> : vector<64x64xf32>
    %73 = tpu.matmul %70, %72, %cst_70 {dimension_numbers = #tpu.dot_dimension_numbers<[1], [0], [0], [1], [0, 0, 1, 1], [], []>} : vector<64x64xbf16>, vector<64x64xbf16>, vector<64x64xf32> -> vector<64x64xf32>
    %74 = arith.addf %68, %73 : vector<64x64xf32>
    %c16_71 = arith.constant 16 : index
    %c0_72 = arith.constant 0 : index
    %75 = vector.load %arg9[%c16_71, %c0_72] : memref<80x64xf32, #tpu.memory_space<vmem>>, vector<64x64xf32>
    %76 = arith.truncf %75 : vector<64x64xf32> to vector<64x64xbf16>
    %c2_73 = arith.constant 2 : index
    %c0_74 = arith.constant 0 : index
    %c0_75 = arith.constant 0 : index
    %77 = vector.load %arg4[%c2_73, %c0_74, %c0_75] : memref<3x64x64xbf16, #tpu.memory_space<vmem>>, vector<1x64x64xbf16>
    %78 = vector.shape_cast %77 : vector<1x64x64xbf16> to vector<64x64xbf16>
    %cst_76 = arith.constant dense<0.000000e+00> : vector<64x64xf32>
    %79 = tpu.matmul %76, %78, %cst_76 {dimension_numbers = #tpu.dot_dimension_numbers<[1], [0], [0], [1], [0, 0, 1, 1], [], []>} : vector<64x64xbf16>, vector<64x64xbf16>, vector<64x64xf32> -> vector<64x64xf32>
    %80 = arith.addf %74, %79 : vector<64x64xf32>
    %c2_77 = arith.constant 2 : index
    %c0_78 = arith.constant 0 : index
    %c0_79 = arith.constant 0 : index
    %81 = vector.load %arg6[%c2_77, %c0_78, %c0_79] : memref<4x1x64xf32, #tpu.memory_space<vmem>>, vector<1x1x64xf32>
    %82 = vector.shape_cast %81 : vector<1x1x64xf32> to vector<1x64xf32>
    %83 = vector.broadcast %82 : vector<1x64xf32> to vector<64x64xf32>
    %84 = arith.addf %80, %83 : vector<64x64xf32>
    %cst_80 = arith.constant 0.000000e+00 : f32
    %85 = vector.broadcast %cst_80 : f32 to vector<64x64xf32>
    %86 = arith.maximumf %84, %85 : vector<64x64xf32>
    %c8_81 = arith.constant 8 : index
    %c0_82 = arith.constant 0 : index
    %87 = vector.load %arg10[%c8_81, %c0_82] : memref<80x64xf32, #tpu.memory_space<vmem>>, vector<64x64xf32>
    tpu.vector_store %arg10[%c8_81, %c0_82], %86 {strides = array<i32>} : memref<80x64xf32, #tpu.memory_space<vmem>>, vector<64x64xf32>,
    %c2_83 = arith.constant 2 : index
    %c0_84 = arith.constant 0 : index
    %c0_85 = arith.constant 0 : index
    %88 = vector.load %arg7[%c2_83, %c0_84, %c0_85] : memref<4x64x1xf32, #tpu.memory_space<vmem>>, vector<1x64x1xf32>
    %89 = vector.shape_cast %88 : vector<1x64x1xf32> to vector<64x1xf32>
    %c3 = arith.constant 3 : index
    %c0_86 = arith.constant 0 : index
    %c0_87 = arith.constant 0 : index
    %90 = vector.load %arg7[%c3, %c0_86, %c0_87] : memref<4x64x1xf32, #tpu.memory_space<vmem>>, vector<1x64x1xf32>
    %91 = vector.shape_cast %90 : vector<1x64x1xf32> to vector<64x1xf32>
    %c8_88 = arith.constant 8 : index
    %c0_89 = arith.constant 0 : index
    %92 = vector.load %arg10[%c8_88, %c0_89] : memref<80x64xf32, #tpu.memory_space<vmem>>, vector<64x64xf32>
    %93 = arith.truncf %92 : vector<64x64xf32> to vector<64x64xbf16>
    %c1_90 = arith.constant 1 : index
    %c0_91 = arith.constant 0 : index
    %c0_92 = arith.constant 0 : index
    %94 = vector.load %arg5[%c1_90, %c0_91, %c0_92] : memref<3x64x64xbf16, #tpu.memory_space<vmem>>, vector<1x64x64xbf16>
    %95 = vector.shape_cast %94 : vector<1x64x64xbf16> to vector<64x64xbf16>
    %cst_93 = arith.constant dense<0.000000e+00> : vector<64x64xf32>
    %96 = tpu.matmul %93, %95, %cst_93 {dimension_numbers = #tpu.dot_dimension_numbers<[1], [0], [0], [1], [0, 0, 1, 1], [], []>} : vector<64x64xbf16>, vector<64x64xbf16>, vector<64x64xf32> -> vector<64x64xf32>
    %c7_94 = arith.constant 7 : index
    %c0_95 = arith.constant 0 : index
    %97 = vector.load %arg10[%c7_94, %c0_95] : memref<80x64xf32, #tpu.memory_space<vmem>>, vector<64x64xf32>
    %98 = vector.broadcast %89 : vector<64x1xf32> to vector<64x64xf32>
    %99 = arith.mulf %97, %98 : vector<64x64xf32>
    %100 = arith.truncf %99 : vector<64x64xf32> to vector<64x64xbf16>
    %c0_96 = arith.constant 0 : index
    %c0_97 = arith.constant 0 : index
    %c0_98 = arith.constant 0 : index
    %101 = vector.load %arg5[%c0_96, %c0_97, %c0_98] : memref<3x64x64xbf16, #tpu.memory_space<vmem>>, vector<1x64x64xbf16>
    %102 = vector.shape_cast %101 : vector<1x64x64xbf16> to vector<64x64xbf16>
    %cst_99 = arith.constant dense<0.000000e+00> : vector<64x64xf32>
    %103 = tpu.matmul %100, %102, %cst_99 {dimension_numbers = #tpu.dot_dimension_numbers<[1], [0], [0], [1], [0, 0, 1, 1], [], []>} : vector<64x64xbf16>, vector<64x64xbf16>, vector<64x64xf32> -> vector<64x64xf32>
    %104 = arith.addf %96, %103 : vector<64x64xf32>
    %c9_100 = arith.constant 9 : index
    %c0_101 = arith.constant 0 : index
    %105 = vector.load %arg10[%c9_100, %c0_101] : memref<80x64xf32, #tpu.memory_space<vmem>>, vector<64x64xf32>
    %106 = vector.broadcast %91 : vector<64x1xf32> to vector<64x64xf32>
    %107 = arith.mulf %105, %106 : vector<64x64xf32>
    %108 = arith.truncf %107 : vector<64x64xf32> to vector<64x64xbf16>
    %c2_102 = arith.constant 2 : index
    %c0_103 = arith.constant 0 : index
    %c0_104 = arith.constant 0 : index
    %109 = vector.load %arg5[%c2_102, %c0_103, %c0_104] : memref<3x64x64xbf16, #tpu.memory_space<vmem>>, vector<1x64x64xbf16>
    %110 = vector.shape_cast %109 : vector<1x64x64xbf16> to vector<64x64xbf16>
    %cst_105 = arith.constant dense<0.000000e+00> : vector<64x64xf32>
    %111 = tpu.matmul %108, %110, %cst_105 {dimension_numbers = #tpu.dot_dimension_numbers<[1], [0], [0], [1], [0, 0, 1, 1], [], []>} : vector<64x64xbf16>, vector<64x64xbf16>, vector<64x64xf32> -> vector<64x64xf32>
    %112 = arith.addf %104, %111 : vector<64x64xf32>
    %c3_106 = arith.constant 3 : index
    %c0_107 = arith.constant 0 : index
    %c0_108 = arith.constant 0 : index
    %113 = vector.load %arg6[%c3_106, %c0_107, %c0_108] : memref<4x1x64xf32, #tpu.memory_space<vmem>>, vector<1x1x64xf32>
    %114 = vector.shape_cast %113 : vector<1x1x64xf32> to vector<1x64xf32>
    %115 = vector.broadcast %114 : vector<1x64xf32> to vector<64x64xf32>
    %116 = arith.addf %112, %115 : vector<64x64xf32>
    %c0_109 = arith.constant 0 : index
    %c0_110 = arith.constant 0 : index
    %c0_111 = arith.constant 0 : index
    %117 = vector.load %arg1[%c0_109, %c0_110, %c0_111] : memref<1x64x64xf32, #tpu.memory_space<vmem>>, vector<1x64x64xf32>
    %118 = vector.shape_cast %117 : vector<1x64x64xf32> to vector<64x64xf32>
    %119 = arith.addf %116, %118 : vector<64x64xf32>
    %cst_112 = arith.constant 0.000000e+00 : f32
    %120 = vector.broadcast %cst_112 : f32 to vector<64x64xf32>
    %121 = arith.maximumf %119, %120 : vector<64x64xf32>
    %c0_113 = arith.constant 0 : index
    %c0_114 = arith.constant 0 : index
    %c0_115 = arith.constant 0 : index
    %122 = vector.load %arg8[%c0_113, %c0_114, %c0_115] : memref<1x64x64xf32, #tpu.memory_space<vmem>>, vector<1x64x64xf32>
    %123 = vector.shape_cast %122 : vector<1x64x64xf32> to vector<64x64xf32>
    %124 = vector.shape_cast %121 : vector<64x64xf32> to vector<1x64x64xf32>
    tpu.vector_store %arg8[%c0_113, %c0_114, %c0_115], %124 {strides = array<i32>} : memref<1x64x64xf32, #tpu.memory_space<vmem>>, vector<1x64x64xf32>,
    return
  }
  func.func @transform_0(%arg0: i32) -> (i32, i32, i32) {
    %c0_i32 = arith.constant 0 : i32
    %c0_i32_0 = arith.constant 0 : i32
    %c0_i32_1 = arith.constant 0 : i32
    return %arg0, %c0_i32, %c0_i32_0 : i32, i32, i32
  }
  func.func @transform_1(%arg0: i32) -> (i32, i32, i32) {
    %c0_i32 = arith.constant 0 : i32
    %c0_i32_0 = arith.constant 0 : i32
    %c0_i32_1 = arith.constant 0 : i32
    %c0_i32_2 = arith.constant 0 : i32
    return %c0_i32, %c0_i32_0, %c0_i32_1 : i32, i32, i32
  }
  func.func @transform_2(%arg0: i32) -> (i32, i32, i32) {
    %c0_i32 = arith.constant 0 : i32
    %c0_i32_0 = arith.constant 0 : i32
    %c0_i32_1 = arith.constant 0 : i32
    %c0_i32_2 = arith.constant 0 : i32
    return %c0_i32, %c0_i32_0, %c0_i32_1 : i32, i32, i32
  }
  func.func @transform_3(%arg0: i32) -> (i32, i32, i32) {
    %c0_i32 = arith.constant 0 : i32
    %c0_i32_0 = arith.constant 0 : i32
    %c0_i32_1 = arith.constant 0 : i32
    %c0_i32_2 = arith.constant 0 : i32
    return %c0_i32, %c0_i32_0, %c0_i32_1 : i32, i32, i32
  }
  func.func @transform_4(%arg0: i32) -> (i32, i32, i32) {
    %c0_i32 = arith.constant 0 : i32
    %c0_i32_0 = arith.constant 0 : i32
    %c0_i32_1 = arith.constant 0 : i32
    %c0_i32_2 = arith.constant 0 : i32
    return %c0_i32, %c0_i32_0, %c0_i32_1 : i32, i32, i32
  }
  func.func @transform_5(%arg0: i32) -> (i32, i32, i32) {
    %c0_i32 = arith.constant 0 : i32
    %c0_i32_0 = arith.constant 0 : i32
    %c0_i32_1 = arith.constant 0 : i32
    %c0_i32_2 = arith.constant 0 : i32
    return %c0_i32, %c0_i32_0, %c0_i32_1 : i32, i32, i32
  }
  func.func @transform_6(%arg0: i32) -> (i32, i32, i32) {
    %c0_i32 = arith.constant 0 : i32
    %c0_i32_0 = arith.constant 0 : i32
    %c0_i32_1 = arith.constant 0 : i32
    %c0_i32_2 = arith.constant 0 : i32
    return %c0_i32, %c0_i32_0, %c0_i32_1 : i32, i32, i32
  }
  func.func @transform_7(%arg0: i32) -> (i32, i32, i32) {
    %c0_i32 = arith.constant 0 : i32
    %c0_i32_0 = arith.constant 0 : i32
    %c0_i32_1 = arith.constant 0 : i32
    return %arg0, %c0_i32, %c0_i32_0 : i32, i32, i32
  }
}

module attributes {stable_mosaic.version = 11 : i64} {
  func.func @_down_kernel(%arg0: i32, %arg1: memref<16x64xf32, #tpu.memory_space<vmem>>, %arg2: memref<16x64xf32, #tpu.memory_space<vmem>>, %arg3: memref<16x64xf32, #tpu.memory_space<vmem>>, %arg4: memref<16x64xf32, #tpu.memory_space<vmem>>, %arg5: memref<16x64xf32, #tpu.memory_space<vmem>>, %arg6: memref<16x64xf32, #tpu.memory_space<vmem>>, %arg7: memref<16x64xf32, #tpu.memory_space<vmem>>, %arg8: memref<16x64xf32, #tpu.memory_space<vmem>>, %arg9: memref<16x64xf32, #tpu.memory_space<vmem>>, %arg10: memref<9x64x64xbf16, #tpu.memory_space<vmem>>, %arg11: memref<1x64xf32, #tpu.memory_space<vmem>>, %arg12: memref<1x64xf32, #tpu.memory_space<vmem>>, %arg13: memref<1x64xf32, #tpu.memory_space<vmem>>, %arg14: memref<16x128xf32, #tpu.memory_space<vmem>>) attributes {dimension_semantics = [#tpu.dimension_semantics<parallel>], iteration_bounds = array<i64: 2>, scalar_prefetch = 0 : i64, scratch_operands = 0 : i64, tpu.core_type = #tpu.core_type<tc>, window_params = [{transform_indices = @transform_0, window_bounds = array<i64: 16, 64>}, {transform_indices = @transform_1, window_bounds = array<i64: 16, 64>}, {transform_indices = @transform_2, window_bounds = array<i64: 16, 64>}, {transform_indices = @transform_3, window_bounds = array<i64: 16, 64>}, {transform_indices = @transform_4, window_bounds = array<i64: 16, 64>}, {transform_indices = @transform_5, window_bounds = array<i64: 16, 64>}, {transform_indices = @transform_6, window_bounds = array<i64: 16, 64>}, {transform_indices = @transform_7, window_bounds = array<i64: 16, 64>}, {transform_indices = @transform_8, window_bounds = array<i64: 16, 64>}, {pipeline_mode = #tpu.pipeline_mode<synchronous>, transform_indices = @transform_9, window_bounds = array<i64: 9, 64, 64>}, {pipeline_mode = #tpu.pipeline_mode<synchronous>, transform_indices = @transform_10, window_bounds = array<i64: 1, 64>}, {pipeline_mode = #tpu.pipeline_mode<synchronous>, transform_indices = @transform_11, window_bounds = array<i64: 1, 64>}, {pipeline_mode = #tpu.pipeline_mode<synchronous>, transform_indices = @transform_12, window_bounds = array<i64: 1, 64>}, {transform_indices = @transform_13, window_bounds = array<i64: 16, 128>}]} {
    %c0 = arith.constant 0 : index
    %c0_0 = arith.constant 0 : index
    %0 = vector.load %arg1[%c0, %c0_0] : memref<16x64xf32, #tpu.memory_space<vmem>>, vector<16x64xf32>
    %1 = arith.truncf %0 : vector<16x64xf32> to vector<16x64xbf16>
    %c0_1 = arith.constant 0 : index
    %c0_2 = arith.constant 0 : index
    %c0_3 = arith.constant 0 : index
    %2 = vector.load %arg10[%c0_1, %c0_2, %c0_3] : memref<9x64x64xbf16, #tpu.memory_space<vmem>>, vector<1x64x64xbf16>
    %3 = vector.shape_cast %2 : vector<1x64x64xbf16> to vector<64x64xbf16>
    %cst = arith.constant dense<0.000000e+00> : vector<16x64xf32>
    %4 = tpu.matmul %1, %3, %cst {dimension_numbers = #tpu.dot_dimension_numbers<[1], [0], [0], [1], [0, 0, 1, 1], [], []>} : vector<16x64xbf16>, vector<64x64xbf16>, vector<16x64xf32> -> vector<16x64xf32>
    %c0_4 = arith.constant 0 : index
    %c0_5 = arith.constant 0 : index
    %5 = vector.load %arg2[%c0_4, %c0_5] : memref<16x64xf32, #tpu.memory_space<vmem>>, vector<16x64xf32>
    %6 = arith.truncf %5 : vector<16x64xf32> to vector<16x64xbf16>
    %c1 = arith.constant 1 : index
    %c0_6 = arith.constant 0 : index
    %c0_7 = arith.constant 0 : index
    %7 = vector.load %arg10[%c1, %c0_6, %c0_7] : memref<9x64x64xbf16, #tpu.memory_space<vmem>>, vector<1x64x64xbf16>
    %8 = vector.shape_cast %7 : vector<1x64x64xbf16> to vector<64x64xbf16>
    %cst_8 = arith.constant dense<0.000000e+00> : vector<16x64xf32>
    %9 = tpu.matmul %6, %8, %cst_8 {dimension_numbers = #tpu.dot_dimension_numbers<[1], [0], [0], [1], [0, 0, 1, 1], [], []>} : vector<16x64xbf16>, vector<64x64xbf16>, vector<16x64xf32> -> vector<16x64xf32>
    %10 = arith.addf %4, %9 : vector<16x64xf32>
    %c0_9 = arith.constant 0 : index
    %c0_10 = arith.constant 0 : index
    %11 = vector.load %arg3[%c0_9, %c0_10] : memref<16x64xf32, #tpu.memory_space<vmem>>, vector<16x64xf32>
    %12 = arith.truncf %11 : vector<16x64xf32> to vector<16x64xbf16>
    %c2 = arith.constant 2 : index
    %c0_11 = arith.constant 0 : index
    %c0_12 = arith.constant 0 : index
    %13 = vector.load %arg10[%c2, %c0_11, %c0_12] : memref<9x64x64xbf16, #tpu.memory_space<vmem>>, vector<1x64x64xbf16>
    %14 = vector.shape_cast %13 : vector<1x64x64xbf16> to vector<64x64xbf16>
    %cst_13 = arith.constant dense<0.000000e+00> : vector<16x64xf32>
    %15 = tpu.matmul %12, %14, %cst_13 {dimension_numbers = #tpu.dot_dimension_numbers<[1], [0], [0], [1], [0, 0, 1, 1], [], []>} : vector<16x64xbf16>, vector<64x64xbf16>, vector<16x64xf32> -> vector<16x64xf32>
    %16 = arith.addf %10, %15 : vector<16x64xf32>
    %c0_14 = arith.constant 0 : index
    %c0_15 = arith.constant 0 : index
    %17 = vector.load %arg4[%c0_14, %c0_15] : memref<16x64xf32, #tpu.memory_space<vmem>>, vector<16x64xf32>
    %18 = arith.truncf %17 : vector<16x64xf32> to vector<16x64xbf16>
    %c3 = arith.constant 3 : index
    %c0_16 = arith.constant 0 : index
    %c0_17 = arith.constant 0 : index
    %19 = vector.load %arg10[%c3, %c0_16, %c0_17] : memref<9x64x64xbf16, #tpu.memory_space<vmem>>, vector<1x64x64xbf16>
    %20 = vector.shape_cast %19 : vector<1x64x64xbf16> to vector<64x64xbf16>
    %cst_18 = arith.constant dense<0.000000e+00> : vector<16x64xf32>
    %21 = tpu.matmul %18, %20, %cst_18 {dimension_numbers = #tpu.dot_dimension_numbers<[1], [0], [0], [1], [0, 0, 1, 1], [], []>} : vector<16x64xbf16>, vector<64x64xbf16>, vector<16x64xf32> -> vector<16x64xf32>
    %22 = arith.addf %16, %21 : vector<16x64xf32>
    %c0_19 = arith.constant 0 : index
    %c0_20 = arith.constant 0 : index
    %23 = vector.load %arg5[%c0_19, %c0_20] : memref<16x64xf32, #tpu.memory_space<vmem>>, vector<16x64xf32>
    %24 = arith.truncf %23 : vector<16x64xf32> to vector<16x64xbf16>
    %c4 = arith.constant 4 : index
    %c0_21 = arith.constant 0 : index
    %c0_22 = arith.constant 0 : index
    %25 = vector.load %arg10[%c4, %c0_21, %c0_22] : memref<9x64x64xbf16, #tpu.memory_space<vmem>>, vector<1x64x64xbf16>
    %26 = vector.shape_cast %25 : vector<1x64x64xbf16> to vector<64x64xbf16>
    %cst_23 = arith.constant dense<0.000000e+00> : vector<16x64xf32>
    %27 = tpu.matmul %24, %26, %cst_23 {dimension_numbers = #tpu.dot_dimension_numbers<[1], [0], [0], [1], [0, 0, 1, 1], [], []>} : vector<16x64xbf16>, vector<64x64xbf16>, vector<16x64xf32> -> vector<16x64xf32>
    %28 = arith.addf %22, %27 : vector<16x64xf32>
    %c0_24 = arith.constant 0 : index
    %c0_25 = arith.constant 0 : index
    %29 = vector.load %arg6[%c0_24, %c0_25] : memref<16x64xf32, #tpu.memory_space<vmem>>, vector<16x64xf32>
    %30 = arith.truncf %29 : vector<16x64xf32> to vector<16x64xbf16>
    %c5 = arith.constant 5 : index
    %c0_26 = arith.constant 0 : index
    %c0_27 = arith.constant 0 : index
    %31 = vector.load %arg10[%c5, %c0_26, %c0_27] : memref<9x64x64xbf16, #tpu.memory_space<vmem>>, vector<1x64x64xbf16>
    %32 = vector.shape_cast %31 : vector<1x64x64xbf16> to vector<64x64xbf16>
    %cst_28 = arith.constant dense<0.000000e+00> : vector<16x64xf32>
    %33 = tpu.matmul %30, %32, %cst_28 {dimension_numbers = #tpu.dot_dimension_numbers<[1], [0], [0], [1], [0, 0, 1, 1], [], []>} : vector<16x64xbf16>, vector<64x64xbf16>, vector<16x64xf32> -> vector<16x64xf32>
    %34 = arith.addf %28, %33 : vector<16x64xf32>
    %c0_29 = arith.constant 0 : index
    %c0_30 = arith.constant 0 : index
    %35 = vector.load %arg7[%c0_29, %c0_30] : memref<16x64xf32, #tpu.memory_space<vmem>>, vector<16x64xf32>
    %36 = arith.truncf %35 : vector<16x64xf32> to vector<16x64xbf16>
    %c6 = arith.constant 6 : index
    %c0_31 = arith.constant 0 : index
    %c0_32 = arith.constant 0 : index
    %37 = vector.load %arg10[%c6, %c0_31, %c0_32] : memref<9x64x64xbf16, #tpu.memory_space<vmem>>, vector<1x64x64xbf16>
    %38 = vector.shape_cast %37 : vector<1x64x64xbf16> to vector<64x64xbf16>
    %cst_33 = arith.constant dense<0.000000e+00> : vector<16x64xf32>
    %39 = tpu.matmul %36, %38, %cst_33 {dimension_numbers = #tpu.dot_dimension_numbers<[1], [0], [0], [1], [0, 0, 1, 1], [], []>} : vector<16x64xbf16>, vector<64x64xbf16>, vector<16x64xf32> -> vector<16x64xf32>
    %40 = arith.addf %34, %39 : vector<16x64xf32>
    %c0_34 = arith.constant 0 : index
    %c0_35 = arith.constant 0 : index
    %41 = vector.load %arg8[%c0_34, %c0_35] : memref<16x64xf32, #tpu.memory_space<vmem>>, vector<16x64xf32>
    %42 = arith.truncf %41 : vector<16x64xf32> to vector<16x64xbf16>
    %c7 = arith.constant 7 : index
    %c0_36 = arith.constant 0 : index
    %c0_37 = arith.constant 0 : index
    %43 = vector.load %arg10[%c7, %c0_36, %c0_37] : memref<9x64x64xbf16, #tpu.memory_space<vmem>>, vector<1x64x64xbf16>
    %44 = vector.shape_cast %43 : vector<1x64x64xbf16> to vector<64x64xbf16>
    %cst_38 = arith.constant dense<0.000000e+00> : vector<16x64xf32>
    %45 = tpu.matmul %42, %44, %cst_38 {dimension_numbers = #tpu.dot_dimension_numbers<[1], [0], [0], [1], [0, 0, 1, 1], [], []>} : vector<16x64xbf16>, vector<64x64xbf16>, vector<16x64xf32> -> vector<16x64xf32>
    %46 = arith.addf %40, %45 : vector<16x64xf32>
    %c0_39 = arith.constant 0 : index
    %c0_40 = arith.constant 0 : index
    %47 = vector.load %arg9[%c0_39, %c0_40] : memref<16x64xf32, #tpu.memory_space<vmem>>, vector<16x64xf32>
    %48 = arith.truncf %47 : vector<16x64xf32> to vector<16x64xbf16>
    %c8 = arith.constant 8 : index
    %c0_41 = arith.constant 0 : index
    %c0_42 = arith.constant 0 : index
    %49 = vector.load %arg10[%c8, %c0_41, %c0_42] : memref<9x64x64xbf16, #tpu.memory_space<vmem>>, vector<1x64x64xbf16>
    %50 = vector.shape_cast %49 : vector<1x64x64xbf16> to vector<64x64xbf16>
    %cst_43 = arith.constant dense<0.000000e+00> : vector<16x64xf32>
    %51 = tpu.matmul %48, %50, %cst_43 {dimension_numbers = #tpu.dot_dimension_numbers<[1], [0], [0], [1], [0, 0, 1, 1], [], []>} : vector<16x64xbf16>, vector<64x64xbf16>, vector<16x64xf32> -> vector<16x64xf32>
    %52 = arith.addf %46, %51 : vector<16x64xf32>
    %c0_44 = arith.constant 0 : index
    %c0_45 = arith.constant 0 : index
    %53 = vector.load %arg11[%c0_44, %c0_45] : memref<1x64xf32, #tpu.memory_space<vmem>>, vector<1x64xf32>
    %54 = vector.broadcast %53 : vector<1x64xf32> to vector<16x64xf32>
    %55 = arith.addf %52, %54 : vector<16x64xf32>
    %cst_46 = arith.constant 0.000000e+00 : f32
    %56 = vector.broadcast %cst_46 : f32 to vector<16x64xf32>
    %57 = arith.maximumf %55, %56 : vector<16x64xf32>
    %c0_47 = arith.constant 0 : index
    %c0_48 = arith.constant 0 : index
    %58 = vector.load %arg5[%c0_47, %c0_48] : memref<16x64xf32, #tpu.memory_space<vmem>>, vector<16x64xf32>
    %c0_49 = arith.constant 0 : index
    %c0_50 = arith.constant 0 : index
    %59 = vector.load %arg6[%c0_49, %c0_50] : memref<16x64xf32, #tpu.memory_space<vmem>>, vector<16x64xf32>
    %60 = arith.maximumf %58, %59 : vector<16x64xf32>
    %c0_51 = arith.constant 0 : index
    %c0_52 = arith.constant 0 : index
    %61 = vector.load %arg8[%c0_51, %c0_52] : memref<16x64xf32, #tpu.memory_space<vmem>>, vector<16x64xf32>
    %c0_53 = arith.constant 0 : index
    %c0_54 = arith.constant 0 : index
    %62 = vector.load %arg9[%c0_53, %c0_54] : memref<16x64xf32, #tpu.memory_space<vmem>>, vector<16x64xf32>
    %63 = arith.maximumf %61, %62 : vector<16x64xf32>
    %64 = arith.maximumf %60, %63 : vector<16x64xf32>
    %c0_55 = arith.constant 0 : index
    %c0_56 = arith.constant 0 : index
    %65 = vector.load %arg12[%c0_55, %c0_56] : memref<1x64xf32, #tpu.memory_space<vmem>>, vector<1x64xf32>
    %66 = vector.broadcast %65 : vector<1x64xf32> to vector<16x64xf32>
    %67 = arith.mulf %64, %66 : vector<16x64xf32>
    %c0_57 = arith.constant 0 : index
    %c0_58 = arith.constant 0 : index
    %68 = vector.load %arg13[%c0_57, %c0_58] : memref<1x64xf32, #tpu.memory_space<vmem>>, vector<1x64xf32>
    %69 = vector.broadcast %68 : vector<1x64xf32> to vector<16x64xf32>
    %70 = arith.addf %67, %69 : vector<16x64xf32>
    %cst_59 = arith.constant 0.000000e+00 : f32
    %71 = vector.broadcast %cst_59 : f32 to vector<16x64xf32>
    %72 = arith.maximumf %70, %71 : vector<16x64xf32>
    %73 = tpu.concatenate %57, %72 in 1 : vector<16x64xf32>, vector<16x64xf32> -> vector<16x128xf32>
    %c0_60 = arith.constant 0 : index
    %c0_61 = arith.constant 0 : index
    %74 = vector.load %arg14[%c0_60, %c0_61] : memref<16x128xf32, #tpu.memory_space<vmem>>, vector<16x128xf32>
    tpu.vector_store %arg14[%c0_60, %c0_61], %73 {strides = array<i32>} : memref<16x128xf32, #tpu.memory_space<vmem>>, vector<16x128xf32>,
    return
  }
  func.func @transform_0(%arg0: i32) -> (i32, i32) {
    %c0_i32 = arith.constant 0 : i32
    %c0_i32_0 = arith.constant 0 : i32
    return %arg0, %c0_i32 : i32, i32
  }
  func.func @transform_1(%arg0: i32) -> (i32, i32) {
    %c0_i32 = arith.constant 0 : i32
    %c0_i32_0 = arith.constant 0 : i32
    return %arg0, %c0_i32 : i32, i32
  }
  func.func @transform_2(%arg0: i32) -> (i32, i32) {
    %c0_i32 = arith.constant 0 : i32
    %c0_i32_0 = arith.constant 0 : i32
    return %arg0, %c0_i32 : i32, i32
  }
  func.func @transform_3(%arg0: i32) -> (i32, i32) {
    %c0_i32 = arith.constant 0 : i32
    %c0_i32_0 = arith.constant 0 : i32
    return %arg0, %c0_i32 : i32, i32
  }
  func.func @transform_4(%arg0: i32) -> (i32, i32) {
    %c0_i32 = arith.constant 0 : i32
    %c0_i32_0 = arith.constant 0 : i32
    return %arg0, %c0_i32 : i32, i32
  }
  func.func @transform_5(%arg0: i32) -> (i32, i32) {
    %c0_i32 = arith.constant 0 : i32
    %c0_i32_0 = arith.constant 0 : i32
    return %arg0, %c0_i32 : i32, i32
  }
  func.func @transform_6(%arg0: i32) -> (i32, i32) {
    %c0_i32 = arith.constant 0 : i32
    %c0_i32_0 = arith.constant 0 : i32
    return %arg0, %c0_i32 : i32, i32
  }
  func.func @transform_7(%arg0: i32) -> (i32, i32) {
    %c0_i32 = arith.constant 0 : i32
    %c0_i32_0 = arith.constant 0 : i32
    return %arg0, %c0_i32 : i32, i32
  }
  func.func @transform_8(%arg0: i32) -> (i32, i32) {
    %c0_i32 = arith.constant 0 : i32
    %c0_i32_0 = arith.constant 0 : i32
    return %arg0, %c0_i32 : i32, i32
  }
  func.func @transform_9(%arg0: i32) -> (i32, i32, i32) {
    %c0_i32 = arith.constant 0 : i32
    %c0_i32_0 = arith.constant 0 : i32
    %c0_i32_1 = arith.constant 0 : i32
    %c0_i32_2 = arith.constant 0 : i32
    return %c0_i32, %c0_i32_0, %c0_i32_1 : i32, i32, i32
  }
  func.func @transform_10(%arg0: i32) -> (i32, i32) {
    %c0_i32 = arith.constant 0 : i32
    %c0_i32_0 = arith.constant 0 : i32
    %c0_i32_1 = arith.constant 0 : i32
    return %c0_i32, %c0_i32_0 : i32, i32
  }
  func.func @transform_11(%arg0: i32) -> (i32, i32) {
    %c0_i32 = arith.constant 0 : i32
    %c0_i32_0 = arith.constant 0 : i32
    %c0_i32_1 = arith.constant 0 : i32
    return %c0_i32, %c0_i32_0 : i32, i32
  }
  func.func @transform_12(%arg0: i32) -> (i32, i32) {
    %c0_i32 = arith.constant 0 : i32
    %c0_i32_0 = arith.constant 0 : i32
    %c0_i32_1 = arith.constant 0 : i32
    return %c0_i32, %c0_i32_0 : i32, i32
  }
  func.func @transform_13(%arg0: i32) -> (i32, i32) {
    %c0_i32 = arith.constant 0 : i32
    %c0_i32_0 = arith.constant 0 : i32
    return %arg0, %c0_i32 : i32, i32
  }
}

module attributes {stable_mosaic.version = 11 : i64} {
  func.func @_nb1d_kernel(%arg0: i32, %arg1: memref<1x16x128xf32, #tpu.memory_space<vmem>>, %arg2: memref<3x128x128xbf16, #tpu.memory_space<vmem>>, %arg3: memref<3x128x128xbf16, #tpu.memory_space<vmem>>, %arg4: memref<3x128x128xbf16, #tpu.memory_space<vmem>>, %arg5: memref<3x128x128xbf16, #tpu.memory_space<vmem>>, %arg6: memref<4x1x128xf32, #tpu.memory_space<vmem>>, %arg7: memref<4x16x1xf32, #tpu.memory_space<vmem>>, %arg8: memref<1x16x128xf32, #tpu.memory_space<vmem>>, %arg9: memref<32x128xf32, #tpu.memory_space<vmem>>, %arg10: memref<32x128xf32, #tpu.memory_space<vmem>>) attributes {dimension_semantics = [#tpu.dimension_semantics<parallel>], iteration_bounds = array<i64: 2>, scalar_prefetch = 0 : i64, scratch_operands = 2 : i64, tpu.core_type = #tpu.core_type<tc>, window_params = [{transform_indices = @transform_0, window_bounds = array<i64: 1, 16, 128>}, {pipeline_mode = #tpu.pipeline_mode<synchronous>, transform_indices = @transform_1, window_bounds = array<i64: 3, 128, 128>}, {pipeline_mode = #tpu.pipeline_mode<synchronous>, transform_indices = @transform_2, window_bounds = array<i64: 3, 128, 128>}, {pipeline_mode = #tpu.pipeline_mode<synchronous>, transform_indices = @transform_3, window_bounds = array<i64: 3, 128, 128>}, {pipeline_mode = #tpu.pipeline_mode<synchronous>, transform_indices = @transform_4, window_bounds = array<i64: 3, 128, 128>}, {pipeline_mode = #tpu.pipeline_mode<synchronous>, transform_indices = @transform_5, window_bounds = array<i64: 4, 1, 128>}, {pipeline_mode = #tpu.pipeline_mode<synchronous>, transform_indices = @transform_6, window_bounds = array<i64: 4, 16, 1>}, {transform_indices = @transform_7, window_bounds = array<i64: 1, 16, 128>}]} {
    %cst = arith.constant 0.000000e+00 : f32
    %0 = vector.broadcast %cst : f32 to vector<8x128xf32>
    %c0 = arith.constant 0 : index
    %c0_0 = arith.constant 0 : index
    %1 = vector.load %arg9[%c0, %c0_0] : memref<32x128xf32, #tpu.memory_space<vmem>>, vector<8x128xf32>
    tpu.vector_store %arg9[%c0, %c0_0], %0 {strides = array<i32>} : memref<32x128xf32, #tpu.memory_space<vmem>>, vector<8x128xf32>,
    %c24 = arith.constant 24 : index
    %c0_1 = arith.constant 0 : index
    %2 = vector.load %arg9[%c24, %c0_1] : memref<32x128xf32, #tpu.memory_space<vmem>>, vector<8x128xf32>
    tpu.vector_store %arg9[%c24, %c0_1], %0 {strides = array<i32>} : memref<32x128xf32, #tpu.memory_space<vmem>>, vector<8x128xf32>,
    %c0_2 = arith.constant 0 : index
    %c0_3 = arith.constant 0 : index
    %3 = vector.load %arg10[%c0_2, %c0_3] : memref<32x128xf32, #tpu.memory_space<vmem>>, vector<8x128xf32>
    tpu.vector_store %arg10[%c0_2, %c0_3], %0 {strides = array<i32>} : memref<32x128xf32, #tpu.memory_space<vmem>>, vector<8x128xf32>,
    %c24_4 = arith.constant 24 : index
    %c0_5 = arith.constant 0 : index
    %4 = vector.load %arg10[%c24_4, %c0_5] : memref<32x128xf32, #tpu.memory_space<vmem>>, vector<8x128xf32>
    tpu.vector_store %arg10[%c24_4, %c0_5], %0 {strides = array<i32>} : memref<32x128xf32, #tpu.memory_space<vmem>>, vector<8x128xf32>,
    %c0_6 = arith.constant 0 : index
    %c0_7 = arith.constant 0 : index
    %c0_8 = arith.constant 0 : index
    %5 = vector.load %arg1[%c0_6, %c0_7, %c0_8] : memref<1x16x128xf32, #tpu.memory_space<vmem>>, vector<1x16x128xf32>
    %6 = vector.shape_cast %5 : vector<1x16x128xf32> to vector<16x128xf32>
    %c8 = arith.constant 8 : index
    %c0_9 = arith.constant 0 : index
    %7 = vector.load %arg9[%c8, %c0_9] : memref<32x128xf32, #tpu.memory_space<vmem>>, vector<16x128xf32>
    tpu.vector_store %arg9[%c8, %c0_9], %6 {strides = array<i32>} : memref<32x128xf32, #tpu.memory_space<vmem>>, vector<16x128xf32>,
    %c8_10 = arith.constant 8 : index
    %c0_11 = arith.constant 0 : index
    %8 = vector.load %arg9[%c8_10, %c0_11] : memref<32x128xf32, #tpu.memory_space<vmem>>, vector<16x128xf32>
    %9 = arith.truncf %8 : vector<16x128xf32> to vector<16x128xbf16>
    %c1 = arith.constant 1 : index
    %c0_12 = arith.constant 0 : index
    %c0_13 = arith.constant 0 : index
    %10 = vector.load %arg2[%c1, %c0_12, %c0_13] : memref<3x128x128xbf16, #tpu.memory_space<vmem>>, vector<1x128x128xbf16>
    %11 = vector.shape_cast %10 : vector<1x128x128xbf16> to vector<128x128xbf16>
    %cst_14 = arith.constant dense<0.000000e+00> : vector<16x128xf32>
    %12 = tpu.matmul %9, %11, %cst_14 {dimension_numbers = #tpu.dot_dimension_numbers<[1], [0], [0], [1], [0, 0, 1, 1], [], []>} : vector<16x128xbf16>, vector<128x128xbf16>, vector<16x128xf32> -> vector<16x128xf32>
    %c4 = arith.constant 4 : index
    %c0_15 = arith.constant 0 : index
    %13 = vector.load %arg9[%c4, %c0_15] : memref<32x128xf32, #tpu.memory_space<vmem>>, vector<16x128xf32>
    %14 = arith.truncf %13 : vector<16x128xf32> to vector<16x128xbf16>
    %c0_16 = arith.constant 0 : index
    %c0_17 = arith.constant 0 : index
    %c0_18 = arith.constant 0 : index
    %15 = vector.load %arg2[%c0_16, %c0_17, %c0_18] : memref<3x128x128xbf16, #tpu.memory_space<vmem>>, vector<1x128x128xbf16>
    %16 = vector.shape_cast %15 : vector<1x128x128xbf16> to vector<128x128xbf16>
    %cst_19 = arith.constant dense<0.000000e+00> : vector<16x128xf32>
    %17 = tpu.matmul %14, %16, %cst_19 {dimension_numbers = #tpu.dot_dimension_numbers<[1], [0], [0], [1], [0, 0, 1, 1], [], []>} : vector<16x128xbf16>, vector<128x128xbf16>, vector<16x128xf32> -> vector<16x128xf32>
    %18 = arith.addf %12, %17 : vector<16x128xf32>
    %c12 = arith.constant 12 : index
    %c0_20 = arith.constant 0 : index
    %19 = vector.load %arg9[%c12, %c0_20] : memref<32x128xf32, #tpu.memory_space<vmem>>, vector<16x128xf32>
    %20 = arith.truncf %19 : vector<16x128xf32> to vector<16x128xbf16>
    %c2 = arith.constant 2 : index
    %c0_21 = arith.constant 0 : index
    %c0_22 = arith.constant 0 : index
    %21 = vector.load %arg2[%c2, %c0_21, %c0_22] : memref<3x128x128xbf16, #tpu.memory_space<vmem>>, vector<1x128x128xbf16>
    %22 = vector.shape_cast %21 : vector<1x128x128xbf16> to vector<128x128xbf16>
    %cst_23 = arith.constant dense<0.000000e+00> : vector<16x128xf32>
    %23 = tpu.matmul %20, %22, %cst_23 {dimension_numbers = #tpu.dot_dimension_numbers<[1], [0], [0], [1], [0, 0, 1, 1], [], []>} : vector<16x128xbf16>, vector<128x128xbf16>, vector<16x128xf32> -> vector<16x128xf32>
    %24 = arith.addf %18, %23 : vector<16x128xf32>
    %c0_24 = arith.constant 0 : index
    %c0_25 = arith.constant 0 : index
    %c0_26 = arith.constant 0 : index
    %25 = vector.load %arg6[%c0_24, %c0_25, %c0_26] : memref<4x1x128xf32, #tpu.memory_space<vmem>>, vector<1x1x128xf32>
    %26 = vector.shape_cast %25 : vector<1x1x128xf32> to vector<1x128xf32>
    %27 = vector.broadcast %26 : vector<1x128xf32> to vector<16x128xf32>
    %28 = arith.addf %24, %27 : vector<16x128xf32>
    %cst_27 = arith.constant 0.000000e+00 : f32
    %29 = vector.broadcast %cst_27 : f32 to vector<16x128xf32>
    %30 = arith.maximumf %28, %29 : vector<16x128xf32>
    %c8_28 = arith.constant 8 : index
    %c0_29 = arith.constant 0 : index
    %31 = vector.load %arg10[%c8_28, %c0_29] : memref<32x128xf32, #tpu.memory_space<vmem>>, vector<16x128xf32>
    tpu.vector_store %arg10[%c8_28, %c0_29], %30 {strides = array<i32>} : memref<32x128xf32, #tpu.memory_space<vmem>>, vector<16x128xf32>,
    %c0_30 = arith.constant 0 : index
    %c0_31 = arith.constant 0 : index
    %c0_32 = arith.constant 0 : index
    %32 = vector.load %arg7[%c0_30, %c0_31, %c0_32] : memref<4x16x1xf32, #tpu.memory_space<vmem>>, vector<1x16x1xf32>
    %33 = vector.shape_cast %32 : vector<1x16x1xf32> to vector<16x1xf32>
    %c1_33 = arith.constant 1 : index
    %c0_34 = arith.constant 0 : index
    %c0_35 = arith.constant 0 : index
    %34 = vector.load %arg7[%c1_33, %c0_34, %c0_35] : memref<4x16x1xf32, #tpu.memory_space<vmem>>, vector<1x16x1xf32>
    %35 = vector.shape_cast %34 : vector<1x16x1xf32> to vector<16x1xf32>
    %c8_36 = arith.constant 8 : index
    %c0_37 = arith.constant 0 : index
    %36 = vector.load %arg10[%c8_36, %c0_37] : memref<32x128xf32, #tpu.memory_space<vmem>>, vector<16x128xf32>
    %37 = arith.truncf %36 : vector<16x128xf32> to vector<16x128xbf16>
    %c1_38 = arith.constant 1 : index
    %c0_39 = arith.constant 0 : index
    %c0_40 = arith.constant 0 : index
    %38 = vector.load %arg3[%c1_38, %c0_39, %c0_40] : memref<3x128x128xbf16, #tpu.memory_space<vmem>>, vector<1x128x128xbf16>
    %39 = vector.shape_cast %38 : vector<1x128x128xbf16> to vector<128x128xbf16>
    %cst_41 = arith.constant dense<0.000000e+00> : vector<16x128xf32>
    %40 = tpu.matmul %37, %39, %cst_41 {dimension_numbers = #tpu.dot_dimension_numbers<[1], [0], [0], [1], [0, 0, 1, 1], [], []>} : vector<16x128xbf16>, vector<128x128xbf16>, vector<16x128xf32> -> vector<16x128xf32>
    %c7 = arith.constant 7 : index
    %c0_42 = arith.constant 0 : index
    %41 = vector.load %arg10[%c7, %c0_42] : memref<32x128xf32, #tpu.memory_space<vmem>>, vector<16x128xf32>
    %42 = vector.broadcast %33 : vector<16x1xf32> to vector<16x128xf32>
    %43 = arith.mulf %41, %42 : vector<16x128xf32>
    %44 = arith.truncf %43 : vector<16x128xf32> to vector<16x128xbf16>
    %c0_43 = arith.constant 0 : index
    %c0_44 = arith.constant 0 : index
    %c0_45 = arith.constant 0 : index
    %45 = vector.load %arg3[%c0_43, %c0_44, %c0_45] : memref<3x128x128xbf16, #tpu.memory_space<vmem>>, vector<1x128x128xbf16>
    %46 = vector.shape_cast %45 : vector<1x128x128xbf16> to vector<128x128xbf16>
    %cst_46 = arith.constant dense<0.000000e+00> : vector<16x128xf32>
    %47 = tpu.matmul %44, %46, %cst_46 {dimension_numbers = #tpu.dot_dimension_numbers<[1], [0], [0], [1], [0, 0, 1, 1], [], []>} : vector<16x128xbf16>, vector<128x128xbf16>, vector<16x128xf32> -> vector<16x128xf32>
    %48 = arith.addf %40, %47 : vector<16x128xf32>
    %c9 = arith.constant 9 : index
    %c0_47 = arith.constant 0 : index
    %49 = vector.load %arg10[%c9, %c0_47] : memref<32x128xf32, #tpu.memory_space<vmem>>, vector<16x128xf32>
    %50 = vector.broadcast %35 : vector<16x1xf32> to vector<16x128xf32>
    %51 = arith.mulf %49, %50 : vector<16x128xf32>
    %52 = arith.truncf %51 : vector<16x128xf32> to vector<16x128xbf16>
    %c2_48 = arith.constant 2 : index
    %c0_49 = arith.constant 0 : index
    %c0_50 = arith.constant 0 : index
    %53 = vector.load %arg3[%c2_48, %c0_49, %c0_50] : memref<3x128x128xbf16, #tpu.memory_space<vmem>>, vector<1x128x128xbf16>
    %54 = vector.shape_cast %53 : vector<1x128x128xbf16> to vector<128x128xbf16>
    %cst_51 = arith.constant dense<0.000000e+00> : vector<16x128xf32>
    %55 = tpu.matmul %52, %54, %cst_51 {dimension_numbers = #tpu.dot_dimension_numbers<[1], [0], [0], [1], [0, 0, 1, 1], [], []>} : vector<16x128xbf16>, vector<128x128xbf16>, vector<16x128xf32> -> vector<16x128xf32>
    %56 = arith.addf %48, %55 : vector<16x128xf32>
    %c1_52 = arith.constant 1 : index
    %c0_53 = arith.constant 0 : index
    %c0_54 = arith.constant 0 : index
    %57 = vector.load %arg6[%c1_52, %c0_53, %c0_54] : memref<4x1x128xf32, #tpu.memory_space<vmem>>, vector<1x1x128xf32>
    %58 = vector.shape_cast %57 : vector<1x1x128xf32> to vector<1x128xf32>
    %59 = vector.broadcast %58 : vector<1x128xf32> to vector<16x128xf32>
    %60 = arith.addf %56, %59 : vector<16x128xf32>
    %cst_55 = arith.constant 0.000000e+00 : f32
    %61 = vector.broadcast %cst_55 : f32 to vector<16x128xf32>
    %62 = arith.maximumf %60, %61 : vector<16x128xf32>
    %c8_56 = arith.constant 8 : index
    %c0_57 = arith.constant 0 : index
    %63 = vector.load %arg9[%c8_56, %c0_57] : memref<32x128xf32, #tpu.memory_space<vmem>>, vector<16x128xf32>
    tpu.vector_store %arg9[%c8_56, %c0_57], %62 {strides = array<i32>} : memref<32x128xf32, #tpu.memory_space<vmem>>, vector<16x128xf32>,
    %c8_58 = arith.constant 8 : index
    %c0_59 = arith.constant 0 : index
    %64 = vector.load %arg9[%c8_58, %c0_59] : memref<32x128xf32, #tpu.memory_space<vmem>>, vector<16x128xf32>
    %65 = arith.truncf %64 : vector<16x128xf32> to vector<16x128xbf16>
    %c1_60 = arith.constant 1 : index
    %c0_61 = arith.constant 0 : index
    %c0_62 = arith.constant 0 : index
    %66 = vector.load %arg4[%c1_60, %c0_61, %c0_62] : memref<3x128x128xbf16, #tpu.memory_space<vmem>>, vector<1x128x128xbf16>
    %67 = vector.shape_cast %66 : vector<1x128x128xbf16> to vector<128x128xbf16>
    %cst_63 = arith.constant dense<0.000000e+00> : vector<16x128xf32>
    %68 = tpu.matmul %65, %67, %cst_63 {dimension_numbers = #tpu.dot_dimension_numbers<[1], [0], [0], [1], [0, 0, 1, 1], [], []>} : vector<16x128xbf16>, vector<128x128xbf16>, vector<16x128xf32> -> vector<16x128xf32>
    %c0_64 = arith.constant 0 : index
    %c0_65 = arith.constant 0 : index
    %69 = vector.load %arg9[%c0_64, %c0_65] : memref<32x128xf32, #tpu.memory_space<vmem>>, vector<16x128xf32>
    %70 = arith.truncf %69 : vector<16x128xf32> to vector<16x128xbf16>
    %c0_66 = arith.constant 0 : index
    %c0_67 = arith.constant 0 : index
    %c0_68 = arith.constant 0 : index
    %71 = vector.load %arg4[%c0_66, %c0_67, %c0_68] : memref<3x128x128xbf16, #tpu.memory_space<vmem>>, vector<1x128x128xbf16>
    %72 = vector.shape_cast %71 : vector<1x128x128xbf16> to vector<128x128xbf16>
    %cst_69 = arith.constant dense<0.000000e+00> : vector<16x128xf32>
    %73 = tpu.matmul %70, %72, %cst_69 {dimension_numbers = #tpu.dot_dimension_numbers<[1], [0], [0], [1], [0, 0, 1, 1], [], []>} : vector<16x128xbf16>, vector<128x128xbf16>, vector<16x128xf32> -> vector<16x128xf32>
    %74 = arith.addf %68, %73 : vector<16x128xf32>
    %c16 = arith.constant 16 : index
    %c0_70 = arith.constant 0 : index
    %75 = vector.load %arg9[%c16, %c0_70] : memref<32x128xf32, #tpu.memory_space<vmem>>, vector<16x128xf32>
    %76 = arith.truncf %75 : vector<16x128xf32> to vector<16x128xbf16>
    %c2_71 = arith.constant 2 : index
    %c0_72 = arith.constant 0 : index
    %c0_73 = arith.constant 0 : index
    %77 = vector.load %arg4[%c2_71, %c0_72, %c0_73] : memref<3x128x128xbf16, #tpu.memory_space<vmem>>, vector<1x128x128xbf16>
    %78 = vector.shape_cast %77 : vector<1x128x128xbf16> to vector<128x128xbf16>
    %cst_74 = arith.constant dense<0.000000e+00> : vector<16x128xf32>
    %79 = tpu.matmul %76, %78, %cst_74 {dimension_numbers = #tpu.dot_dimension_numbers<[1], [0], [0], [1], [0, 0, 1, 1], [], []>} : vector<16x128xbf16>, vector<128x128xbf16>, vector<16x128xf32> -> vector<16x128xf32>
    %80 = arith.addf %74, %79 : vector<16x128xf32>
    %c2_75 = arith.constant 2 : index
    %c0_76 = arith.constant 0 : index
    %c0_77 = arith.constant 0 : index
    %81 = vector.load %arg6[%c2_75, %c0_76, %c0_77] : memref<4x1x128xf32, #tpu.memory_space<vmem>>, vector<1x1x128xf32>
    %82 = vector.shape_cast %81 : vector<1x1x128xf32> to vector<1x128xf32>
    %83 = vector.broadcast %82 : vector<1x128xf32> to vector<16x128xf32>
    %84 = arith.addf %80, %83 : vector<16x128xf32>
    %cst_78 = arith.constant 0.000000e+00 : f32
    %85 = vector.broadcast %cst_78 : f32 to vector<16x128xf32>
    %86 = arith.maximumf %84, %85 : vector<16x128xf32>
    %c8_79 = arith.constant 8 : index
    %c0_80 = arith.constant 0 : index
    %87 = vector.load %arg10[%c8_79, %c0_80] : memref<32x128xf32, #tpu.memory_space<vmem>>, vector<16x128xf32>
    tpu.vector_store %arg10[%c8_79, %c0_80], %86 {strides = array<i32>} : memref<32x128xf32, #tpu.memory_space<vmem>>, vector<16x128xf32>,
    %c2_81 = arith.constant 2 : index
    %c0_82 = arith.constant 0 : index
    %c0_83 = arith.constant 0 : index
    %88 = vector.load %arg7[%c2_81, %c0_82, %c0_83] : memref<4x16x1xf32, #tpu.memory_space<vmem>>, vector<1x16x1xf32>
    %89 = vector.shape_cast %88 : vector<1x16x1xf32> to vector<16x1xf32>
    %c3 = arith.constant 3 : index
    %c0_84 = arith.constant 0 : index
    %c0_85 = arith.constant 0 : index
    %90 = vector.load %arg7[%c3, %c0_84, %c0_85] : memref<4x16x1xf32, #tpu.memory_space<vmem>>, vector<1x16x1xf32>
    %91 = vector.shape_cast %90 : vector<1x16x1xf32> to vector<16x1xf32>
    %c8_86 = arith.constant 8 : index
    %c0_87 = arith.constant 0 : index
    %92 = vector.load %arg10[%c8_86, %c0_87] : memref<32x128xf32, #tpu.memory_space<vmem>>, vector<16x128xf32>
    %93 = arith.truncf %92 : vector<16x128xf32> to vector<16x128xbf16>
    %c1_88 = arith.constant 1 : index
    %c0_89 = arith.constant 0 : index
    %c0_90 = arith.constant 0 : index
    %94 = vector.load %arg5[%c1_88, %c0_89, %c0_90] : memref<3x128x128xbf16, #tpu.memory_space<vmem>>, vector<1x128x128xbf16>
    %95 = vector.shape_cast %94 : vector<1x128x128xbf16> to vector<128x128xbf16>
    %cst_91 = arith.constant dense<0.000000e+00> : vector<16x128xf32>
    %96 = tpu.matmul %93, %95, %cst_91 {dimension_numbers = #tpu.dot_dimension_numbers<[1], [0], [0], [1], [0, 0, 1, 1], [], []>} : vector<16x128xbf16>, vector<128x128xbf16>, vector<16x128xf32> -> vector<16x128xf32>
    %c6 = arith.constant 6 : index
    %c0_92 = arith.constant 0 : index
    %97 = vector.load %arg10[%c6, %c0_92] : memref<32x128xf32, #tpu.memory_space<vmem>>, vector<16x128xf32>
    %98 = vector.broadcast %89 : vector<16x1xf32> to vector<16x128xf32>
    %99 = arith.mulf %97, %98 : vector<16x128xf32>
    %100 = arith.truncf %99 : vector<16x128xf32> to vector<16x128xbf16>
    %c0_93 = arith.constant 0 : index
    %c0_94 = arith.constant 0 : index
    %c0_95 = arith.constant 0 : index
    %101 = vector.load %arg5[%c0_93, %c0_94, %c0_95] : memref<3x128x128xbf16, #tpu.memory_space<vmem>>, vector<1x128x128xbf16>
    %102 = vector.shape_cast %101 : vector<1x128x128xbf16> to vector<128x128xbf16>
    %cst_96 = arith.constant dense<0.000000e+00> : vector<16x128xf32>
    %103 = tpu.matmul %100, %102, %cst_96 {dimension_numbers = #tpu.dot_dimension_numbers<[1], [0], [0], [1], [0, 0, 1, 1], [], []>} : vector<16x128xbf16>, vector<128x128xbf16>, vector<16x128xf32> -> vector<16x128xf32>
    %104 = arith.addf %96, %103 : vector<16x128xf32>
    %c10 = arith.constant 10 : index
    %c0_97 = arith.constant 0 : index
    %105 = vector.load %arg10[%c10, %c0_97] : memref<32x128xf32, #tpu.memory_space<vmem>>, vector<16x128xf32>
    %106 = vector.broadcast %91 : vector<16x1xf32> to vector<16x128xf32>
    %107 = arith.mulf %105, %106 : vector<16x128xf32>
    %108 = arith.truncf %107 : vector<16x128xf32> to vector<16x128xbf16>
    %c2_98 = arith.constant 2 : index
    %c0_99 = arith.constant 0 : index
    %c0_100 = arith.constant 0 : index
    %109 = vector.load %arg5[%c2_98, %c0_99, %c0_100] : memref<3x128x128xbf16, #tpu.memory_space<vmem>>, vector<1x128x128xbf16>
    %110 = vector.shape_cast %109 : vector<1x128x128xbf16> to vector<128x128xbf16>
    %cst_101 = arith.constant dense<0.000000e+00> : vector<16x128xf32>
    %111 = tpu.matmul %108, %110, %cst_101 {dimension_numbers = #tpu.dot_dimension_numbers<[1], [0], [0], [1], [0, 0, 1, 1], [], []>} : vector<16x128xbf16>, vector<128x128xbf16>, vector<16x128xf32> -> vector<16x128xf32>
    %112 = arith.addf %104, %111 : vector<16x128xf32>
    %c3_102 = arith.constant 3 : index
    %c0_103 = arith.constant 0 : index
    %c0_104 = arith.constant 0 : index
    %113 = vector.load %arg6[%c3_102, %c0_103, %c0_104] : memref<4x1x128xf32, #tpu.memory_space<vmem>>, vector<1x1x128xf32>
    %114 = vector.shape_cast %113 : vector<1x1x128xf32> to vector<1x128xf32>
    %115 = vector.broadcast %114 : vector<1x128xf32> to vector<16x128xf32>
    %116 = arith.addf %112, %115 : vector<16x128xf32>
    %c0_105 = arith.constant 0 : index
    %c0_106 = arith.constant 0 : index
    %c0_107 = arith.constant 0 : index
    %117 = vector.load %arg1[%c0_105, %c0_106, %c0_107] : memref<1x16x128xf32, #tpu.memory_space<vmem>>, vector<1x16x128xf32>
    %118 = vector.shape_cast %117 : vector<1x16x128xf32> to vector<16x128xf32>
    %119 = arith.addf %116, %118 : vector<16x128xf32>
    %cst_108 = arith.constant 0.000000e+00 : f32
    %120 = vector.broadcast %cst_108 : f32 to vector<16x128xf32>
    %121 = arith.maximumf %119, %120 : vector<16x128xf32>
    %c0_109 = arith.constant 0 : index
    %c0_110 = arith.constant 0 : index
    %c0_111 = arith.constant 0 : index
    %122 = vector.load %arg8[%c0_109, %c0_110, %c0_111] : memref<1x16x128xf32, #tpu.memory_space<vmem>>, vector<1x16x128xf32>
    %123 = vector.shape_cast %122 : vector<1x16x128xf32> to vector<16x128xf32>
    %124 = vector.shape_cast %121 : vector<16x128xf32> to vector<1x16x128xf32>
    tpu.vector_store %arg8[%c0_109, %c0_110, %c0_111], %124 {strides = array<i32>} : memref<1x16x128xf32, #tpu.memory_space<vmem>>, vector<1x16x128xf32>,
    return
  }
  func.func @transform_0(%arg0: i32) -> (i32, i32, i32) {
    %c0_i32 = arith.constant 0 : i32
    %c0_i32_0 = arith.constant 0 : i32
    %c0_i32_1 = arith.constant 0 : i32
    return %arg0, %c0_i32, %c0_i32_0 : i32, i32, i32
  }
  func.func @transform_1(%arg0: i32) -> (i32, i32, i32) {
    %c0_i32 = arith.constant 0 : i32
    %c0_i32_0 = arith.constant 0 : i32
    %c0_i32_1 = arith.constant 0 : i32
    %c0_i32_2 = arith.constant 0 : i32
    return %c0_i32, %c0_i32_0, %c0_i32_1 : i32, i32, i32
  }
  func.func @transform_2(%arg0: i32) -> (i32, i32, i32) {
    %c0_i32 = arith.constant 0 : i32
    %c0_i32_0 = arith.constant 0 : i32
    %c0_i32_1 = arith.constant 0 : i32
    %c0_i32_2 = arith.constant 0 : i32
    return %c0_i32, %c0_i32_0, %c0_i32_1 : i32, i32, i32
  }
  func.func @transform_3(%arg0: i32) -> (i32, i32, i32) {
    %c0_i32 = arith.constant 0 : i32
    %c0_i32_0 = arith.constant 0 : i32
    %c0_i32_1 = arith.constant 0 : i32
    %c0_i32_2 = arith.constant 0 : i32
    return %c0_i32, %c0_i32_0, %c0_i32_1 : i32, i32, i32
  }
  func.func @transform_4(%arg0: i32) -> (i32, i32, i32) {
    %c0_i32 = arith.constant 0 : i32
    %c0_i32_0 = arith.constant 0 : i32
    %c0_i32_1 = arith.constant 0 : i32
    %c0_i32_2 = arith.constant 0 : i32
    return %c0_i32, %c0_i32_0, %c0_i32_1 : i32, i32, i32
  }
  func.func @transform_5(%arg0: i32) -> (i32, i32, i32) {
    %c0_i32 = arith.constant 0 : i32
    %c0_i32_0 = arith.constant 0 : i32
    %c0_i32_1 = arith.constant 0 : i32
    %c0_i32_2 = arith.constant 0 : i32
    return %c0_i32, %c0_i32_0, %c0_i32_1 : i32, i32, i32
  }
  func.func @transform_6(%arg0: i32) -> (i32, i32, i32) {
    %c0_i32 = arith.constant 0 : i32
    %c0_i32_0 = arith.constant 0 : i32
    %c0_i32_1 = arith.constant 0 : i32
    %c0_i32_2 = arith.constant 0 : i32
    return %c0_i32, %c0_i32_0, %c0_i32_1 : i32, i32, i32
  }
  func.func @transform_7(%arg0: i32) -> (i32, i32, i32) {
    %c0_i32 = arith.constant 0 : i32
    %c0_i32_0 = arith.constant 0 : i32
    %c0_i32_1 = arith.constant 0 : i32
    return %arg0, %c0_i32, %c0_i32_0 : i32, i32, i32
  }
}

module attributes {stable_mosaic.version = 11 : i64} {
  func.func @_nb1d_kernel(%arg0: i32, %arg1: memref<1x16x128xf32, #tpu.memory_space<vmem>>, %arg2: memref<3x128x128xbf16, #tpu.memory_space<vmem>>, %arg3: memref<3x128x128xbf16, #tpu.memory_space<vmem>>, %arg4: memref<3x128x128xbf16, #tpu.memory_space<vmem>>, %arg5: memref<3x128x128xbf16, #tpu.memory_space<vmem>>, %arg6: memref<4x1x128xf32, #tpu.memory_space<vmem>>, %arg7: memref<4x16x1xf32, #tpu.memory_space<vmem>>, %arg8: memref<1x16x128xf32, #tpu.memory_space<vmem>>, %arg9: memref<48x128xf32, #tpu.memory_space<vmem>>, %arg10: memref<48x128xf32, #tpu.memory_space<vmem>>) attributes {dimension_semantics = [#tpu.dimension_semantics<parallel>], iteration_bounds = array<i64: 2>, scalar_prefetch = 0 : i64, scratch_operands = 2 : i64, tpu.core_type = #tpu.core_type<tc>, window_params = [{transform_indices = @transform_0, window_bounds = array<i64: 1, 16, 128>}, {pipeline_mode = #tpu.pipeline_mode<synchronous>, transform_indices = @transform_1, window_bounds = array<i64: 3, 128, 128>}, {pipeline_mode = #tpu.pipeline_mode<synchronous>, transform_indices = @transform_2, window_bounds = array<i64: 3, 128, 128>}, {pipeline_mode = #tpu.pipeline_mode<synchronous>, transform_indices = @transform_3, window_bounds = array<i64: 3, 128, 128>}, {pipeline_mode = #tpu.pipeline_mode<synchronous>, transform_indices = @transform_4, window_bounds = array<i64: 3, 128, 128>}, {pipeline_mode = #tpu.pipeline_mode<synchronous>, transform_indices = @transform_5, window_bounds = array<i64: 4, 1, 128>}, {pipeline_mode = #tpu.pipeline_mode<synchronous>, transform_indices = @transform_6, window_bounds = array<i64: 4, 16, 1>}, {transform_indices = @transform_7, window_bounds = array<i64: 1, 16, 128>}]} {
    %cst = arith.constant 0.000000e+00 : f32
    %0 = vector.broadcast %cst : f32 to vector<16x128xf32>
    %c0 = arith.constant 0 : index
    %c0_0 = arith.constant 0 : index
    %1 = vector.load %arg9[%c0, %c0_0] : memref<48x128xf32, #tpu.memory_space<vmem>>, vector<16x128xf32>
    tpu.vector_store %arg9[%c0, %c0_0], %0 {strides = array<i32>} : memref<48x128xf32, #tpu.memory_space<vmem>>, vector<16x128xf32>,
    %c32 = arith.constant 32 : index
    %c0_1 = arith.constant 0 : index
    %2 = vector.load %arg9[%c32, %c0_1] : memref<48x128xf32, #tpu.memory_space<vmem>>, vector<16x128xf32>
    tpu.vector_store %arg9[%c32, %c0_1], %0 {strides = array<i32>} : memref<48x128xf32, #tpu.memory_space<vmem>>, vector<16x128xf32>,
    %c0_2 = arith.constant 0 : index
    %c0_3 = arith.constant 0 : index
    %3 = vector.load %arg10[%c0_2, %c0_3] : memref<48x128xf32, #tpu.memory_space<vmem>>, vector<16x128xf32>
    tpu.vector_store %arg10[%c0_2, %c0_3], %0 {strides = array<i32>} : memref<48x128xf32, #tpu.memory_space<vmem>>, vector<16x128xf32>,
    %c32_4 = arith.constant 32 : index
    %c0_5 = arith.constant 0 : index
    %4 = vector.load %arg10[%c32_4, %c0_5] : memref<48x128xf32, #tpu.memory_space<vmem>>, vector<16x128xf32>
    tpu.vector_store %arg10[%c32_4, %c0_5], %0 {strides = array<i32>} : memref<48x128xf32, #tpu.memory_space<vmem>>, vector<16x128xf32>,
    %c0_6 = arith.constant 0 : index
    %c0_7 = arith.constant 0 : index
    %c0_8 = arith.constant 0 : index
    %5 = vector.load %arg1[%c0_6, %c0_7, %c0_8] : memref<1x16x128xf32, #tpu.memory_space<vmem>>, vector<1x16x128xf32>
    %6 = vector.shape_cast %5 : vector<1x16x128xf32> to vector<16x128xf32>
    %c16 = arith.constant 16 : index
    %c0_9 = arith.constant 0 : index
    %7 = vector.load %arg9[%c16, %c0_9] : memref<48x128xf32, #tpu.memory_space<vmem>>, vector<16x128xf32>
    tpu.vector_store %arg9[%c16, %c0_9], %6 {strides = array<i32>} : memref<48x128xf32, #tpu.memory_space<vmem>>, vector<16x128xf32>,
    %c16_10 = arith.constant 16 : index
    %c0_11 = arith.constant 0 : index
    %8 = vector.load %arg9[%c16_10, %c0_11] : memref<48x128xf32, #tpu.memory_space<vmem>>, vector<16x128xf32>
    %9 = arith.truncf %8 : vector<16x128xf32> to vector<16x128xbf16>
    %c1 = arith.constant 1 : index
    %c0_12 = arith.constant 0 : index
    %c0_13 = arith.constant 0 : index
    %10 = vector.load %arg2[%c1, %c0_12, %c0_13] : memref<3x128x128xbf16, #tpu.memory_space<vmem>>, vector<1x128x128xbf16>
    %11 = vector.shape_cast %10 : vector<1x128x128xbf16> to vector<128x128xbf16>
    %cst_14 = arith.constant dense<0.000000e+00> : vector<16x128xf32>
    %12 = tpu.matmul %9, %11, %cst_14 {dimension_numbers = #tpu.dot_dimension_numbers<[1], [0], [0], [1], [0, 0, 1, 1], [], []>} : vector<16x128xbf16>, vector<128x128xbf16>, vector<16x128xf32> -> vector<16x128xf32>
    %c12 = arith.constant 12 : index
    %c0_15 = arith.constant 0 : index
    %13 = vector.load %arg9[%c12, %c0_15] : memref<48x128xf32, #tpu.memory_space<vmem>>, vector<16x128xf32>
    %14 = arith.truncf %13 : vector<16x128xf32> to vector<16x128xbf16>
    %c0_16 = arith.constant 0 : index
    %c0_17 = arith.constant 0 : index
    %c0_18 = arith.constant 0 : index
    %15 = vector.load %arg2[%c0_16, %c0_17, %c0_18] : memref<3x128x128xbf16, #tpu.memory_space<vmem>>, vector<1x128x128xbf16>
    %16 = vector.shape_cast %15 : vector<1x128x128xbf16> to vector<128x128xbf16>
    %cst_19 = arith.constant dense<0.000000e+00> : vector<16x128xf32>
    %17 = tpu.matmul %14, %16, %cst_19 {dimension_numbers = #tpu.dot_dimension_numbers<[1], [0], [0], [1], [0, 0, 1, 1], [], []>} : vector<16x128xbf16>, vector<128x128xbf16>, vector<16x128xf32> -> vector<16x128xf32>
    %18 = arith.addf %12, %17 : vector<16x128xf32>
    %c20 = arith.constant 20 : index
    %c0_20 = arith.constant 0 : index
    %19 = vector.load %arg9[%c20, %c0_20] : memref<48x128xf32, #tpu.memory_space<vmem>>, vector<16x128xf32>
    %20 = arith.truncf %19 : vector<16x128xf32> to vector<16x128xbf16>
    %c2 = arith.constant 2 : index
    %c0_21 = arith.constant 0 : index
    %c0_22 = arith.constant 0 : index
    %21 = vector.load %arg2[%c2, %c0_21, %c0_22] : memref<3x128x128xbf16, #tpu.memory_space<vmem>>, vector<1x128x128xbf16>
    %22 = vector.shape_cast %21 : vector<1x128x128xbf16> to vector<128x128xbf16>
    %cst_23 = arith.constant dense<0.000000e+00> : vector<16x128xf32>
    %23 = tpu.matmul %20, %22, %cst_23 {dimension_numbers = #tpu.dot_dimension_numbers<[1], [0], [0], [1], [0, 0, 1, 1], [], []>} : vector<16x128xbf16>, vector<128x128xbf16>, vector<16x128xf32> -> vector<16x128xf32>
    %24 = arith.addf %18, %23 : vector<16x128xf32>
    %c0_24 = arith.constant 0 : index
    %c0_25 = arith.constant 0 : index
    %c0_26 = arith.constant 0 : index
    %25 = vector.load %arg6[%c0_24, %c0_25, %c0_26] : memref<4x1x128xf32, #tpu.memory_space<vmem>>, vector<1x1x128xf32>
    %26 = vector.shape_cast %25 : vector<1x1x128xf32> to vector<1x128xf32>
    %27 = vector.broadcast %26 : vector<1x128xf32> to vector<16x128xf32>
    %28 = arith.addf %24, %27 : vector<16x128xf32>
    %cst_27 = arith.constant 0.000000e+00 : f32
    %29 = vector.broadcast %cst_27 : f32 to vector<16x128xf32>
    %30 = arith.maximumf %28, %29 : vector<16x128xf32>
    %c16_28 = arith.constant 16 : index
    %c0_29 = arith.constant 0 : index
    %31 = vector.load %arg10[%c16_28, %c0_29] : memref<48x128xf32, #tpu.memory_space<vmem>>, vector<16x128xf32>
    tpu.vector_store %arg10[%c16_28, %c0_29], %30 {strides = array<i32>} : memref<48x128xf32, #tpu.memory_space<vmem>>, vector<16x128xf32>,
    %c0_30 = arith.constant 0 : index
    %c0_31 = arith.constant 0 : index
    %c0_32 = arith.constant 0 : index
    %32 = vector.load %arg7[%c0_30, %c0_31, %c0_32] : memref<4x16x1xf32, #tpu.memory_space<vmem>>, vector<1x16x1xf32>
    %33 = vector.shape_cast %32 : vector<1x16x1xf32> to vector<16x1xf32>
    %c1_33 = arith.constant 1 : index
    %c0_34 = arith.constant 0 : index
    %c0_35 = arith.constant 0 : index
    %34 = vector.load %arg7[%c1_33, %c0_34, %c0_35] : memref<4x16x1xf32, #tpu.memory_space<vmem>>, vector<1x16x1xf32>
    %35 = vector.shape_cast %34 : vector<1x16x1xf32> to vector<16x1xf32>
    %c16_36 = arith.constant 16 : index
    %c0_37 = arith.constant 0 : index
    %36 = vector.load %arg10[%c16_36, %c0_37] : memref<48x128xf32, #tpu.memory_space<vmem>>, vector<16x128xf32>
    %37 = arith.truncf %36 : vector<16x128xf32> to vector<16x128xbf16>
    %c1_38 = arith.constant 1 : index
    %c0_39 = arith.constant 0 : index
    %c0_40 = arith.constant 0 : index
    %38 = vector.load %arg3[%c1_38, %c0_39, %c0_40] : memref<3x128x128xbf16, #tpu.memory_space<vmem>>, vector<1x128x128xbf16>
    %39 = vector.shape_cast %38 : vector<1x128x128xbf16> to vector<128x128xbf16>
    %cst_41 = arith.constant dense<0.000000e+00> : vector<16x128xf32>
    %40 = tpu.matmul %37, %39, %cst_41 {dimension_numbers = #tpu.dot_dimension_numbers<[1], [0], [0], [1], [0, 0, 1, 1], [], []>} : vector<16x128xbf16>, vector<128x128xbf16>, vector<16x128xf32> -> vector<16x128xf32>
    %c15 = arith.constant 15 : index
    %c0_42 = arith.constant 0 : index
    %41 = vector.load %arg10[%c15, %c0_42] : memref<48x128xf32, #tpu.memory_space<vmem>>, vector<16x128xf32>
    %42 = vector.broadcast %33 : vector<16x1xf32> to vector<16x128xf32>
    %43 = arith.mulf %41, %42 : vector<16x128xf32>
    %44 = arith.truncf %43 : vector<16x128xf32> to vector<16x128xbf16>
    %c0_43 = arith.constant 0 : index
    %c0_44 = arith.constant 0 : index
    %c0_45 = arith.constant 0 : index
    %45 = vector.load %arg3[%c0_43, %c0_44, %c0_45] : memref<3x128x128xbf16, #tpu.memory_space<vmem>>, vector<1x128x128xbf16>
    %46 = vector.shape_cast %45 : vector<1x128x128xbf16> to vector<128x128xbf16>
    %cst_46 = arith.constant dense<0.000000e+00> : vector<16x128xf32>
    %47 = tpu.matmul %44, %46, %cst_46 {dimension_numbers = #tpu.dot_dimension_numbers<[1], [0], [0], [1], [0, 0, 1, 1], [], []>} : vector<16x128xbf16>, vector<128x128xbf16>, vector<16x128xf32> -> vector<16x128xf32>
    %48 = arith.addf %40, %47 : vector<16x128xf32>
    %c17 = arith.constant 17 : index
    %c0_47 = arith.constant 0 : index
    %49 = vector.load %arg10[%c17, %c0_47] : memref<48x128xf32, #tpu.memory_space<vmem>>, vector<16x128xf32>
    %50 = vector.broadcast %35 : vector<16x1xf32> to vector<16x128xf32>
    %51 = arith.mulf %49, %50 : vector<16x128xf32>
    %52 = arith.truncf %51 : vector<16x128xf32> to vector<16x128xbf16>
    %c2_48 = arith.constant 2 : index
    %c0_49 = arith.constant 0 : index
    %c0_50 = arith.constant 0 : index
    %53 = vector.load %arg3[%c2_48, %c0_49, %c0_50] : memref<3x128x128xbf16, #tpu.memory_space<vmem>>, vector<1x128x128xbf16>
    %54 = vector.shape_cast %53 : vector<1x128x128xbf16> to vector<128x128xbf16>
    %cst_51 = arith.constant dense<0.000000e+00> : vector<16x128xf32>
    %55 = tpu.matmul %52, %54, %cst_51 {dimension_numbers = #tpu.dot_dimension_numbers<[1], [0], [0], [1], [0, 0, 1, 1], [], []>} : vector<16x128xbf16>, vector<128x128xbf16>, vector<16x128xf32> -> vector<16x128xf32>
    %56 = arith.addf %48, %55 : vector<16x128xf32>
    %c1_52 = arith.constant 1 : index
    %c0_53 = arith.constant 0 : index
    %c0_54 = arith.constant 0 : index
    %57 = vector.load %arg6[%c1_52, %c0_53, %c0_54] : memref<4x1x128xf32, #tpu.memory_space<vmem>>, vector<1x1x128xf32>
    %58 = vector.shape_cast %57 : vector<1x1x128xf32> to vector<1x128xf32>
    %59 = vector.broadcast %58 : vector<1x128xf32> to vector<16x128xf32>
    %60 = arith.addf %56, %59 : vector<16x128xf32>
    %cst_55 = arith.constant 0.000000e+00 : f32
    %61 = vector.broadcast %cst_55 : f32 to vector<16x128xf32>
    %62 = arith.maximumf %60, %61 : vector<16x128xf32>
    %c16_56 = arith.constant 16 : index
    %c0_57 = arith.constant 0 : index
    %63 = vector.load %arg9[%c16_56, %c0_57] : memref<48x128xf32, #tpu.memory_space<vmem>>, vector<16x128xf32>
    tpu.vector_store %arg9[%c16_56, %c0_57], %62 {strides = array<i32>} : memref<48x128xf32, #tpu.memory_space<vmem>>, vector<16x128xf32>,
    %c16_58 = arith.constant 16 : index
    %c0_59 = arith.constant 0 : index
    %64 = vector.load %arg9[%c16_58, %c0_59] : memref<48x128xf32, #tpu.memory_space<vmem>>, vector<16x128xf32>
    %65 = arith.truncf %64 : vector<16x128xf32> to vector<16x128xbf16>
    %c1_60 = arith.constant 1 : index
    %c0_61 = arith.constant 0 : index
    %c0_62 = arith.constant 0 : index
    %66 = vector.load %arg4[%c1_60, %c0_61, %c0_62] : memref<3x128x128xbf16, #tpu.memory_space<vmem>>, vector<1x128x128xbf16>
    %67 = vector.shape_cast %66 : vector<1x128x128xbf16> to vector<128x128xbf16>
    %cst_63 = arith.constant dense<0.000000e+00> : vector<16x128xf32>
    %68 = tpu.matmul %65, %67, %cst_63 {dimension_numbers = #tpu.dot_dimension_numbers<[1], [0], [0], [1], [0, 0, 1, 1], [], []>} : vector<16x128xbf16>, vector<128x128xbf16>, vector<16x128xf32> -> vector<16x128xf32>
    %c2_64 = arith.constant 2 : index
    %c0_65 = arith.constant 0 : index
    %c0_66 = arith.constant 0 : index
    %69 = vector.load %arg6[%c2_64, %c0_65, %c0_66] : memref<4x1x128xf32, #tpu.memory_space<vmem>>, vector<1x1x128xf32>
    %70 = vector.shape_cast %69 : vector<1x1x128xf32> to vector<1x128xf32>
    %71 = vector.broadcast %70 : vector<1x128xf32> to vector<16x128xf32>
    %72 = arith.addf %68, %71 : vector<16x128xf32>
    %cst_67 = arith.constant 0.000000e+00 : f32
    %73 = vector.broadcast %cst_67 : f32 to vector<16x128xf32>
    %74 = arith.maximumf %72, %73 : vector<16x128xf32>
    %c16_68 = arith.constant 16 : index
    %c0_69 = arith.constant 0 : index
    %75 = vector.load %arg10[%c16_68, %c0_69] : memref<48x128xf32, #tpu.memory_space<vmem>>, vector<16x128xf32>
    tpu.vector_store %arg10[%c16_68, %c0_69], %74 {strides = array<i32>} : memref<48x128xf32, #tpu.memory_space<vmem>>, vector<16x128xf32>,
    %c16_70 = arith.constant 16 : index
    %c0_71 = arith.constant 0 : index
    %76 = vector.load %arg10[%c16_70, %c0_71] : memref<48x128xf32, #tpu.memory_space<vmem>>, vector<16x128xf32>
    %77 = arith.truncf %76 : vector<16x128xf32> to vector<16x128xbf16>
    %c1_72 = arith.constant 1 : index
    %c0_73 = arith.constant 0 : index
    %c0_74 = arith.constant 0 : index
    %78 = vector.load %arg5[%c1_72, %c0_73, %c0_74] : memref<3x128x128xbf16, #tpu.memory_space<vmem>>, vector<1x128x128xbf16>
    %79 = vector.shape_cast %78 : vector<1x128x128xbf16> to vector<128x128xbf16>
    %cst_75 = arith.constant dense<0.000000e+00> : vector<16x128xf32>
    %80 = tpu.matmul %77, %79, %cst_75 {dimension_numbers = #tpu.dot_dimension_numbers<[1], [0], [0], [1], [0, 0, 1, 1], [], []>} : vector<16x128xbf16>, vector<128x128xbf16>, vector<16x128xf32> -> vector<16x128xf32>
    %c3 = arith.constant 3 : index
    %c0_76 = arith.constant 0 : index
    %c0_77 = arith.constant 0 : index
    %81 = vector.load %arg6[%c3, %c0_76, %c0_77] : memref<4x1x128xf32, #tpu.memory_space<vmem>>, vector<1x1x128xf32>
    %82 = vector.shape_cast %81 : vector<1x1x128xf32> to vector<1x128xf32>
    %83 = vector.broadcast %82 : vector<1x128xf32> to vector<16x128xf32>
    %84 = arith.addf %80, %83 : vector<16x128xf32>
    %c0_78 = arith.constant 0 : index
    %c0_79 = arith.constant 0 : index
    %c0_80 = arith.constant 0 : index
    %85 = vector.load %arg1[%c0_78, %c0_79, %c0_80] : memref<1x16x128xf32, #tpu.memory_space<vmem>>, vector<1x16x128xf32>
    %86 = vector.shape_cast %85 : vector<1x16x128xf32> to vector<16x128xf32>
    %87 = arith.addf %84, %86 : vector<16x128xf32>
    %cst_81 = arith.constant 0.000000e+00 : f32
    %88 = vector.broadcast %cst_81 : f32 to vector<16x128xf32>
    %89 = arith.maximumf %87, %88 : vector<16x128xf32>
    %c0_82 = arith.constant 0 : index
    %c0_83 = arith.constant 0 : index
    %c0_84 = arith.constant 0 : index
    %90 = vector.load %arg8[%c0_82, %c0_83, %c0_84] : memref<1x16x128xf32, #tpu.memory_space<vmem>>, vector<1x16x128xf32>
    %91 = vector.shape_cast %90 : vector<1x16x128xf32> to vector<16x128xf32>
    %92 = vector.shape_cast %89 : vector<16x128xf32> to vector<1x16x128xf32>
    tpu.vector_store %arg8[%c0_82, %c0_83, %c0_84], %92 {strides = array<i32>} : memref<1x16x128xf32, #tpu.memory_space<vmem>>, vector<1x16x128xf32>,
    return
  }
  func.func @transform_0(%arg0: i32) -> (i32, i32, i32) {
    %c0_i32 = arith.constant 0 : i32
    %c0_i32_0 = arith.constant 0 : i32
    %c0_i32_1 = arith.constant 0 : i32
    return %arg0, %c0_i32, %c0_i32_0 : i32, i32, i32
  }
  func.func @transform_1(%arg0: i32) -> (i32, i32, i32) {
    %c0_i32 = arith.constant 0 : i32
    %c0_i32_0 = arith.constant 0 : i32
    %c0_i32_1 = arith.constant 0 : i32
    %c0_i32_2 = arith.constant 0 : i32
    return %c0_i32, %c0_i32_0, %c0_i32_1 : i32, i32, i32
  }
  func.func @transform_2(%arg0: i32) -> (i32, i32, i32) {
    %c0_i32 = arith.constant 0 : i32
    %c0_i32_0 = arith.constant 0 : i32
    %c0_i32_1 = arith.constant 0 : i32
    %c0_i32_2 = arith.constant 0 : i32
    return %c0_i32, %c0_i32_0, %c0_i32_1 : i32, i32, i32
  }
  func.func @transform_3(%arg0: i32) -> (i32, i32, i32) {
    %c0_i32 = arith.constant 0 : i32
    %c0_i32_0 = arith.constant 0 : i32
    %c0_i32_1 = arith.constant 0 : i32
    %c0_i32_2 = arith.constant 0 : i32
    return %c0_i32, %c0_i32_0, %c0_i32_1 : i32, i32, i32
  }
  func.func @transform_4(%arg0: i32) -> (i32, i32, i32) {
    %c0_i32 = arith.constant 0 : i32
    %c0_i32_0 = arith.constant 0 : i32
    %c0_i32_1 = arith.constant 0 : i32
    %c0_i32_2 = arith.constant 0 : i32
    return %c0_i32, %c0_i32_0, %c0_i32_1 : i32, i32, i32
  }
  func.func @transform_5(%arg0: i32) -> (i32, i32, i32) {
    %c0_i32 = arith.constant 0 : i32
    %c0_i32_0 = arith.constant 0 : i32
    %c0_i32_1 = arith.constant 0 : i32
    %c0_i32_2 = arith.constant 0 : i32
    return %c0_i32, %c0_i32_0, %c0_i32_1 : i32, i32, i32
  }
  func.func @transform_6(%arg0: i32) -> (i32, i32, i32) {
    %c0_i32 = arith.constant 0 : i32
    %c0_i32_0 = arith.constant 0 : i32
    %c0_i32_1 = arith.constant 0 : i32
    %c0_i32_2 = arith.constant 0 : i32
    return %c0_i32, %c0_i32_0, %c0_i32_1 : i32, i32, i32
  }
  func.func @transform_7(%arg0: i32) -> (i32, i32, i32) {
    %c0_i32 = arith.constant 0 : i32
    %c0_i32_0 = arith.constant 0 : i32
    %c0_i32_1 = arith.constant 0 : i32
    return %arg0, %c0_i32, %c0_i32_0 : i32, i32, i32
  }
}

module attributes {stable_mosaic.version = 11 : i64} {
  func.func @_nb1d_kernel(%arg0: i32, %arg1: memref<1x16x128xf32, #tpu.memory_space<vmem>>, %arg2: memref<3x128x128xbf16, #tpu.memory_space<vmem>>, %arg3: memref<3x128x128xbf16, #tpu.memory_space<vmem>>, %arg4: memref<3x128x128xbf16, #tpu.memory_space<vmem>>, %arg5: memref<3x128x128xbf16, #tpu.memory_space<vmem>>, %arg6: memref<4x1x128xf32, #tpu.memory_space<vmem>>, %arg7: memref<4x16x1xf32, #tpu.memory_space<vmem>>, %arg8: memref<1x16x128xf32, #tpu.memory_space<vmem>>, %arg9: memref<80x128xf32, #tpu.memory_space<vmem>>, %arg10: memref<80x128xf32, #tpu.memory_space<vmem>>) attributes {dimension_semantics = [#tpu.dimension_semantics<parallel>], iteration_bounds = array<i64: 2>, scalar_prefetch = 0 : i64, scratch_operands = 2 : i64, tpu.core_type = #tpu.core_type<tc>, window_params = [{transform_indices = @transform_0, window_bounds = array<i64: 1, 16, 128>}, {pipeline_mode = #tpu.pipeline_mode<synchronous>, transform_indices = @transform_1, window_bounds = array<i64: 3, 128, 128>}, {pipeline_mode = #tpu.pipeline_mode<synchronous>, transform_indices = @transform_2, window_bounds = array<i64: 3, 128, 128>}, {pipeline_mode = #tpu.pipeline_mode<synchronous>, transform_indices = @transform_3, window_bounds = array<i64: 3, 128, 128>}, {pipeline_mode = #tpu.pipeline_mode<synchronous>, transform_indices = @transform_4, window_bounds = array<i64: 3, 128, 128>}, {pipeline_mode = #tpu.pipeline_mode<synchronous>, transform_indices = @transform_5, window_bounds = array<i64: 4, 1, 128>}, {pipeline_mode = #tpu.pipeline_mode<synchronous>, transform_indices = @transform_6, window_bounds = array<i64: 4, 16, 1>}, {transform_indices = @transform_7, window_bounds = array<i64: 1, 16, 128>}]} {
    %cst = arith.constant 0.000000e+00 : f32
    %0 = vector.broadcast %cst : f32 to vector<32x128xf32>
    %c0 = arith.constant 0 : index
    %c0_0 = arith.constant 0 : index
    %1 = vector.load %arg9[%c0, %c0_0] : memref<80x128xf32, #tpu.memory_space<vmem>>, vector<32x128xf32>
    tpu.vector_store %arg9[%c0, %c0_0], %0 {strides = array<i32>} : memref<80x128xf32, #tpu.memory_space<vmem>>, vector<32x128xf32>,
    %c48 = arith.constant 48 : index
    %c0_1 = arith.constant 0 : index
    %2 = vector.load %arg9[%c48, %c0_1] : memref<80x128xf32, #tpu.memory_space<vmem>>, vector<32x128xf32>
    tpu.vector_store %arg9[%c48, %c0_1], %0 {strides = array<i32>} : memref<80x128xf32, #tpu.memory_space<vmem>>, vector<32x128xf32>,
    %c0_2 = arith.constant 0 : index
    %c0_3 = arith.constant 0 : index
    %3 = vector.load %arg10[%c0_2, %c0_3] : memref<80x128xf32, #tpu.memory_space<vmem>>, vector<32x128xf32>
    tpu.vector_store %arg10[%c0_2, %c0_3], %0 {strides = array<i32>} : memref<80x128xf32, #tpu.memory_space<vmem>>, vector<32x128xf32>,
    %c48_4 = arith.constant 48 : index
    %c0_5 = arith.constant 0 : index
    %4 = vector.load %arg10[%c48_4, %c0_5] : memref<80x128xf32, #tpu.memory_space<vmem>>, vector<32x128xf32>
    tpu.vector_store %arg10[%c48_4, %c0_5], %0 {strides = array<i32>} : memref<80x128xf32, #tpu.memory_space<vmem>>, vector<32x128xf32>,
    %c0_6 = arith.constant 0 : index
    %c0_7 = arith.constant 0 : index
    %c0_8 = arith.constant 0 : index
    %5 = vector.load %arg1[%c0_6, %c0_7, %c0_8] : memref<1x16x128xf32, #tpu.memory_space<vmem>>, vector<1x16x128xf32>
    %6 = vector.shape_cast %5 : vector<1x16x128xf32> to vector<16x128xf32>
    %c32 = arith.constant 32 : index
    %c0_9 = arith.constant 0 : index
    %7 = vector.load %arg9[%c32, %c0_9] : memref<80x128xf32, #tpu.memory_space<vmem>>, vector<16x128xf32>
    tpu.vector_store %arg9[%c32, %c0_9], %6 {strides = array<i32>} : memref<80x128xf32, #tpu.memory_space<vmem>>, vector<16x128xf32>,
    %c32_10 = arith.constant 32 : index
    %c0_11 = arith.constant 0 : index
    %8 = vector.load %arg9[%c32_10, %c0_11] : memref<80x128xf32, #tpu.memory_space<vmem>>, vector<16x128xf32>
    %9 = arith.truncf %8 : vector<16x128xf32> to vector<16x128xbf16>
    %c1 = arith.constant 1 : index
    %c0_12 = arith.constant 0 : index
    %c0_13 = arith.constant 0 : index
    %10 = vector.load %arg2[%c1, %c0_12, %c0_13] : memref<3x128x128xbf16, #tpu.memory_space<vmem>>, vector<1x128x128xbf16>
    %11 = vector.shape_cast %10 : vector<1x128x128xbf16> to vector<128x128xbf16>
    %cst_14 = arith.constant dense<0.000000e+00> : vector<16x128xf32>
    %12 = tpu.matmul %9, %11, %cst_14 {dimension_numbers = #tpu.dot_dimension_numbers<[1], [0], [0], [1], [0, 0, 1, 1], [], []>} : vector<16x128xbf16>, vector<128x128xbf16>, vector<16x128xf32> -> vector<16x128xf32>
    %c28 = arith.constant 28 : index
    %c0_15 = arith.constant 0 : index
    %13 = vector.load %arg9[%c28, %c0_15] : memref<80x128xf32, #tpu.memory_space<vmem>>, vector<16x128xf32>
    %14 = arith.truncf %13 : vector<16x128xf32> to vector<16x128xbf16>
    %c0_16 = arith.constant 0 : index
    %c0_17 = arith.constant 0 : index
    %c0_18 = arith.constant 0 : index
    %15 = vector.load %arg2[%c0_16, %c0_17, %c0_18] : memref<3x128x128xbf16, #tpu.memory_space<vmem>>, vector<1x128x128xbf16>
    %16 = vector.shape_cast %15 : vector<1x128x128xbf16> to vector<128x128xbf16>
    %cst_19 = arith.constant dense<0.000000e+00> : vector<16x128xf32>
    %17 = tpu.matmul %14, %16, %cst_19 {dimension_numbers = #tpu.dot_dimension_numbers<[1], [0], [0], [1], [0, 0, 1, 1], [], []>} : vector<16x128xbf16>, vector<128x128xbf16>, vector<16x128xf32> -> vector<16x128xf32>
    %18 = arith.addf %12, %17 : vector<16x128xf32>
    %c36 = arith.constant 36 : index
    %c0_20 = arith.constant 0 : index
    %19 = vector.load %arg9[%c36, %c0_20] : memref<80x128xf32, #tpu.memory_space<vmem>>, vector<16x128xf32>
    %20 = arith.truncf %19 : vector<16x128xf32> to vector<16x128xbf16>
    %c2 = arith.constant 2 : index
    %c0_21 = arith.constant 0 : index
    %c0_22 = arith.constant 0 : index
    %21 = vector.load %arg2[%c2, %c0_21, %c0_22] : memref<3x128x128xbf16, #tpu.memory_space<vmem>>, vector<1x128x128xbf16>
    %22 = vector.shape_cast %21 : vector<1x128x128xbf16> to vector<128x128xbf16>
    %cst_23 = arith.constant dense<0.000000e+00> : vector<16x128xf32>
    %23 = tpu.matmul %20, %22, %cst_23 {dimension_numbers = #tpu.dot_dimension_numbers<[1], [0], [0], [1], [0, 0, 1, 1], [], []>} : vector<16x128xbf16>, vector<128x128xbf16>, vector<16x128xf32> -> vector<16x128xf32>
    %24 = arith.addf %18, %23 : vector<16x128xf32>
    %c0_24 = arith.constant 0 : index
    %c0_25 = arith.constant 0 : index
    %c0_26 = arith.constant 0 : index
    %25 = vector.load %arg6[%c0_24, %c0_25, %c0_26] : memref<4x1x128xf32, #tpu.memory_space<vmem>>, vector<1x1x128xf32>
    %26 = vector.shape_cast %25 : vector<1x1x128xf32> to vector<1x128xf32>
    %27 = vector.broadcast %26 : vector<1x128xf32> to vector<16x128xf32>
    %28 = arith.addf %24, %27 : vector<16x128xf32>
    %cst_27 = arith.constant 0.000000e+00 : f32
    %29 = vector.broadcast %cst_27 : f32 to vector<16x128xf32>
    %30 = arith.maximumf %28, %29 : vector<16x128xf32>
    %c32_28 = arith.constant 32 : index
    %c0_29 = arith.constant 0 : index
    %31 = vector.load %arg10[%c32_28, %c0_29] : memref<80x128xf32, #tpu.memory_space<vmem>>, vector<16x128xf32>
    tpu.vector_store %arg10[%c32_28, %c0_29], %30 {strides = array<i32>} : memref<80x128xf32, #tpu.memory_space<vmem>>, vector<16x128xf32>,
    %c0_30 = arith.constant 0 : index
    %c0_31 = arith.constant 0 : index
    %c0_32 = arith.constant 0 : index
    %32 = vector.load %arg7[%c0_30, %c0_31, %c0_32] : memref<4x16x1xf32, #tpu.memory_space<vmem>>, vector<1x16x1xf32>
    %33 = vector.shape_cast %32 : vector<1x16x1xf32> to vector<16x1xf32>
    %c1_33 = arith.constant 1 : index
    %c0_34 = arith.constant 0 : index
    %c0_35 = arith.constant 0 : index
    %34 = vector.load %arg7[%c1_33, %c0_34, %c0_35] : memref<4x16x1xf32, #tpu.memory_space<vmem>>, vector<1x16x1xf32>
    %35 = vector.shape_cast %34 : vector<1x16x1xf32> to vector<16x1xf32>
    %c32_36 = arith.constant 32 : index
    %c0_37 = arith.constant 0 : index
    %36 = vector.load %arg10[%c32_36, %c0_37] : memref<80x128xf32, #tpu.memory_space<vmem>>, vector<16x128xf32>
    %37 = arith.truncf %36 : vector<16x128xf32> to vector<16x128xbf16>
    %c1_38 = arith.constant 1 : index
    %c0_39 = arith.constant 0 : index
    %c0_40 = arith.constant 0 : index
    %38 = vector.load %arg3[%c1_38, %c0_39, %c0_40] : memref<3x128x128xbf16, #tpu.memory_space<vmem>>, vector<1x128x128xbf16>
    %39 = vector.shape_cast %38 : vector<1x128x128xbf16> to vector<128x128xbf16>
    %cst_41 = arith.constant dense<0.000000e+00> : vector<16x128xf32>
    %40 = tpu.matmul %37, %39, %cst_41 {dimension_numbers = #tpu.dot_dimension_numbers<[1], [0], [0], [1], [0, 0, 1, 1], [], []>} : vector<16x128xbf16>, vector<128x128xbf16>, vector<16x128xf32> -> vector<16x128xf32>
    %c31 = arith.constant 31 : index
    %c0_42 = arith.constant 0 : index
    %41 = vector.load %arg10[%c31, %c0_42] : memref<80x128xf32, #tpu.memory_space<vmem>>, vector<16x128xf32>
    %42 = vector.broadcast %33 : vector<16x1xf32> to vector<16x128xf32>
    %43 = arith.mulf %41, %42 : vector<16x128xf32>
    %44 = arith.truncf %43 : vector<16x128xf32> to vector<16x128xbf16>
    %c0_43 = arith.constant 0 : index
    %c0_44 = arith.constant 0 : index
    %c0_45 = arith.constant 0 : index
    %45 = vector.load %arg3[%c0_43, %c0_44, %c0_45] : memref<3x128x128xbf16, #tpu.memory_space<vmem>>, vector<1x128x128xbf16>
    %46 = vector.shape_cast %45 : vector<1x128x128xbf16> to vector<128x128xbf16>
    %cst_46 = arith.constant dense<0.000000e+00> : vector<16x128xf32>
    %47 = tpu.matmul %44, %46, %cst_46 {dimension_numbers = #tpu.dot_dimension_numbers<[1], [0], [0], [1], [0, 0, 1, 1], [], []>} : vector<16x128xbf16>, vector<128x128xbf16>, vector<16x128xf32> -> vector<16x128xf32>
    %48 = arith.addf %40, %47 : vector<16x128xf32>
    %c33 = arith.constant 33 : index
    %c0_47 = arith.constant 0 : index
    %49 = vector.load %arg10[%c33, %c0_47] : memref<80x128xf32, #tpu.memory_space<vmem>>, vector<16x128xf32>
    %50 = vector.broadcast %35 : vector<16x1xf32> to vector<16x128xf32>
    %51 = arith.mulf %49, %50 : vector<16x128xf32>
    %52 = arith.truncf %51 : vector<16x128xf32> to vector<16x128xbf16>
    %c2_48 = arith.constant 2 : index
    %c0_49 = arith.constant 0 : index
    %c0_50 = arith.constant 0 : index
    %53 = vector.load %arg3[%c2_48, %c0_49, %c0_50] : memref<3x128x128xbf16, #tpu.memory_space<vmem>>, vector<1x128x128xbf16>
    %54 = vector.shape_cast %53 : vector<1x128x128xbf16> to vector<128x128xbf16>
    %cst_51 = arith.constant dense<0.000000e+00> : vector<16x128xf32>
    %55 = tpu.matmul %52, %54, %cst_51 {dimension_numbers = #tpu.dot_dimension_numbers<[1], [0], [0], [1], [0, 0, 1, 1], [], []>} : vector<16x128xbf16>, vector<128x128xbf16>, vector<16x128xf32> -> vector<16x128xf32>
    %56 = arith.addf %48, %55 : vector<16x128xf32>
    %c1_52 = arith.constant 1 : index
    %c0_53 = arith.constant 0 : index
    %c0_54 = arith.constant 0 : index
    %57 = vector.load %arg6[%c1_52, %c0_53, %c0_54] : memref<4x1x128xf32, #tpu.memory_space<vmem>>, vector<1x1x128xf32>
    %58 = vector.shape_cast %57 : vector<1x1x128xf32> to vector<1x128xf32>
    %59 = vector.broadcast %58 : vector<1x128xf32> to vector<16x128xf32>
    %60 = arith.addf %56, %59 : vector<16x128xf32>
    %cst_55 = arith.constant 0.000000e+00 : f32
    %61 = vector.broadcast %cst_55 : f32 to vector<16x128xf32>
    %62 = arith.maximumf %60, %61 : vector<16x128xf32>
    %c32_56 = arith.constant 32 : index
    %c0_57 = arith.constant 0 : index
    %63 = vector.load %arg9[%c32_56, %c0_57] : memref<80x128xf32, #tpu.memory_space<vmem>>, vector<16x128xf32>
    tpu.vector_store %arg9[%c32_56, %c0_57], %62 {strides = array<i32>} : memref<80x128xf32, #tpu.memory_space<vmem>>, vector<16x128xf32>,
    %c32_58 = arith.constant 32 : index
    %c0_59 = arith.constant 0 : index
    %64 = vector.load %arg9[%c32_58, %c0_59] : memref<80x128xf32, #tpu.memory_space<vmem>>, vector<16x128xf32>
    %65 = arith.truncf %64 : vector<16x128xf32> to vector<16x128xbf16>
    %c1_60 = arith.constant 1 : index
    %c0_61 = arith.constant 0 : index
    %c0_62 = arith.constant 0 : index
    %66 = vector.load %arg4[%c1_60, %c0_61, %c0_62] : memref<3x128x128xbf16, #tpu.memory_space<vmem>>, vector<1x128x128xbf16>
    %67 = vector.shape_cast %66 : vector<1x128x128xbf16> to vector<128x128xbf16>
    %cst_63 = arith.constant dense<0.000000e+00> : vector<16x128xf32>
    %68 = tpu.matmul %65, %67, %cst_63 {dimension_numbers = #tpu.dot_dimension_numbers<[1], [0], [0], [1], [0, 0, 1, 1], [], []>} : vector<16x128xbf16>, vector<128x128xbf16>, vector<16x128xf32> -> vector<16x128xf32>
    %c2_64 = arith.constant 2 : index
    %c0_65 = arith.constant 0 : index
    %c0_66 = arith.constant 0 : index
    %69 = vector.load %arg6[%c2_64, %c0_65, %c0_66] : memref<4x1x128xf32, #tpu.memory_space<vmem>>, vector<1x1x128xf32>
    %70 = vector.shape_cast %69 : vector<1x1x128xf32> to vector<1x128xf32>
    %71 = vector.broadcast %70 : vector<1x128xf32> to vector<16x128xf32>
    %72 = arith.addf %68, %71 : vector<16x128xf32>
    %cst_67 = arith.constant 0.000000e+00 : f32
    %73 = vector.broadcast %cst_67 : f32 to vector<16x128xf32>
    %74 = arith.maximumf %72, %73 : vector<16x128xf32>
    %c32_68 = arith.constant 32 : index
    %c0_69 = arith.constant 0 : index
    %75 = vector.load %arg10[%c32_68, %c0_69] : memref<80x128xf32, #tpu.memory_space<vmem>>, vector<16x128xf32>
    tpu.vector_store %arg10[%c32_68, %c0_69], %74 {strides = array<i32>} : memref<80x128xf32, #tpu.memory_space<vmem>>, vector<16x128xf32>,
    %c32_70 = arith.constant 32 : index
    %c0_71 = arith.constant 0 : index
    %76 = vector.load %arg10[%c32_70, %c0_71] : memref<80x128xf32, #tpu.memory_space<vmem>>, vector<16x128xf32>
    %77 = arith.truncf %76 : vector<16x128xf32> to vector<16x128xbf16>
    %c1_72 = arith.constant 1 : index
    %c0_73 = arith.constant 0 : index
    %c0_74 = arith.constant 0 : index
    %78 = vector.load %arg5[%c1_72, %c0_73, %c0_74] : memref<3x128x128xbf16, #tpu.memory_space<vmem>>, vector<1x128x128xbf16>
    %79 = vector.shape_cast %78 : vector<1x128x128xbf16> to vector<128x128xbf16>
    %cst_75 = arith.constant dense<0.000000e+00> : vector<16x128xf32>
    %80 = tpu.matmul %77, %79, %cst_75 {dimension_numbers = #tpu.dot_dimension_numbers<[1], [0], [0], [1], [0, 0, 1, 1], [], []>} : vector<16x128xbf16>, vector<128x128xbf16>, vector<16x128xf32> -> vector<16x128xf32>
    %c3 = arith.constant 3 : index
    %c0_76 = arith.constant 0 : index
    %c0_77 = arith.constant 0 : index
    %81 = vector.load %arg6[%c3, %c0_76, %c0_77] : memref<4x1x128xf32, #tpu.memory_space<vmem>>, vector<1x1x128xf32>
    %82 = vector.shape_cast %81 : vector<1x1x128xf32> to vector<1x128xf32>
    %83 = vector.broadcast %82 : vector<1x128xf32> to vector<16x128xf32>
    %84 = arith.addf %80, %83 : vector<16x128xf32>
    %c0_78 = arith.constant 0 : index
    %c0_79 = arith.constant 0 : index
    %c0_80 = arith.constant 0 : index
    %85 = vector.load %arg1[%c0_78, %c0_79, %c0_80] : memref<1x16x128xf32, #tpu.memory_space<vmem>>, vector<1x16x128xf32>
    %86 = vector.shape_cast %85 : vector<1x16x128xf32> to vector<16x128xf32>
    %87 = arith.addf %84, %86 : vector<16x128xf32>
    %cst_81 = arith.constant 0.000000e+00 : f32
    %88 = vector.broadcast %cst_81 : f32 to vector<16x128xf32>
    %89 = arith.maximumf %87, %88 : vector<16x128xf32>
    %c0_82 = arith.constant 0 : index
    %c0_83 = arith.constant 0 : index
    %c0_84 = arith.constant 0 : index
    %90 = vector.load %arg8[%c0_82, %c0_83, %c0_84] : memref<1x16x128xf32, #tpu.memory_space<vmem>>, vector<1x16x128xf32>
    %91 = vector.shape_cast %90 : vector<1x16x128xf32> to vector<16x128xf32>
    %92 = vector.shape_cast %89 : vector<16x128xf32> to vector<1x16x128xf32>
    tpu.vector_store %arg8[%c0_82, %c0_83, %c0_84], %92 {strides = array<i32>} : memref<1x16x128xf32, #tpu.memory_space<vmem>>, vector<1x16x128xf32>,
    return
  }
  func.func @transform_0(%arg0: i32) -> (i32, i32, i32) {
    %c0_i32 = arith.constant 0 : i32
    %c0_i32_0 = arith.constant 0 : i32
    %c0_i32_1 = arith.constant 0 : i32
    return %arg0, %c0_i32, %c0_i32_0 : i32, i32, i32
  }
  func.func @transform_1(%arg0: i32) -> (i32, i32, i32) {
    %c0_i32 = arith.constant 0 : i32
    %c0_i32_0 = arith.constant 0 : i32
    %c0_i32_1 = arith.constant 0 : i32
    %c0_i32_2 = arith.constant 0 : i32
    return %c0_i32, %c0_i32_0, %c0_i32_1 : i32, i32, i32
  }
  func.func @transform_2(%arg0: i32) -> (i32, i32, i32) {
    %c0_i32 = arith.constant 0 : i32
    %c0_i32_0 = arith.constant 0 : i32
    %c0_i32_1 = arith.constant 0 : i32
    %c0_i32_2 = arith.constant 0 : i32
    return %c0_i32, %c0_i32_0, %c0_i32_1 : i32, i32, i32
  }
  func.func @transform_3(%arg0: i32) -> (i32, i32, i32) {
    %c0_i32 = arith.constant 0 : i32
    %c0_i32_0 = arith.constant 0 : i32
    %c0_i32_1 = arith.constant 0 : i32
    %c0_i32_2 = arith.constant 0 : i32
    return %c0_i32, %c0_i32_0, %c0_i32_1 : i32, i32, i32
  }
  func.func @transform_4(%arg0: i32) -> (i32, i32, i32) {
    %c0_i32 = arith.constant 0 : i32
    %c0_i32_0 = arith.constant 0 : i32
    %c0_i32_1 = arith.constant 0 : i32
    %c0_i32_2 = arith.constant 0 : i32
    return %c0_i32, %c0_i32_0, %c0_i32_1 : i32, i32, i32
  }
  func.func @transform_5(%arg0: i32) -> (i32, i32, i32) {
    %c0_i32 = arith.constant 0 : i32
    %c0_i32_0 = arith.constant 0 : i32
    %c0_i32_1 = arith.constant 0 : i32
    %c0_i32_2 = arith.constant 0 : i32
    return %c0_i32, %c0_i32_0, %c0_i32_1 : i32, i32, i32
  }
  func.func @transform_6(%arg0: i32) -> (i32, i32, i32) {
    %c0_i32 = arith.constant 0 : i32
    %c0_i32_0 = arith.constant 0 : i32
    %c0_i32_1 = arith.constant 0 : i32
    %c0_i32_2 = arith.constant 0 : i32
    return %c0_i32, %c0_i32_0, %c0_i32_1 : i32, i32, i32
  }
  func.func @transform_7(%arg0: i32) -> (i32, i32, i32) {
    %c0_i32 = arith.constant 0 : i32
    %c0_i32_0 = arith.constant 0 : i32
    %c0_i32_1 = arith.constant 0 : i32
    return %arg0, %c0_i32, %c0_i32_0 : i32, i32, i32
  }
}

module attributes {stable_mosaic.version = 11 : i64} {
  func.func @_nb1d_kernel(%arg0: i32, %arg1: memref<1x16x128xf32, #tpu.memory_space<vmem>>, %arg2: memref<3x128x128xbf16, #tpu.memory_space<vmem>>, %arg3: memref<3x128x128xbf16, #tpu.memory_space<vmem>>, %arg4: memref<3x128x128xbf16, #tpu.memory_space<vmem>>, %arg5: memref<3x128x128xbf16, #tpu.memory_space<vmem>>, %arg6: memref<4x1x128xf32, #tpu.memory_space<vmem>>, %arg7: memref<4x16x1xf32, #tpu.memory_space<vmem>>, %arg8: memref<1x16x128xf32, #tpu.memory_space<vmem>>, %arg9: memref<144x128xf32, #tpu.memory_space<vmem>>, %arg10: memref<144x128xf32, #tpu.memory_space<vmem>>) attributes {dimension_semantics = [#tpu.dimension_semantics<parallel>], iteration_bounds = array<i64: 2>, scalar_prefetch = 0 : i64, scratch_operands = 2 : i64, tpu.core_type = #tpu.core_type<tc>, window_params = [{transform_indices = @transform_0, window_bounds = array<i64: 1, 16, 128>}, {pipeline_mode = #tpu.pipeline_mode<synchronous>, transform_indices = @transform_1, window_bounds = array<i64: 3, 128, 128>}, {pipeline_mode = #tpu.pipeline_mode<synchronous>, transform_indices = @transform_2, window_bounds = array<i64: 3, 128, 128>}, {pipeline_mode = #tpu.pipeline_mode<synchronous>, transform_indices = @transform_3, window_bounds = array<i64: 3, 128, 128>}, {pipeline_mode = #tpu.pipeline_mode<synchronous>, transform_indices = @transform_4, window_bounds = array<i64: 3, 128, 128>}, {pipeline_mode = #tpu.pipeline_mode<synchronous>, transform_indices = @transform_5, window_bounds = array<i64: 4, 1, 128>}, {pipeline_mode = #tpu.pipeline_mode<synchronous>, transform_indices = @transform_6, window_bounds = array<i64: 4, 16, 1>}, {transform_indices = @transform_7, window_bounds = array<i64: 1, 16, 128>}]} {
    %cst = arith.constant 0.000000e+00 : f32
    %0 = vector.broadcast %cst : f32 to vector<64x128xf32>
    %c0 = arith.constant 0 : index
    %c0_0 = arith.constant 0 : index
    %1 = vector.load %arg9[%c0, %c0_0] : memref<144x128xf32, #tpu.memory_space<vmem>>, vector<64x128xf32>
    tpu.vector_store %arg9[%c0, %c0_0], %0 {strides = array<i32>} : memref<144x128xf32, #tpu.memory_space<vmem>>, vector<64x128xf32>,
    %c80 = arith.constant 80 : index
    %c0_1 = arith.constant 0 : index
    %2 = vector.load %arg9[%c80, %c0_1] : memref<144x128xf32, #tpu.memory_space<vmem>>, vector<64x128xf32>
    tpu.vector_store %arg9[%c80, %c0_1], %0 {strides = array<i32>} : memref<144x128xf32, #tpu.memory_space<vmem>>, vector<64x128xf32>,
    %c0_2 = arith.constant 0 : index
    %c0_3 = arith.constant 0 : index
    %3 = vector.load %arg10[%c0_2, %c0_3] : memref<144x128xf32, #tpu.memory_space<vmem>>, vector<64x128xf32>
    tpu.vector_store %arg10[%c0_2, %c0_3], %0 {strides = array<i32>} : memref<144x128xf32, #tpu.memory_space<vmem>>, vector<64x128xf32>,
    %c80_4 = arith.constant 80 : index
    %c0_5 = arith.constant 0 : index
    %4 = vector.load %arg10[%c80_4, %c0_5] : memref<144x128xf32, #tpu.memory_space<vmem>>, vector<64x128xf32>
    tpu.vector_store %arg10[%c80_4, %c0_5], %0 {strides = array<i32>} : memref<144x128xf32, #tpu.memory_space<vmem>>, vector<64x128xf32>,
    %c0_6 = arith.constant 0 : index
    %c0_7 = arith.constant 0 : index
    %c0_8 = arith.constant 0 : index
    %5 = vector.load %arg1[%c0_6, %c0_7, %c0_8] : memref<1x16x128xf32, #tpu.memory_space<vmem>>, vector<1x16x128xf32>
    %6 = vector.shape_cast %5 : vector<1x16x128xf32> to vector<16x128xf32>
    %c64 = arith.constant 64 : index
    %c0_9 = arith.constant 0 : index
    %7 = vector.load %arg9[%c64, %c0_9] : memref<144x128xf32, #tpu.memory_space<vmem>>, vector<16x128xf32>
    tpu.vector_store %arg9[%c64, %c0_9], %6 {strides = array<i32>} : memref<144x128xf32, #tpu.memory_space<vmem>>, vector<16x128xf32>,
    %c64_10 = arith.constant 64 : index
    %c0_11 = arith.constant 0 : index
    %8 = vector.load %arg9[%c64_10, %c0_11] : memref<144x128xf32, #tpu.memory_space<vmem>>, vector<16x128xf32>
    %9 = arith.truncf %8 : vector<16x128xf32> to vector<16x128xbf16>
    %c1 = arith.constant 1 : index
    %c0_12 = arith.constant 0 : index
    %c0_13 = arith.constant 0 : index
    %10 = vector.load %arg2[%c1, %c0_12, %c0_13] : memref<3x128x128xbf16, #tpu.memory_space<vmem>>, vector<1x128x128xbf16>
    %11 = vector.shape_cast %10 : vector<1x128x128xbf16> to vector<128x128xbf16>
    %cst_14 = arith.constant dense<0.000000e+00> : vector<16x128xf32>
    %12 = tpu.matmul %9, %11, %cst_14 {dimension_numbers = #tpu.dot_dimension_numbers<[1], [0], [0], [1], [0, 0, 1, 1], [], []>} : vector<16x128xbf16>, vector<128x128xbf16>, vector<16x128xf32> -> vector<16x128xf32>
    %c60 = arith.constant 60 : index
    %c0_15 = arith.constant 0 : index
    %13 = vector.load %arg9[%c60, %c0_15] : memref<144x128xf32, #tpu.memory_space<vmem>>, vector<16x128xf32>
    %14 = arith.truncf %13 : vector<16x128xf32> to vector<16x128xbf16>
    %c0_16 = arith.constant 0 : index
    %c0_17 = arith.constant 0 : index
    %c0_18 = arith.constant 0 : index
    %15 = vector.load %arg2[%c0_16, %c0_17, %c0_18] : memref<3x128x128xbf16, #tpu.memory_space<vmem>>, vector<1x128x128xbf16>
    %16 = vector.shape_cast %15 : vector<1x128x128xbf16> to vector<128x128xbf16>
    %cst_19 = arith.constant dense<0.000000e+00> : vector<16x128xf32>
    %17 = tpu.matmul %14, %16, %cst_19 {dimension_numbers = #tpu.dot_dimension_numbers<[1], [0], [0], [1], [0, 0, 1, 1], [], []>} : vector<16x128xbf16>, vector<128x128xbf16>, vector<16x128xf32> -> vector<16x128xf32>
    %18 = arith.addf %12, %17 : vector<16x128xf32>
    %c68 = arith.constant 68 : index
    %c0_20 = arith.constant 0 : index
    %19 = vector.load %arg9[%c68, %c0_20] : memref<144x128xf32, #tpu.memory_space<vmem>>, vector<16x128xf32>
    %20 = arith.truncf %19 : vector<16x128xf32> to vector<16x128xbf16>
    %c2 = arith.constant 2 : index
    %c0_21 = arith.constant 0 : index
    %c0_22 = arith.constant 0 : index
    %21 = vector.load %arg2[%c2, %c0_21, %c0_22] : memref<3x128x128xbf16, #tpu.memory_space<vmem>>, vector<1x128x128xbf16>
    %22 = vector.shape_cast %21 : vector<1x128x128xbf16> to vector<128x128xbf16>
    %cst_23 = arith.constant dense<0.000000e+00> : vector<16x128xf32>
    %23 = tpu.matmul %20, %22, %cst_23 {dimension_numbers = #tpu.dot_dimension_numbers<[1], [0], [0], [1], [0, 0, 1, 1], [], []>} : vector<16x128xbf16>, vector<128x128xbf16>, vector<16x128xf32> -> vector<16x128xf32>
    %24 = arith.addf %18, %23 : vector<16x128xf32>
    %c0_24 = arith.constant 0 : index
    %c0_25 = arith.constant 0 : index
    %c0_26 = arith.constant 0 : index
    %25 = vector.load %arg6[%c0_24, %c0_25, %c0_26] : memref<4x1x128xf32, #tpu.memory_space<vmem>>, vector<1x1x128xf32>
    %26 = vector.shape_cast %25 : vector<1x1x128xf32> to vector<1x128xf32>
    %27 = vector.broadcast %26 : vector<1x128xf32> to vector<16x128xf32>
    %28 = arith.addf %24, %27 : vector<16x128xf32>
    %cst_27 = arith.constant 0.000000e+00 : f32
    %29 = vector.broadcast %cst_27 : f32 to vector<16x128xf32>
    %30 = arith.maximumf %28, %29 : vector<16x128xf32>
    %c64_28 = arith.constant 64 : index
    %c0_29 = arith.constant 0 : index
    %31 = vector.load %arg10[%c64_28, %c0_29] : memref<144x128xf32, #tpu.memory_space<vmem>>, vector<16x128xf32>
    tpu.vector_store %arg10[%c64_28, %c0_29], %30 {strides = array<i32>} : memref<144x128xf32, #tpu.memory_space<vmem>>, vector<16x128xf32>,
    %c0_30 = arith.constant 0 : index
    %c0_31 = arith.constant 0 : index
    %c0_32 = arith.constant 0 : index
    %32 = vector.load %arg7[%c0_30, %c0_31, %c0_32] : memref<4x16x1xf32, #tpu.memory_space<vmem>>, vector<1x16x1xf32>
    %33 = vector.shape_cast %32 : vector<1x16x1xf32> to vector<16x1xf32>
    %c1_33 = arith.constant 1 : index
    %c0_34 = arith.constant 0 : index
    %c0_35 = arith.constant 0 : index
    %34 = vector.load %arg7[%c1_33, %c0_34, %c0_35] : memref<4x16x1xf32, #tpu.memory_space<vmem>>, vector<1x16x1xf32>
    %35 = vector.shape_cast %34 : vector<1x16x1xf32> to vector<16x1xf32>
    %c64_36 = arith.constant 64 : index
    %c0_37 = arith.constant 0 : index
    %36 = vector.load %arg10[%c64_36, %c0_37] : memref<144x128xf32, #tpu.memory_space<vmem>>, vector<16x128xf32>
    %37 = arith.truncf %36 : vector<16x128xf32> to vector<16x128xbf16>
    %c1_38 = arith.constant 1 : index
    %c0_39 = arith.constant 0 : index
    %c0_40 = arith.constant 0 : index
    %38 = vector.load %arg3[%c1_38, %c0_39, %c0_40] : memref<3x128x128xbf16, #tpu.memory_space<vmem>>, vector<1x128x128xbf16>
    %39 = vector.shape_cast %38 : vector<1x128x128xbf16> to vector<128x128xbf16>
    %cst_41 = arith.constant dense<0.000000e+00> : vector<16x128xf32>
    %40 = tpu.matmul %37, %39, %cst_41 {dimension_numbers = #tpu.dot_dimension_numbers<[1], [0], [0], [1], [0, 0, 1, 1], [], []>} : vector<16x128xbf16>, vector<128x128xbf16>, vector<16x128xf32> -> vector<16x128xf32>
    %c63 = arith.constant 63 : index
    %c0_42 = arith.constant 0 : index
    %41 = vector.load %arg10[%c63, %c0_42] : memref<144x128xf32, #tpu.memory_space<vmem>>, vector<16x128xf32>
    %42 = vector.broadcast %33 : vector<16x1xf32> to vector<16x128xf32>
    %43 = arith.mulf %41, %42 : vector<16x128xf32>
    %44 = arith.truncf %43 : vector<16x128xf32> to vector<16x128xbf16>
    %c0_43 = arith.constant 0 : index
    %c0_44 = arith.constant 0 : index
    %c0_45 = arith.constant 0 : index
    %45 = vector.load %arg3[%c0_43, %c0_44, %c0_45] : memref<3x128x128xbf16, #tpu.memory_space<vmem>>, vector<1x128x128xbf16>
    %46 = vector.shape_cast %45 : vector<1x128x128xbf16> to vector<128x128xbf16>
    %cst_46 = arith.constant dense<0.000000e+00> : vector<16x128xf32>
    %47 = tpu.matmul %44, %46, %cst_46 {dimension_numbers = #tpu.dot_dimension_numbers<[1], [0], [0], [1], [0, 0, 1, 1], [], []>} : vector<16x128xbf16>, vector<128x128xbf16>, vector<16x128xf32> -> vector<16x128xf32>
    %48 = arith.addf %40, %47 : vector<16x128xf32>
    %c65 = arith.constant 65 : index
    %c0_47 = arith.constant 0 : index
    %49 = vector.load %arg10[%c65, %c0_47] : memref<144x128xf32, #tpu.memory_space<vmem>>, vector<16x128xf32>
    %50 = vector.broadcast %35 : vector<16x1xf32> to vector<16x128xf32>
    %51 = arith.mulf %49, %50 : vector<16x128xf32>
    %52 = arith.truncf %51 : vector<16x128xf32> to vector<16x128xbf16>
    %c2_48 = arith.constant 2 : index
    %c0_49 = arith.constant 0 : index
    %c0_50 = arith.constant 0 : index
    %53 = vector.load %arg3[%c2_48, %c0_49, %c0_50] : memref<3x128x128xbf16, #tpu.memory_space<vmem>>, vector<1x128x128xbf16>
    %54 = vector.shape_cast %53 : vector<1x128x128xbf16> to vector<128x128xbf16>
    %cst_51 = arith.constant dense<0.000000e+00> : vector<16x128xf32>
    %55 = tpu.matmul %52, %54, %cst_51 {dimension_numbers = #tpu.dot_dimension_numbers<[1], [0], [0], [1], [0, 0, 1, 1], [], []>} : vector<16x128xbf16>, vector<128x128xbf16>, vector<16x128xf32> -> vector<16x128xf32>
    %56 = arith.addf %48, %55 : vector<16x128xf32>
    %c1_52 = arith.constant 1 : index
    %c0_53 = arith.constant 0 : index
    %c0_54 = arith.constant 0 : index
    %57 = vector.load %arg6[%c1_52, %c0_53, %c0_54] : memref<4x1x128xf32, #tpu.memory_space<vmem>>, vector<1x1x128xf32>
    %58 = vector.shape_cast %57 : vector<1x1x128xf32> to vector<1x128xf32>
    %59 = vector.broadcast %58 : vector<1x128xf32> to vector<16x128xf32>
    %60 = arith.addf %56, %59 : vector<16x128xf32>
    %cst_55 = arith.constant 0.000000e+00 : f32
    %61 = vector.broadcast %cst_55 : f32 to vector<16x128xf32>
    %62 = arith.maximumf %60, %61 : vector<16x128xf32>
    %c64_56 = arith.constant 64 : index
    %c0_57 = arith.constant 0 : index
    %63 = vector.load %arg9[%c64_56, %c0_57] : memref<144x128xf32, #tpu.memory_space<vmem>>, vector<16x128xf32>
    tpu.vector_store %arg9[%c64_56, %c0_57], %62 {strides = array<i32>} : memref<144x128xf32, #tpu.memory_space<vmem>>, vector<16x128xf32>,
    %c64_58 = arith.constant 64 : index
    %c0_59 = arith.constant 0 : index
    %64 = vector.load %arg9[%c64_58, %c0_59] : memref<144x128xf32, #tpu.memory_space<vmem>>, vector<16x128xf32>
    %65 = arith.truncf %64 : vector<16x128xf32> to vector<16x128xbf16>
    %c1_60 = arith.constant 1 : index
    %c0_61 = arith.constant 0 : index
    %c0_62 = arith.constant 0 : index
    %66 = vector.load %arg4[%c1_60, %c0_61, %c0_62] : memref<3x128x128xbf16, #tpu.memory_space<vmem>>, vector<1x128x128xbf16>
    %67 = vector.shape_cast %66 : vector<1x128x128xbf16> to vector<128x128xbf16>
    %cst_63 = arith.constant dense<0.000000e+00> : vector<16x128xf32>
    %68 = tpu.matmul %65, %67, %cst_63 {dimension_numbers = #tpu.dot_dimension_numbers<[1], [0], [0], [1], [0, 0, 1, 1], [], []>} : vector<16x128xbf16>, vector<128x128xbf16>, vector<16x128xf32> -> vector<16x128xf32>
    %c2_64 = arith.constant 2 : index
    %c0_65 = arith.constant 0 : index
    %c0_66 = arith.constant 0 : index
    %69 = vector.load %arg6[%c2_64, %c0_65, %c0_66] : memref<4x1x128xf32, #tpu.memory_space<vmem>>, vector<1x1x128xf32>
    %70 = vector.shape_cast %69 : vector<1x1x128xf32> to vector<1x128xf32>
    %71 = vector.broadcast %70 : vector<1x128xf32> to vector<16x128xf32>
    %72 = arith.addf %68, %71 : vector<16x128xf32>
    %cst_67 = arith.constant 0.000000e+00 : f32
    %73 = vector.broadcast %cst_67 : f32 to vector<16x128xf32>
    %74 = arith.maximumf %72, %73 : vector<16x128xf32>
    %c64_68 = arith.constant 64 : index
    %c0_69 = arith.constant 0 : index
    %75 = vector.load %arg10[%c64_68, %c0_69] : memref<144x128xf32, #tpu.memory_space<vmem>>, vector<16x128xf32>
    tpu.vector_store %arg10[%c64_68, %c0_69], %74 {strides = array<i32>} : memref<144x128xf32, #tpu.memory_space<vmem>>, vector<16x128xf32>,
    %c64_70 = arith.constant 64 : index
    %c0_71 = arith.constant 0 : index
    %76 = vector.load %arg10[%c64_70, %c0_71] : memref<144x128xf32, #tpu.memory_space<vmem>>, vector<16x128xf32>
    %77 = arith.truncf %76 : vector<16x128xf32> to vector<16x128xbf16>
    %c1_72 = arith.constant 1 : index
    %c0_73 = arith.constant 0 : index
    %c0_74 = arith.constant 0 : index
    %78 = vector.load %arg5[%c1_72, %c0_73, %c0_74] : memref<3x128x128xbf16, #tpu.memory_space<vmem>>, vector<1x128x128xbf16>
    %79 = vector.shape_cast %78 : vector<1x128x128xbf16> to vector<128x128xbf16>
    %cst_75 = arith.constant dense<0.000000e+00> : vector<16x128xf32>
    %80 = tpu.matmul %77, %79, %cst_75 {dimension_numbers = #tpu.dot_dimension_numbers<[1], [0], [0], [1], [0, 0, 1, 1], [], []>} : vector<16x128xbf16>, vector<128x128xbf16>, vector<16x128xf32> -> vector<16x128xf32>
    %c3 = arith.constant 3 : index
    %c0_76 = arith.constant 0 : index
    %c0_77 = arith.constant 0 : index
    %81 = vector.load %arg6[%c3, %c0_76, %c0_77] : memref<4x1x128xf32, #tpu.memory_space<vmem>>, vector<1x1x128xf32>
    %82 = vector.shape_cast %81 : vector<1x1x128xf32> to vector<1x128xf32>
    %83 = vector.broadcast %82 : vector<1x128xf32> to vector<16x128xf32>
    %84 = arith.addf %80, %83 : vector<16x128xf32>
    %c0_78 = arith.constant 0 : index
    %c0_79 = arith.constant 0 : index
    %c0_80 = arith.constant 0 : index
    %85 = vector.load %arg1[%c0_78, %c0_79, %c0_80] : memref<1x16x128xf32, #tpu.memory_space<vmem>>, vector<1x16x128xf32>
    %86 = vector.shape_cast %85 : vector<1x16x128xf32> to vector<16x128xf32>
    %87 = arith.addf %84, %86 : vector<16x128xf32>
    %cst_81 = arith.constant 0.000000e+00 : f32
    %88 = vector.broadcast %cst_81 : f32 to vector<16x128xf32>
    %89 = arith.maximumf %87, %88 : vector<16x128xf32>
    %c0_82 = arith.constant 0 : index
    %c0_83 = arith.constant 0 : index
    %c0_84 = arith.constant 0 : index
    %90 = vector.load %arg8[%c0_82, %c0_83, %c0_84] : memref<1x16x128xf32, #tpu.memory_space<vmem>>, vector<1x16x128xf32>
    %91 = vector.shape_cast %90 : vector<1x16x128xf32> to vector<16x128xf32>
    %92 = vector.shape_cast %89 : vector<16x128xf32> to vector<1x16x128xf32>
    tpu.vector_store %arg8[%c0_82, %c0_83, %c0_84], %92 {strides = array<i32>} : memref<1x16x128xf32, #tpu.memory_space<vmem>>, vector<1x16x128xf32>,
    return
  }
  func.func @transform_0(%arg0: i32) -> (i32, i32, i32) {
    %c0_i32 = arith.constant 0 : i32
    %c0_i32_0 = arith.constant 0 : i32
    %c0_i32_1 = arith.constant 0 : i32
    return %arg0, %c0_i32, %c0_i32_0 : i32, i32, i32
  }
  func.func @transform_1(%arg0: i32) -> (i32, i32, i32) {
    %c0_i32 = arith.constant 0 : i32
    %c0_i32_0 = arith.constant 0 : i32
    %c0_i32_1 = arith.constant 0 : i32
    %c0_i32_2 = arith.constant 0 : i32
    return %c0_i32, %c0_i32_0, %c0_i32_1 : i32, i32, i32
  }
  func.func @transform_2(%arg0: i32) -> (i32, i32, i32) {
    %c0_i32 = arith.constant 0 : i32
    %c0_i32_0 = arith.constant 0 : i32
    %c0_i32_1 = arith.constant 0 : i32
    %c0_i32_2 = arith.constant 0 : i32
    return %c0_i32, %c0_i32_0, %c0_i32_1 : i32, i32, i32
  }
  func.func @transform_3(%arg0: i32) -> (i32, i32, i32) {
    %c0_i32 = arith.constant 0 : i32
    %c0_i32_0 = arith.constant 0 : i32
    %c0_i32_1 = arith.constant 0 : i32
    %c0_i32_2 = arith.constant 0 : i32
    return %c0_i32, %c0_i32_0, %c0_i32_1 : i32, i32, i32
  }
  func.func @transform_4(%arg0: i32) -> (i32, i32, i32) {
    %c0_i32 = arith.constant 0 : i32
    %c0_i32_0 = arith.constant 0 : i32
    %c0_i32_1 = arith.constant 0 : i32
    %c0_i32_2 = arith.constant 0 : i32
    return %c0_i32, %c0_i32_0, %c0_i32_1 : i32, i32, i32
  }
  func.func @transform_5(%arg0: i32) -> (i32, i32, i32) {
    %c0_i32 = arith.constant 0 : i32
    %c0_i32_0 = arith.constant 0 : i32
    %c0_i32_1 = arith.constant 0 : i32
    %c0_i32_2 = arith.constant 0 : i32
    return %c0_i32, %c0_i32_0, %c0_i32_1 : i32, i32, i32
  }
  func.func @transform_6(%arg0: i32) -> (i32, i32, i32) {
    %c0_i32 = arith.constant 0 : i32
    %c0_i32_0 = arith.constant 0 : i32
    %c0_i32_1 = arith.constant 0 : i32
    %c0_i32_2 = arith.constant 0 : i32
    return %c0_i32, %c0_i32_0, %c0_i32_1 : i32, i32, i32
  }
  func.func @transform_7(%arg0: i32) -> (i32, i32, i32) {
    %c0_i32 = arith.constant 0 : i32
    %c0_i32_0 = arith.constant 0 : i32
    %c0_i32_1 = arith.constant 0 : i32
    return %arg0, %c0_i32, %c0_i32_0 : i32, i32, i32
  }
}

module attributes {stable_mosaic.version = 11 : i64} {
  func.func @_nb1d_kernel(%arg0: i32, %arg1: memref<1x16x128xf32, #tpu.memory_space<vmem>>, %arg2: memref<3x128x128xbf16, #tpu.memory_space<vmem>>, %arg3: memref<3x128x128xbf16, #tpu.memory_space<vmem>>, %arg4: memref<3x128x128xbf16, #tpu.memory_space<vmem>>, %arg5: memref<3x128x128xbf16, #tpu.memory_space<vmem>>, %arg6: memref<4x1x128xf32, #tpu.memory_space<vmem>>, %arg7: memref<4x16x1xf32, #tpu.memory_space<vmem>>, %arg8: memref<1x16x128xf32, #tpu.memory_space<vmem>>, %arg9: memref<144x128xf32, #tpu.memory_space<vmem>>, %arg10: memref<144x128xf32, #tpu.memory_space<vmem>>) attributes {dimension_semantics = [#tpu.dimension_semantics<parallel>], iteration_bounds = array<i64: 2>, scalar_prefetch = 0 : i64, scratch_operands = 2 : i64, tpu.core_type = #tpu.core_type<tc>, window_params = [{transform_indices = @transform_0, window_bounds = array<i64: 1, 16, 128>}, {pipeline_mode = #tpu.pipeline_mode<synchronous>, transform_indices = @transform_1, window_bounds = array<i64: 3, 128, 128>}, {pipeline_mode = #tpu.pipeline_mode<synchronous>, transform_indices = @transform_2, window_bounds = array<i64: 3, 128, 128>}, {pipeline_mode = #tpu.pipeline_mode<synchronous>, transform_indices = @transform_3, window_bounds = array<i64: 3, 128, 128>}, {pipeline_mode = #tpu.pipeline_mode<synchronous>, transform_indices = @transform_4, window_bounds = array<i64: 3, 128, 128>}, {pipeline_mode = #tpu.pipeline_mode<synchronous>, transform_indices = @transform_5, window_bounds = array<i64: 4, 1, 128>}, {pipeline_mode = #tpu.pipeline_mode<synchronous>, transform_indices = @transform_6, window_bounds = array<i64: 4, 16, 1>}, {transform_indices = @transform_7, window_bounds = array<i64: 1, 16, 128>}]} {
    %cst = arith.constant 0.000000e+00 : f32
    %0 = vector.broadcast %cst : f32 to vector<64x128xf32>
    %c0 = arith.constant 0 : index
    %c0_0 = arith.constant 0 : index
    %1 = vector.load %arg9[%c0, %c0_0] : memref<144x128xf32, #tpu.memory_space<vmem>>, vector<64x128xf32>
    tpu.vector_store %arg9[%c0, %c0_0], %0 {strides = array<i32>} : memref<144x128xf32, #tpu.memory_space<vmem>>, vector<64x128xf32>,
    %c80 = arith.constant 80 : index
    %c0_1 = arith.constant 0 : index
    %2 = vector.load %arg9[%c80, %c0_1] : memref<144x128xf32, #tpu.memory_space<vmem>>, vector<64x128xf32>
    tpu.vector_store %arg9[%c80, %c0_1], %0 {strides = array<i32>} : memref<144x128xf32, #tpu.memory_space<vmem>>, vector<64x128xf32>,
    %c0_2 = arith.constant 0 : index
    %c0_3 = arith.constant 0 : index
    %3 = vector.load %arg10[%c0_2, %c0_3] : memref<144x128xf32, #tpu.memory_space<vmem>>, vector<64x128xf32>
    tpu.vector_store %arg10[%c0_2, %c0_3], %0 {strides = array<i32>} : memref<144x128xf32, #tpu.memory_space<vmem>>, vector<64x128xf32>,
    %c80_4 = arith.constant 80 : index
    %c0_5 = arith.constant 0 : index
    %4 = vector.load %arg10[%c80_4, %c0_5] : memref<144x128xf32, #tpu.memory_space<vmem>>, vector<64x128xf32>
    tpu.vector_store %arg10[%c80_4, %c0_5], %0 {strides = array<i32>} : memref<144x128xf32, #tpu.memory_space<vmem>>, vector<64x128xf32>,
    %c0_6 = arith.constant 0 : index
    %c0_7 = arith.constant 0 : index
    %c0_8 = arith.constant 0 : index
    %5 = vector.load %arg1[%c0_6, %c0_7, %c0_8] : memref<1x16x128xf32, #tpu.memory_space<vmem>>, vector<1x16x128xf32>
    %6 = vector.shape_cast %5 : vector<1x16x128xf32> to vector<16x128xf32>
    %c64 = arith.constant 64 : index
    %c0_9 = arith.constant 0 : index
    %7 = vector.load %arg9[%c64, %c0_9] : memref<144x128xf32, #tpu.memory_space<vmem>>, vector<16x128xf32>
    tpu.vector_store %arg9[%c64, %c0_9], %6 {strides = array<i32>} : memref<144x128xf32, #tpu.memory_space<vmem>>, vector<16x128xf32>,
    %c64_10 = arith.constant 64 : index
    %c0_11 = arith.constant 0 : index
    %8 = vector.load %arg9[%c64_10, %c0_11] : memref<144x128xf32, #tpu.memory_space<vmem>>, vector<16x128xf32>
    %9 = arith.truncf %8 : vector<16x128xf32> to vector<16x128xbf16>
    %c1 = arith.constant 1 : index
    %c0_12 = arith.constant 0 : index
    %c0_13 = arith.constant 0 : index
    %10 = vector.load %arg2[%c1, %c0_12, %c0_13] : memref<3x128x128xbf16, #tpu.memory_space<vmem>>, vector<1x128x128xbf16>
    %11 = vector.shape_cast %10 : vector<1x128x128xbf16> to vector<128x128xbf16>
    %cst_14 = arith.constant dense<0.000000e+00> : vector<16x128xf32>
    %12 = tpu.matmul %9, %11, %cst_14 {dimension_numbers = #tpu.dot_dimension_numbers<[1], [0], [0], [1], [0, 0, 1, 1], [], []>} : vector<16x128xbf16>, vector<128x128xbf16>, vector<16x128xf32> -> vector<16x128xf32>
    %c60 = arith.constant 60 : index
    %c0_15 = arith.constant 0 : index
    %13 = vector.load %arg9[%c60, %c0_15] : memref<144x128xf32, #tpu.memory_space<vmem>>, vector<16x128xf32>
    %14 = arith.truncf %13 : vector<16x128xf32> to vector<16x128xbf16>
    %c0_16 = arith.constant 0 : index
    %c0_17 = arith.constant 0 : index
    %c0_18 = arith.constant 0 : index
    %15 = vector.load %arg2[%c0_16, %c0_17, %c0_18] : memref<3x128x128xbf16, #tpu.memory_space<vmem>>, vector<1x128x128xbf16>
    %16 = vector.shape_cast %15 : vector<1x128x128xbf16> to vector<128x128xbf16>
    %cst_19 = arith.constant dense<0.000000e+00> : vector<16x128xf32>
    %17 = tpu.matmul %14, %16, %cst_19 {dimension_numbers = #tpu.dot_dimension_numbers<[1], [0], [0], [1], [0, 0, 1, 1], [], []>} : vector<16x128xbf16>, vector<128x128xbf16>, vector<16x128xf32> -> vector<16x128xf32>
    %18 = arith.addf %12, %17 : vector<16x128xf32>
    %c68 = arith.constant 68 : index
    %c0_20 = arith.constant 0 : index
    %19 = vector.load %arg9[%c68, %c0_20] : memref<144x128xf32, #tpu.memory_space<vmem>>, vector<16x128xf32>
    %20 = arith.truncf %19 : vector<16x128xf32> to vector<16x128xbf16>
    %c2 = arith.constant 2 : index
    %c0_21 = arith.constant 0 : index
    %c0_22 = arith.constant 0 : index
    %21 = vector.load %arg2[%c2, %c0_21, %c0_22] : memref<3x128x128xbf16, #tpu.memory_space<vmem>>, vector<1x128x128xbf16>
    %22 = vector.shape_cast %21 : vector<1x128x128xbf16> to vector<128x128xbf16>
    %cst_23 = arith.constant dense<0.000000e+00> : vector<16x128xf32>
    %23 = tpu.matmul %20, %22, %cst_23 {dimension_numbers = #tpu.dot_dimension_numbers<[1], [0], [0], [1], [0, 0, 1, 1], [], []>} : vector<16x128xbf16>, vector<128x128xbf16>, vector<16x128xf32> -> vector<16x128xf32>
    %24 = arith.addf %18, %23 : vector<16x128xf32>
    %c0_24 = arith.constant 0 : index
    %c0_25 = arith.constant 0 : index
    %c0_26 = arith.constant 0 : index
    %25 = vector.load %arg6[%c0_24, %c0_25, %c0_26] : memref<4x1x128xf32, #tpu.memory_space<vmem>>, vector<1x1x128xf32>
    %26 = vector.shape_cast %25 : vector<1x1x128xf32> to vector<1x128xf32>
    %27 = vector.broadcast %26 : vector<1x128xf32> to vector<16x128xf32>
    %28 = arith.addf %24, %27 : vector<16x128xf32>
    %cst_27 = arith.constant 0.000000e+00 : f32
    %29 = vector.broadcast %cst_27 : f32 to vector<16x128xf32>
    %30 = arith.maximumf %28, %29 : vector<16x128xf32>
    %c64_28 = arith.constant 64 : index
    %c0_29 = arith.constant 0 : index
    %31 = vector.load %arg10[%c64_28, %c0_29] : memref<144x128xf32, #tpu.memory_space<vmem>>, vector<16x128xf32>
    tpu.vector_store %arg10[%c64_28, %c0_29], %30 {strides = array<i32>} : memref<144x128xf32, #tpu.memory_space<vmem>>, vector<16x128xf32>,
    %c0_30 = arith.constant 0 : index
    %c0_31 = arith.constant 0 : index
    %c0_32 = arith.constant 0 : index
    %32 = vector.load %arg7[%c0_30, %c0_31, %c0_32] : memref<4x16x1xf32, #tpu.memory_space<vmem>>, vector<1x16x1xf32>
    %33 = vector.shape_cast %32 : vector<1x16x1xf32> to vector<16x1xf32>
    %c1_33 = arith.constant 1 : index
    %c0_34 = arith.constant 0 : index
    %c0_35 = arith.constant 0 : index
    %34 = vector.load %arg7[%c1_33, %c0_34, %c0_35] : memref<4x16x1xf32, #tpu.memory_space<vmem>>, vector<1x16x1xf32>
    %35 = vector.shape_cast %34 : vector<1x16x1xf32> to vector<16x1xf32>
    %c64_36 = arith.constant 64 : index
    %c0_37 = arith.constant 0 : index
    %36 = vector.load %arg10[%c64_36, %c0_37] : memref<144x128xf32, #tpu.memory_space<vmem>>, vector<16x128xf32>
    %37 = arith.truncf %36 : vector<16x128xf32> to vector<16x128xbf16>
    %c1_38 = arith.constant 1 : index
    %c0_39 = arith.constant 0 : index
    %c0_40 = arith.constant 0 : index
    %38 = vector.load %arg3[%c1_38, %c0_39, %c0_40] : memref<3x128x128xbf16, #tpu.memory_space<vmem>>, vector<1x128x128xbf16>
    %39 = vector.shape_cast %38 : vector<1x128x128xbf16> to vector<128x128xbf16>
    %cst_41 = arith.constant dense<0.000000e+00> : vector<16x128xf32>
    %40 = tpu.matmul %37, %39, %cst_41 {dimension_numbers = #tpu.dot_dimension_numbers<[1], [0], [0], [1], [0, 0, 1, 1], [], []>} : vector<16x128xbf16>, vector<128x128xbf16>, vector<16x128xf32> -> vector<16x128xf32>
    %c63 = arith.constant 63 : index
    %c0_42 = arith.constant 0 : index
    %41 = vector.load %arg10[%c63, %c0_42] : memref<144x128xf32, #tpu.memory_space<vmem>>, vector<16x128xf32>
    %42 = vector.broadcast %33 : vector<16x1xf32> to vector<16x128xf32>
    %43 = arith.mulf %41, %42 : vector<16x128xf32>
    %44 = arith.truncf %43 : vector<16x128xf32> to vector<16x128xbf16>
    %c0_43 = arith.constant 0 : index
    %c0_44 = arith.constant 0 : index
    %c0_45 = arith.constant 0 : index
    %45 = vector.load %arg3[%c0_43, %c0_44, %c0_45] : memref<3x128x128xbf16, #tpu.memory_space<vmem>>, vector<1x128x128xbf16>
    %46 = vector.shape_cast %45 : vector<1x128x128xbf16> to vector<128x128xbf16>
    %cst_46 = arith.constant dense<0.000000e+00> : vector<16x128xf32>
    %47 = tpu.matmul %44, %46, %cst_46 {dimension_numbers = #tpu.dot_dimension_numbers<[1], [0], [0], [1], [0, 0, 1, 1], [], []>} : vector<16x128xbf16>, vector<128x128xbf16>, vector<16x128xf32> -> vector<16x128xf32>
    %48 = arith.addf %40, %47 : vector<16x128xf32>
    %c65 = arith.constant 65 : index
    %c0_47 = arith.constant 0 : index
    %49 = vector.load %arg10[%c65, %c0_47] : memref<144x128xf32, #tpu.memory_space<vmem>>, vector<16x128xf32>
    %50 = vector.broadcast %35 : vector<16x1xf32> to vector<16x128xf32>
    %51 = arith.mulf %49, %50 : vector<16x128xf32>
    %52 = arith.truncf %51 : vector<16x128xf32> to vector<16x128xbf16>
    %c2_48 = arith.constant 2 : index
    %c0_49 = arith.constant 0 : index
    %c0_50 = arith.constant 0 : index
    %53 = vector.load %arg3[%c2_48, %c0_49, %c0_50] : memref<3x128x128xbf16, #tpu.memory_space<vmem>>, vector<1x128x128xbf16>
    %54 = vector.shape_cast %53 : vector<1x128x128xbf16> to vector<128x128xbf16>
    %cst_51 = arith.constant dense<0.000000e+00> : vector<16x128xf32>
    %55 = tpu.matmul %52, %54, %cst_51 {dimension_numbers = #tpu.dot_dimension_numbers<[1], [0], [0], [1], [0, 0, 1, 1], [], []>} : vector<16x128xbf16>, vector<128x128xbf16>, vector<16x128xf32> -> vector<16x128xf32>
    %56 = arith.addf %48, %55 : vector<16x128xf32>
    %c1_52 = arith.constant 1 : index
    %c0_53 = arith.constant 0 : index
    %c0_54 = arith.constant 0 : index
    %57 = vector.load %arg6[%c1_52, %c0_53, %c0_54] : memref<4x1x128xf32, #tpu.memory_space<vmem>>, vector<1x1x128xf32>
    %58 = vector.shape_cast %57 : vector<1x1x128xf32> to vector<1x128xf32>
    %59 = vector.broadcast %58 : vector<1x128xf32> to vector<16x128xf32>
    %60 = arith.addf %56, %59 : vector<16x128xf32>
    %cst_55 = arith.constant 0.000000e+00 : f32
    %61 = vector.broadcast %cst_55 : f32 to vector<16x128xf32>
    %62 = arith.maximumf %60, %61 : vector<16x128xf32>
    %c64_56 = arith.constant 64 : index
    %c0_57 = arith.constant 0 : index
    %63 = vector.load %arg9[%c64_56, %c0_57] : memref<144x128xf32, #tpu.memory_space<vmem>>, vector<16x128xf32>
    tpu.vector_store %arg9[%c64_56, %c0_57], %62 {strides = array<i32>} : memref<144x128xf32, #tpu.memory_space<vmem>>, vector<16x128xf32>,
    %c64_58 = arith.constant 64 : index
    %c0_59 = arith.constant 0 : index
    %64 = vector.load %arg9[%c64_58, %c0_59] : memref<144x128xf32, #tpu.memory_space<vmem>>, vector<16x128xf32>
    %65 = arith.truncf %64 : vector<16x128xf32> to vector<16x128xbf16>
    %c1_60 = arith.constant 1 : index
    %c0_61 = arith.constant 0 : index
    %c0_62 = arith.constant 0 : index
    %66 = vector.load %arg4[%c1_60, %c0_61, %c0_62] : memref<3x128x128xbf16, #tpu.memory_space<vmem>>, vector<1x128x128xbf16>
    %67 = vector.shape_cast %66 : vector<1x128x128xbf16> to vector<128x128xbf16>
    %cst_63 = arith.constant dense<0.000000e+00> : vector<16x128xf32>
    %68 = tpu.matmul %65, %67, %cst_63 {dimension_numbers = #tpu.dot_dimension_numbers<[1], [0], [0], [1], [0, 0, 1, 1], [], []>} : vector<16x128xbf16>, vector<128x128xbf16>, vector<16x128xf32> -> vector<16x128xf32>
    %c2_64 = arith.constant 2 : index
    %c0_65 = arith.constant 0 : index
    %c0_66 = arith.constant 0 : index
    %69 = vector.load %arg6[%c2_64, %c0_65, %c0_66] : memref<4x1x128xf32, #tpu.memory_space<vmem>>, vector<1x1x128xf32>
    %70 = vector.shape_cast %69 : vector<1x1x128xf32> to vector<1x128xf32>
    %71 = vector.broadcast %70 : vector<1x128xf32> to vector<16x128xf32>
    %72 = arith.addf %68, %71 : vector<16x128xf32>
    %cst_67 = arith.constant 0.000000e+00 : f32
    %73 = vector.broadcast %cst_67 : f32 to vector<16x128xf32>
    %74 = arith.maximumf %72, %73 : vector<16x128xf32>
    %c64_68 = arith.constant 64 : index
    %c0_69 = arith.constant 0 : index
    %75 = vector.load %arg10[%c64_68, %c0_69] : memref<144x128xf32, #tpu.memory_space<vmem>>, vector<16x128xf32>
    tpu.vector_store %arg10[%c64_68, %c0_69], %74 {strides = array<i32>} : memref<144x128xf32, #tpu.memory_space<vmem>>, vector<16x128xf32>,
    %c64_70 = arith.constant 64 : index
    %c0_71 = arith.constant 0 : index
    %76 = vector.load %arg10[%c64_70, %c0_71] : memref<144x128xf32, #tpu.memory_space<vmem>>, vector<16x128xf32>
    %77 = arith.truncf %76 : vector<16x128xf32> to vector<16x128xbf16>
    %c1_72 = arith.constant 1 : index
    %c0_73 = arith.constant 0 : index
    %c0_74 = arith.constant 0 : index
    %78 = vector.load %arg5[%c1_72, %c0_73, %c0_74] : memref<3x128x128xbf16, #tpu.memory_space<vmem>>, vector<1x128x128xbf16>
    %79 = vector.shape_cast %78 : vector<1x128x128xbf16> to vector<128x128xbf16>
    %cst_75 = arith.constant dense<0.000000e+00> : vector<16x128xf32>
    %80 = tpu.matmul %77, %79, %cst_75 {dimension_numbers = #tpu.dot_dimension_numbers<[1], [0], [0], [1], [0, 0, 1, 1], [], []>} : vector<16x128xbf16>, vector<128x128xbf16>, vector<16x128xf32> -> vector<16x128xf32>
    %c3 = arith.constant 3 : index
    %c0_76 = arith.constant 0 : index
    %c0_77 = arith.constant 0 : index
    %81 = vector.load %arg6[%c3, %c0_76, %c0_77] : memref<4x1x128xf32, #tpu.memory_space<vmem>>, vector<1x1x128xf32>
    %82 = vector.shape_cast %81 : vector<1x1x128xf32> to vector<1x128xf32>
    %83 = vector.broadcast %82 : vector<1x128xf32> to vector<16x128xf32>
    %84 = arith.addf %80, %83 : vector<16x128xf32>
    %c0_78 = arith.constant 0 : index
    %c0_79 = arith.constant 0 : index
    %c0_80 = arith.constant 0 : index
    %85 = vector.load %arg1[%c0_78, %c0_79, %c0_80] : memref<1x16x128xf32, #tpu.memory_space<vmem>>, vector<1x16x128xf32>
    %86 = vector.shape_cast %85 : vector<1x16x128xf32> to vector<16x128xf32>
    %87 = arith.addf %84, %86 : vector<16x128xf32>
    %cst_81 = arith.constant 0.000000e+00 : f32
    %88 = vector.broadcast %cst_81 : f32 to vector<16x128xf32>
    %89 = arith.maximumf %87, %88 : vector<16x128xf32>
    %c0_82 = arith.constant 0 : index
    %c0_83 = arith.constant 0 : index
    %c0_84 = arith.constant 0 : index
    %90 = vector.load %arg8[%c0_82, %c0_83, %c0_84] : memref<1x16x128xf32, #tpu.memory_space<vmem>>, vector<1x16x128xf32>
    %91 = vector.shape_cast %90 : vector<1x16x128xf32> to vector<16x128xf32>
    %92 = vector.shape_cast %89 : vector<16x128xf32> to vector<1x16x128xf32>
    tpu.vector_store %arg8[%c0_82, %c0_83, %c0_84], %92 {strides = array<i32>} : memref<1x16x128xf32, #tpu.memory_space<vmem>>, vector<1x16x128xf32>,
    return
  }
  func.func @transform_0(%arg0: i32) -> (i32, i32, i32) {
    %c0_i32 = arith.constant 0 : i32
    %c0_i32_0 = arith.constant 0 : i32
    %c0_i32_1 = arith.constant 0 : i32
    return %arg0, %c0_i32, %c0_i32_0 : i32, i32, i32
  }
  func.func @transform_1(%arg0: i32) -> (i32, i32, i32) {
    %c0_i32 = arith.constant 0 : i32
    %c0_i32_0 = arith.constant 0 : i32
    %c0_i32_1 = arith.constant 0 : i32
    %c0_i32_2 = arith.constant 0 : i32
    return %c0_i32, %c0_i32_0, %c0_i32_1 : i32, i32, i32
  }
  func.func @transform_2(%arg0: i32) -> (i32, i32, i32) {
    %c0_i32 = arith.constant 0 : i32
    %c0_i32_0 = arith.constant 0 : i32
    %c0_i32_1 = arith.constant 0 : i32
    %c0_i32_2 = arith.constant 0 : i32
    return %c0_i32, %c0_i32_0, %c0_i32_1 : i32, i32, i32
  }
  func.func @transform_3(%arg0: i32) -> (i32, i32, i32) {
    %c0_i32 = arith.constant 0 : i32
    %c0_i32_0 = arith.constant 0 : i32
    %c0_i32_1 = arith.constant 0 : i32
    %c0_i32_2 = arith.constant 0 : i32
    return %c0_i32, %c0_i32_0, %c0_i32_1 : i32, i32, i32
  }
  func.func @transform_4(%arg0: i32) -> (i32, i32, i32) {
    %c0_i32 = arith.constant 0 : i32
    %c0_i32_0 = arith.constant 0 : i32
    %c0_i32_1 = arith.constant 0 : i32
    %c0_i32_2 = arith.constant 0 : i32
    return %c0_i32, %c0_i32_0, %c0_i32_1 : i32, i32, i32
  }
  func.func @transform_5(%arg0: i32) -> (i32, i32, i32) {
    %c0_i32 = arith.constant 0 : i32
    %c0_i32_0 = arith.constant 0 : i32
    %c0_i32_1 = arith.constant 0 : i32
    %c0_i32_2 = arith.constant 0 : i32
    return %c0_i32, %c0_i32_0, %c0_i32_1 : i32, i32, i32
  }
  func.func @transform_6(%arg0: i32) -> (i32, i32, i32) {
    %c0_i32 = arith.constant 0 : i32
    %c0_i32_0 = arith.constant 0 : i32
    %c0_i32_1 = arith.constant 0 : i32
    %c0_i32_2 = arith.constant 0 : i32
    return %c0_i32, %c0_i32_0, %c0_i32_1 : i32, i32, i32
  }
  func.func @transform_7(%arg0: i32) -> (i32, i32, i32) {
    %c0_i32 = arith.constant 0 : i32
    %c0_i32_0 = arith.constant 0 : i32
    %c0_i32_1 = arith.constant 0 : i32
    return %arg0, %c0_i32, %c0_i32_0 : i32, i32, i32
  }
}

</mosaic_0001>

<bundles_post_ra>
// kernel: _lambda_.15
= control target key start
LH: loop header
LB: loop body
LE: loop exit
PB: predicated region body
PF: predicated region fallthrough
CT: control target
= control target key end

     0   :  { %s2171_s25 = smov 0   ;;  %s2612_s0 = inlined_call_operand.vmem [shape: f32[128,16], index: 0, kind: input, shape index: {}]   ;;  %s2613_s1 = inlined_call_operand.vmem [shape: f32[128,16], index: 1, kind: input, shape index: {}]   ;;  %s2614_s2 = inlined_call_operand.vmem [shape: f32[128,16], index: 2, kind: input, shape index: {}]   ;;  %s2615_s3 = inlined_call_operand.vmem [shape: f32[128,16], index: 3, kind: input, shape index: {}]   ;;  %s2616_s4 = inlined_call_operand.vmem [shape: f32[128,16], index: 4, kind: input, shape index: {}]   ;;  %s2617_s5 = inlined_call_operand.vmem [shape: f32[128,16], index: 5, kind: input, shape index: {}]   ;;  %s2618_s6 = inlined_call_operand.vmem [shape: f32[128,16], index: 6, kind: input, shape index: {}]   ;;  %s2619_s7 = inlined_call_operand.vmem [shape: f32[128,16], index: 7, kind: input, shape index: {}]   ;;  %s2620_s8 = inlined_call_operand.vmem [shape: f32[128,16], index: 8, kind: input, shape index: {}]   ;;  %s2621_s9 = inlined_call_operand.vmem [shape: bf16[9,16,48], index: 9, kind: input, shape index: {}]   ;;  %s2622_s10 = inlined_call_operand.vmem [shape: f32[1,48], index: 10, kind: input, shape index: {}]   ;;  %s2623_s11 = inlined_call_operand.vmem [shape: f32[1,16], index: 11, kind: input, shape index: {}]   ;;  %s2624_s12 = inlined_call_operand.vmem [shape: f32[1,16], index: 12, kind: input, shape index: {}]   ;;  %s2625_s13 = inlined_call_operand.vmem [shape: f32[128,64], index: 13, kind: output, shape index: {}]  }
   0x1 LB: > { %s1846_s26 = sadd.s32 4294967295, %s2098_s25   ;;  %p1850_p0 = scmp.ge.s32.totalorder %s2098_s25, 1  ;;  %s2098_s25 = sphi %s2171_s25, %s23_s25  }
   0x2   : > { %p476_p1 = scmp.lt.s32.totalorder %s2098_s25, 3 }
   0x4   : > { %p477_p2 = pnand %p1850_p0, %p476_p1 }
   0x5   : > { %s1851_s29 = sshll.u32 (!%p477_p2), %s1846_s26, 3 }
   0x6   : > { %480 = sbr.rel (%p477_p2) target bundleno = 292 (0x124), region = 72  ;;  %p561_p3 = scmp.lt.s32.totalorder (!%p477_p2), %s1851_s29, 15 }
   0xb   : > { %v2083_v0 = vld [vmem:[%s2621_s9 + $0x8] sm:$0xff]   ;;  %v2084_v1 = vld [vmem:[%s2621_s9] sm:$0xff]   ;;  %s2627_s29 = smov (!%p561_p3, %s1851_s29), 15  ;;  %v2085_v2 = vld [vmem:[%s2621_s9 + $0x10] sm:$0xff]   ;;  %vm656_vm0 = vcmask 130048   ;;  %vm1676_vm1 = vcmask 392192  }
   0xc   : > { %2072 = vmatprep.subr.bf16.mxu1 %v2083_v0  ;;  %1982 = vmatprep.subr.bf16.mxu0 %v2083_v0  ;;  %s2188_s17 = sshll.u32 %s2627_s29, 3  ;;  %v2086_v10 = vld [vmem:[%s2621_s9 + $0x18] sm:$0xff]   ;;  %v2087_v22 = vld [vmem:[%s2621_s9 + $0x20] sm:$0xff]   ;;  %v2245_v35 = vld [vmem:[%s2621_s9 + $0x28] sm:$0xff]   ;;  %vm1685_vm2 = vcmask 523264  }
   0xd   : > { %2073 = vmatpush3.bf16.msra.mxu1 %v2083_v0  ;;  %1983 = vmatpush3.bf16.msra.mxu0 %v2083_v0  ;;  %s570_s20 = scalar_lea.vmem %s2613_s1, %s2188_s17  ;;  %s2198_s23 = scalar_lea.vmem %s2612_s0, %s2188_s17  ;;  %v2252_v37 = vld [vmem:[%s2621_s9 + $0x30] sm:$0xff]  }
   0xe   : > { %1992 = vmatprep.subr.bf16.mxu1 %v2084_v1  ;;  %2002 = vmatprep.subr.bf16.mxu0 %v2085_v2  ;;  %v635_v3 = vld [vmem:[%s570_s20] sm:$0xff]  ;;  %v636_v4 = vld [vmem:[%s570_s20 + $0x8] sm:$0xff]  ;;  %s2204_s27 = scalar_lea.vmem %s2614_s2, %s2188_s17  ;;  %v637_v8 = vld [vmem:[%s570_s20 + $0x10] sm:$0xff]  ;;  %s2234_s18 = scalar_lea.vmem %s2615_s3, %s2188_s17 }
   0xf   : > { %v639_v5 = vld [vmem:[%s570_s20 + $0x20] sm:$0xff]  ;;  %v643_v6 = vpack.c.bf16 %v636_v4, %v635_v3  ;;  %v640_v7 = vld [vmem:[%s570_s20 + $0x28] sm:$0xff]  ;;  %v638_v9 = vld [vmem:[%s570_s20 + $0x18] sm:$0xff]  ;;  %s2240_s21 = scalar_lea.vmem %s2616_s4, %s2188_s17  ;;  %s2272_s29 = scalar_lea.vmem %s2617_s5, %s2188_s17 }
  0x10   : > { %v645_v11 = vpack.c.bf16 %v640_v7, %v639_v5  ;;  %v644_v12 = vpack.c.bf16 %v638_v9, %v637_v8  ;;  %v641_v13 = vld [vmem:[%s570_s20 + $0x30] sm:$0xff]  ;;  %v642_v14 = vld [vmem:[%s570_s20 + $0x38] sm:$0xff]  ;;  %v621_v15 = vld [vmem:[%s2198_s23] sm:$0xff]  ;;  %s2288_s15 = scalar_lea.vmem %s2619_s7, %s2188_s17  ;;  %s2294_s20 = scalar_lea.vmem %s2620_s8, %s2188_s17 }
  0x11   : > { %1984 = vmatprep.mubr.msk.bf16.mxu0 %vm656_vm0, %v643_v6  ;;  %v646_v16 = vpack.c.bf16 %v642_v14, %v641_v13  ;;  %v622_v17 = vld [vmem:[%s2198_s23 + $0x8] sm:$0xff]  ;;  %v817_v18 = vld [vmem:[%s2204_s27] sm:$0xff]  ;;  %v819_v23 = vld [vmem:[%s2204_s27 + $0x10] sm:$0xff]  ;;  %s2572_s22 = scalar_lea.vmem %s2625_s13, %s2188_s17 }
  0x12   : > { %v818_v19 = vld [vmem:[%s2204_s27 + $0x8] sm:$0xff]  ;;  %1988 = vmatprep.mubr.msk.bf16.mxu1 %vm656_vm0, %v645_v11  ;;  %1985 = vmatmul.mubr.msk.bf16.vlgmr.msra.gmra.mxu0 %vm656_vm0, %v644_v12  ;;  %v629_v20 = vpack.c.bf16 %v622_v17, %v621_v15  ;;  %v820_v24 = vld [vmem:[%s2204_s27 + $0x18] sm:$0xff]  ;;  %v623_v25 = vld [vmem:[%s2198_s23 + $0x10] sm:$0xff] }
  0x13   : > { %v825_v21 = vpack.c.bf16 %v818_v19, %v817_v18  ;;  %1989 = vmatmul.mubr.msk.bf16.vlgmr.msra.gmra.mxu1 %vm656_vm0, %v646_v16  ;;  %2003 = vmatpush3.bf16.msra.mxu0 %v2085_v2  ;;  %v624_v26 = vld [vmem:[%s2198_s23 + $0x18] sm:$0xff]  ;;  %v625_v27 = vld [vmem:[%s2198_s23 + $0x20] sm:$0xff]  ;;  %v626_v28 = vld [vmem:[%s2198_s23 + $0x28] sm:$0xff]  ;;  %v826_v29 = vpack.c.bf16 %v820_v24, %v819_v23 }
  0x14   : > { %1993 = vmatpush3.bf16.msra.mxu1 %v2084_v1  ;;  %1994 = vmatprep.mubr.msk.bf16.mxu1 %vm656_vm0, %v629_v20  ;;  %v821_v30 = vld [vmem:[%s2204_s27 + $0x20] sm:$0xff]  ;;  %v822_v31 = vld [vmem:[%s2204_s27 + $0x28] sm:$0xff]  ;;  %v630_v32 = vpack.c.bf16 %v624_v26, %v623_v25  ;;  %v631_v33 = vpack.c.bf16 %v626_v28, %v625_v27  ;;  %v627_v36 = vld [vmem:[%s2198_s23 + $0x30] sm:$0xff] }
  0x15   : > { %2004 = vmatprep.mubr.msk.bf16.mxu0 %vm656_vm0, %v825_v21  ;;  %2012 = vmatprep.subr.bf16.mxu1 %v2086_v10  ;;  %v827_v34 = vpack.c.bf16 %v822_v31, %v821_v30  ;;  %v628_v38 = vld [vmem:[%s2198_s23 + $0x38] sm:$0xff]  ;;  %v823_v39 = vld [vmem:[%s2204_s27 + $0x30] sm:$0xff]  ;;  %v923_v41 = vld [vmem:[%s2234_s18] sm:$0xff] }
  0x16   : > { %2022 = vmatprep.subr.bf16.mxu0 %v2087_v22  ;;  %v824_v40 = vld [vmem:[%s2204_s27 + $0x38] sm:$0xff]  ;;  %v1029_v42 = vld [vmem:[%s2240_s21] sm:$0xff]  ;;  %v2262_v43 = vld [vmem:[%s2240_s21 + $0x8] sm:$0xff]  ;;  %v632_v46 = vpack.c.bf16 %v628_v38, %v627_v36  ;;  %s2440_s27 = scalar_lea.vmem %s2618_s6, %s2188_s17 }
  0x17   : > { %v924_v44 = vld [vmem:[%s2234_s18 + $0x8] sm:$0xff]  ;;  %v828_v45 = vpack.c.bf16 %v824_v40, %v823_v39  ;;  %v1037_v47 = vpack.c.bf16 %v2262_v43, %v1029_v42  ;;  %v2276_v49 = vld [vmem:[%s2234_s18 + $0x10] sm:$0xff]  ;;  %v2279_v50 = vld [vmem:[%s2234_s18 + $0x18] sm:$0xff] }
  0x18   : > { %v931_v48 = vpack.c.bf16 %v924_v44, %v923_v41  ;;  %v2282_v51 = vld [vmem:[%s2240_s21 + $0x10] sm:$0xff]  ;;  %v2297_v52 = vld [vmem:[%s2240_s21 + $0x18] sm:$0xff]  ;;  %v2300_v53 = vld [vmem:[%s2272_s29] sm:$0xff]  ;;  %v932_v3 = vpack.c.bf16 %v2279_v50, %v2276_v49 }
  0x19   : > { %v2303_v54 = vld [vmem:[%s2272_s29 + $0x8] sm:$0xff]  ;;  %v2307_v55 = vld [vmem:[%s2234_s18 + $0x20] sm:$0xff]  ;;  %v2319_v59 = vld [vmem:[%s2272_s29 + $0x10] sm:$0xff]  ;;  %v1582_v62 = vmax.f32 %v1029_v42, %v2300_v53 }
  0x1a   : > { %2005 = vmatmul.mubr.msk.bf16.vlgmr.msra.gmra.mxu0 %vm656_vm0, %v826_v29  ;;  %v2310_v56 = vld [vmem:[%s2234_s18 + $0x28] sm:$0xff]  ;;  %v2313_v57 = vld [vmem:[%s2240_s21 + $0x20] sm:$0xff]  ;;  %v2322_v60 = vld [vmem:[%s2272_s29 + $0x18] sm:$0xff]  ;;  %v1583_v4 = vmax.f32 %v2262_v43, %v2303_v54  ;;  %v1584_v9 = vmax.f32 %v2282_v51, %v2319_v59 }
  0x1b   : > { %1995 = vmatmul.mubr.msk.bf16.vlgmr.msra.gmra.mxu1 %vm656_vm0, %v630_v32  ;;  %2023 = vmatpush3.bf16.msra.mxu0 %v2087_v22  ;;  %v2316_v58 = vld [vmem:[%s2240_s21 + $0x28] sm:$0xff]  ;;  %v2325_v61 = vld [vmem:[%s2272_s29 + $0x20] sm:$0xff]  ;;  %v2351_v6 = vld [vmem:[%s2288_s15 + $0x10] sm:$0xff]  ;;  %v1585_v20 = vmax.f32 %v2297_v52, %v2322_v60  ;;  %v933_v28 = vpack.c.bf16 %v2310_v56, %v2307_v55 }
  0x1c   : > { %2013 = vmatpush3.bf16.msra.mxu1 %v2086_v10  ;;  %1998 = vmatprep.mubr.msk.bf16.mxu1 %vm656_vm0, %v631_v33  ;;  %v2331_v63 = vld [vmem:[%s2272_s29 + $0x28] sm:$0xff]  ;;  %v2334_v0 = vld [vmem:[%s2288_s15] sm:$0xff]  ;;  %v2354_v7 = vld [vmem:[%s2288_s15 + $0x18] sm:$0xff]  ;;  %v1038_v10 = vpack.c.bf16 %v2297_v52, %v2282_v51  ;;  %v1586_v13 = vmax.f32 %v2313_v57, %v2325_v61  ;;  %v1039_v29 = vpack.c.bf16 %v2316_v58, %v2313_v57 }
  0x1d   : > { %2008 = vmatprep.mubr.msk.bf16.mxu0 %vm656_vm0, %v827_v34  ;;  %2032 = vmatprep.subr.bf16.mxu1 %v2245_v35  ;;  %v2337_v1 = vld [vmem:[%s2288_s15 + $0x8] sm:$0xff]  ;;  %v2340_v2 = vld [vmem:[%s2294_s20] sm:$0xff]  ;;  %v2363_v11 = vld [vmem:[%s2240_s21 + $0x30] sm:$0xff]  ;;  %v1587_v21 = vmax.f32 %v2316_v58, %v2331_v63 }
  0x1e   : > { %2042 = vmatprep.subr.bf16.mxu0 %v2252_v37  ;;  %v2348_v5 = vld [vmem:[%s2294_s20 + $0x8] sm:$0xff]  ;;  %v1590_v8 = vmax.f32 %v2334_v0, %v2340_v2  ;;  %v2366_v12 = vld [vmem:[%s2240_s21 + $0x38] sm:$0xff]  ;;  %v2371_v14 = vld [vmem:[%s2272_s29 + $0x30] sm:$0xff] }
  0x1f   : > { %v2374_v15 = vld [vmem:[%s2272_s29 + $0x38] sm:$0xff]  ;;  %v1591_v16 = vmax.f32 %v2337_v1, %v2348_v5  ;;  %v2379_v17 = vld [vmem:[%s2294_s20 + $0x10] sm:$0xff]  ;;  %v2385_v19 = vld [vmem:[%s2288_s15 + $0x20] sm:$0xff]  ;;  %v1588_v36 = vmax.f32 %v2363_v11, %v2371_v14 }
  0x20   : > { %v2382_v18 = vld [vmem:[%s2294_s20 + $0x18] sm:$0xff]  ;;  %v2392_v22 = vld [vmem:[%s2288_s15 + $0x28] sm:$0xff]  ;;  %v2395_v23 = vld [vmem:[%s2294_s20 + $0x20] sm:$0xff]  ;;  %v1598_v25 = vmax.f32 %v1582_v62, %v1590_v8  ;;  %v1592_v26 = vmax.f32 %v2351_v6, %v2379_v17  ;;  %v1589_v38 = vmax.f32 %v2366_v12, %v2374_v15 }
  0x21   : > { %v2398_v24 = vld [vmem:[%s2294_s20 + $0x28] sm:$0xff]  ;;  %v1593_v27 = vmax.f32 %v2354_v7, %v2382_v18  ;;  %v1594_v30 = vmax.f32 %v2385_v19, %v2395_v23  ;;  %v2413_v32 = vld [vmem:[%s2288_s15 + $0x30] sm:$0xff]  ;;  %v2416_v33 = vld [vmem:[%s2288_s15 + $0x38] sm:$0xff]  ;;  %v1599_v43 = vmax.f32 %v1583_v4, %v1591_v16 }
  0x22   : > { %2009 = vmatmul.mubr.msk.bf16.gmra.mxu0 %vm656_vm0, %v828_v45  ;;  %v1595_v31 = vmax.f32 %v2392_v22, %v2398_v24  ;;  %v2419_v34 = vld [vmem:[%s2294_s20 + $0x30] sm:$0xff]  ;;  %v2426_v39 = vld [vmem:[%s2294_s20 + $0x38] sm:$0xff]  ;;  %v1933_v40 = vld [vmem:[%s2623_s11] ss:$0 sm:$0xff]  ;;  %v1600_v42 = vmax.f32 %v1584_v9, %v1592_v26 }
  0x23   : > { %1999 = vmatmul.mubr.msk.bf16.gmra.mxu1 %vm656_vm0, %v632_v46  ;;  %2024 = vmatprep.mubr.msk.bf16.mxu0 %vm656_vm0, %v1037_v47  ;;  %v2434_v41 = vld [vmem:[%s2624_s12] ss:$0 sm:$0xff]  ;;  %v2445_v44 = vld [vmem:[%s2621_s9 + $0x38] sm:$0xff]   ;;  %v1596_v45 = vmax.f32 %v2413_v32, %v2419_v34  ;;  %v1597_v46 = vmax.f32 %v2416_v33, %v2426_v39  ;;  %v1613_v47 = vmul.f32 %v1933_v40, %v1598_v25  ;;  %v929_v56 = vld [vmem:[%s2234_s18 + $0x30] sm:$0xff] }
  0x24   : > { %2014 = vmatprep.mubr.msk.bf16.mxu1 %vm656_vm0, %v931_v48  ;;  %v1601_v48 = vmax.f32 %v1585_v20, %v1593_v27  ;;  %v2455_v49 = vld [vmem:[%s2621_s9 + $0x40] sm:$0xff]   ;;  %v1615_v50 = vmul.f32 %v1933_v40, %v1600_v42  ;;  %v1614_v51 = vmul.f32 %v1933_v40, %v1599_v43  ;;  %v1602_v52 = vmax.f32 %v1586_v13, %v1594_v30  ;;  %v930_v62 = vld [vmem:[%s2234_s18 + $0x38] sm:$0xff]  ;;  %v1242_v8 = vld [vmem:[%s2440_s27 + $0x8] sm:$0xff]  ;;  %s2100_s18 = smov 48  }
  0x25   : > { %v1603_v55 = vmax.f32 %v1587_v21, %v1595_v31  ;;  %v1628_v57 = vadd.f32 %v2434_v41, %v1613_v47  ;;  %v1241_v4 = vld [vmem:[%s2440_s27] sm:$0xff]  ;;  %v1604_v20 = vmax.f32 %v1588_v36, %v1596_v45  ;;  %v1605_v25 = vmax.f32 %v1589_v38, %v1597_v46  ;;  %v1243_v38 = vld [vmem:[%s2440_s27 + $0x10] sm:$0xff]  ;;  %v1246_v46 = vld [vmem:[%s2440_s27 + $0x28] sm:$0xff] }
  0x26   : > { %v1616_v58 = vmul.f32 %v1933_v40, %v1601_v48  ;;  %v1630_v9 = vadd.f32 %v2434_v41, %v1615_v50  ;;  %v1617_v13 = vmul.f32 %v1933_v40, %v1602_v52  ;;  %v934_v26 = vpack.c.bf16 %v930_v62, %v929_v56  ;;  %v1248_v56 = vld [vmem:[%s2440_s27 + $0x38] sm:$0xff] }
  0x27   : > { %v1618_v16 = vmul.f32 %v1933_v40, %v1603_v55  ;;  %v1249_v27 = vpack.c.bf16 %v1242_v8, %v1241_v4  ;;  %v1619_v31 = vmul.f32 %v1933_v40, %v1604_v20  ;;  %v1620_v36 = vmul.f32 %v1933_v40, %v1605_v25  ;;  %v1245_v40 = vld [vmem:[%s2440_s27 + $0x20] sm:$0xff] }
  0x28   : > { %v1638_v21 = vmax.f32 %v1630_v9, 0.0  ;;  %v1632_v30 = vadd.f32 %v2434_v41, %v1617_v13  ;;  %v1144_v48 = vpack.c.bf16 %v2322_v60, %v2319_v59  ;;  %v1145_v50 = vpack.c.bf16 %v2331_v63, %v2325_v61 }
  0x29   : > { %v1634_v43 = vadd.f32 %v2434_v41, %v1619_v31  ;;  %v1635_v47 = vadd.f32 %v2434_v41, %v1620_v36  ;;  %v1146_v60 = vpack.c.bf16 %v2374_v15, %v2371_v14  ;;  %v1461_v61 = vpack.c.bf16 %v2348_v5, %v2340_v2 }
  0x2a   : > { %2025 = vmatmul.mubr.msk.bf16.vlgmr.msra.gmra.mxu0 %vm656_vm0, %v1038_v10  ;;  %v1629_v10 = vadd.f32 %v2434_v41, %v1614_v51  ;;  %1656 = vrot.lane.b32.xlu1 %v1638_v21, %s2100_s18  ;;  %v1251_v51 = vpack.c.bf16 %v1246_v46, %v1245_v40  ;;  %v1355_v63 = vpack.c.bf16 %v2337_v1, %v2334_v0 }
  0x2b   : > { %2015 = vmatmul.mubr.msk.bf16.vlgmr.msra.gmra.mxu1 %vm656_vm0, %v932_v3  ;;  %2043 = vmatpush3.bf16.msra.mxu0 %v2252_v37  ;;  %v1636_v37 = vmax.f32 %v1628_v57, 0.0  ;;  %v1631_v3 = vadd.f32 %v2434_v41, %v1616_v58  ;;  %v1642_v52 = vmax.f32 %v1634_v43, 0.0  ;;  %v1643_v55 = vmax.f32 %v1635_v47, 0.0 }
  0x2c   : > { %2033 = vmatpush3.bf16.msra.mxu1 %v2245_v35  ;;  %2018 = vmatprep.mubr.msk.bf16.mxu1 %vm656_vm0, %v933_v28  ;;  %v1040_v35 = vpack.c.bf16 %v2366_v12, %v2363_v11  ;;  %v1143_v28 = vpack.c.bf16 %v2303_v54, %v2300_v53  ;;  %v1633_v12 = vadd.f32 %v2434_v41, %v1618_v16  ;;  %v1244_v53 = vld [vmem:[%s2440_s27 + $0x18] sm:$0xff]  ;;  %v1640_v54 = vmax.f32 %v1632_v30, 0.0  ;;  %v1247_v41 = vld [vmem:[%s2440_s27 + $0x30] sm:$0xff] }
  0x2d   : > { %2028 = vmatprep.mubr.msk.bf16.mxu0 %vm656_vm0, %v1039_v29  ;;  %2052 = vmatprep.subr.bf16.mxu1 %v2445_v44  ;;  %v1637_v29 = vmax.f32 %v1629_v10, 0.0  ;;  %v1639_v11 = vmax.f32 %v1631_v3, 0.0  ;;  %v1250_v45 = vpack.c.bf16 %v1244_v53, %v1243_v38  ;;  %v1252_v59 = vpack.c.bf16 %v1248_v56, %v1247_v41 }
  0x2e   : > { %2062 = vmatprep.subr.bf16.mxu0 %v2455_v49  ;;  %1652 = vrot.lane.b32.xlu0 %v1636_v37, %s2100_s18  ;;  %v1641_v42 = vmax.f32 %v1633_v12, 0.0  ;;  %v1356_v14 = vpack.c.bf16 %v2354_v7, %v2351_v6  ;;  %v1463_v2 = vpack.c.bf16 %v2398_v24, %v2395_v23  ;;  %v1357_v0 = vpack.c.bf16 %v2392_v22, %v2385_v19 }
  0x2f   : > { %1658 = vrot.lane.b32.xlu1 %v1639_v11, %s2100_s18  ;;  %v1464_v1 = vpack.c.bf16 %v2426_v39, %v2419_v34  ;;  %v1358_v5 = vpack.c.bf16 %v2416_v33, %v2413_v32 }
  0x32   : > { %2029 = vmatmul.mubr.msk.bf16.gmra.mxu0 %vm656_vm0, %v1040_v35  ;;  %1654 = vrot.lane.b32.xlu0 %v1637_v29, %s2100_s18 }
  0x33   : > { %2019 = vmatmul.mubr.msk.bf16.gmra.mxu1 %vm656_vm0, %v934_v26  ;;  %2044 = vmatprep.mubr.msk.bf16.mxu0 %vm656_vm0, %v1249_v27 }
  0x34   : > { %2034 = vmatprep.mubr.msk.bf16.mxu1 %vm656_vm0, %v1143_v28  ;;  %1662 = vrot.lane.b32.xlu1 %v1641_v42, %s2100_s18 }
  0x36   : > { %1660 = vrot.lane.b32.xlu0 %v1640_v54, %s2100_s18 }
  0x38   : > { %1666 = vrot.lane.b32.xlu1 %v1643_v55, %s2100_s18 }
  0x3a   : > { %2045 = vmatmul.mubr.msk.bf16.vlgmr.msra.gmra.mxu0 %vm656_vm0, %v1250_v45  ;;  %1664 = vrot.lane.b32.xlu0 %v1642_v52, %s2100_s18 }
  0x3b   : > { %2035 = vmatmul.mubr.msk.bf16.vlgmr.msra.gmra.mxu1 %vm656_vm0, %v1144_v48  ;;  %2063 = vmatpush3.bf16.msra.mxu0 %v2455_v49 }
  0x3c   : > { %2053 = vmatpush3.bf16.msra.mxu1 %v2445_v44  ;;  %2038 = vmatprep.mubr.msk.bf16.mxu1 %vm656_vm0, %v1145_v50  ;;  %v1462_v44 = vpack.c.bf16 %v2382_v18, %v2379_v17 }
  0x3d   : > { %2048 = vmatprep.mubr.msk.bf16.mxu0 %vm656_vm0, %v1251_v51 }
  0x42   : > { %2049 = vmatmul.mubr.msk.bf16.gmra.mxu0 %vm656_vm0, %v1252_v59 }
  0x43   : > { %2039 = vmatmul.mubr.msk.bf16.gmra.mxu1 %vm656_vm0, %v1146_v60  ;;  %2064 = vmatprep.mubr.msk.bf16.mxu0 %vm656_vm0, %v1461_v61 }
  0x44   : > { %2054 = vmatprep.mubr.msk.bf16.mxu1 %vm656_vm0, %v1355_v63 }
  0x4a   : > { %2065 = vmatmul.mubr.msk.bf16.vlgmr.msra.gmra.mxu0 %vm656_vm0, %v1462_v44 }
  0x4b   : > { %2055 = vmatmul.mubr.msk.bf16.vlgmr.msra.gmra.mxu1 %vm656_vm0, %v1356_v14  ;;  %2068 = vmatprep.mubr.msk.bf16.mxu0 %vm656_vm0, %v1463_v2 }
  0x4c   : > { %2058 = vmatprep.mubr.msk.bf16.mxu1 %vm656_vm0, %v1357_v0 }
  0x52   : > { %2069 = vmatmul.mubr.msk.bf16.gmra.mxu0 %vm656_vm0, %v1464_v1 }
  0x53   : > { %2059 = vmatmul.mubr.msk.bf16.gmra.mxu1 %vm656_vm0, %v1358_v5 }
  0xd2   : > { %v1986_v6 = vpop.f32.mrf.mxu0 }
  0xd3   : > { %v1990_v7 = vpop.f32.mrf.mxu1 }
  0xd4   : > { %v703_v15 = vpop.f32.mrf.mxu0 }
  0xd5   : > { %v719_v17 = vpop.f32.mrf.mxu1 }
  0xd6   : > { %v1987_v18 = vpop.f32.mrf.mxu0 }
  0xd7   : > { %v1991_v19 = vpop.f32.mrf.mxu1 }
  0xd8   : > { %v706_v22 = vpop.f32.mrf.mxu0 }
  0xd9   : > { %v2536_v23 = vpop.f32.mrf.mxu1 }
  0xda   : > { %v2006_v24 = vpop.f32.mrf.mxu0 }
  0xdb   : > { %v1996_v49 = vpop.f32.mrf.mxu1 }
  0xdc   : > { %v884_v57 = vpop.f32.mrf.mxu0  ;;  %v795_v54 = vadd.f32 %v1996_v49, %v1986_v6 }
  0xdd   : > { %v786_v34 = vpop.f32.mrf.mxu1 }
  0xde   : > { %v2007_v39 = vpop.f32.mrf.mxu0  ;;  %v787_v45 = vadd.f32 %v786_v34, %v703_v15  ;;  %v917_v47 = vadd.f32 %v2006_v24, %v795_v54 }
  0xdf   : > { %v1997_v58 = vpop.f32.mrf.mxu1 }
  0xe0   : > { %v887_v32 = vpop.f32.mrf.mxu0  ;;  %v798_v48 = vadd.f32 %v1997_v58, %v1987_v18  ;;  %v915_v52 = vadd.f32 %v884_v57, %v787_v45 }
  0xe1   : > { %v789_v33 = vpop.f32.mrf.mxu1 }
  0xe2   : > { %v2010_v62 = vpop.f32.mrf.mxu0  ;;  %v790_v55 = vadd.f32 %v789_v33, %v706_v22  ;;  %v918_v60 = vadd.f32 %v2007_v39, %v798_v48 }
  0xe3   : > { %v2000_v4 = vpop.f32.mrf.mxu1 }
  0xe4   : > { %v900_v8 = vpop.f32.mrf.mxu0  ;;  %v811_v44 = vadd.f32 %v2000_v4, %v1990_v7  ;;  %v916_v0 = vadd.f32 %v887_v32, %v790_v55  ;;  %v2555_v32 = vpop.permute.xlu0 %1652 }
  0xe5   : > { %v802_v9 = vpop.f32.mrf.mxu1 }
  0xe6   : > { %v2011_v10 = vpop.f32.mrf.mxu0  ;;  %v803_v14 = vadd.f32 %v802_v9, %v719_v17  ;;  %v921_v34 = vadd.f32 %v2010_v62, %v811_v44 }
  0xe7   : > { %v2001_v13 = vpop.f32.mrf.mxu1 }
  0xe8   : > { %v2538_v37 = vpop.f32.mrf.mxu0  ;;  %v814_v15 = vadd.f32 %v2001_v13, %v1991_v19  ;;  %v919_v39 = vadd.f32 %v900_v8, %v803_v14 }
  0xe9   : > { %v805_v3 = vpop.f32.mrf.mxu1 }
  0xea   : > { %v2026_v16 = vpop.f32.mrf.mxu0  ;;  %v806_v58 = vadd.f32 %v805_v3, %v2536_v23  ;;  %v922_v9 = vadd.f32 %v2011_v10, %v814_v15 }
  0xeb   : > { %v2016_v20 = vpop.f32.mrf.mxu1 }
  0xec   : > { %v1096_v35 = vpop.f32.mrf.mxu0  ;;  %v1023_v41 = vadd.f32 %v2016_v20, %v917_v47  ;;  %v920_v62 = vadd.f32 %v2538_v37, %v806_v58 }
  0xed   : > { %v990_v21 = vpop.f32.mrf.mxu1 }
  0xee   : > { %v2027_v25 = vpop.f32.mrf.mxu0  ;;  %v1021_v61 = vadd.f32 %v990_v21, %v915_v52  ;;  %v1129_v1 = vadd.f32 %v2026_v16, %v1023_v41 }
  0xef   : > { %v2017_v26 = vpop.f32.mrf.mxu1 }
  0xf0   : > { %v1099_v27 = vpop.f32.mrf.mxu0  ;;  %v1024_v5 = vadd.f32 %v2017_v26, %v918_v60  ;;  %v1127_v24 = vadd.f32 %v1096_v35, %v1021_v61 }
  0xf1   : > { %v993_v28 = vpop.f32.mrf.mxu1 }
  0xf2   : > { %v2540_v29 = vpop.f32.mrf.mxu0  ;;  %v1022_v49 = vadd.f32 %v993_v28, %v916_v0  ;;  %v1130_v7 = vadd.f32 %v2027_v25, %v1024_v5  ;;  %v1657_v28 = vpop.permute.xlu1 %1656 }
  0xf3   : > { %v2020_v30 = vpop.f32.mrf.mxu1 }
  0xf4   : > { %v1112_v11 = vpop.f32.mrf.mxu0  ;;  %v1027_v16 = vadd.f32 %v2020_v30, %v921_v34  ;;  %v1128_v20 = vadd.f32 %v1099_v27, %v1022_v49  ;;  %v2562_v27 = vld [vmem:[%s2622_s10] ss:$0 sm:$0xff] }
  0xf5   : > { %v1006_v12 = vpop.f32.mrf.mxu1 }
  0xf6   : > { %v2542_v31 = vpop.f32.mrf.mxu0  ;;  %v1025_v19 = vadd.f32 %v1006_v12, %v919_v39  ;;  %v1133_v45 = vadd.f32 %v2540_v29, %v1027_v16 }
  0xf7   : > { %v2021_v36 = vpop.f32.mrf.mxu1 }
  0xf8   : > { %v2544_v38 = vpop.f32.mrf.mxu0  ;;  %v1028_v8 = vadd.f32 %v2021_v36, %v922_v9  ;;  %v1655_v36 = vpop.permute.xlu0 %1654 }
  0xf9   : > { %v1009_v53 = vpop.f32.mrf.mxu1 }
  0xfa   : > { %v2046_v42 = vpop.f32.mrf.mxu0  ;;  %v1026_v10 = vadd.f32 %v1009_v53, %v920_v62 }
  0xfb   : > { %v2036_v43 = vpop.f32.mrf.mxu1 }
  0xfc   : > { %v1308_v40 = vpop.f32.mrf.mxu0  ;;  %v1235_v22 = vadd.f32 %v2036_v43, %v1129_v1  ;;  %v1132_v60 = vadd.f32 %v2544_v38, %v1026_v10  ;;  %v1661_v34 = vpop.permute.xlu0 %1660 }
  0xfd   : > { %v1202_v46 = vpop.f32.mrf.mxu1 }
  0xfe   : > { %v2047_v50 = vpop.f32.mrf.mxu0  ;;  %v1233_v17 = vadd.f32 %v1202_v46, %v1127_v24  ;;  %v1341_v35 = vadd.f32 %v2046_v42, %v1235_v22  ;;  %v1131_v46 = vadd.f32 %v1112_v11, %v1025_v19 }
  0xff   : > { %v2037_v51 = vpop.f32.mrf.mxu1 }
 0x100   : > { %v1311_v56 = vpop.f32.mrf.mxu0  ;;  %v1236_v21 = vadd.f32 %v2037_v51, %v1130_v7  ;;  %v1339_v3 = vadd.f32 %v1308_v40, %v1233_v17  ;;  %v1134_v40 = vadd.f32 %v2542_v31, %v1028_v8 }
 0x101   : > { %v1205_v59 = vpop.f32.mrf.mxu1 }
 0x102   : > { %v2546_v63 = vpop.f32.mrf.mxu0  ;;  %v1234_v25 = vadd.f32 %v1205_v59, %v1128_v20  ;;  %v1342_v12 = vadd.f32 %v2047_v50, %v1236_v21  ;;  %v1659_v59 = vpop.permute.xlu1 %1658 }
 0x103   : > { %v2040_v2 = vpop.f32.mrf.mxu1 }
 0x104   : > { %v2548_v6 = vpop.f32.mrf.mxu0  ;;  %v1239_v48 = vadd.f32 %v2040_v2, %v1133_v45  ;;  %v1340_v29 = vadd.f32 %v1311_v56, %v1234_v25 }
 0x105   : > { %v1218_v18 = vpop.f32.mrf.mxu1 }
 0x106   : > { %v2550_v57 = vpop.f32.mrf.mxu0  ;;  %v1237_v51 = vadd.f32 %v1218_v18, %v1131_v46  ;;  %v1345_v0 = vadd.f32 %v2546_v63, %v1239_v48  ;;  %v1663_v9 = vpop.permute.xlu1 %1662 }
 0x107   : > { %v2041_v33 = vpop.f32.mrf.mxu1 }
 0x108   : > { %v2553_v4 = vpop.f32.mrf.mxu0  ;;  %v1240_v50 = vadd.f32 %v2041_v33, %v1134_v40  ;;  %v1343_v38 = vadd.f32 %v2548_v6, %v1237_v51 }
 0x109   : > { %v1221_v13 = vpop.f32.mrf.mxu1 }
 0x10a   : > { %v2066_v26 = vpop.f32.mrf.mxu0  ;;  %v1238_v1 = vadd.f32 %v1221_v13, %v1132_v60  ;;  %v1346_v39 = vadd.f32 %v2550_v57, %v1240_v50 }
 0x10b   : > { %v2056_v23 = vpop.f32.mrf.mxu1 }
 0x10c   : > { %v1447_v54 = vadd.f32 %v2056_v23, %v1341_v35  ;;  %v1520_v43 = vpop.f32.mrf.mxu0  ;;  %v1344_v16 = vadd.f32 %v2553_v4, %v1238_v1 }
 0x10d   : > { %v1414_v30 = vpop.f32.mrf.mxu1 }
 0x10e   : > { %v1553_v42 = vadd.f32 %v2066_v26, %v1447_v54  ;;  %v1445_v47 = vadd.f32 %v1414_v30, %v1339_v3  ;;  %v2067_v37 = vpop.f32.mrf.mxu0  ;;  %v1665_v3 = vpop.permute.xlu0 %1664 }
 0x10f   : > { %v2057_v52 = vpop.f32.mrf.mxu1  ;;  %v1667_v30 = vpop.permute.xlu1 %1666 }
 0x110   : > { %v1568_v11 = vadd.f32 %v2562_v27, %v1553_v42  ;;  %v1551_v53 = vadd.f32 %v1520_v43, %v1445_v47  ;;  %v1448_v55 = vadd.f32 %v2057_v52, %v1342_v12  ;;  %v1523_v41 = vpop.f32.mrf.mxu0 }
 0x111   : > { %v1417_v61 = vpop.f32.mrf.mxu1 }
 0x112   : > { %v1576_v44 = vmax.f32 %v1568_v11, 0.0  ;;  %v1566_v31 = vadd.f32 %v2562_v27, %v1551_v53  ;;  %v1554_v56 = vadd.f32 %v2067_v37, %v1448_v55  ;;  %v1446_v14 = vadd.f32 %v1417_v61, %v1340_v29  ;;  %v2070_v2 = vpop.f32.mrf.mxu0 }
 0x113   : > { %v2060_v5 = vpop.f32.mrf.mxu1 }
 0x114   : > { %v1574_v15 = vmax.f32 %v1566_v31, 0.0  ;;  %v1569_v18 = vadd.f32 %v2562_v27, %v1554_v56  ;;  %v1552_v24 = vadd.f32 %v1523_v41, %v1446_v14  ;;  %v1679_v49 = vsel %vm1676_vm1, %v1576_v44, %v1657_v28  ;;  %v1536_v22 = vpop.f32.mrf.mxu0 }
 0x115   : > { %1688 = vst.msk [vmem:[%s2572_s22 + $0x10] sm:$0xff] %vm1685_vm2, %v1679_v49  ;;  %v1451_v58 = vadd.f32 %v2060_v5, %v1345_v0  ;;  %v1430_v33 = vpop.f32.mrf.mxu1 }
 0x116   : > { %v1677_v63 = vsel %vm1676_vm1, %v1574_v15, %v2555_v32  ;;  %v1577_v6 = vmax.f32 %v1569_v18, 0.0  ;;  %v1567_v7 = vadd.f32 %v2562_v27, %v1552_v24  ;;  %v1449_v17 = vadd.f32 %v1430_v33, %v1343_v38  ;;  %v2071_v13 = vpop.f32.mrf.mxu0 }
 0x117   : > { %1686 = vst.msk [vmem:[%s2572_s22] sm:$0xff] %vm1685_vm2, %v1677_v63  ;;  %v1557_v19 = vadd.f32 %v2070_v2, %v1451_v58  ;;  %v2061_v57 = vpop.f32.mrf.mxu1 }
 0x118   : > { %v1575_v20 = vmax.f32 %v1567_v7, 0.0  ;;  %v1555_v35 = vadd.f32 %v1536_v22, %v1449_v17  ;;  %v1680_v21 = vsel %vm1676_vm1, %v1577_v6, %v1659_v59  ;;  %v1452_v26 = vadd.f32 %v2061_v57, %v1346_v39  ;;  %v1539_v54 = vpop.f32.mrf.mxu0 }
 0x119   : > { %v1572_v32 = vadd.f32 %v2562_v27, %v1557_v19  ;;  %1689 = vst.msk [vmem:[%s2572_s22 + $0x18] sm:$0xff] %vm1685_vm2, %v1680_v21  ;;  %v1433_v28 = vpop.f32.mrf.mxu1 }
 0x11a   : > { %v1678_v62 = vsel %vm1676_vm1, %v1575_v20, %v1655_v36  ;;  %v1570_v4 = vadd.f32 %v2562_v27, %v1555_v35  ;;  %v1558_v8 = vadd.f32 %v2071_v13, %v1452_v26  ;;  %v1450_v23 = vadd.f32 %v1433_v28, %v1344_v16 }
 0x11b   : > { %1687 = vst.msk [vmem:[%s2572_s22 + $0x8] sm:$0xff] %vm1685_vm2, %v1678_v62  ;;  %v1580_v25 = vmax.f32 %v1572_v32, 0.0 }
 0x11c   : > { %v1578_v43 = vmax.f32 %v1570_v4, 0.0  ;;  %v1573_v45 = vadd.f32 %v2562_v27, %v1558_v8  ;;  %v1556_v46 = vadd.f32 %v1539_v54, %v1450_v23 }
 0x11d   : > { %v1683_v10 = vsel %vm1676_vm1, %v1580_v25, %v1665_v3 }
 0x11e   : > { %v1681_v12 = vsel %vm1676_vm1, %v1578_v43, %v1661_v34  ;;  %v1581_v42 = vmax.f32 %v1573_v45, 0.0  ;;  %v1571_v47 = vadd.f32 %v2562_v27, %v1556_v46  ;;  %1692 = vst.msk [vmem:[%s2572_s22 + $0x30] sm:$0xff] %vm1685_vm2, %v1683_v10 }
 0x11f   : > { %1690 = vst.msk [vmem:[%s2572_s22 + $0x20] sm:$0xff] %vm1685_vm2, %v1681_v12 }
 0x120   : > { %v1579_v37 = vmax.f32 %v1571_v47, 0.0  ;;  %v1684_v36 = vsel %vm1676_vm1, %v1581_v42, %v1667_v30 }
 0x121   : > { %1693 = vst.msk [vmem:[%s2572_s22 + $0x38] sm:$0xff] %vm1685_vm2, %v1684_v36 }
 0x122   : > { %v1682_v40 = vsel %vm1676_vm1, %v1579_v37, %v1663_v9 }
 0x123   : > { %1691 = vst.msk [vmem:[%s2572_s22 + $0x28] sm:$0xff] %vm1685_vm2, %v1682_v40 }
 0x124 PF: > { %s23_s25 = sadd.s32 1, %s2098_s25  }
 0x125   : > { %p20_p4 = scmp.ge.s32.totalorder %s23_s25, 4  }
 0x127   :  { %22 = sbr.rel (!%p20_p4) target bundleno = 1 (0x1), region = 134 }

// kernel: _lambda_.16
= control target key start
LH: loop header
LB: loop body
LE: loop exit
PB: predicated region body
PF: predicated region fallthrough
CT: control target
= control target key end

     0   :  { %s2806_s24 = smov 0   ;;  %s3234_s0 = inlined_call_operand.vmem [shape: f32[2,64,64], index: 0, kind: input, shape index: {}]   ;;  %s3235_s1 = inlined_call_operand.vmem [shape: bf16[3,64,64], index: 1, kind: input, shape index: {}]   ;;  %s3236_s2 = inlined_call_operand.vmem [shape: bf16[3,64,64], index: 2, kind: input, shape index: {}]   ;;  %s3237_s3 = inlined_call_operand.vmem [shape: bf16[3,64,64], index: 3, kind: input, shape index: {}]   ;;  %s3238_s4 = inlined_call_operand.vmem [shape: bf16[3,64,64], index: 4, kind: input, shape index: {}]   ;;  %s3239_s5 = inlined_call_operand.vmem [shape: f32[4,1,64], index: 5, kind: input, shape index: {}]   ;;  %s3240_s6 = inlined_call_operand.vmem [shape: f32[4,64,1], index: 6, kind: input, shape index: {}]   ;;  %s3241_s7 = inlined_call_operand.vmem [shape: f32[2,64,64], index: 7, kind: output, shape index: {}]  }
   0x1 LB: > { %s2204_s25 = sadd.s32 4294967295, %s2762_s24   ;;  %p2208_p0 = scmp.ge.s32.totalorder %s2762_s24, 1  ;;  %s2762_s24 = sphi %s2806_s24, %s17_s24  }
   0x2   : > { %p237_p1 = scmp.lt.s32.totalorder %s2762_s24, 3 }
   0x4   : > { %p238_p2 = pnand %p2208_p0, %p237_p1 }
   0x5   : > { %p269_p3 = scmp.lt.s32.totalorder (!%p238_p2), %s2204_s25, 1 }
   0x6   : > { %241 = sbr.rel (%p238_p2) target bundleno = 961 (0x3c1), region = 48 }
   0xb   : > { %v2708_v0 = vld [vmem:[%s3235_s1 + $0x18] sm:$0xff]   ;;  %vm280_vm0 = vcmask 523264   ;;  %v2710_v2 = vld [vmem:[%s3235_s1 + $0x10] sm:$0xff]   ;;  %s3243_s25 = smov (!%p269_p3, %s2204_s25), 1  ;;  %v2712_v4 = vld [vmem:[%s3235_s1 + $0x8] sm:$0xff]   ;;  %v2764_v5 = vmov 0.0  }
   0xc   : > { %v2709_v1 = vld [vmem:[%s3235_s1 + $0x38] sm:$0xff]   ;;  %2504 = vmatprep.subr.bf16.mxu0 %v2708_v0  ;;  %v2711_v3 = vld [vmem:[%s3235_s1 + $0x30] sm:$0xff]   ;;  %s2406_s13 = sshll.u32 %s3243_s25, 6  ;;  %281 = vst.msk [vmem:[#allocation2] sm:$0xff] %vm280_vm0, %v2764_v5  ;;  %282 = vst.msk [vmem:[#allocation2 + $0x48] sm:$0xff] %vm280_vm0, %v2764_v5  ;;  %v2765_v8 = vmov 0  }
   0xd   : > { %2520 = vmatprep.subr.bf16.mxu1 %v2709_v1  ;;  %2505 = vmatpush3.bf16.msra.mxu0 %v2708_v0  ;;  %283 = vst.msk [vmem:[#allocation3] sm:$0xff] %vm280_vm0, %v2764_v5  ;;  %284 = vst.msk [vmem:[#allocation3 + $0x48] sm:$0xff] %vm280_vm0, %v2764_v5  ;;  %v2713_v6 = vld [vmem:[%s3235_s1 + $0x28] sm:$0xff]   ;;  %s2844_s18 = scalar_lea.vmem %s3234_s0, %s2406_s13  ;;  %v2714_v7 = vld [vmem:[%s3235_s1] sm:$0xff]   ;;  %s3207_s27 = scalar_lea.vmem %s3241_s7, %s2406_s13 }
   0xe   : > { %2521 = vmatpush3.bf16.msra.mxu1 %v2709_v1  ;;  %2506 = vmatprep.subr.bf16.mxu0 %v2710_v2  ;;  %v2715_v9 = vld [vmem:[%s3235_s1 + $0x20] sm:$0xff]   ;;  %v286_v11 = vld [vmem:[%s2844_s18 + $0x8] sm:$0xff]  ;;  %v287_v12 = vld [vmem:[%s2844_s18 + $0x10] sm:$0xff] }
   0xf   : > { %2522 = vmatprep.subr.bf16.mxu1 %v2711_v3  ;;  %2706 = vset.pattern.permute.xlu0 %v2765_v8  ;;  %v285_v10 = vld [vmem:[%s2844_s18] sm:$0xff]  ;;  %294 = vst.msk [vmem:[#allocation2 + $0x10] sm:$0xff] %vm280_vm0, %v286_v11  ;;  %295 = vst.msk [vmem:[#allocation2 + $0x18] sm:$0xff] %vm280_vm0, %v287_v12  ;;  %v288_v13 = vld [vmem:[%s2844_s18 + $0x18] sm:$0xff] }
  0x10   : > { %2707 = vset.pattern.permute.xlu1 %v2765_v8  ;;  %293 = vst.msk [vmem:[#allocation2 + $0x8] sm:$0xff] %vm280_vm0, %v285_v10  ;;  %296 = vst.msk [vmem:[#allocation2 + $0x20] sm:$0xff] %vm280_vm0, %v288_v13  ;;  %v2716_v14 = vld [vmem:[%s3235_s1 + $0x58] sm:$0xff]   ;;  %v289_v15 = vld [vmem:[%s2844_s18 + $0x20] sm:$0xff] }
  0x11   : > { %2507 = vmatpush3.bf16.msra.mxu0 %v2710_v2  ;;  %297 = vst.msk [vmem:[#allocation2 + $0x28] sm:$0xff] %vm280_vm0, %v289_v15  ;;  %v290_v16 = vld [vmem:[%s2844_s18 + $0x28] sm:$0xff]  ;;  %v291_v17 = vld [vmem:[%s2844_s18 + $0x30] sm:$0xff]  ;;  %v292_v18 = vld [vmem:[%s2844_s18 + $0x38] sm:$0xff] }
  0x12   : > { %2523 = vmatpush3.bf16.msra.mxu1 %v2711_v3  ;;  %2508 = vmatprep.subr.bf16.mxu0 %v2712_v4  ;;  %298 = vst.msk [vmem:[#allocation2 + $0x30] sm:$0xff] %vm280_vm0, %v290_v16  ;;  %299 = vst.msk [vmem:[#allocation2 + $0x38] sm:$0xff] %vm280_vm0, %v291_v17  ;;  %v698_v20 = vld [vmem:[%s3240_s6] sm:$0xff]  ;;  %v700_v21 = vld [vmem:[%s3240_s6 + $0x10] sm:$0xff] }
  0x13   : > { %2524 = vmatprep.subr.bf16.mxu1 %v2713_v6  ;;  %300 = vst.msk [vmem:[#allocation2 + $0x40] sm:$0xff] %vm280_vm0, %v292_v18  ;;  %v2871_v19 = vld [vmem:[#allocation2] sm:$0xff]  ;;  %746 = vperm.xlu0 %2706, %v698_v20   ;;  %v2717_v30 = vld [vmem:[%s3235_s1 + $0x50] sm:$0xff]   ;;  %v699_v34 = vld [vmem:[%s3240_s6 + $0x8] sm:$0xff] }
  0x14   : > { %756 = vperm.xlu1 %2707, %v700_v21   ;;  %v701_v38 = vld [vmem:[%s3240_s6 + $0x18] sm:$0xff]  ;;  %v2718_v39 = vld [vmem:[%s3235_s1 + $0x48] sm:$0xff]   ;;  %v702_v42 = vld [vmem:[%s3240_s6 + $0x20] sm:$0xff] }
  0x15   : > { %2509 = vmatpush3.bf16.msra.mxu0 %v2712_v4  ;;  %v2719_v43 = vld [vmem:[%s3235_s1 + $0x40] sm:$0xff]   ;;  %v703_v44 = vld [vmem:[%s3240_s6 + $0x28] sm:$0xff]  ;;  %v704_v45 = vld [vmem:[%s3240_s6 + $0x30] sm:$0xff] }
  0x16   : > { %2525 = vmatpush3.bf16.msra.mxu1 %v2713_v6  ;;  %2510 = vmatprep.subr.bf16.mxu0 %v2714_v7  ;;  %v302_v23 = vld [vmem:[#allocation2 + $0x10] sm:$0xff]  ;;  %v303_v24 = vld [vmem:[#allocation2 + $0x18] sm:$0xff]  ;;  %v2254_v47 = vld [vmem:[%s3240_s6 + $0x40] sm:$0xff] }
  0x17   : > { %2526 = vmatprep.subr.bf16.mxu1 %v2715_v9  ;;  %v301_v22 = vld [vmem:[#allocation2 + $0x8] sm:$0xff]  ;;  %v324_v27 = vpack.c.bf16 %v303_v24, %v302_v23  ;;  %v304_v28 = vld [vmem:[#allocation2 + $0x20] sm:$0xff]  ;;  %751 = vperm.xlu0 %2706, %v699_v34   ;;  %v705_v46 = vld [vmem:[%s3240_s6 + $0x38] sm:$0xff] }
  0x18   : > { %v323_v25 = vpack.c.bf16 %v301_v22, %v2871_v19  ;;  %v309_v26 = vpack.c.bf16 %v302_v23, %v301_v22  ;;  %v310_v29 = vpack.c.bf16 %v304_v28, %v303_v24  ;;  %v305_v31 = vld [vmem:[#allocation2 + $0x28] sm:$0xff]  ;;  %761 = vperm.xlu1 %2707, %v701_v38   ;;  %v2256_v49 = vld [vmem:[%s3240_s6 + $0x50] sm:$0xff]  ;;  %v2257_v51 = vld [vmem:[%s3240_s6 + $0x58] sm:$0xff] }
  0x19   : > { %2511 = vmatpush3.bf16.msra.mxu0 %v2714_v7  ;;  %v325_v32 = vpack.c.bf16 %v305_v31, %v304_v28  ;;  %v306_v33 = vld [vmem:[#allocation2 + $0x30] sm:$0xff]  ;;  %v307_v36 = vld [vmem:[#allocation2 + $0x38] sm:$0xff]  ;;  %v2255_v48 = vld [vmem:[%s3240_s6 + $0x48] sm:$0xff] }
  0x1a   : > { %2527 = vmatpush3.bf16.msra.mxu1 %v2715_v9  ;;  %2536 = vmatprep.subr.bf16.mxu0 %v2716_v14  ;;  %v311_v35 = vpack.c.bf16 %v306_v33, %v305_v31  ;;  %v308_v37 = vld [vmem:[#allocation2 + $0x40] sm:$0xff]  ;;  %v326_v40 = vpack.c.bf16 %v307_v36, %v306_v33  ;;  %v2925_v50 = vld [vmem:[#allocation2 + $0x48] sm:$0xff]  ;;  %v2260_v55 = vld [vmem:[%s3240_s6 + $0x70] sm:$0xff] }
  0x1b   : > { %2512 = vmatprep.mubr.msk.bf16.mxu0 %vm280_vm0, %v323_v25  ;;  %2528 = vmatprep.mubr.msk.bf16.mxu1 %vm280_vm0, %v309_v26  ;;  %v312_v41 = vpack.c.bf16 %v308_v37, %v307_v36  ;;  %v2258_v52 = vld [vmem:[%s3240_s6 + $0x60] sm:$0xff]  ;;  %v548_v53 = vpack.c.bf16 %v2925_v50, %v308_v37  ;;  %v2259_v54 = vld [vmem:[%s3240_s6 + $0x68] sm:$0xff]  ;;  %v2261_v56 = vld [vmem:[%s3240_s6 + $0x78] sm:$0xff] }
  0x1c   : > { %2513 = vmatmul.mubr.msk.bf16.vlgmr.msra.gmra.mxu0 %vm280_vm0, %v324_v27  ;;  %766 = vperm.xlu0 %2706, %v702_v42   ;;  %v2346_v57 = vld [vmem:[%s3240_s6 + $0x80] sm:$0xff]  ;;  %v2347_v58 = vld [vmem:[%s3240_s6 + $0x88] sm:$0xff]  ;;  %v2348_v59 = vld [vmem:[%s3240_s6 + $0x90] sm:$0xff] }
  0x1d   : > { %2529 = vmatmul.mubr.msk.bf16.vlgmr.msra.gmra.mxu1 %vm280_vm0, %v310_v29  ;;  %2537 = vmatpush3.bf16.msra.mxu0 %v2716_v14  ;;  %v2349_v60 = vld [vmem:[%s3240_s6 + $0x98] sm:$0xff]  ;;  %v2350_v61 = vld [vmem:[%s3240_s6 + $0xa0] sm:$0xff]  ;;  %v2351_v62 = vld [vmem:[%s3240_s6 + $0xa8] sm:$0xff] }
  0x1e   : > { %2538 = vmatprep.subr.bf16.mxu0 %v2717_v30  ;;  %2516 = vmatprep.mubr.msk.bf16.mxu0 %vm280_vm0, %v325_v32  ;;  %v2352_v63 = vld [vmem:[%s3240_s6 + $0xb0] sm:$0xff]  ;;  %v2353_v0 = vld [vmem:[%s3240_s6 + $0xb8] sm:$0xff]  ;;  %v2354_v1 = vld [vmem:[%s3240_s6 + $0xc0] sm:$0xff] }
  0x1f   : > { %2532 = vmatprep.mubr.msk.bf16.mxu1 %vm280_vm0, %v311_v35  ;;  %771 = vperm.xlu1 %2707, %v703_v44   ;;  %v2355_v2 = vld [vmem:[%s3240_s6 + $0xc8] sm:$0xff]  ;;  %v2356_v3 = vld [vmem:[%s3240_s6 + $0xd0] sm:$0xff]  ;;  %v2357_v4 = vld [vmem:[%s3240_s6 + $0xd8] sm:$0xff] }
  0x20   : > { %776 = vperm.xlu0 %2706, %v704_v45   ;;  %v2358_v5 = vld [vmem:[%s3240_s6 + $0xe0] sm:$0xff]  ;;  %v2359_v6 = vld [vmem:[%s3240_s6 + $0xe8] sm:$0xff]  ;;  %v2360_v7 = vld [vmem:[%s3240_s6 + $0xf0] sm:$0xff] }
  0x21   : > { %2539 = vmatpush3.bf16.msra.mxu0 %v2717_v30  ;;  %v2361_v8 = vld [vmem:[%s3240_s6 + $0xf8] sm:$0xff]  ;;  %v2722_v11 = vld [vmem:[%s3236_s2 + $0x30] sm:$0xff]   ;;  %v2724_v13 = vld [vmem:[%s3236_s2 + $0x28] sm:$0xff]  }
  0x22   : > { %2540 = vmatprep.subr.bf16.mxu0 %v2718_v39  ;;  %v2720_v9 = vld [vmem:[%s3236_s2 + $0x38] sm:$0xff]   ;;  %v2723_v12 = vld [vmem:[%s3236_s2 + $0x10] sm:$0xff]   ;;  %v2725_v14 = vld [vmem:[%s3236_s2 + $0x8] sm:$0xff]  }
  0x23   : > { %781 = vperm.xlu1 %2707, %v705_v46   ;;  %v2721_v10 = vld [vmem:[%s3236_s2 + $0x18] sm:$0xff]   ;;  %v2726_v15 = vld [vmem:[%s3236_s2 + $0x20] sm:$0xff]  }
  0x24   : > { %2517 = vmatmul.mubr.msk.bf16.gmra.mxu0 %vm280_vm0, %v326_v40  ;;  %1016 = vperm.xlu0 %2706, %v2254_v47   ;;  %v2727_v16 = vld [vmem:[%s3236_s2] sm:$0xff]   ;;  %v3021_v17 = vld [vmem:[%s3236_s2 + $0x58] sm:$0xff]  }
  0x25   : > { %2533 = vmatmul.mubr.msk.bf16.gmra.mxu1 %vm280_vm0, %v312_v41  ;;  %2541 = vmatpush3.bf16.msra.mxu0 %v2718_v39  ;;  %v2253_v36 = vld [vmem:[%s3239_s5] ss:$0 sm:$0xff] }
  0x26   : > { %2544 = vmatprep.mubr.msk.bf16.mxu0 %vm280_vm0, %v324_v27  ;;  %2542 = vmatprep.subr.bf16.mxu0 %v2719_v43 }
  0x27   : > { %1021 = vperm.xlu1 %2707, %v2255_v48   ;;  %2552 = vmatprep.subr.bf16.mxu1 %v2721_v10 }
  0x28   : > { %1026 = vperm.xlu0 %2706, %v2256_v49   ;;  %2553 = vmatpush3.bf16.msra.mxu1 %v2721_v10 }
  0x29   : > { %2543 = vmatpush3.bf16.msra.mxu0 %v2719_v43  ;;  %2554 = vmatprep.subr.bf16.mxu1 %v2723_v12 }
  0x2a   : > { %2568 = vmatprep.subr.bf16.mxu0 %v2720_v9 }
  0x2b   : > { %1031 = vperm.xlu1 %2707, %v2257_v51  }
  0x2c   : > { %2545 = vmatmul.mubr.msk.bf16.vlgmr.msra.gmra.mxu0 %vm280_vm0, %v325_v32  ;;  %1036 = vperm.xlu0 %2706, %v2258_v52  }
  0x2d   : > { %2548 = vmatprep.mubr.msk.bf16.mxu0 %vm280_vm0, %v326_v40  ;;  %2569 = vmatpush3.bf16.msra.mxu0 %v2720_v9 }
  0x2e   : > { %2570 = vmatprep.subr.bf16.mxu0 %v2722_v11  ;;  %2555 = vmatpush3.bf16.msra.mxu1 %v2723_v12 }
  0x2f   : > { %1041 = vperm.xlu1 %2707, %v2259_v54   ;;  %2556 = vmatprep.subr.bf16.mxu1 %v2725_v14 }
  0x30   : > { %1046 = vperm.xlu0 %2706, %v2260_v55  }
  0x31   : > { %2571 = vmatpush3.bf16.msra.mxu0 %v2722_v11 }
  0x32   : > { %2572 = vmatprep.subr.bf16.mxu0 %v2724_v13  ;;  %2557 = vmatpush3.bf16.msra.mxu1 %v2725_v14 }
  0x33   : > { %1051 = vperm.xlu1 %2707, %v2261_v56   ;;  %2558 = vmatprep.subr.bf16.mxu1 %v2727_v16 }
  0x34   : > { %2549 = vmatmul.mubr.msk.bf16.gmra.mxu0 %vm280_vm0, %v548_v53  ;;  %1663 = vperm.xlu0 %2706, %v2346_v57  }
  0x35   : > { %2573 = vmatpush3.bf16.msra.mxu0 %v2724_v13 }
  0x36   : > { %2574 = vmatprep.subr.bf16.mxu0 %v2726_v15  ;;  %2559 = vmatpush3.bf16.msra.mxu1 %v2727_v16 }
  0x37   : > { %1668 = vperm.xlu1 %2707, %v2347_v58   ;;  %2584 = vmatprep.subr.bf16.mxu1 %v3021_v17 }
  0x38   : > { %1673 = vperm.xlu0 %2706, %v2348_v59  }
  0x39   : > { %2575 = vmatpush3.bf16.msra.mxu0 %v2726_v15 }
  0x3b   : > { %1678 = vperm.xlu1 %2707, %v2349_v60  }
  0x3c   : > { %1683 = vperm.xlu0 %2706, %v2350_v61  }
  0x3f   : > { %1688 = vperm.xlu1 %2707, %v2351_v62  }
  0x40   : > { %1693 = vperm.xlu0 %2706, %v2352_v63  }
  0x43   : > { %1698 = vperm.xlu1 %2707, %v2353_v0  }
  0x44   : > { %1933 = vperm.xlu0 %2706, %v2354_v1  }
  0x47   : > { %1938 = vperm.xlu1 %2707, %v2355_v2  }
  0x48   : > { %1943 = vperm.xlu0 %2706, %v2356_v3  }
  0x4b   : > { %1948 = vperm.xlu1 %2707, %v2357_v4  }
  0x4c   : > { %1953 = vperm.xlu0 %2706, %v2358_v5  }
  0x4f   : > { %1958 = vperm.xlu1 %2707, %v2359_v6  }
  0x50   : > { %1963 = vperm.xlu0 %2706, %v2360_v7  }
  0x53   : > { %1968 = vperm.xlu1 %2707, %v2361_v8  }
  0x8e   : > { %v3024_v32 = vpop.permute.xlu0 %746 }
  0x8f   : > { %v3026_v33 = vpop.permute.xlu1 %756 }
  0x92   : > { %v752_v45 = vpop.permute.xlu0 %751 }
  0x93   : > { %v762_v46 = vpop.permute.xlu1 %761 }
  0x97   : > { %v767_v1 = vpop.permute.xlu0 %766 }
  0x9a   : > { %v772_v6 = vpop.permute.xlu1 %771 }
  0xdc   : > { %v2514_v18 = vpop.f32.mrf.mxu0 }
  0xdd   : > { %v2530_v20 = vpop.f32.mrf.mxu1 }
  0xde   : > { %v405_v21 = vpop.f32.mrf.mxu0  ;;  %v515_v34 = vadd.f32 %v2530_v20, %v2514_v18 }
  0xdf   : > { %v506_v22 = vpop.f32.mrf.mxu1 }
  0xe0   : > { %v2515_v23 = vpop.f32.mrf.mxu0  ;;  %v507_v37 = vadd.f32 %v506_v22, %v405_v21  ;;  %v777_v21 = vpop.permute.xlu0 %776 }
  0xe1   : > { %v2531_v24 = vpop.f32.mrf.mxu1  ;;  %v782_v22 = vpop.permute.xlu1 %781 }
  0xe2   : > { %v408_v25 = vpop.f32.mrf.mxu0  ;;  %v518_v41 = vadd.f32 %v2531_v24, %v2515_v23 }
  0xe3   : > { %v509_v27 = vpop.f32.mrf.mxu1 }
  0xe4   : > { %v2518_v26 = vpop.f32.mrf.mxu0  ;;  %v510_v47 = vadd.f32 %v509_v27, %v408_v25 }
  0xe5   : > { %v2534_v30 = vpop.f32.mrf.mxu1 }
  0xe6   : > { %v421_v28 = vpop.f32.mrf.mxu0  ;;  %v531_v54 = vadd.f32 %v2534_v30, %v2518_v26 }
  0xe7   : > { %v522_v39 = vpop.f32.mrf.mxu1 }
  0xe8   : > { %v2519_v29 = vpop.f32.mrf.mxu0  ;;  %v523_v59 = vadd.f32 %v522_v39, %v421_v28 }
  0xe9   : > { %v2535_v52 = vpop.f32.mrf.mxu1 }
  0xea   : > { %v424_v31 = vpop.f32.mrf.mxu0  ;;  %v534_v2 = vadd.f32 %v2535_v52, %v2519_v29 }
  0xeb   : > { %v525_v63 = vpop.f32.mrf.mxu1 }
  0xec   : > { %v2546_v35 = vpop.f32.mrf.mxu0  ;;  %v526_v8 = vadd.f32 %v525_v63, %v424_v31 }
  0xed   : > { %v661_v38 = vadd.f32 %v2546_v35, %v515_v34 }
  0xee   : > { %v628_v40 = vpop.f32.mrf.mxu0 }
  0xef   : > { %v676_v42 = vadd.f32 %v2253_v36, %v661_v38  ;;  %v659_v43 = vadd.f32 %v628_v40, %v507_v37 }
  0xf0   : > { %v2547_v44 = vpop.f32.mrf.mxu0 }
  0xf1   : > { %v684_v48 = vmax.f32 %v676_v42, 0.0  ;;  %v674_v49 = vadd.f32 %v2253_v36, %v659_v43  ;;  %v662_v51 = vadd.f32 %v2547_v44, %v518_v41  ;;  %v1017_v41 = vpop.permute.xlu0 %1016  ;;  %v1022_v42 = vpop.permute.xlu1 %1021 }
  0xf2   : > { %v631_v53 = vpop.f32.mrf.mxu0 }
  0xf3   : > { %692 = vst.msk [vmem:[#allocation3 + $0x18] sm:$0xff] %vm280_vm0, %v684_v48  ;;  %v682_v55 = vmax.f32 %v674_v49, 0.0  ;;  %v677_v56 = vadd.f32 %v2253_v36, %v662_v51  ;;  %v660_v57 = vadd.f32 %v631_v53, %v510_v47  ;;  %v2730_v48 = vld [vmem:[%s3236_s2 + $0x48] sm:$0xff]  }
  0xf4   : > { %v2550_v58 = vpop.f32.mrf.mxu0 }
  0xf5   : > { %690 = vst.msk [vmem:[#allocation3 + $0x8] sm:$0xff] %vm280_vm0, %v682_v55  ;;  %v685_v60 = vmax.f32 %v677_v56, 0.0  ;;  %v675_v61 = vadd.f32 %v2253_v36, %v660_v57  ;;  %v665_v62 = vadd.f32 %v2550_v58, %v531_v54 }
  0xf6   : > { %v644_v0 = vpop.f32.mrf.mxu0 }
  0xf7   : > { %693 = vst.msk [vmem:[#allocation3 + $0x20] sm:$0xff] %vm280_vm0, %v685_v60  ;;  %v683_v3 = vmax.f32 %v675_v61, 0.0  ;;  %v680_v4 = vadd.f32 %v2253_v36, %v665_v62  ;;  %v663_v5 = vadd.f32 %v644_v0, %v523_v59  ;;  %v1027_v61 = vpop.permute.xlu0 %1026 }
  0xf8   : > { %v2551_v7 = vpop.f32.mrf.mxu0 }
  0xf9   : > { %691 = vst.msk [vmem:[#allocation3 + $0x10] sm:$0xff] %vm280_vm0, %v683_v3  ;;  %v688_v9 = vmax.f32 %v680_v4, 0.0  ;;  %v678_v10 = vadd.f32 %v2253_v36, %v663_v5  ;;  %v666_v11 = vadd.f32 %v2551_v7, %v534_v2 }
  0xfa   : > { %v647_v12 = vpop.f32.mrf.mxu0  ;;  %v717_v34 = vld [vmem:[#allocation3 + $0x18] sm:$0xff] }
  0xfb   : > { %696 = vst.msk [vmem:[#allocation3 + $0x38] sm:$0xff] %vm280_vm0, %v688_v9  ;;  %v686_v13 = vmax.f32 %v678_v10, 0.0  ;;  %v681_v14 = vadd.f32 %v2253_v36, %v666_v11  ;;  %v664_v15 = vadd.f32 %v647_v12, %v526_v8  ;;  %v1037_v7 = vpop.permute.xlu0 %1036 }
  0xfc   : > { %v736_v20 = vld [vmem:[#allocation3 + $0x7] sm:$0xff] }
  0xfd   : > { %694 = vst.msk [vmem:[#allocation3 + $0x28] sm:$0xff] %vm280_vm0, %v686_v13  ;;  %v689_v16 = vmax.f32 %v681_v14, 0.0  ;;  %v679_v18 = vadd.f32 %v2253_v36, %v664_v15  ;;  %v715_v25 = vld [vmem:[#allocation3 + $0x8] sm:$0xff]  ;;  %v784_v29 = vmul.f32 %v3024_v32, %v736_v20  ;;  %v2729_v32 = vld [vmem:[%s3236_s2 + $0x50] sm:$0xff]  }
  0xfe   : > { %v739_v23 = vld [vmem:[#allocation3 + $0x1f] sm:$0xff] }
  0xff   : > { %697 = vst.msk [vmem:[#allocation3 + $0x40] sm:$0xff] %vm280_vm0, %v689_v16  ;;  %v687_v24 = vmax.f32 %v679_v18, 0.0  ;;  %v718_v26 = vld [vmem:[#allocation3 + $0x20] sm:$0xff]  ;;  %v787_v37 = vmul.f32 %v762_v46, %v739_v23  ;;  %v1047_v18 = vpop.permute.xlu0 %1046 }
 0x100   : > { %v716_v27 = vld [vmem:[#allocation3 + $0x10] sm:$0xff]  ;;  %v724_v38 = vpack.c.bf16 %v718_v26, %v717_v34  ;;  %v2734_v26 = vld [vmem:[%s3237_s3 + $0x10] sm:$0xff]   ;;  %v3090_v34 = vld [vmem:[%s3237_s3 + $0x58] sm:$0xff]  }
 0x101   : > { %v737_v28 = vld [vmem:[#allocation3 + $0xf] sm:$0xff]  ;;  %v738_v30 = vld [vmem:[#allocation3 + $0x17] sm:$0xff]  ;;  %695 = vst.msk [vmem:[#allocation3 + $0x30] sm:$0xff] %vm280_vm0, %v687_v24  ;;  %v723_v31 = vpack.c.bf16 %v716_v27, %v715_v25  ;;  %v2735_v27 = vld [vmem:[%s3237_s3 + $0x30] sm:$0xff]  }
 0x102   : > { %v785_v35 = vmul.f32 %v752_v45, %v737_v28  ;;  %v786_v36 = vmul.f32 %v3026_v33, %v738_v30  ;;  %v1006_v44 = vld [vmem:[#allocation3 + $0x9] sm:$0xff]  ;;  %v1007_v45 = vld [vmem:[#allocation3 + $0x11] sm:$0xff] }
 0x103   : > { %2576 = vmatprep.mubr.msk.bf16.mxu0 %vm280_vm0, %v723_v31  ;;  %v1054_v54 = vmul.f32 %v1017_v41, %v1006_v44  ;;  %v1055_v55 = vmul.f32 %v1022_v42, %v1007_v45  ;;  %v721_v57 = vld [vmem:[#allocation3 + $0x38] sm:$0xff]  ;;  %v2732_v24 = vld [vmem:[%s3237_s3 + $0x18] sm:$0xff]   ;;  %v2738_v30 = vld [vmem:[%s3237_s3] sm:$0xff]  }
 0x104   : > { %v792_v39 = vpack.c.bf16 %v785_v35, %v784_v29  ;;  %v793_v40 = vpack.c.bf16 %v787_v37, %v786_v36  ;;  %2577 = vmatmul.mubr.msk.bf16.vlgmr.msra.gmra.mxu0 %vm280_vm0, %v724_v38  ;;  %v740_v43 = vld [vmem:[#allocation3 + $0x27] sm:$0xff]  ;;  %2600 = vmatprep.subr.bf16.mxu0 %v2732_v24  ;;  %v2736_v28 = vld [vmem:[%s3237_s3 + $0x8] sm:$0xff]   ;;  %v2739_v31 = vld [vmem:[%s3237_s3 + $0x20] sm:$0xff]  }
 0x105   : > { %v719_v46 = vld [vmem:[#allocation3 + $0x28] sm:$0xff]  ;;  %v788_v52 = vmul.f32 %v767_v1, %v740_v43  ;;  %v2731_v1 = vld [vmem:[%s3236_s2 + $0x40] sm:$0xff]   ;;  %v1062_v2 = vpack.c.bf16 %v1055_v55, %v1054_v54  ;;  %2601 = vmatpush3.bf16.msra.mxu0 %v2732_v24  ;;  %v2737_v29 = vld [vmem:[%s3237_s3 + $0x28] sm:$0xff]  }
 0x106   : > { %2560 = vmatprep.mubr.msk.bf16.mxu1 %vm280_vm0, %v792_v39  ;;  %v743_v33 = vld [vmem:[#allocation3 + $0x3f] sm:$0xff]  ;;  %v2733_v25 = vld [vmem:[%s3237_s3 + $0x38] sm:$0xff]   ;;  %2602 = vmatprep.subr.bf16.mxu0 %v2734_v26 }
 0x107   : > { %2561 = vmatmul.mubr.msk.bf16.vlgmr.msra.gmra.mxu1 %vm280_vm0, %v793_v40  ;;  %v722_v47 = vld [vmem:[#allocation3 + $0x40] sm:$0xff]  ;;  %v791_v60 = vmul.f32 %v782_v22, %v743_v33 }
 0x108   : > { %2585 = vmatpush3.bf16.msra.mxu1 %v3021_v17  ;;  %v720_v49 = vld [vmem:[#allocation3 + $0x30] sm:$0xff]  ;;  %v1032_v17 = vpop.permute.xlu1 %1031  ;;  %v726_v62 = vpack.c.bf16 %v722_v47, %v721_v57  ;;  %v1009_v3 = vld [vmem:[#allocation3 + $0x21] sm:$0xff]  ;;  %v1012_v15 = vld [vmem:[#allocation3 + $0x39] sm:$0xff] }
 0x109   : > { %2586 = vmatprep.subr.bf16.mxu1 %v2729_v32  ;;  %v741_v51 = vld [vmem:[#allocation3 + $0x2f] sm:$0xff]  ;;  %v742_v53 = vld [vmem:[#allocation3 + $0x37] sm:$0xff]  ;;  %v725_v56 = vpack.c.bf16 %v720_v49, %v719_v46  ;;  %v1057_v9 = vmul.f32 %v1032_v17, %v1009_v3  ;;  %v1013_v16 = vld [vmem:[#allocation3 + $0x41] sm:$0xff]  ;;  %2603 = vmatpush3.bf16.msra.mxu0 %v2734_v26 }
 0x10a   : > { %v789_v58 = vmul.f32 %v772_v6, %v741_v51  ;;  %v790_v59 = vmul.f32 %v777_v21, %v742_v53  ;;  %v1010_v4 = vld [vmem:[#allocation3 + $0x29] sm:$0xff]  ;;  %v1011_v5 = vld [vmem:[#allocation3 + $0x31] sm:$0xff]  ;;  %v1008_v6 = vld [vmem:[#allocation3 + $0x19] sm:$0xff]  ;;  %v1060_v21 = vmul.f32 %v1047_v18, %v1012_v15  ;;  %2604 = vmatprep.subr.bf16.mxu0 %v2736_v28 }
 0x10b   : > { %2580 = vmatprep.mubr.msk.bf16.mxu0 %vm280_vm0, %v725_v56  ;;  %v1058_v10 = vmul.f32 %v1037_v7, %v1010_v4  ;;  %v1056_v12 = vmul.f32 %v1027_v61, %v1008_v6 }
 0x10c   : > { %2587 = vmatpush3.bf16.msra.mxu1 %v2729_v32  ;;  %v794_v63 = vpack.c.bf16 %v789_v58, %v788_v52  ;;  %v795_v0 = vpack.c.bf16 %v791_v60, %v790_v59  ;;  %2581 = vmatmul.mubr.msk.bf16.gmra.mxu0 %vm280_vm0, %v726_v62  ;;  %v1042_v8 = vpop.permute.xlu1 %1041 }
 0x10d   : > { %2588 = vmatprep.subr.bf16.mxu1 %v2730_v48  ;;  %v1059_v11 = vmul.f32 %v1042_v8, %v1011_v5  ;;  %v1063_v13 = vpack.c.bf16 %v1057_v9, %v1056_v12  ;;  %2605 = vmatpush3.bf16.msra.mxu0 %v2736_v28 }
 0x10e   : > { %2564 = vmatprep.mubr.msk.bf16.mxu1 %vm280_vm0, %v794_v63  ;;  %2606 = vmatprep.subr.bf16.mxu0 %v2738_v30 }
 0x10f   : > { %2565 = vmatmul.mubr.msk.bf16.gmra.mxu1 %vm280_vm0, %v795_v0  ;;  %v1064_v14 = vpack.c.bf16 %v1059_v11, %v1058_v10 }
 0x110   : > { %2589 = vmatpush3.bf16.msra.mxu1 %v2730_v48  ;;  %2592 = vmatprep.mubr.msk.bf16.mxu1 %vm280_vm0, %v1062_v2  ;;  %v1052_v20 = vpop.permute.xlu1 %1051  ;;  %v2303_v48 = vld [vmem:[%s3239_s5 + $0x1] ss:$0 sm:$0xff] }
 0x111   : > { %2590 = vmatprep.subr.bf16.mxu1 %v2731_v1  ;;  %v1061_v22 = vmul.f32 %v1052_v20, %v1013_v16  ;;  %2607 = vmatpush3.bf16.msra.mxu0 %v2738_v30 }
 0x112   : > { %2632 = vmatprep.subr.bf16.mxu0 %v3090_v34 }
 0x113   : > { %v1065_v23 = vpack.c.bf16 %v1061_v22, %v1060_v21 }
 0x114   : > { %2591 = vmatpush3.bf16.msra.mxu1 %v2731_v1 }
 0x115   : > { %2616 = vmatprep.subr.bf16.mxu1 %v2733_v25 }
 0x117   : > { %2593 = vmatmul.mubr.msk.bf16.vlgmr.msra.gmra.mxu1 %vm280_vm0, %v1063_v13 }
 0x118   : > { %2596 = vmatprep.mubr.msk.bf16.mxu1 %vm280_vm0, %v1064_v14  ;;  %2617 = vmatpush3.bf16.msra.mxu1 %v2733_v25 }
 0x119   : > { %2618 = vmatprep.subr.bf16.mxu1 %v2735_v27 }
 0x11c   : > { %2619 = vmatpush3.bf16.msra.mxu1 %v2735_v27 }
 0x11d   : > { %2620 = vmatprep.subr.bf16.mxu1 %v2737_v29 }
 0x11f   : > { %2597 = vmatmul.mubr.msk.bf16.gmra.mxu1 %vm280_vm0, %v1065_v23 }
 0x120   : > { %2621 = vmatpush3.bf16.msra.mxu1 %v2737_v29 }
 0x121   : > { %2622 = vmatprep.subr.bf16.mxu1 %v2739_v31 }
 0x124   : > { %2623 = vmatpush3.bf16.msra.mxu1 %v2739_v31 }
 0x1c4   : > { %v2578_v35 = vpop.f32.mrf.mxu0 }
 0x1c6   : > { %v975_v38 = vpop.f32.mrf.mxu0 }
 0x1c7   : > { %v2562_v36 = vpop.f32.mrf.mxu1 }
 0x1c8   : > { %v2579_v41 = vpop.f32.mrf.mxu0  ;;  %v984_v33 = vadd.f32 %v2578_v35, %v2562_v36 }
 0x1c9   : > { %v874_v37 = vpop.f32.mrf.mxu1 }
 0x1ca   : > { %v978_v43 = vpop.f32.mrf.mxu0  ;;  %v976_v49 = vadd.f32 %v975_v38, %v874_v37  ;;  %v2741_v38 = vld [vmem:[%s3237_s3 + $0x50] sm:$0xff]  }
 0x1cb   : > { %v2563_v39 = vpop.f32.mrf.mxu1 }
 0x1cc   : > { %v2582_v46 = vpop.f32.mrf.mxu0  ;;  %v987_v53 = vadd.f32 %v2579_v41, %v2563_v39  ;;  %v2742_v41 = vld [vmem:[%s3237_s3 + $0x48] sm:$0xff]  }
 0x1cd   : > { %v877_v40 = vpop.f32.mrf.mxu1 }
 0x1ce   : > { %v991_v56 = vpop.f32.mrf.mxu0  ;;  %v979_v58 = vadd.f32 %v978_v43, %v877_v40 }
 0x1cf   : > { %v2566_v42 = vpop.f32.mrf.mxu1 }
 0x1d0   : > { %v1000_v62 = vadd.f32 %v2582_v46, %v2566_v42  ;;  %v2583_v2 = vpop.f32.mrf.mxu0 }
 0x1d1   : > { %v890_v32 = vpop.f32.mrf.mxu1 }
 0x1d2   : > { %v992_v4 = vadd.f32 %v991_v56, %v890_v32  ;;  %v994_v13 = vpop.f32.mrf.mxu0 }
 0x1d3   : > { %v2567_v44 = vpop.f32.mrf.mxu1 }
 0x1d4   : > { %v1003_v9 = vadd.f32 %v2583_v2, %v2567_v44 }
 0x1d5   : > { %v893_v45 = vpop.f32.mrf.mxu1 }
 0x1d6   : > { %v995_v15 = vadd.f32 %v994_v13, %v893_v45 }
 0x1d7   : > { %v2594_v47 = vpop.f32.mrf.mxu1 }
 0x1d8   : > { %v1178_v51 = vadd.f32 %v2594_v47, %v984_v33  ;;  %v2744_v47 = vld [vmem:[%s3238_s4 + $0x38] sm:$0xff]  }
 0x1d9   : > { %v1145_v52 = vpop.f32.mrf.mxu1 }
 0x1da   : > { %v1194_v54 = vadd.f32 %v2303_v48, %v1178_v51  ;;  %v1176_v55 = vadd.f32 %v1145_v52, %v976_v49  ;;  %v2746_v49 = vld [vmem:[%s3238_s4 + $0x30] sm:$0xff]   ;;  %v2748_v51 = vld [vmem:[%s3238_s4 + $0x28] sm:$0xff]  }
 0x1db   : > { %v2595_v57 = vpop.f32.mrf.mxu1  ;;  %v2749_v52 = vld [vmem:[%s3238_s4 + $0x8] sm:$0xff]  }
 0x1dc   : > { %v1202_v59 = vmax.f32 %v1194_v54, 0.0  ;;  %v1192_v60 = vadd.f32 %v2303_v48, %v1176_v55  ;;  %v1179_v61 = vadd.f32 %v2595_v57, %v987_v53  ;;  %v2750_v53 = vld [vmem:[%s3238_s4 + $0x20] sm:$0xff]   ;;  %v3155_v55 = vld [vmem:[%s3238_s4 + $0x58] sm:$0xff]  }
 0x1dd   : > { %v1148_v17 = vpop.f32.mrf.mxu1  ;;  %v2751_v54 = vld [vmem:[%s3238_s4] sm:$0xff]  }
 0x1de   : > { %1210 = vst.msk [vmem:[#allocation2 + $0x18] sm:$0xff] %vm280_vm0, %v1202_v59  ;;  %v1200_v63 = vmax.f32 %v1192_v60, 0.0  ;;  %v1195_v0 = vadd.f32 %v2303_v48, %v1179_v61  ;;  %v1177_v1 = vadd.f32 %v1148_v17, %v979_v58 }
 0x1df   : > { %v2598_v3 = vpop.f32.mrf.mxu1 }
 0x1e0   : > { %1208 = vst.msk [vmem:[#allocation2 + $0x8] sm:$0xff] %vm280_vm0, %v1200_v63  ;;  %v1203_v5 = vmax.f32 %v1195_v0, 0.0  ;;  %v1193_v6 = vadd.f32 %v2303_v48, %v1177_v1  ;;  %v1182_v7 = vadd.f32 %v2598_v3, %v1000_v62 }
 0x1e1   : > { %v1161_v8 = vpop.f32.mrf.mxu1 }
 0x1e2   : > { %1211 = vst.msk [vmem:[#allocation2 + $0x20] sm:$0xff] %vm280_vm0, %v1203_v5  ;;  %v1201_v10 = vmax.f32 %v1193_v6, 0.0  ;;  %v1198_v11 = vadd.f32 %v2303_v48, %v1182_v7  ;;  %v1180_v12 = vadd.f32 %v1161_v8, %v992_v4  ;;  %v3158_v4 = vpop.permute.xlu0 %1663  ;;  %v3160_v5 = vpop.permute.xlu1 %1668  ;;  %v2345_v8 = vld [vmem:[%s3239_s5 + $0x2] ss:$0 sm:$0xff] }
 0x1e3   : > { %v2599_v14 = vpop.f32.mrf.mxu1 }
 0x1e4   : > { %1209 = vst.msk [vmem:[#allocation2 + $0x10] sm:$0xff] %vm280_vm0, %v1201_v10  ;;  %v1206_v16 = vmax.f32 %v1198_v11, 0.0  ;;  %v1196_v18 = vadd.f32 %v2303_v48, %v1180_v12  ;;  %v1183_v20 = vadd.f32 %v2599_v14, %v1003_v9 }
 0x1e5   : > { %v1164_v21 = vpop.f32.mrf.mxu1  ;;  %v1218_v35 = vld [vmem:[#allocation2 + $0x18] sm:$0xff] }
 0x1e6   : > { %1214 = vst.msk [vmem:[#allocation2 + $0x38] sm:$0xff] %vm280_vm0, %v1206_v16  ;;  %v1204_v22 = vmax.f32 %v1196_v18, 0.0  ;;  %v1199_v23 = vadd.f32 %v2303_v48, %v1183_v20  ;;  %v1181_v24 = vadd.f32 %v1164_v21, %v995_v15  ;;  %v1674_v18 = vpop.permute.xlu0 %1673  ;;  %v1679_v20 = vpop.permute.xlu1 %1678 }
 0x1e7   : > { %v1216_v25 = vld [vmem:[#allocation2 + $0x8] sm:$0xff] }
 0x1e8   : > { %1212 = vst.msk [vmem:[#allocation2 + $0x28] sm:$0xff] %vm280_vm0, %v1204_v22  ;;  %v1207_v26 = vmax.f32 %v1199_v23, 0.0  ;;  %v1197_v27 = vadd.f32 %v2303_v48, %v1181_v24  ;;  %v1238_v28 = vpack.c.bf16 %v1216_v25, %v2871_v19  ;;  %v2745_v48 = vld [vmem:[%s3238_s4 + $0x18] sm:$0xff]  }
 0x1e9   : > { %v1219_v30 = vld [vmem:[#allocation2 + $0x20] sm:$0xff]  ;;  %2648 = vmatprep.subr.bf16.mxu1 %v2745_v48 }
 0x1ea   : > { %1215 = vst.msk [vmem:[#allocation2 + $0x40] sm:$0xff] %vm280_vm0, %v1207_v26  ;;  %v1205_v29 = vmax.f32 %v1197_v27, 0.0  ;;  %2608 = vmatprep.mubr.msk.bf16.mxu0 %vm280_vm0, %v1238_v28  ;;  %v1225_v39 = vpack.c.bf16 %v1219_v30, %v1218_v35 }
 0x1eb   : > { %v1217_v31 = vld [vmem:[#allocation2 + $0x10] sm:$0xff] }
 0x1ec   : > { %1213 = vst.msk [vmem:[#allocation2 + $0x30] sm:$0xff] %vm280_vm0, %v1205_v29  ;;  %v1239_v36 = vpack.c.bf16 %v1218_v35, %v1217_v31  ;;  %v1224_v37 = vpack.c.bf16 %v1217_v31, %v1216_v25 }
 0x1ed   : > { %v1222_v43 = vld [vmem:[#allocation2 + $0x38] sm:$0xff] }
 0x1ee   : > { %2609 = vmatmul.mubr.msk.bf16.vlgmr.msra.gmra.mxu0 %vm280_vm0, %v1239_v36  ;;  %2624 = vmatprep.mubr.msk.bf16.mxu1 %vm280_vm0, %v1224_v37 }
 0x1ef   : > { %2625 = vmatmul.mubr.msk.bf16.vlgmr.msra.gmra.mxu1 %vm280_vm0, %v1225_v39  ;;  %2633 = vmatpush3.bf16.msra.mxu0 %v3090_v34  ;;  %v1220_v19 = vld [vmem:[#allocation2 + $0x28] sm:$0xff]  ;;  %v2743_v34 = vld [vmem:[%s3237_s3 + $0x40] sm:$0xff]  }
 0x1f0   : > { %v1240_v40 = vpack.c.bf16 %v1220_v19, %v1219_v30  ;;  %2634 = vmatprep.subr.bf16.mxu0 %v2741_v38  ;;  %2649 = vmatpush3.bf16.msra.mxu1 %v2745_v48 }
 0x1f1   : > { %v1223_v42 = vld [vmem:[#allocation2 + $0x40] sm:$0xff] }
 0x1f2   : > { %2612 = vmatprep.mubr.msk.bf16.mxu0 %vm280_vm0, %v1240_v40  ;;  %v1227_v33 = vpack.c.bf16 %v1223_v42, %v1222_v43  ;;  %v1463_v46 = vpack.c.bf16 %v2925_v50, %v1223_v42  ;;  %v2747_v50 = vld [vmem:[%s3238_s4 + $0x10] sm:$0xff]  }
 0x1f3   : > { %2635 = vmatpush3.bf16.msra.mxu0 %v2741_v38  ;;  %v1221_v32 = vld [vmem:[#allocation2 + $0x30] sm:$0xff]  ;;  %2650 = vmatprep.subr.bf16.mxu1 %v2747_v50 }
 0x1f4   : > { %v1241_v44 = vpack.c.bf16 %v1222_v43, %v1221_v32  ;;  %v1226_v45 = vpack.c.bf16 %v1221_v32, %v1220_v19  ;;  %2636 = vmatprep.subr.bf16.mxu0 %v2742_v41  ;;  %2651 = vmatpush3.bf16.msra.mxu1 %v2747_v50 }
 0x1f5   : > { %2652 = vmatprep.subr.bf16.mxu1 %v2749_v52 }
 0x1f6   : > { %2613 = vmatmul.mubr.msk.bf16.gmra.mxu0 %vm280_vm0, %v1241_v44  ;;  %2628 = vmatprep.mubr.msk.bf16.mxu1 %vm280_vm0, %v1226_v45 }
 0x1f7   : > { %2629 = vmatmul.mubr.msk.bf16.gmra.mxu1 %vm280_vm0, %v1227_v33  ;;  %2637 = vmatpush3.bf16.msra.mxu0 %v2742_v41 }
 0x1f8   : > { %2640 = vmatprep.mubr.msk.bf16.mxu0 %vm280_vm0, %v1239_v36  ;;  %2638 = vmatprep.subr.bf16.mxu0 %v2743_v34 }
 0x1f9   : > { %2653 = vmatpush3.bf16.msra.mxu1 %v2749_v52 }
 0x1fa   : > { %2654 = vmatprep.subr.bf16.mxu1 %v2751_v54 }
 0x1fb   : > { %2639 = vmatpush3.bf16.msra.mxu0 %v2743_v34 }
 0x1fc   : > { %2664 = vmatprep.subr.bf16.mxu0 %v2744_v47 }
 0x1fd   : > { %2655 = vmatpush3.bf16.msra.mxu1 %v2751_v54 }
 0x1fe   : > { %2641 = vmatmul.mubr.msk.bf16.vlgmr.msra.gmra.mxu0 %vm280_vm0, %v1240_v40  ;;  %2680 = vmatprep.subr.bf16.mxu1 %v3155_v55  ;;  %v1684_v40 = vpop.permute.xlu0 %1683 }
 0x1ff   : > { %2644 = vmatprep.mubr.msk.bf16.mxu0 %vm280_vm0, %v1241_v44  ;;  %2665 = vmatpush3.bf16.msra.mxu0 %v2744_v47  ;;  %v1689_v44 = vpop.permute.xlu1 %1688 }
 0x200   : > { %2666 = vmatprep.subr.bf16.mxu0 %v2746_v49 }
 0x203   : > { %2667 = vmatpush3.bf16.msra.mxu0 %v2746_v49 }
 0x204   : > { %2668 = vmatprep.subr.bf16.mxu0 %v2748_v51 }
 0x206   : > { %2645 = vmatmul.mubr.msk.bf16.gmra.mxu0 %vm280_vm0, %v1463_v46 }
 0x207   : > { %2669 = vmatpush3.bf16.msra.mxu0 %v2748_v51 }
 0x208   : > { %2670 = vmatprep.subr.bf16.mxu0 %v2750_v53 }
 0x20b   : > { %2671 = vmatpush3.bf16.msra.mxu0 %v2750_v53 }
 0x2ae   : > { %v2610_v56 = vpop.f32.mrf.mxu0 }
 0x2af   : > { %v2626_v57 = vpop.f32.mrf.mxu1 }
 0x2b0   : > { %v1320_v58 = vpop.f32.mrf.mxu0  ;;  %v1430_v6 = vadd.f32 %v2626_v57, %v2610_v56  ;;  %v1694_v56 = vpop.permute.xlu0 %1693 }
 0x2b1   : > { %v1421_v59 = vpop.f32.mrf.mxu1  ;;  %v1699_v57 = vpop.permute.xlu1 %1698 }
 0x2b2   : > { %v2611_v60 = vpop.f32.mrf.mxu0  ;;  %v1422_v9 = vadd.f32 %v1421_v59, %v1320_v58 }
 0x2b3   : > { %v2627_v61 = vpop.f32.mrf.mxu1 }
 0x2b4   : > { %v1323_v17 = vpop.f32.mrf.mxu0  ;;  %v1433_v13 = vadd.f32 %v2627_v61, %v2611_v60 }
 0x2b5   : > { %v1424_v63 = vpop.f32.mrf.mxu1 }
 0x2b6   : > { %v2614_v62 = vpop.f32.mrf.mxu0  ;;  %v1425_v21 = vadd.f32 %v1424_v63, %v1323_v17 }
 0x2b7   : > { %v2630_v2 = vpop.f32.mrf.mxu1 }
 0x2b8   : > { %v1336_v0 = vpop.f32.mrf.mxu0  ;;  %v1446_v27 = vadd.f32 %v2630_v2, %v2614_v62 }
 0x2b9   : > { %v1437_v11 = vpop.f32.mrf.mxu1 }
 0x2ba   : > { %v2615_v1 = vpop.f32.mrf.mxu0  ;;  %v1438_v35 = vadd.f32 %v1437_v11, %v1336_v0  ;;  %v1934_v11 = vpop.permute.xlu0 %1933 }
 0x2bb   : > { %v2631_v25 = vpop.f32.mrf.mxu1 }
 0x2bc   : > { %v1339_v3 = vpop.f32.mrf.mxu0  ;;  %v1449_v41 = vadd.f32 %v2631_v25, %v2615_v1 }
 0x2bd   : > { %v1440_v39 = vpop.f32.mrf.mxu1 }
 0x2be   : > { %v2642_v7 = vpop.f32.mrf.mxu0  ;;  %v1441_v34 = vadd.f32 %v1440_v39, %v1339_v3  ;;  %v2755_v39 = vld [vmem:[%s3238_s4 + $0x40] sm:$0xff]  }
 0x2bf   : > { %v1576_v10 = vadd.f32 %v2642_v7, %v1430_v6 }
 0x2c0   : > { %v1543_v12 = vpop.f32.mrf.mxu0 }
 0x2c1   : > { %v1592_v14 = vadd.f32 %v2345_v8, %v1576_v10  ;;  %v1574_v15 = vadd.f32 %v1543_v12, %v1422_v9  ;;  %v1939_v12 = vpop.permute.xlu1 %1938 }
 0x2c2   : > { %v2643_v16 = vpop.f32.mrf.mxu0 }
 0x2c3   : > { %v1600_v22 = vmax.f32 %v1592_v14, 0.0  ;;  %v1590_v23 = vadd.f32 %v2345_v8, %v1574_v15  ;;  %v1577_v24 = vadd.f32 %v2643_v16, %v1433_v13 }
 0x2c4   : > { %v1546_v26 = vpop.f32.mrf.mxu0 }
 0x2c5   : > { %1608 = vst.msk [vmem:[#allocation3 + $0x18] sm:$0xff] %vm280_vm0, %v1600_v22  ;;  %v1598_v28 = vmax.f32 %v1590_v23, 0.0  ;;  %v1593_v29 = vadd.f32 %v2345_v8, %v1577_v24  ;;  %v1575_v30 = vadd.f32 %v1546_v26, %v1425_v21 }
 0x2c6   : > { %v2646_v31 = vpop.f32.mrf.mxu0 }
 0x2c7   : > { %1606 = vst.msk [vmem:[#allocation3 + $0x8] sm:$0xff] %vm280_vm0, %v1598_v28  ;;  %v1601_v36 = vmax.f32 %v1593_v29, 0.0  ;;  %v1591_v37 = vadd.f32 %v2345_v8, %v1575_v30  ;;  %v1580_v38 = vadd.f32 %v2646_v31, %v1446_v27 }
 0x2c8   : > { %v1559_v19 = vpop.f32.mrf.mxu0 }
 0x2c9   : > { %1609 = vst.msk [vmem:[#allocation3 + $0x20] sm:$0xff] %vm280_vm0, %v1601_v36  ;;  %v1599_v42 = vmax.f32 %v1591_v37, 0.0  ;;  %v1596_v32 = vadd.f32 %v2345_v8, %v1580_v38  ;;  %v1578_v43 = vadd.f32 %v1559_v19, %v1438_v35  ;;  %v1944_v35 = vpop.permute.xlu0 %1943 }
 0x2ca   : > { %v2647_v45 = vpop.f32.mrf.mxu0 }
 0x2cb   : > { %1607 = vst.msk [vmem:[#allocation3 + $0x10] sm:$0xff] %vm280_vm0, %v1599_v42  ;;  %v1604_v33 = vmax.f32 %v1596_v32, 0.0  ;;  %v1594_v46 = vadd.f32 %v2345_v8, %v1578_v43  ;;  %v1581_v47 = vadd.f32 %v2647_v45, %v1449_v41 }
 0x2cc   : > { %v1562_v48 = vpop.f32.mrf.mxu0  ;;  %v1634_v2 = vld [vmem:[#allocation3 + $0x18] sm:$0xff] }
 0x2cd   : > { %1612 = vst.msk [vmem:[#allocation3 + $0x38] sm:$0xff] %vm280_vm0, %v1604_v33  ;;  %v1602_v49 = vmax.f32 %v1594_v46, 0.0  ;;  %v1597_v50 = vadd.f32 %v2345_v8, %v1581_v47  ;;  %v1579_v51 = vadd.f32 %v1562_v48, %v1441_v34  ;;  %v1954_v43 = vpop.permute.xlu0 %1953 }
 0x2ce   : > { %v1653_v54 = vld [vmem:[#allocation3 + $0x7] sm:$0xff] }
 0x2cf   : > { %1610 = vst.msk [vmem:[#allocation3 + $0x28] sm:$0xff] %vm280_vm0, %v1602_v49  ;;  %v1605_v52 = vmax.f32 %v1597_v50, 0.0  ;;  %v1595_v53 = vadd.f32 %v2345_v8, %v1579_v51  ;;  %v1632_v60 = vld [vmem:[#allocation3 + $0x8] sm:$0xff]  ;;  %v1701_v63 = vmul.f32 %v3158_v4, %v1653_v54  ;;  %v2753_v4 = vld [vmem:[%s3238_s4 + $0x50] sm:$0xff]  }
 0x2d0   : > { %v1656_v58 = vld [vmem:[#allocation3 + $0x1f] sm:$0xff] }
 0x2d1   : > { %1613 = vst.msk [vmem:[#allocation3 + $0x40] sm:$0xff] %vm280_vm0, %v1605_v52  ;;  %v1603_v59 = vmax.f32 %v1595_v53, 0.0  ;;  %v1635_v61 = vld [vmem:[#allocation3 + $0x20] sm:$0xff]  ;;  %v1704_v7 = vmul.f32 %v1679_v20, %v1656_v58  ;;  %v2754_v20 = vld [vmem:[%s3238_s4 + $0x48] sm:$0xff]   ;;  %v1964_v51 = vpop.permute.xlu0 %1963 }
 0x2d2   : > { %v1633_v17 = vld [vmem:[#allocation3 + $0x10] sm:$0xff]  ;;  %v1641_v8 = vpack.c.bf16 %v1635_v61, %v1634_v2  ;;  %v1925_v32 = vld [vmem:[#allocation3 + $0x19] sm:$0xff] }
 0x2d3   : > { %v1654_v62 = vld [vmem:[#allocation3 + $0xf] sm:$0xff]  ;;  %v1655_v0 = vld [vmem:[#allocation3 + $0x17] sm:$0xff]  ;;  %1611 = vst.msk [vmem:[#allocation3 + $0x30] sm:$0xff] %vm280_vm0, %v1603_v59  ;;  %v1640_v1 = vpack.c.bf16 %v1633_v17, %v1632_v60  ;;  %v1973_v46 = vmul.f32 %v1944_v35, %v1925_v32 }
 0x2d4   : > { %v1702_v3 = vmul.f32 %v3160_v5, %v1654_v62  ;;  %v1703_v6 = vmul.f32 %v1674_v18, %v1655_v0  ;;  %v1923_v14 = vld [vmem:[#allocation3 + $0x9] sm:$0xff]  ;;  %v1924_v5 = vld [vmem:[#allocation3 + $0x11] sm:$0xff] }
 0x2d5   : > { %2672 = vmatprep.mubr.msk.bf16.mxu0 %vm280_vm0, %v1640_v1  ;;  %v1971_v25 = vmul.f32 %v1934_v11, %v1923_v14  ;;  %v1972_v26 = vmul.f32 %v1939_v12, %v1924_v5  ;;  %v1638_v28 = vld [vmem:[#allocation3 + $0x38] sm:$0xff]  ;;  %v2119_v12 = vld [vmem:[%s2844_s18 + $0x10] sm:$0xff] }
 0x2d6   : > { %v1709_v9 = vpack.c.bf16 %v1702_v3, %v1701_v63  ;;  %v1710_v10 = vpack.c.bf16 %v1704_v7, %v1703_v6  ;;  %2673 = vmatmul.mubr.msk.bf16.vlgmr.msra.gmra.mxu0 %vm280_vm0, %v1641_v8  ;;  %v1657_v13 = vld [vmem:[#allocation3 + $0x27] sm:$0xff] }
 0x2d7   : > { %v1636_v16 = vld [vmem:[#allocation3 + $0x28] sm:$0xff]  ;;  %v1705_v23 = vmul.f32 %v1684_v40, %v1657_v13  ;;  %v1979_v19 = vpack.c.bf16 %v1972_v26, %v1971_v25 }
 0x2d8   : > { %2656 = vmatprep.mubr.msk.bf16.mxu1 %vm280_vm0, %v1709_v9  ;;  %v1660_v15 = vld [vmem:[#allocation3 + $0x3f] sm:$0xff]  ;;  %v2403_v9 = vld [vmem:[%s3239_s5 + $0x3] ss:$0 sm:$0xff]  ;;  %v2120_v25 = vld [vmem:[%s2844_s18 + $0x18] sm:$0xff] }
 0x2d9   : > { %2657 = vmatmul.mubr.msk.bf16.vlgmr.msra.gmra.mxu1 %vm280_vm0, %v1710_v10  ;;  %v1639_v18 = vld [vmem:[#allocation3 + $0x40] sm:$0xff]  ;;  %v1708_v31 = vmul.f32 %v1699_v57, %v1660_v15 }
 0x2da   : > { %2681 = vmatpush3.bf16.msra.mxu1 %v3155_v55  ;;  %v1637_v21 = vld [vmem:[#allocation3 + $0x30] sm:$0xff]  ;;  %v1949_v55 = vpop.permute.xlu1 %1948  ;;  %v1643_v36 = vpack.c.bf16 %v1639_v18, %v1638_v28  ;;  %v1926_v40 = vld [vmem:[#allocation3 + $0x21] sm:$0xff]  ;;  %v1929_v49 = vld [vmem:[#allocation3 + $0x39] sm:$0xff] }
 0x2db   : > { %2682 = vmatprep.subr.bf16.mxu1 %v2753_v4  ;;  %v1658_v22 = vld [vmem:[#allocation3 + $0x2f] sm:$0xff]  ;;  %v1659_v24 = vld [vmem:[#allocation3 + $0x37] sm:$0xff]  ;;  %v1642_v27 = vpack.c.bf16 %v1637_v21, %v1636_v16  ;;  %v1974_v45 = vmul.f32 %v1949_v55, %v1926_v40  ;;  %v1930_v50 = vld [vmem:[#allocation3 + $0x41] sm:$0xff]  ;;  %v1977_v53 = vmul.f32 %v1964_v51, %v1929_v49 }
 0x2dc   : > { %v1706_v29 = vmul.f32 %v1689_v44, %v1658_v22  ;;  %v1707_v30 = vmul.f32 %v1694_v56, %v1659_v24  ;;  %v1927_v41 = vld [vmem:[#allocation3 + $0x29] sm:$0xff]  ;;  %v1928_v42 = vld [vmem:[#allocation3 + $0x31] sm:$0xff] }
 0x2dd   : > { %2676 = vmatprep.mubr.msk.bf16.mxu0 %vm280_vm0, %v1642_v27  ;;  %v1975_v34 = vmul.f32 %v1954_v43, %v1927_v41  ;;  %v1980_v47 = vpack.c.bf16 %v1974_v45, %v1973_v46  ;;  %v2117_v16 = vld [vmem:[%s2844_s18] sm:$0xff]  ;;  %v2118_v55 = vld [vmem:[%s2844_s18 + $0x8] sm:$0xff]  ;;  %v2123_v41 = vld [vmem:[%s2844_s18 + $0x30] sm:$0xff] }
 0x2de   : > { %2683 = vmatpush3.bf16.msra.mxu1 %v2753_v4  ;;  %v1711_v37 = vpack.c.bf16 %v1706_v29, %v1705_v23  ;;  %v1712_v38 = vpack.c.bf16 %v1708_v31, %v1707_v30  ;;  %2677 = vmatmul.mubr.msk.bf16.gmra.mxu0 %vm280_vm0, %v1643_v36  ;;  %v1959_v44 = vpop.permute.xlu1 %1958  ;;  %v2121_v46 = vld [vmem:[%s2844_s18 + $0x20] sm:$0xff] }
 0x2df   : > { %2684 = vmatprep.subr.bf16.mxu1 %v2754_v20  ;;  %v1976_v33 = vmul.f32 %v1959_v44, %v1928_v42 }
 0x2e0   : > { %2660 = vmatprep.mubr.msk.bf16.mxu1 %vm280_vm0, %v1711_v37 }
 0x2e1   : > { %2661 = vmatmul.mubr.msk.bf16.gmra.mxu1 %vm280_vm0, %v1712_v38  ;;  %v1981_v48 = vpack.c.bf16 %v1976_v33, %v1975_v34 }
 0x2e2   : > { %2685 = vmatpush3.bf16.msra.mxu1 %v2754_v20  ;;  %2688 = vmatprep.mubr.msk.bf16.mxu1 %vm280_vm0, %v1979_v19  ;;  %v1969_v52 = vpop.permute.xlu1 %1968 }
 0x2e3   : > { %2686 = vmatprep.subr.bf16.mxu1 %v2755_v39  ;;  %v1978_v54 = vmul.f32 %v1969_v52, %v1930_v50  ;;  %v2124_v52 = vld [vmem:[%s2844_s18 + $0x38] sm:$0xff] }
 0x2e5   : > { %v1982_v56 = vpack.c.bf16 %v1978_v54, %v1977_v53 }
 0x2e6   : > { %2687 = vmatpush3.bf16.msra.mxu1 %v2755_v39 }
 0x2e9   : > { %2689 = vmatmul.mubr.msk.bf16.vlgmr.msra.gmra.mxu1 %vm280_vm0, %v1980_v47 }
 0x2ea   : > { %2692 = vmatprep.mubr.msk.bf16.mxu1 %vm280_vm0, %v1981_v48 }
 0x2f1   : > { %2693 = vmatmul.mubr.msk.bf16.gmra.mxu1 %vm280_vm0, %v1982_v56 }
 0x396   : > { %v2674_v57 = vpop.f32.mrf.mxu0 }
 0x398   : > { %v1892_v60 = vpop.f32.mrf.mxu0 }
 0x399   : > { %v2658_v58 = vpop.f32.mrf.mxu1 }
 0x39a   : > { %v2675_v62 = vpop.f32.mrf.mxu0  ;;  %v1901_v6 = vadd.f32 %v2674_v57, %v2658_v58 }
 0x39b   : > { %v1791_v59 = vpop.f32.mrf.mxu1 }
 0x39c   : > { %v1895_v1 = vpop.f32.mrf.mxu0  ;;  %v1893_v10 = vadd.f32 %v1892_v60, %v1791_v59  ;;  %v2122_v59 = vld [vmem:[%s2844_s18 + $0x28] sm:$0xff] }
 0x39d   : > { %v2659_v61 = vpop.f32.mrf.mxu1 }
 0x39e   : > { %v2678_v7 = vpop.f32.mrf.mxu0  ;;  %v1904_v13 = vadd.f32 %v2675_v62, %v2659_v61 }
 0x39f   : > { %v1794_v17 = vpop.f32.mrf.mxu1 }
 0x3a0   : > { %v1908_v14 = vpop.f32.mrf.mxu0  ;;  %v1896_v20 = vadd.f32 %v1895_v1, %v1794_v17 }
 0x3a1   : > { %v2662_v63 = vpop.f32.mrf.mxu1 }
 0x3a2   : > { %v1917_v24 = vadd.f32 %v2678_v7, %v2662_v63  ;;  %v2679_v27 = vpop.f32.mrf.mxu0 }
 0x3a3   : > { %v1807_v0 = vpop.f32.mrf.mxu1 }
 0x3a4   : > { %v1909_v35 = vadd.f32 %v1908_v14, %v1807_v0  ;;  %v1911_v32 = vpop.f32.mrf.mxu0 }
 0x3a5   : > { %v2663_v2 = vpop.f32.mrf.mxu1 }
 0x3a6   : > { %v1920_v40 = vadd.f32 %v2679_v27, %v2663_v2 }
 0x3a7   : > { %v1810_v3 = vpop.f32.mrf.mxu1 }
 0x3a8   : > { %v1912_v33 = vadd.f32 %v1911_v32, %v1810_v3 }
 0x3a9   : > { %v2690_v8 = vpop.f32.mrf.mxu1 }
 0x3aa   : > { %v2095_v11 = vadd.f32 %v2690_v8, %v1901_v6 }
 0x3ab   : > { %v2062_v4 = vpop.f32.mrf.mxu1 }
 0x3ac   : > { %v2111_v5 = vadd.f32 %v2403_v9, %v2095_v11  ;;  %v2093_v15 = vadd.f32 %v2062_v4, %v1893_v10 }
 0x3ad   : > { %v2691_v18 = vpop.f32.mrf.mxu1 }
 0x3ae   : > { %v2127_v21 = vadd.f32 %v2119_v12, %v2111_v5  ;;  %v2109_v22 = vadd.f32 %v2403_v9, %v2093_v15  ;;  %v2096_v23 = vadd.f32 %v2691_v18, %v1904_v13 }
 0x3af   : > { %v2065_v26 = vpop.f32.mrf.mxu1 }
 0x3b0   : > { %v2135_v28 = vmax.f32 %v2127_v21, 0.0  ;;  %v2125_v29 = vadd.f32 %v2117_v16, %v2109_v22  ;;  %v2112_v30 = vadd.f32 %v2403_v9, %v2096_v23  ;;  %v2094_v31 = vadd.f32 %v2065_v26, %v1896_v20 }
 0x3b1   : > { %v2694_v36 = vpop.f32.mrf.mxu1 }
 0x3b2   : > { %2143 = vst.msk [vmem:[%s3207_s27 + $0x10] sm:$0xff] %vm280_vm0, %v2135_v28  ;;  %v2133_v37 = vmax.f32 %v2125_v29, 0.0  ;;  %v2128_v38 = vadd.f32 %v2120_v25, %v2112_v30  ;;  %v2110_v39 = vadd.f32 %v2403_v9, %v2094_v31  ;;  %v2099_v19 = vadd.f32 %v2694_v36, %v1917_v24 }
 0x3b3   : > { %v2078_v42 = vpop.f32.mrf.mxu1 }
 0x3b4   : > { %2141 = vst.msk [vmem:[%s3207_s27] sm:$0xff] %vm280_vm0, %v2133_v37  ;;  %v2136_v43 = vmax.f32 %v2128_v38, 0.0  ;;  %v2126_v44 = vadd.f32 %v2118_v55, %v2110_v39  ;;  %v2115_v45 = vadd.f32 %v2403_v9, %v2099_v19  ;;  %v2097_v34 = vadd.f32 %v2078_v42, %v1909_v35 }
 0x3b5   : > { %v2695_v47 = vpop.f32.mrf.mxu1 }
 0x3b6   : > { %2144 = vst.msk [vmem:[%s3207_s27 + $0x18] sm:$0xff] %vm280_vm0, %v2136_v43  ;;  %v2134_v48 = vmax.f32 %v2126_v44, 0.0  ;;  %v2131_v49 = vadd.f32 %v2123_v41, %v2115_v45  ;;  %v2113_v50 = vadd.f32 %v2403_v9, %v2097_v34  ;;  %v2100_v51 = vadd.f32 %v2695_v47, %v1920_v40 }
 0x3b7   : > { %v2081_v53 = vpop.f32.mrf.mxu1 }
 0x3b8   : > { %2142 = vst.msk [vmem:[%s3207_s27 + $0x8] sm:$0xff] %vm280_vm0, %v2134_v48  ;;  %v2139_v54 = vmax.f32 %v2131_v49, 0.0  ;;  %v2129_v56 = vadd.f32 %v2121_v46, %v2113_v50  ;;  %v2116_v57 = vadd.f32 %v2403_v9, %v2100_v51  ;;  %v2098_v58 = vadd.f32 %v2081_v53, %v1912_v33 }
 0x3ba   : > { %2147 = vst.msk [vmem:[%s3207_s27 + $0x30] sm:$0xff] %vm280_vm0, %v2139_v54  ;;  %v2137_v60 = vmax.f32 %v2129_v56, 0.0  ;;  %v2132_v61 = vadd.f32 %v2124_v52, %v2116_v57  ;;  %v2114_v17 = vadd.f32 %v2403_v9, %v2098_v58 }
 0x3bc   : > { %2145 = vst.msk [vmem:[%s3207_s27 + $0x20] sm:$0xff] %vm280_vm0, %v2137_v60  ;;  %v2140_v62 = vmax.f32 %v2132_v61, 0.0  ;;  %v2130_v63 = vadd.f32 %v2122_v59, %v2114_v17 }
 0x3be   : > { %2148 = vst.msk [vmem:[%s3207_s27 + $0x38] sm:$0xff] %vm280_vm0, %v2140_v62  ;;  %v2138_v0 = vmax.f32 %v2130_v63, 0.0 }
 0x3c0   : > { %2146 = vst.msk [vmem:[%s3207_s27 + $0x28] sm:$0xff] %vm280_vm0, %v2138_v0 }
 0x3c1 PF: > { %s17_s24 = sadd.s32 1, %s2762_s24  }
 0x3c2   : > { %p14_p4 = scmp.ge.s32.totalorder %s17_s24, 4  }
 0x3c4   :  { %16 = sbr.rel (!%p14_p4) target bundleno = 1 (0x1), region = 92 }

// kernel: _lambda_.21
= control target key start
LH: loop header
LB: loop body
LE: loop exit
PB: predicated region body
PF: predicated region fallthrough
CT: control target
= control target key end

     0   :  { %s1976_s25 = smov 0   ;;  %s2227_s0 = inlined_call_operand.vmem [shape: f32[32,64], index: 0, kind: input, shape index: {}]   ;;  %s2228_s1 = inlined_call_operand.vmem [shape: f32[32,64], index: 1, kind: input, shape index: {}]   ;;  %s2229_s2 = inlined_call_operand.vmem [shape: f32[32,64], index: 2, kind: input, shape index: {}]   ;;  %s2230_s3 = inlined_call_operand.vmem [shape: f32[32,64], index: 3, kind: input, shape index: {}]   ;;  %s2231_s4 = inlined_call_operand.vmem [shape: f32[32,64], index: 4, kind: input, shape index: {}]   ;;  %s2232_s5 = inlined_call_operand.vmem [shape: f32[32,64], index: 5, kind: input, shape index: {}]   ;;  %s2233_s6 = inlined_call_operand.vmem [shape: f32[32,64], index: 6, kind: input, shape index: {}]   ;;  %s2234_s7 = inlined_call_operand.vmem [shape: f32[32,64], index: 7, kind: input, shape index: {}]   ;;  %s2235_s8 = inlined_call_operand.vmem [shape: f32[32,64], index: 8, kind: input, shape index: {}]   ;;  %s2236_s9 = inlined_call_operand.vmem [shape: bf16[9,64,64], index: 9, kind: input, shape index: {}]   ;;  %s2237_s10 = inlined_call_operand.vmem [shape: f32[1,64], index: 10, kind: input, shape index: {}]   ;;  %s2238_s11 = inlined_call_operand.vmem [shape: f32[1,64], index: 11, kind: input, shape index: {}]   ;;  %s2239_s12 = inlined_call_operand.vmem [shape: f32[1,64], index: 12, kind: input, shape index: {}]   ;;  %s2240_s13 = inlined_call_operand.vmem [shape: f32[32,128], index: 13, kind: output, shape index: {}]  }
   0x1 LB: > { %s1556_s26 = sadd.s32 4294967295, %s1901_s25   ;;  %p1560_p0 = scmp.ge.s32.totalorder %s1901_s25, 1  ;;  %s1901_s25 = sphi %s1976_s25, %s23_s25  }
   0x2   : > { %p476_p1 = scmp.lt.s32.totalorder %s1901_s25, 3 }
   0x4   : > { %p477_p2 = pnand %p1560_p0, %p476_p1 }
   0x5   : > { %s1561_s16 = sshll.u32 (!%p477_p2), %s1556_s26, 1 }
   0x6   : > { %480 = sbr.rel (%p477_p2) target bundleno = 297 (0x129), region = 72  ;;  %p561_p3 = scmp.lt.s32.totalorder (!%p477_p2), %s1561_s16, 3 }
   0xb   : > { %v1859_v0 = vld [vmem:[%s2236_s9 + $0x38] sm:$0xff]   ;;  %v1903_v1 = vmov 0.0   ;;  %v1861_v3 = vld [vmem:[%s2236_s9 + $0x30] sm:$0xff]   ;;  %vm1904_vm0 = vmmov 0   ;;  %s2242_s16 = smov (!%p561_p3, %s1561_s16), 3  ;;  %v1863_v5 = vld [vmem:[%s2236_s9 + $0x28] sm:$0xff]  }
   0xc   : > { %1740 = vmatprep.subr.bf16.mxu0 %v1903_v1  ;;  %1752 = vmatprep.subr.bf16.mxu1 %v1903_v1  ;;  %v1860_v2 = vld [vmem:[%s2236_s9 + $0x18] sm:$0xff]   ;;  %v1862_v4 = vld [vmem:[%s2236_s9 + $0x10] sm:$0xff]   ;;  %v1864_v6 = vld [vmem:[%s2236_s9 + $0x8] sm:$0xff]   ;;  %s2011_s23 = sshll.u32 %s2242_s16, 3  ;;  %vm668_vm1 = vcmask 523264  }
   0xd   : > { %1741 = vmatpush3.bf16.msra.mxu0 %v1859_v0  ;;  %1748 = vmatprep.mubr.msk.bf16.mxu0 %vm1904_vm0, %v1903_v1  ;;  %v1865_v7 = vld [vmem:[%s2236_s9 + $0x20] sm:$0xff]   ;;  %s570_s29 = scalar_lea.vmem %s2228_s1, %s2011_s23  ;;  %s564_s15 = scalar_lea.vmem %s2227_s0, %s2011_s23  ;;  %v1867_v15 = vld [vmem:[%s2236_s9 + $0x58] sm:$0xff]   ;;  %v1869_v17 = vld [vmem:[%s2236_s9 + $0x50] sm:$0xff]  }
   0xe   : > { %1753 = vmatpush3.bf16.msra.mxu1 %v1860_v2  ;;  %1742 = vmatprep.subr.bf16.mxu0 %v1903_v1  ;;  %v1866_v8 = vld [vmem:[%s2236_s9] sm:$0xff]   ;;  %v633_v10 = vld [vmem:[%s570_s29 + $0x8] sm:$0xff]  ;;  %v1868_v16 = vld [vmem:[%s2236_s9 + $0x78] sm:$0xff]   ;;  %s582_s20 = scalar_lea.vmem %s2230_s3, %s2011_s23  ;;  %s588_s16 = scalar_lea.vmem %s2231_s4, %s2011_s23 }
   0xf   : > { %1754 = vmatprep.subr.bf16.mxu1 %v1903_v1  ;;  %1760 = vmatprep.mubr.msk.bf16.mxu1 %vm1904_vm0, %v1903_v1  ;;  %v632_v9 = vld [vmem:[%s570_s29] sm:$0xff]  ;;  %v622_v12 = vld [vmem:[%s564_s15 + $0x8] sm:$0xff]  ;;  %v1870_v18 = vld [vmem:[%s2236_s9 + $0x70] sm:$0xff]   ;;  %s594_s24 = scalar_lea.vmem %s2232_s5, %s2011_s23  ;;  %s612_s19 = scalar_lea.vmem %s2235_s8, %s2011_s23 }
  0x10   : > { %v621_v11 = vld [vmem:[%s564_s15] sm:$0xff]  ;;  %v634_v13 = vpack.c.bf16 %v633_v10, %v632_v9  ;;  %v1871_v19 = vld [vmem:[%s2236_s9 + $0x48] sm:$0xff]   ;;  %s576_s15 = scalar_lea.vmem %s2229_s2, %s2011_s23  ;;  %v1875_v28 = vld [vmem:[%s2236_s9 + $0x98] sm:$0xff]   ;;  %s600_s29 = scalar_lea.vmem %s2233_s6, %s2011_s23 }
  0x11   : > { %1743 = vmatpush3.bf16.msra.mxu0 %v1861_v3  ;;  %v623_v14 = vpack.c.bf16 %v622_v12, %v621_v11  ;;  %v1872_v20 = vld [vmem:[%s2236_s9 + $0x68] sm:$0xff]   ;;  %v1873_v21 = vld [vmem:[%s2236_s9 + $0x40] sm:$0xff]   ;;  %v1876_v30 = vld [vmem:[%s2236_s9 + $0xb8] sm:$0xff]   ;;  %s618_s14 = scalar_lea.vmem %s2240_s13, %s2011_s23 }
  0x12   : > { %1755 = vmatpush3.bf16.msra.mxu1 %v1862_v4  ;;  %1744 = vmatprep.subr.bf16.mxu0 %v1903_v1  ;;  %v1874_v22 = vld [vmem:[%s2236_s9 + $0x60] sm:$0xff]   ;;  %v782_v24 = vld [vmem:[%s576_s15 + $0x8] sm:$0xff]  ;;  %v1877_v31 = vld [vmem:[%s2236_s9 + $0x90] sm:$0xff]  }
  0x13   : > { %1756 = vmatprep.subr.bf16.mxu1 %v1903_v1  ;;  %v781_v23 = vld [vmem:[%s576_s15] sm:$0xff]  ;;  %v864_v26 = vld [vmem:[%s582_s20 + $0x8] sm:$0xff]  ;;  %v1878_v32 = vld [vmem:[%s2236_s9 + $0xb0] sm:$0xff]   ;;  %s606_s15 = scalar_lea.vmem %s2234_s7, %s2011_s23 }
  0x14   : > { %v863_v25 = vld [vmem:[%s582_s20] sm:$0xff]  ;;  %v783_v27 = vpack.c.bf16 %v782_v24, %v781_v23  ;;  %v1879_v33 = vld [vmem:[%s2236_s9 + $0x88] sm:$0xff]   ;;  %v1883_v54 = vld [vmem:[%s2236_s9 + $0xd8] sm:$0xff]   ;;  %s1905_s20 = smov 64  }
  0x15   : > { %1745 = vmatpush3.bf16.msra.mxu0 %v1863_v5  ;;  %v865_v29 = vpack.c.bf16 %v864_v26, %v863_v25  ;;  %v1880_v34 = vld [vmem:[%s2236_s9 + $0xa8] sm:$0xff]   ;;  %v945_v35 = vld [vmem:[%s588_s16] sm:$0xff]  ;;  %v1884_v58 = vld [vmem:[%s2236_s9 + $0xf8] sm:$0xff]  }
  0x16   : > { %1757 = vmatpush3.bf16.msra.mxu1 %v1864_v6  ;;  %1746 = vmatprep.subr.bf16.mxu0 %v1903_v1  ;;  %v946_v36 = vld [vmem:[%s588_s16 + $0x8] sm:$0xff]  ;;  %v1027_v37 = vld [vmem:[%s594_s24] sm:$0xff]  ;;  %v1885_v61 = vld [vmem:[%s2236_s9 + $0xd0] sm:$0xff]  }
  0x17   : > { %1758 = vmatprep.subr.bf16.mxu1 %v1903_v1  ;;  %v1028_v38 = vld [vmem:[%s594_s24 + $0x8] sm:$0xff]  ;;  %v2122_v39 = vld [vmem:[%s606_s15] sm:$0xff]  ;;  %v1366_v40 = vmax.f32 %v945_v35, %v1027_v37  ;;  %v947_v52 = vpack.c.bf16 %v946_v36, %v945_v35  ;;  %v1886_v63 = vld [vmem:[%s2236_s9 + $0xf0] sm:$0xff]  }
  0x18   : > { %v1367_v41 = vmax.f32 %v946_v36, %v1028_v38  ;;  %v2124_v42 = vld [vmem:[%s606_s15 + $0x8] sm:$0xff]  ;;  %v2126_v43 = vld [vmem:[%s612_s19] sm:$0xff]  ;;  %v1029_v55 = vpack.c.bf16 %v1028_v38, %v1027_v37  ;;  %v1891_v9 = vld [vmem:[%s2236_s9 + $0x118] sm:$0xff]  }
  0x19   : > { %1747 = vmatpush3.bf16.msra.mxu0 %v1865_v7  ;;  %v2128_v44 = vld [vmem:[%s612_s19 + $0x8] sm:$0xff]  ;;  %v1881_v45 = vld [vmem:[%s2236_s9 + $0x80] sm:$0xff]   ;;  %v1368_v46 = vmax.f32 %v2122_v39, %v2126_v43  ;;  %v1193_v10 = vpack.c.bf16 %v2124_v42, %v2122_v39  ;;  %v1892_v11 = vld [vmem:[%s2236_s9 + $0x110] sm:$0xff]  }
  0x1a   : > { %1759 = vmatpush3.bf16.msra.mxu1 %v1866_v8  ;;  %1764 = vmatprep.subr.bf16.mxu0 %v1903_v1  ;;  %v1369_v47 = vmax.f32 %v2124_v42, %v2128_v44  ;;  %v1882_v48 = vld [vmem:[%s2236_s9 + $0xa0] sm:$0xff]   ;;  %v1887_v2 = vld [vmem:[%s2236_s9 + $0xc8] sm:$0xff]  }
  0x1b   : > { %1776 = vmatprep.subr.bf16.mxu1 %v1903_v1  ;;  %v1691_v49 = vld [vmem:[%s2238_s11] ss:$0 sm:$0xff]  ;;  %v1370_v50 = vmax.f32 %v1366_v40, %v1368_v46  ;;  %v1888_v3 = vld [vmem:[%s2236_s9 + $0xe8] sm:$0xff]  }
  0x1c   : > { %1749 = vmatmul.mubr.msk.bf16.vlgmr.msra.gmra.mxu0 %vm668_vm1, %v634_v13  ;;  %v1371_v51 = vmax.f32 %v1367_v41, %v1369_v47  ;;  %v1692_v53 = vld [vmem:[%s2239_s12] ss:$0 sm:$0xff]  ;;  %v1110_v6 = vld [vmem:[%s600_s29 + $0x8] sm:$0xff] }
  0x1d   : > { %1761 = vmatmul.mubr.msk.bf16.vlgmr.msra.gmra.mxu1 %vm668_vm1, %v623_v14  ;;  %1765 = vmatpush3.bf16.msra.mxu0 %v1867_v15  ;;  %v1379_v56 = vmul.f32 %v1691_v49, %v1370_v50  ;;  %v1889_v4 = vld [vmem:[%s2236_s9 + $0xc0] sm:$0xff]   ;;  %v1893_v12 = vld [vmem:[%s2236_s9 + $0x108] sm:$0xff]   ;;  %v1275_v14 = vpack.c.bf16 %v2128_v44, %v2126_v43 }
  0x1e   : > { %1777 = vmatpush3.bf16.msra.mxu1 %v1868_v16  ;;  %1766 = vmatprep.subr.bf16.mxu0 %v1903_v1  ;;  %v1380_v57 = vmul.f32 %v1691_v49, %v1371_v51  ;;  %v1109_v5 = vld [vmem:[%s600_s29] sm:$0xff] }
  0x1f   : > { %1778 = vmatprep.subr.bf16.mxu1 %v1903_v1  ;;  %1772 = vmatprep.mubr.msk.bf16.mxu0 %vm1904_vm0, %v1903_v1  ;;  %v1388_v59 = vadd.f32 %v1692_v53, %v1379_v56  ;;  %v1890_v7 = vld [vmem:[%s2236_s9 + $0xe0] sm:$0xff]   ;;  %v1111_v8 = vpack.c.bf16 %v1110_v6, %v1109_v5 }
  0x20   : > { %1784 = vmatprep.mubr.msk.bf16.mxu1 %vm1904_vm0, %v1903_v1  ;;  %v1389_v60 = vadd.f32 %v1692_v53, %v1380_v57  ;;  %v1894_v13 = vld [vmem:[%s2236_s9 + $0x100] sm:$0xff]  }
  0x21   : > { %1767 = vmatpush3.bf16.msra.mxu0 %v1869_v17  ;;  %v1390_v62 = vmax.f32 %v1388_v59, 0.0 }
  0x22   : > { %1779 = vmatpush3.bf16.msra.mxu1 %v1870_v18  ;;  %1768 = vmatprep.subr.bf16.mxu0 %v1903_v1  ;;  %v1391_v0 = vmax.f32 %v1389_v60, 0.0  ;;  %v1690_v60 = vld [vmem:[%s2237_s10] ss:$0 sm:$0xff] }
  0x23   : > { %1780 = vmatprep.subr.bf16.mxu1 %v1903_v1  ;;  %1394 = vrot.lane.b32.xlu0 %v1390_v62, %s1905_s20 }
  0x25   : > { %1769 = vmatpush3.bf16.msra.mxu0 %v1871_v19 }
  0x26   : > { %1781 = vmatpush3.bf16.msra.mxu1 %v1872_v20  ;;  %1770 = vmatprep.subr.bf16.mxu0 %v1903_v1 }
  0x27   : > { %1782 = vmatprep.subr.bf16.mxu1 %v1903_v1  ;;  %1396 = vrot.lane.b32.xlu0 %v1391_v0, %s1905_s20 }
  0x29   : > { %1771 = vmatpush3.bf16.msra.mxu0 %v1873_v21 }
  0x2a   : > { %1783 = vmatpush3.bf16.msra.mxu1 %v1874_v22  ;;  %1788 = vmatprep.subr.bf16.mxu0 %v1903_v1 }
  0x2b   : > { %1800 = vmatprep.subr.bf16.mxu1 %v1903_v1 }
  0x2c   : > { %1773 = vmatmul.mubr.msk.bf16.vlgmr.msra.gmra.mxu0 %vm668_vm1, %v783_v27 }
  0x2d   : > { %1789 = vmatpush3.bf16.msra.mxu0 %v1875_v28  ;;  %1785 = vmatmul.mubr.msk.bf16.vlgmr.msra.gmra.mxu1 %vm668_vm1, %v865_v29 }
  0x2e   : > { %1801 = vmatpush3.bf16.msra.mxu1 %v1876_v30  ;;  %1790 = vmatprep.subr.bf16.mxu0 %v1903_v1 }
  0x2f   : > { %1802 = vmatprep.subr.bf16.mxu1 %v1903_v1  ;;  %1796 = vmatprep.mubr.msk.bf16.mxu0 %vm1904_vm0, %v1903_v1 }
  0x30   : > { %1808 = vmatprep.mubr.msk.bf16.mxu1 %vm1904_vm0, %v1903_v1 }
  0x31   : > { %1791 = vmatpush3.bf16.msra.mxu0 %v1877_v31 }
  0x32   : > { %1803 = vmatpush3.bf16.msra.mxu1 %v1878_v32  ;;  %1792 = vmatprep.subr.bf16.mxu0 %v1903_v1 }
  0x33   : > { %1804 = vmatprep.subr.bf16.mxu1 %v1903_v1 }
  0x35   : > { %1793 = vmatpush3.bf16.msra.mxu0 %v1879_v33 }
  0x36   : > { %1805 = vmatpush3.bf16.msra.mxu1 %v1880_v34  ;;  %1794 = vmatprep.subr.bf16.mxu0 %v1903_v1 }
  0x37   : > { %1806 = vmatprep.subr.bf16.mxu1 %v1903_v1 }
  0x39   : > { %1795 = vmatpush3.bf16.msra.mxu0 %v1881_v45 }
  0x3a   : > { %1807 = vmatpush3.bf16.msra.mxu1 %v1882_v48  ;;  %1812 = vmatprep.subr.bf16.mxu0 %v1903_v1 }
  0x3b   : > { %1824 = vmatprep.subr.bf16.mxu1 %v1903_v1 }
  0x3c   : > { %1797 = vmatmul.mubr.msk.bf16.vlgmr.msra.gmra.mxu0 %vm668_vm1, %v947_v52 }
  0x3d   : > { %1813 = vmatpush3.bf16.msra.mxu0 %v1883_v54  ;;  %1809 = vmatmul.mubr.msk.bf16.vlgmr.msra.gmra.mxu1 %vm668_vm1, %v1029_v55 }
  0x3e   : > { %1825 = vmatpush3.bf16.msra.mxu1 %v1884_v58  ;;  %1814 = vmatprep.subr.bf16.mxu0 %v1903_v1 }
  0x3f   : > { %1826 = vmatprep.subr.bf16.mxu1 %v1903_v1  ;;  %1820 = vmatprep.mubr.msk.bf16.mxu0 %vm1904_vm0, %v1903_v1 }
  0x40   : > { %1832 = vmatprep.mubr.msk.bf16.mxu1 %vm1904_vm0, %v1903_v1 }
  0x41   : > { %1815 = vmatpush3.bf16.msra.mxu0 %v1885_v61 }
  0x42   : > { %1827 = vmatpush3.bf16.msra.mxu1 %v1886_v63  ;;  %1816 = vmatprep.subr.bf16.mxu0 %v1903_v1 }
  0x43   : > { %1828 = vmatprep.subr.bf16.mxu1 %v1903_v1 }
  0x45   : > { %1817 = vmatpush3.bf16.msra.mxu0 %v1887_v2 }
  0x46   : > { %1829 = vmatpush3.bf16.msra.mxu1 %v1888_v3  ;;  %1818 = vmatprep.subr.bf16.mxu0 %v1903_v1 }
  0x47   : > { %1830 = vmatprep.subr.bf16.mxu1 %v1903_v1 }
  0x49   : > { %1819 = vmatpush3.bf16.msra.mxu0 %v1889_v4 }
  0x4a   : > { %1831 = vmatpush3.bf16.msra.mxu1 %v1890_v7  ;;  %1836 = vmatprep.subr.bf16.mxu0 %v1903_v1 }
  0x4c   : > { %1821 = vmatmul.mubr.msk.bf16.vlgmr.msra.gmra.mxu0 %vm668_vm1, %v1111_v8 }
  0x4d   : > { %1837 = vmatpush3.bf16.msra.mxu0 %v1891_v9  ;;  %1833 = vmatmul.mubr.msk.bf16.vlgmr.msra.gmra.mxu1 %vm668_vm1, %v1193_v10 }
  0x4e   : > { %1838 = vmatprep.subr.bf16.mxu0 %v1903_v1  ;;  %1844 = vmatprep.mubr.msk.bf16.mxu0 %vm1904_vm0, %v1903_v1 }
  0x51   : > { %1839 = vmatpush3.bf16.msra.mxu0 %v1892_v11 }
  0x52   : > { %1840 = vmatprep.subr.bf16.mxu0 %v1903_v1 }
  0x55   : > { %1841 = vmatpush3.bf16.msra.mxu0 %v1893_v12 }
  0x56   : > { %1842 = vmatprep.subr.bf16.mxu0 %v1903_v1 }
  0x59   : > { %1843 = vmatpush3.bf16.msra.mxu0 %v1894_v13 }
  0x5c   : > { %1845 = vmatmul.mubr.msk.bf16.vlgmr.msra.gmra.mxu0 %vm668_vm1, %v1275_v14 }
  0x95   : > { %v1395_v63 = vpop.permute.xlu0 %1394 }
  0x99   : > { %v1397_v9 = vpop.permute.xlu0 %1396 }
  0xdc   : > { %v706_v15 = vpop.f32.mrf.mxu0 }
  0xdd   : > { %v774_v16 = vpop.f32.mrf.mxu1 }
  0xde   : > { %v1750_v17 = vpop.f32.mrf.mxu0  ;;  %v775_v38 = vadd.f32 %v774_v16, %v706_v15 }
  0xdf   : > { %v1762_v18 = vpop.f32.mrf.mxu1 }
  0xe0   : > { %v709_v19 = vpop.f32.mrf.mxu0 }
  0xe1   : > { %v777_v20 = vpop.f32.mrf.mxu1 }
  0xe2   : > { %v1751_v21 = vpop.f32.mrf.mxu0  ;;  %v778_v41 = vadd.f32 %v777_v20, %v709_v19 }
  0xe3   : > { %v1763_v22 = vpop.f32.mrf.mxu1 }
  0xec   : > { %v854_v23 = vpop.f32.mrf.mxu0 }
  0xed   : > { %v936_v24 = vpop.f32.mrf.mxu1  ;;  %v861_v39 = vadd.f32 %v854_v23, %v775_v38 }
  0xee   : > { %v1774_v25 = vpop.f32.mrf.mxu0 }
  0xef   : > { %v1786_v26 = vpop.f32.mrf.mxu1  ;;  %v943_v44 = vadd.f32 %v936_v24, %v861_v39 }
  0xf0   : > { %v857_v27 = vpop.f32.mrf.mxu0 }
  0xf1   : > { %v939_v1 = vpop.f32.mrf.mxu1  ;;  %v862_v45 = vadd.f32 %v857_v27, %v778_v41 }
  0xf2   : > { %v1775_v28 = vpop.f32.mrf.mxu0 }
  0xf3   : > { %v1787_v29 = vpop.f32.mrf.mxu1  ;;  %v944_v51 = vadd.f32 %v939_v1, %v862_v45 }
  0xfc   : > { %v1018_v30 = vpop.f32.mrf.mxu0 }
  0xfd   : > { %v1100_v31 = vpop.f32.mrf.mxu1  ;;  %v1025_v48 = vadd.f32 %v1018_v30, %v943_v44 }
  0xfe   : > { %v1798_v32 = vpop.f32.mrf.mxu0 }
  0xff   : > { %v1810_v33 = vpop.f32.mrf.mxu1  ;;  %v1107_v53 = vadd.f32 %v1100_v31, %v1025_v48 }
 0x100   : > { %v1021_v34 = vpop.f32.mrf.mxu0 }
 0x101   : > { %v1103_v35 = vpop.f32.mrf.mxu1  ;;  %v1026_v54 = vadd.f32 %v1021_v34, %v944_v51 }
 0x102   : > { %v1799_v36 = vpop.f32.mrf.mxu0 }
 0x103   : > { %v1811_v37 = vpop.f32.mrf.mxu1  ;;  %v1108_v56 = vadd.f32 %v1103_v35, %v1026_v54 }
 0x10c   : > { %v1182_v40 = vpop.f32.mrf.mxu0 }
 0x10d   : > { %v1264_v42 = vpop.f32.mrf.mxu1  ;;  %v1189_v55 = vadd.f32 %v1182_v40, %v1107_v53 }
 0x10e   : > { %v1822_v43 = vpop.f32.mrf.mxu0 }
 0x10f   : > { %v1834_v46 = vpop.f32.mrf.mxu1  ;;  %v1271_v57 = vadd.f32 %v1264_v42, %v1189_v55 }
 0x110   : > { %v1185_v47 = vpop.f32.mrf.mxu0 }
 0x111   : > { %v1267_v49 = vpop.f32.mrf.mxu1  ;;  %v1190_v58 = vadd.f32 %v1185_v47, %v1108_v56 }
 0x112   : > { %v1823_v50 = vpop.f32.mrf.mxu0 }
 0x113   : > { %v1835_v52 = vpop.f32.mrf.mxu1  ;;  %v1272_v0 = vadd.f32 %v1267_v49, %v1190_v58 }
 0x11c   : > { %v1346_v59 = vpop.f32.mrf.mxu0 }
 0x11d   : > { %v1353_v61 = vadd.f32 %v1346_v59, %v1271_v57 }
 0x11e   : > { %v1846_v62 = vpop.f32.mrf.mxu0 }
 0x11f   : > { %v1362_v2 = vadd.f32 %v1690_v60, %v1353_v61 }
 0x120   : > { %v1349_v3 = vpop.f32.mrf.mxu0 }
 0x121   : > { %v1364_v4 = vmax.f32 %v1362_v2, 0.0  ;;  %v1354_v5 = vadd.f32 %v1349_v3, %v1272_v0 }
 0x122   : > { %v1847_v6 = vpop.f32.mrf.mxu0 }
 0x123   : > { %v1363_v7 = vadd.f32 %v1690_v60, %v1354_v5  ;;  %v1400_v8 = vsel %vm668_vm1, %v1364_v4, %v1395_v63 }
 0x124   : > { %1402 = vst [vmem:[%s618_s14] sm:$0xff] %v1400_v8 }
 0x125   : > { %v1365_v10 = vmax.f32 %v1363_v7, 0.0 }
 0x127   : > { %v1401_v11 = vsel %vm668_vm1, %v1365_v10, %v1397_v9 }
 0x128   : > { %1403 = vst [vmem:[%s618_s14 + $0x8] sm:$0xff] %v1401_v11 }
 0x129 PF: > { %s23_s25 = sadd.s32 1, %s1901_s25  }
 0x12a   : > { %p20_p4 = scmp.ge.s32.totalorder %s23_s25, 4  }
 0x12c   :  { %22 = sbr.rel (!%p20_p4) target bundleno = 1 (0x1), region = 134 }

// kernel: _lambda_.24
= control target key start
LH: loop header
LB: loop body
LE: loop exit
PB: predicated region body
PF: predicated region fallthrough
CT: control target
= control target key end

     0   :  { %s1855_s24 = smov 0   ;;  %s2189_s0 = inlined_call_operand.vmem [shape: f32[2,16,128], index: 0, kind: input, shape index: {}]   ;;  %s2190_s1 = inlined_call_operand.vmem [shape: bf16[3,128,128], index: 1, kind: input, shape index: {}]   ;;  %s2191_s2 = inlined_call_operand.vmem [shape: bf16[3,128,128], index: 2, kind: input, shape index: {}]   ;;  %s2192_s3 = inlined_call_operand.vmem [shape: bf16[3,128,128], index: 3, kind: input, shape index: {}]   ;;  %s2193_s4 = inlined_call_operand.vmem [shape: bf16[3,128,128], index: 4, kind: input, shape index: {}]   ;;  %s2194_s5 = inlined_call_operand.vmem [shape: f32[4,1,128], index: 5, kind: input, shape index: {}]   ;;  %s2195_s6 = inlined_call_operand.vmem [shape: f32[4,16,1], index: 6, kind: input, shape index: {}]   ;;  %s2196_s7 = inlined_call_operand.vmem [shape: f32[2,16,128], index: 7, kind: output, shape index: {}]  }
   0x1 LB: > { %s1313_s25 = sadd.s32 4294967295, %s1810_s24   ;;  %p1317_p0 = scmp.ge.s32.totalorder %s1810_s24, 1  ;;  %s1810_s24 = sphi %s1855_s24, %s17_s24  }
   0x2   : > { %p237_p1 = scmp.lt.s32.totalorder %s1810_s24, 3 }
   0x4   : > { %p238_p2 = pnand %p1317_p0, %p237_p1 }
   0x5   : > { %p269_p3 = scmp.lt.s32.totalorder (!%p238_p2), %s1313_s25, 1 }
   0x6   : > { %241 = sbr.rel (%p238_p2) target bundleno = 935 (0x3a7), region = 48 }
   0xb   : > { %v1740_v0 = vld [vmem:[%s2190_s1 + $0x38] sm:$0xff]   ;;  %v1812_v1 = vmov 0.0   ;;  %v1742_v3 = vld [vmem:[%s2190_s1 + $0x30] sm:$0xff]   ;;  %vm1813_vm0 = vmmov 0   ;;  %v1814_v5 = vmov 0   ;;  %v1744_v6 = vld [vmem:[%s2190_s1 + $0x28] sm:$0xff]  }
   0xc   : > { %1567 = vmatprep.subr.bf16.mxu0 %v1812_v1  ;;  %283 = vst [vmem:[#allocation2 + $0x18] sm:$0xff] %v1812_v1  ;;  %284 = vst [vmem:[#allocation2 + $0x30] sm:$0xff] %v1812_v1  ;;  %1587 = vmatprep.subr.bf16.mxu1 %v1812_v1  ;;  %v1741_v2 = vld [vmem:[%s2190_s1 + $0x78] sm:$0xff]   ;;  %v1743_v4 = vld [vmem:[%s2190_s1 + $0x70] sm:$0xff]   ;;  %s2198_s25 = smov (!%p269_p3, %s1313_s25), 1 }
   0xd   : > { %291 = vst [vmem:[#allocation3 + $0x18] sm:$0xff] %v1812_v1  ;;  %292 = vst [vmem:[#allocation3 + $0x30] sm:$0xff] %v1812_v1  ;;  %1568 = vmatpush3.bf16.msra.mxu0 %v1740_v0  ;;  %1583 = vmatprep.mubr.msk.bf16.mxu0 %vm1813_vm0, %v1812_v1  ;;  %v1745_v7 = vld [vmem:[%s2190_s1 + $0x68] sm:$0xff]   ;;  %v1746_v8 = vld [vmem:[%s2190_s1 + $0x20] sm:$0xff]   ;;  %s1493_s17 = sshll.u32 %s2198_s25, 4 }
   0xe   : > { %1588 = vmatpush3.bf16.msra.mxu1 %v1741_v2  ;;  %1569 = vmatprep.subr.bf16.mxu0 %v1812_v1  ;;  %v1747_v9 = vld [vmem:[%s2190_s1 + $0x60] sm:$0xff]   ;;  %s273_s22 = scalar_lea.vmem %s2189_s0, %s1493_s17  ;;  %v1748_v10 = vld [vmem:[%s2190_s1 + $0x18] sm:$0xff]   ;;  %v1750_v14 = vld [vmem:[%s2190_s1 + $0x10] sm:$0xff]   ;;  %s278_s12 = scalar_lea.vmem %s2196_s7, %s1493_s17 }
   0xf   : > { %1589 = vmatprep.subr.bf16.mxu1 %v1812_v1  ;;  %1603 = vmatprep.mubr.msk.bf16.mxu1 %vm1813_vm0, %v1812_v1  ;;  %v1749_v11 = vld [vmem:[%s2190_s1 + $0x58] sm:$0xff]   ;;  %v1919_v12 = vld [vmem:[%s273_s22] sm:$0xff]  ;;  %v1921_v13 = vld [vmem:[%s273_s22 + $0x8] sm:$0xff] }
  0x10   : > { %1738 = vset.pattern.permute.xlu0 %v1814_v5  ;;  %1739 = vset.pattern.permute.xlu1 %v1814_v5  ;;  %298 = vst [vmem:[#allocation2 + $0x20] sm:$0xff] %v1919_v12  ;;  %299 = vst [vmem:[#allocation2 + $0x28] sm:$0xff] %v1921_v13  ;;  %v1751_v15 = vld [vmem:[%s2190_s1 + $0x50] sm:$0xff]   ;;  %v1752_v16 = vld [vmem:[%s2190_s1 + $0x8] sm:$0xff]   ;;  %v302_v28 = vpack.c.bf16 %v1921_v13, %v1919_v12 }
  0x11   : > { %1570 = vmatpush3.bf16.msra.mxu0 %v1742_v3  ;;  %v1753_v17 = vld [vmem:[%s2190_s1 + $0x48] sm:$0xff]   ;;  %v1754_v18 = vld [vmem:[%s2190_s1] sm:$0xff]   ;;  %v1379_v23 = vld [vmem:[%s2195_s6 + $0x10] sm:$0xff] }
  0x12   : > { %1590 = vmatpush3.bf16.msra.mxu1 %v1743_v4  ;;  %1571 = vmatprep.subr.bf16.mxu0 %v1812_v1  ;;  %v1755_v19 = vld [vmem:[%s2190_s1 + $0x40] sm:$0xff]   ;;  %v642_v24 = vld [vmem:[%s2195_s6 + $0x8] sm:$0xff]  ;;  %v1380_v25 = vld [vmem:[%s2195_s6 + $0x18] sm:$0xff] }
  0x13   : > { %1591 = vmatprep.subr.bf16.mxu1 %v1812_v1  ;;  %v641_v21 = vld [vmem:[%s2195_s6] sm:$0xff]  ;;  %v1756_v26 = vld [vmem:[%s2190_s1 + $0xb8] sm:$0xff]   ;;  %879 = vperm.xlu1 %1739, %v1379_v23   ;;  %v1757_v29 = vld [vmem:[%s2190_s1 + $0xb0] sm:$0xff]  }
  0x14   : > { %670 = vperm.xlu0 %1738, %v641_v21   ;;  %v1758_v30 = vld [vmem:[%s2190_s1 + $0xa8] sm:$0xff]   ;;  %v1759_v31 = vld [vmem:[%s2190_s1 + $0xa0] sm:$0xff]   ;;  %v1760_v32 = vld [vmem:[%s2190_s1 + $0x98] sm:$0xff]  }
  0x15   : > { %1572 = vmatpush3.bf16.msra.mxu0 %v1744_v6  ;;  %v1761_v33 = vld [vmem:[%s2190_s1 + $0x90] sm:$0xff]   ;;  %v1762_v34 = vld [vmem:[%s2190_s1 + $0x88] sm:$0xff]   ;;  %v1763_v35 = vld [vmem:[%s2190_s1 + $0x80] sm:$0xff]  }
  0x16   : > { %1592 = vmatpush3.bf16.msra.mxu1 %v1745_v7  ;;  %1573 = vmatprep.subr.bf16.mxu0 %v1812_v1  ;;  %v1764_v38 = vld [vmem:[%s2191_s2 + $0x78] sm:$0xff]   ;;  %v1766_v40 = vld [vmem:[%s2191_s2 + $0x70] sm:$0xff]   ;;  %v1768_v42 = vld [vmem:[%s2191_s2 + $0x68] sm:$0xff]  }
  0x17   : > { %1593 = vmatprep.subr.bf16.mxu1 %v1812_v1  ;;  %v320_v20 = vld [vmem:[#allocation2 + $0x1c] sm:$0xff]  ;;  %v321_v22 = vld [vmem:[#allocation2 + $0x24] sm:$0xff]  ;;  %884 = vperm.xlu1 %1739, %v1380_v25   ;;  %v518_v36 = vld [vmem:[#allocation2 + $0x2c] sm:$0xff] }
  0x18   : > { %v322_v27 = vpack.c.bf16 %v321_v22, %v320_v20  ;;  %675 = vperm.xlu0 %1738, %v642_v24   ;;  %v519_v37 = vpack.c.bf16 %v518_v36, %v321_v22  ;;  %v1765_v39 = vld [vmem:[%s2191_s2 + $0x38] sm:$0xff]   ;;  %v1767_v41 = vld [vmem:[%s2191_s2 + $0x30] sm:$0xff]   ;;  %v1769_v43 = vld [vmem:[%s2191_s2 + $0x28] sm:$0xff]  }
  0x19   : > { %1574 = vmatpush3.bf16.msra.mxu0 %v1746_v8  ;;  %v1770_v44 = vld [vmem:[%s2191_s2 + $0x60] sm:$0xff]   ;;  %v1772_v45 = vld [vmem:[%s2191_s2 + $0x58] sm:$0xff]   ;;  %v1774_v46 = vld [vmem:[%s2191_s2 + $0x50] sm:$0xff]  }
  0x1a   : > { %1594 = vmatpush3.bf16.msra.mxu1 %v1747_v9  ;;  %1575 = vmatprep.subr.bf16.mxu0 %v1812_v1  ;;  %v1771_v47 = vld [vmem:[%s2191_s2 + $0x20] sm:$0xff]   ;;  %v1776_v48 = vld [vmem:[%s2191_s2 + $0x48] sm:$0xff]   ;;  %v1773_v49 = vld [vmem:[%s2191_s2 + $0x18] sm:$0xff]  }
  0x1b   : > { %1595 = vmatprep.subr.bf16.mxu1 %v1812_v1  ;;  %v1778_v50 = vld [vmem:[%s2191_s2 + $0x40] sm:$0xff]   ;;  %v1775_v51 = vld [vmem:[%s2191_s2 + $0x10] sm:$0xff]   ;;  %v1777_v52 = vld [vmem:[%s2191_s2 + $0x8] sm:$0xff]  }
  0x1c   : > { %v1779_v53 = vld [vmem:[%s2191_s2] sm:$0xff]   ;;  %v1780_v21 = vld [vmem:[%s2191_s2 + $0xb8] sm:$0xff]   ;;  %v1781_v23 = vld [vmem:[%s2191_s2 + $0xb0] sm:$0xff]  }
  0x1d   : > { %1576 = vmatpush3.bf16.msra.mxu0 %v1748_v10  ;;  %v1378_v0 = vld [vmem:[%s2194_s5] ss:$0 sm:$0xff]  ;;  %v1782_v24 = vld [vmem:[%s2191_s2 + $0xa8] sm:$0xff]  }
  0x1e   : > { %1596 = vmatpush3.bf16.msra.mxu1 %v1749_v11  ;;  %1577 = vmatprep.subr.bf16.mxu0 %v1812_v1  ;;  %v1783_v25 = vld [vmem:[%s2191_s2 + $0xa0] sm:$0xff]  }
  0x1f   : > { %1597 = vmatprep.subr.bf16.mxu1 %v1812_v1 }
  0x21   : > { %1578 = vmatpush3.bf16.msra.mxu0 %v1750_v14 }
  0x22   : > { %1598 = vmatpush3.bf16.msra.mxu1 %v1751_v15  ;;  %1579 = vmatprep.subr.bf16.mxu0 %v1812_v1 }
  0x23   : > { %1599 = vmatprep.subr.bf16.mxu1 %v1812_v1 }
  0x25   : > { %1580 = vmatpush3.bf16.msra.mxu0 %v1752_v16 }
  0x26   : > { %1600 = vmatpush3.bf16.msra.mxu1 %v1753_v17  ;;  %1581 = vmatprep.subr.bf16.mxu0 %v1812_v1 }
  0x27   : > { %1601 = vmatprep.subr.bf16.mxu1 %v1812_v1 }
  0x29   : > { %1582 = vmatpush3.bf16.msra.mxu0 %v1754_v18 }
  0x2a   : > { %1602 = vmatpush3.bf16.msra.mxu1 %v1755_v19  ;;  %1607 = vmatprep.subr.bf16.mxu0 %v1812_v1 }
  0x2b   : > { %1627 = vmatprep.subr.bf16.mxu1 %v1812_v1 }
  0x2c   : > { %1584 = vmatmul.mubr.bf16.vlgmr.msra.gmra.mxu0 %v322_v27 }
  0x2d   : > { %1604 = vmatmul.mubr.bf16.vlgmr.msra.gmra.mxu1 %v302_v28  ;;  %1608 = vmatpush3.bf16.msra.mxu0 %v1756_v26  ;;  %v1784_v26 = vld [vmem:[%s2191_s2 + $0x98] sm:$0xff]   ;;  %v1785_v28 = vld [vmem:[%s2191_s2 + $0x90] sm:$0xff]  }
  0x2e   : > { %1609 = vmatprep.subr.bf16.mxu0 %v1812_v1  ;;  %1623 = vmatprep.mubr.msk.bf16.mxu0 %vm1813_vm0, %v1812_v1 }
  0x2f   : > { %1643 = vmatprep.mubr.msk.bf16.mxu1 %vm1813_vm0, %v1812_v1  ;;  %1628 = vmatpush3.bf16.msra.mxu1 %v1765_v39  ;;  %v1790_v39 = vld [vmem:[%s2192_s3 + $0x68] sm:$0xff]  }
  0x30   : > { %1629 = vmatprep.subr.bf16.mxu1 %v1812_v1 }
  0x31   : > { %1610 = vmatpush3.bf16.msra.mxu0 %v1757_v29  ;;  %v1786_v29 = vld [vmem:[%s2191_s2 + $0x88] sm:$0xff]  }
  0x32   : > { %1611 = vmatprep.subr.bf16.mxu0 %v1812_v1 }
  0x33   : > { %1630 = vmatpush3.bf16.msra.mxu1 %v1767_v41  ;;  %v1792_v41 = vld [vmem:[%s2192_s3 + $0x58] sm:$0xff]  }
  0x34   : > { %1631 = vmatprep.subr.bf16.mxu1 %v1812_v1 }
  0x35   : > { %1612 = vmatpush3.bf16.msra.mxu0 %v1758_v30 }
  0x36   : > { %1613 = vmatprep.subr.bf16.mxu0 %v1812_v1 }
  0x37   : > { %1632 = vmatpush3.bf16.msra.mxu1 %v1769_v43  ;;  %v1794_v43 = vld [vmem:[%s2192_s3 + $0x48] sm:$0xff]  }
  0x38   : > { %1633 = vmatprep.subr.bf16.mxu1 %v1812_v1 }
  0x39   : > { %1614 = vmatpush3.bf16.msra.mxu0 %v1759_v31 }
  0x3a   : > { %1615 = vmatprep.subr.bf16.mxu0 %v1812_v1 }
  0x3b   : > { %1634 = vmatpush3.bf16.msra.mxu1 %v1771_v47  ;;  %v1798_v47 = vld [vmem:[%s2193_s4 + $0x68] sm:$0xff]  }
  0x3c   : > { %1635 = vmatprep.subr.bf16.mxu1 %v1812_v1 }
  0x3d   : > { %1616 = vmatpush3.bf16.msra.mxu0 %v1760_v32 }
  0x3e   : > { %1617 = vmatprep.subr.bf16.mxu0 %v1812_v1 }
  0x3f   : > { %1636 = vmatpush3.bf16.msra.mxu1 %v1773_v49 }
  0x40   : > { %1637 = vmatprep.subr.bf16.mxu1 %v1812_v1 }
  0x41   : > { %1618 = vmatpush3.bf16.msra.mxu0 %v1761_v33  ;;  %v1787_v33 = vld [vmem:[%s2191_s2 + $0x80] sm:$0xff]  }
  0x42   : > { %1619 = vmatprep.subr.bf16.mxu0 %v1812_v1 }
  0x43   : > { %1638 = vmatpush3.bf16.msra.mxu1 %v1775_v51 }
  0x44   : > { %1639 = vmatprep.subr.bf16.mxu1 %v1812_v1 }
  0x45   : > { %1620 = vmatpush3.bf16.msra.mxu0 %v1762_v34 }
  0x46   : > { %1621 = vmatprep.subr.bf16.mxu0 %v1812_v1 }
  0x47   : > { %1640 = vmatpush3.bf16.msra.mxu1 %v1777_v52 }
  0x48   : > { %1641 = vmatprep.subr.bf16.mxu1 %v1812_v1 }
  0x49   : > { %1622 = vmatpush3.bf16.msra.mxu0 %v1763_v35 }
  0x4a   : > { %1647 = vmatprep.subr.bf16.mxu0 %v1812_v1 }
  0x4b   : > { %1642 = vmatpush3.bf16.msra.mxu1 %v1779_v53 }
  0x4c   : > { %1624 = vmatmul.mubr.bf16.vlgmr.msra.gmra.mxu0 %v519_v37  ;;  %1667 = vmatprep.subr.bf16.mxu1 %v1812_v1  ;;  %v1788_v37 = vld [vmem:[%s2192_s3 + $0x78] sm:$0xff]  }
  0x4d   : > { %1663 = vmatprep.mubr.msk.bf16.mxu0 %vm1813_vm0, %v1812_v1  ;;  %1648 = vmatpush3.bf16.msra.mxu0 %v1764_v38  ;;  %v1789_v38 = vld [vmem:[%s2192_s3 + $0x70] sm:$0xff]  }
  0x4e   : > { %1649 = vmatprep.subr.bf16.mxu0 %v1812_v1 }
  0x51   : > { %1650 = vmatpush3.bf16.msra.mxu0 %v1766_v40  ;;  %v1791_v40 = vld [vmem:[%s2192_s3 + $0x60] sm:$0xff]  }
  0x52   : > { %1651 = vmatprep.subr.bf16.mxu0 %v1812_v1 }
  0x55   : > { %1652 = vmatpush3.bf16.msra.mxu0 %v1768_v42  ;;  %v1793_v42 = vld [vmem:[%s2192_s3 + $0x50] sm:$0xff]  }
  0x56   : > { %1653 = vmatprep.subr.bf16.mxu0 %v1812_v1 }
  0x59   : > { %1654 = vmatpush3.bf16.msra.mxu0 %v1770_v44  ;;  %v1795_v44 = vld [vmem:[%s2192_s3 + $0x40] sm:$0xff]  }
  0x5a   : > { %1655 = vmatprep.subr.bf16.mxu0 %v1812_v1 }
  0x5d   : > { %1656 = vmatpush3.bf16.msra.mxu0 %v1772_v45  ;;  %v1796_v45 = vld [vmem:[%s2193_s4 + $0x78] sm:$0xff]  }
  0x5e   : > { %1657 = vmatprep.subr.bf16.mxu0 %v1812_v1 }
  0x61   : > { %1658 = vmatpush3.bf16.msra.mxu0 %v1774_v46  ;;  %v1797_v46 = vld [vmem:[%s2193_s4 + $0x70] sm:$0xff]  }
  0x62   : > { %1659 = vmatprep.subr.bf16.mxu0 %v1812_v1 }
  0x65   : > { %1660 = vmatpush3.bf16.msra.mxu0 %v1776_v48 }
  0x66   : > { %1661 = vmatprep.subr.bf16.mxu0 %v1812_v1 }
  0x69   : > { %1662 = vmatpush3.bf16.msra.mxu0 %v1778_v50 }
  0x6a   : > { %1687 = vmatprep.subr.bf16.mxu0 %v1812_v1 }
  0x8e   : > { %v880_v27 = vpop.permute.xlu1 %879 }
  0x8f   : > { %v671_v15 = vpop.permute.xlu0 %670 }
  0x92   : > { %v885_v31 = vpop.permute.xlu1 %884 }
  0x93   : > { %v676_v17 = vpop.permute.xlu0 %675 }
  0xec   : > { %v421_v54 = vpop.f32.mrf.mxu0 }
  0xed   : > { %v510_v55 = vpop.f32.mrf.mxu1 }
  0xee   : > { %v1585_v56 = vpop.f32.mrf.mxu0  ;;  %v511_v62 = vadd.f32 %v510_v55, %v421_v54 }
  0xef   : > { %v1605_v57 = vpop.f32.mrf.mxu1 }
  0xf0   : > { %v424_v58 = vpop.f32.mrf.mxu0 }
  0xf1   : > { %v513_v59 = vpop.f32.mrf.mxu1 }
  0xf2   : > { %v1586_v60 = vpop.f32.mrf.mxu0  ;;  %v514_v4 = vadd.f32 %v513_v59, %v424_v58  ;;  %v1438_v58 = vld [vmem:[%s2194_s5 + $0x1] ss:$0 sm:$0xff] }
  0xf3   : > { %v1606_v61 = vpop.f32.mrf.mxu1 }
 0x10c   : > { %v619_v63 = vpop.f32.mrf.mxu0 }
 0x10d   : > { %v626_v2 = vadd.f32 %v619_v63, %v511_v62 }
 0x10e   : > { %v1625_v3 = vpop.f32.mrf.mxu0 }
 0x10f   : > { %v635_v5 = vadd.f32 %v1378_v0, %v626_v2 }
 0x110   : > { %v622_v6 = vpop.f32.mrf.mxu0 }
 0x111   : > { %v637_v7 = vmax.f32 %v635_v5, 0.0  ;;  %v627_v8 = vadd.f32 %v622_v6, %v514_v4 }
 0x112   : > { %v1626_v9 = vpop.f32.mrf.mxu0 }
 0x113   : > { %639 = vst [vmem:[#allocation3 + $0x20] sm:$0xff] %v637_v7  ;;  %v636_v10 = vadd.f32 %v1378_v0, %v627_v8  ;;  %v1800_v8 = vld [vmem:[%s2193_s4 + $0x58] sm:$0xff]   ;;  %v1801_v9 = vld [vmem:[%s2193_s4 + $0x50] sm:$0xff]  }
 0x115   : > { %v638_v11 = vmax.f32 %v636_v10, 0.0  ;;  %v1802_v10 = vld [vmem:[%s2193_s4 + $0x48] sm:$0xff]  }
 0x117   : > { %640 = vst [vmem:[#allocation3 + $0x28] sm:$0xff] %v638_v11  ;;  %v648_v14 = vpack.c.bf16 %v638_v11, %v637_v7  ;;  %v1799_v7 = vld [vmem:[%s2193_s4 + $0x60] sm:$0xff]  }
 0x118   : > { %v1803_v11 = vld [vmem:[%s2193_s4 + $0x40] sm:$0xff]  }
 0x119   : > { %1664 = vmatmul.mubr.bf16.vlgmr.msra.gmra.mxu0 %v648_v14  ;;  %v1456_v14 = vld [vmem:[%s2194_s5 + $0x2] ss:$0 sm:$0xff] }
 0x11a   : > { %1703 = vmatprep.mubr.msk.bf16.mxu0 %vm1813_vm0, %v1812_v1  ;;  %v666_v16 = vld [vmem:[#allocation3 + $0x1f] sm:$0xff]  ;;  %1688 = vmatpush3.bf16.msra.mxu0 %v1788_v37 }
 0x11b   : > { %v678_v19 = vmul.f32 %v671_v15, %v666_v16  ;;  %1689 = vmatprep.subr.bf16.mxu0 %v1812_v1 }
 0x11e   : > { %v667_v18 = vld [vmem:[#allocation3 + $0x27] sm:$0xff]  ;;  %1690 = vmatpush3.bf16.msra.mxu0 %v1789_v38 }
 0x11f   : > { %v679_v20 = vmul.f32 %v676_v17, %v667_v18  ;;  %v875_v30 = vld [vmem:[#allocation3 + $0x21] sm:$0xff]  ;;  %v876_v32 = vld [vmem:[#allocation3 + $0x29] sm:$0xff]  ;;  %1691 = vmatprep.subr.bf16.mxu0 %v1812_v1 }
 0x120   : > { %v887_v34 = vmul.f32 %v880_v27, %v875_v30  ;;  %v888_v35 = vmul.f32 %v885_v31, %v876_v32 }
 0x121   : > { %v680_v22 = vpack.c.bf16 %v679_v20, %v678_v19 }
 0x122   : > { %v889_v36 = vpack.c.bf16 %v888_v35, %v887_v34  ;;  %1692 = vmatpush3.bf16.msra.mxu0 %v1790_v39 }
 0x123   : > { %1644 = vmatmul.mubr.bf16.vlgmr.msra.gmra.mxu1 %v680_v22  ;;  %1693 = vmatprep.subr.bf16.mxu0 %v1812_v1 }
 0x124   : > { %1668 = vmatpush3.bf16.msra.mxu1 %v1780_v21  ;;  %1683 = vmatprep.mubr.msk.bf16.mxu1 %vm1813_vm0, %v1812_v1 }
 0x125   : > { %1669 = vmatprep.subr.bf16.mxu1 %v1812_v1 }
 0x126   : > { %1694 = vmatpush3.bf16.msra.mxu0 %v1791_v40 }
 0x127   : > { %1695 = vmatprep.subr.bf16.mxu0 %v1812_v1 }
 0x128   : > { %1670 = vmatpush3.bf16.msra.mxu1 %v1781_v23  ;;  %v1482_v23 = vld [vmem:[%s2194_s5 + $0x3] ss:$0 sm:$0xff] }
 0x129   : > { %1671 = vmatprep.subr.bf16.mxu1 %v1812_v1 }
 0x12a   : > { %1696 = vmatpush3.bf16.msra.mxu0 %v1792_v41 }
 0x12b   : > { %1697 = vmatprep.subr.bf16.mxu0 %v1812_v1 }
 0x12c   : > { %1672 = vmatpush3.bf16.msra.mxu1 %v1782_v24 }
 0x12d   : > { %1673 = vmatprep.subr.bf16.mxu1 %v1812_v1 }
 0x12e   : > { %1698 = vmatpush3.bf16.msra.mxu0 %v1793_v42 }
 0x12f   : > { %1699 = vmatprep.subr.bf16.mxu0 %v1812_v1 }
 0x130   : > { %1674 = vmatpush3.bf16.msra.mxu1 %v1783_v25 }
 0x131   : > { %1675 = vmatprep.subr.bf16.mxu1 %v1812_v1 }
 0x132   : > { %1700 = vmatpush3.bf16.msra.mxu0 %v1794_v43 }
 0x133   : > { %1701 = vmatprep.subr.bf16.mxu0 %v1812_v1 }
 0x134   : > { %1676 = vmatpush3.bf16.msra.mxu1 %v1784_v26 }
 0x135   : > { %1677 = vmatprep.subr.bf16.mxu1 %v1812_v1 }
 0x136   : > { %1702 = vmatpush3.bf16.msra.mxu0 %v1795_v44 }
 0x138   : > { %1678 = vmatpush3.bf16.msra.mxu1 %v1785_v28 }
 0x139   : > { %1679 = vmatprep.subr.bf16.mxu1 %v1812_v1 }
 0x13c   : > { %1680 = vmatpush3.bf16.msra.mxu1 %v1786_v29 }
 0x13d   : > { %1681 = vmatprep.subr.bf16.mxu1 %v1812_v1 }
 0x140   : > { %1682 = vmatpush3.bf16.msra.mxu1 %v1787_v33 }
 0x141   : > { %1707 = vmatprep.subr.bf16.mxu1 %v1812_v1 }
 0x143   : > { %1684 = vmatmul.mubr.bf16.vlgmr.msra.gmra.mxu1 %v889_v36 }
 0x144   : > { %1723 = vmatprep.mubr.msk.bf16.mxu1 %vm1813_vm0, %v1812_v1  ;;  %1708 = vmatpush3.bf16.msra.mxu1 %v1796_v45 }
 0x145   : > { %1709 = vmatprep.subr.bf16.mxu1 %v1812_v1 }
 0x148   : > { %1710 = vmatpush3.bf16.msra.mxu1 %v1797_v46 }
 0x149   : > { %1711 = vmatprep.subr.bf16.mxu1 %v1812_v1 }
 0x14c   : > { %1712 = vmatpush3.bf16.msra.mxu1 %v1798_v47 }
 0x14d   : > { %1713 = vmatprep.subr.bf16.mxu1 %v1812_v1 }
 0x150   : > { %1714 = vmatpush3.bf16.msra.mxu1 %v1799_v7 }
 0x151   : > { %1715 = vmatprep.subr.bf16.mxu1 %v1812_v1 }
 0x154   : > { %1716 = vmatpush3.bf16.msra.mxu1 %v1800_v8 }
 0x155   : > { %1717 = vmatprep.subr.bf16.mxu1 %v1812_v1 }
 0x158   : > { %1718 = vmatpush3.bf16.msra.mxu1 %v1801_v9 }
 0x159   : > { %1719 = vmatprep.subr.bf16.mxu1 %v1812_v1 }
 0x15c   : > { %1720 = vmatpush3.bf16.msra.mxu1 %v1802_v10 }
 0x15d   : > { %1721 = vmatprep.subr.bf16.mxu1 %v1812_v1 }
 0x160   : > { %1722 = vmatpush3.bf16.msra.mxu1 %v1803_v11 }
 0x1d9   : > { %v868_v48 = vpop.f32.mrf.mxu0 }
 0x1db   : > { %v1665_v49 = vpop.f32.mrf.mxu0 }
 0x1dd   : > { %v871_v50 = vpop.f32.mrf.mxu0 }
 0x1df   : > { %v1666_v51 = vpop.f32.mrf.mxu0 }
 0x1e3   : > { %v779_v52 = vpop.f32.mrf.mxu1 }
 0x1e4   : > { %v869_v56 = vadd.f32 %v868_v48, %v779_v52 }
 0x1e5   : > { %v1645_v53 = vpop.f32.mrf.mxu1 }
 0x1e7   : > { %v782_v54 = vpop.f32.mrf.mxu1 }
 0x1e8   : > { %v872_v61 = vadd.f32 %v871_v50, %v782_v54 }
 0x1e9   : > { %v1646_v55 = vpop.f32.mrf.mxu1 }
 0x203   : > { %v989_v57 = vpop.f32.mrf.mxu1 }
 0x204   : > { %v996_v59 = vadd.f32 %v989_v57, %v869_v56 }
 0x205   : > { %v1685_v60 = vpop.f32.mrf.mxu1 }
 0x206   : > { %v1006_v62 = vadd.f32 %v1438_v58, %v996_v59 }
 0x207   : > { %v992_v63 = vpop.f32.mrf.mxu1 }
 0x208   : > { %v1008_v0 = vmax.f32 %v1006_v62, 0.0  ;;  %v997_v2 = vadd.f32 %v992_v63, %v872_v61 }
 0x209   : > { %v1686_v3 = vpop.f32.mrf.mxu1 }
 0x20a   : > { %1010 = vst [vmem:[#allocation2 + $0x20] sm:$0xff] %v1008_v0  ;;  %v1007_v4 = vadd.f32 %v1438_v58, %v997_v2 }
 0x20c   : > { %v1009_v5 = vmax.f32 %v1007_v4, 0.0 }
 0x20e   : > { %1011 = vst [vmem:[#allocation2 + $0x28] sm:$0xff] %v1009_v5  ;;  %v1014_v6 = vpack.c.bf16 %v1009_v5, %v1008_v0 }
 0x210   : > { %1704 = vmatmul.mubr.bf16.vlgmr.msra.gmra.mxu0 %v1014_v6 }
 0x2d0   : > { %v1122_v15 = vpop.f32.mrf.mxu0 }
 0x2d1   : > { %v1123_v16 = vadd.f32 %v1456_v14, %v1122_v15 }
 0x2d2   : > { %v1705_v17 = vpop.f32.mrf.mxu0 }
 0x2d3   : > { %v1129_v18 = vmax.f32 %v1123_v16, 0.0 }
 0x2d4   : > { %v1125_v19 = vpop.f32.mrf.mxu0 }
 0x2d5   : > { %1131 = vst [vmem:[#allocation3 + $0x20] sm:$0xff] %v1129_v18  ;;  %v1126_v20 = vadd.f32 %v1456_v14, %v1125_v19 }
 0x2d6   : > { %v1706_v21 = vpop.f32.mrf.mxu0 }
 0x2d7   : > { %v1130_v22 = vmax.f32 %v1126_v20, 0.0 }
 0x2d9   : > { %1132 = vst [vmem:[#allocation3 + $0x28] sm:$0xff] %v1130_v22  ;;  %v1135_v1 = vpack.c.bf16 %v1130_v22, %v1129_v18 }
 0x2db   : > { %1724 = vmatmul.mubr.bf16.vlgmr.msra.gmra.mxu1 %v1135_v1 }
 0x39b   : > { %v1243_v24 = vpop.f32.mrf.mxu1 }
 0x39c   : > { %v1244_v25 = vadd.f32 %v1482_v23, %v1243_v24 }
 0x39d   : > { %v1725_v26 = vpop.f32.mrf.mxu1 }
 0x39e   : > { %v1252_v27 = vadd.f32 %v1244_v25, %v1919_v12 }
 0x39f   : > { %v1246_v28 = vpop.f32.mrf.mxu1 }
 0x3a0   : > { %v1254_v29 = vmax.f32 %v1252_v27, 0.0  ;;  %v1247_v30 = vadd.f32 %v1482_v23, %v1246_v28 }
 0x3a1   : > { %v1726_v31 = vpop.f32.mrf.mxu1 }
 0x3a2   : > { %1256 = vst [vmem:[%s278_s12] sm:$0xff] %v1254_v29  ;;  %v1253_v32 = vadd.f32 %v1247_v30, %v1921_v13 }
 0x3a4   : > { %v1255_v33 = vmax.f32 %v1253_v32, 0.0 }
 0x3a6   : > { %1257 = vst [vmem:[%s278_s12 + $0x8] sm:$0xff] %v1255_v33 }
 0x3a7 PF: > { %s17_s24 = sadd.s32 1, %s1810_s24  }
 0x3a8   : > { %p14_p4 = scmp.ge.s32.totalorder %s17_s24, 4  }
 0x3aa   :  { %16 = sbr.rel (!%p14_p4) target bundleno = 1 (0x1), region = 88 }

// kernel: _lambda_.22
= control target key start
LH: loop header
LB: loop body
LE: loop exit
PB: predicated region body
PF: predicated region fallthrough
CT: control target
= control target key end

     0   :  { %s2531_s24 = smov 0   ;;  %s3013_s0 = inlined_call_operand.vmem [shape: f32[2,16,128], index: 0, kind: input, shape index: {}]   ;;  %s3014_s1 = inlined_call_operand.vmem [shape: bf16[3,128,128], index: 1, kind: input, shape index: {}]   ;;  %s3015_s2 = inlined_call_operand.vmem [shape: bf16[3,128,128], index: 2, kind: input, shape index: {}]   ;;  %s3016_s3 = inlined_call_operand.vmem [shape: bf16[3,128,128], index: 3, kind: input, shape index: {}]   ;;  %s3017_s4 = inlined_call_operand.vmem [shape: bf16[3,128,128], index: 4, kind: input, shape index: {}]   ;;  %s3018_s5 = inlined_call_operand.vmem [shape: f32[4,1,128], index: 5, kind: input, shape index: {}]   ;;  %s3019_s6 = inlined_call_operand.vmem [shape: f32[4,16,1], index: 6, kind: input, shape index: {}]   ;;  %s3020_s7 = inlined_call_operand.vmem [shape: f32[2,16,128], index: 7, kind: output, shape index: {}]  }
   0x1 LB: > { %s1772_s25 = sadd.s32 4294967295, %s2486_s24   ;;  %p1776_p0 = scmp.ge.s32.totalorder %s2486_s24, 1  ;;  %s2486_s24 = sphi %s2531_s24, %s17_s24  }
   0x2   : > { %p237_p1 = scmp.lt.s32.totalorder %s2486_s24, 3 }
   0x4   : > { %p238_p2 = pnand %p1776_p0, %p237_p1 }
   0x5   : > { %p269_p3 = scmp.lt.s32.totalorder (!%p238_p2), %s1772_s25, 1 }
   0x6   : > { %241 = sbr.rel (%p238_p2) target bundleno = 1009 (0x3f1), region = 48 }
   0xb   : > { %v2383_v0 = vld [vmem:[%s3014_s1 + $0x38] sm:$0xff]   ;;  %v2488_v1 = vmov 0.0   ;;  %v2385_v3 = vld [vmem:[%s3014_s1 + $0x30] sm:$0xff]   ;;  %vm2489_vm0 = vmmov 0   ;;  %v2490_v5 = vmov 0   ;;  %v2387_v6 = vld [vmem:[%s3014_s1 + $0x28] sm:$0xff]  }
   0xc   : > { %2130 = vmatprep.subr.bf16.mxu0 %v2488_v1  ;;  %280 = vst [vmem:[#allocation2] sm:$0xff] %v2488_v1  ;;  %281 = vst [vmem:[#allocation2 + $0x18] sm:$0xff] %v2488_v1  ;;  %2150 = vmatprep.subr.bf16.mxu1 %v2488_v1  ;;  %v2384_v2 = vld [vmem:[%s3014_s1 + $0x78] sm:$0xff]   ;;  %v2386_v4 = vld [vmem:[%s3014_s1 + $0x70] sm:$0xff]   ;;  %s3022_s25 = smov (!%p269_p3, %s1772_s25), 1 }
   0xd   : > { %282 = vst [vmem:[#allocation3] sm:$0xff] %v2488_v1  ;;  %283 = vst [vmem:[#allocation3 + $0x18] sm:$0xff] %v2488_v1  ;;  %2131 = vmatpush3.bf16.msra.mxu0 %v2383_v0  ;;  %2146 = vmatprep.mubr.msk.bf16.mxu0 %vm2489_vm0, %v2488_v1  ;;  %v2388_v7 = vld [vmem:[%s3014_s1 + $0x68] sm:$0xff]   ;;  %v2389_v8 = vld [vmem:[%s3014_s1 + $0x20] sm:$0xff]   ;;  %s2020_s17 = sshll.u32 %s3022_s25, 4 }
   0xe   : > { %2151 = vmatpush3.bf16.msra.mxu1 %v2384_v2  ;;  %2132 = vmatprep.subr.bf16.mxu0 %v2488_v1  ;;  %v2390_v9 = vld [vmem:[%s3014_s1 + $0x60] sm:$0xff]   ;;  %s2587_s22 = scalar_lea.vmem %s3013_s0, %s2020_s17  ;;  %v2391_v10 = vld [vmem:[%s3014_s1 + $0x18] sm:$0xff]   ;;  %v2393_v14 = vld [vmem:[%s3014_s1 + $0x10] sm:$0xff]   ;;  %s278_s14 = scalar_lea.vmem %s3020_s7, %s2020_s17 }
   0xf   : > { %2152 = vmatprep.subr.bf16.mxu1 %v2488_v1  ;;  %2166 = vmatprep.mubr.msk.bf16.mxu1 %vm2489_vm0, %v2488_v1  ;;  %v2392_v11 = vld [vmem:[%s3014_s1 + $0x58] sm:$0xff]   ;;  %v284_v12 = vld [vmem:[%s2587_s22] sm:$0xff]  ;;  %v285_v13 = vld [vmem:[%s2587_s22 + $0x8] sm:$0xff] }
  0x10   : > { %2381 = vset.pattern.permute.xlu0 %v2490_v5  ;;  %2382 = vset.pattern.permute.xlu1 %v2490_v5  ;;  %286 = vst [vmem:[#allocation2 + $0x8] sm:$0xff] %v284_v12  ;;  %287 = vst [vmem:[#allocation2 + $0x10] sm:$0xff] %v285_v13  ;;  %v2394_v15 = vld [vmem:[%s3014_s1 + $0x50] sm:$0xff]   ;;  %v2395_v16 = vld [vmem:[%s3014_s1 + $0x8] sm:$0xff]   ;;  %v290_v28 = vpack.c.bf16 %v285_v13, %v284_v12 }
  0x11   : > { %2133 = vmatpush3.bf16.msra.mxu0 %v2385_v3  ;;  %v2396_v17 = vld [vmem:[%s3014_s1 + $0x48] sm:$0xff]   ;;  %v2397_v18 = vld [vmem:[%s3014_s1] sm:$0xff]   ;;  %v1838_v22 = vld [vmem:[%s3019_s6 + $0x10] sm:$0xff] }
  0x12   : > { %2153 = vmatpush3.bf16.msra.mxu1 %v2386_v4  ;;  %2134 = vmatprep.subr.bf16.mxu0 %v2488_v1  ;;  %v629_v19 = vld [vmem:[%s3019_s6] sm:$0xff]  ;;  %v630_v24 = vld [vmem:[%s3019_s6 + $0x8] sm:$0xff]  ;;  %v2399_v25 = vld [vmem:[%s3014_s1 + $0xb8] sm:$0xff]  }
  0x13   : > { %2154 = vmatprep.subr.bf16.mxu1 %v2488_v1  ;;  %658 = vperm.xlu0 %2381, %v629_v19   ;;  %v2398_v23 = vld [vmem:[%s3014_s1 + $0x40] sm:$0xff]   ;;  %v1839_v26 = vld [vmem:[%s3019_s6 + $0x18] sm:$0xff]  ;;  %v1957_v30 = vld [vmem:[%s3019_s6 + $0x28] sm:$0xff] }
  0x14   : > { %867 = vperm.xlu1 %2382, %v1838_v22   ;;  %v1956_v29 = vld [vmem:[%s3019_s6 + $0x20] sm:$0xff]  ;;  %v2400_v31 = vld [vmem:[%s3014_s1 + $0xb0] sm:$0xff]   ;;  %v1959_v33 = vld [vmem:[%s3019_s6 + $0x38] sm:$0xff] }
  0x15   : > { %2135 = vmatpush3.bf16.msra.mxu0 %v2387_v6  ;;  %v1958_v32 = vld [vmem:[%s3019_s6 + $0x30] sm:$0xff]  ;;  %v2401_v34 = vld [vmem:[%s3014_s1 + $0xa8] sm:$0xff]   ;;  %v2402_v35 = vld [vmem:[%s3014_s1 + $0xa0] sm:$0xff]  }
  0x16   : > { %2155 = vmatpush3.bf16.msra.mxu1 %v2388_v7  ;;  %2136 = vmatprep.subr.bf16.mxu0 %v2488_v1  ;;  %v2403_v36 = vld [vmem:[%s3014_s1 + $0x98] sm:$0xff]   ;;  %v2404_v37 = vld [vmem:[%s3014_s1 + $0x90] sm:$0xff]   ;;  %v2405_v38 = vld [vmem:[%s3014_s1 + $0x88] sm:$0xff]  }
  0x17   : > { %2156 = vmatprep.subr.bf16.mxu1 %v2488_v1  ;;  %v308_v20 = vld [vmem:[#allocation2 + $0x4] sm:$0xff]  ;;  %v309_v21 = vld [vmem:[#allocation2 + $0xc] sm:$0xff]  ;;  %663 = vperm.xlu0 %2381, %v630_v24   ;;  %v506_v40 = vld [vmem:[#allocation2 + $0x14] sm:$0xff] }
  0x18   : > { %v310_v27 = vpack.c.bf16 %v309_v21, %v308_v20  ;;  %872 = vperm.xlu1 %2382, %v1839_v26   ;;  %v2406_v39 = vld [vmem:[%s3014_s1 + $0x80] sm:$0xff]   ;;  %v507_v41 = vpack.c.bf16 %v506_v40, %v309_v21  ;;  %v2407_v42 = vld [vmem:[%s3015_s2 + $0x78] sm:$0xff]   ;;  %v2409_v44 = vld [vmem:[%s3015_s2 + $0x70] sm:$0xff]  }
  0x19   : > { %2137 = vmatpush3.bf16.msra.mxu0 %v2389_v8  ;;  %v2408_v43 = vld [vmem:[%s3015_s2 + $0x38] sm:$0xff]   ;;  %v2410_v45 = vld [vmem:[%s3015_s2 + $0x30] sm:$0xff]   ;;  %v2411_v46 = vld [vmem:[%s3015_s2 + $0x68] sm:$0xff]  }
  0x1a   : > { %2157 = vmatpush3.bf16.msra.mxu1 %v2390_v9  ;;  %2138 = vmatprep.subr.bf16.mxu0 %v2488_v1  ;;  %v2412_v47 = vld [vmem:[%s3015_s2 + $0x28] sm:$0xff]   ;;  %v2413_v48 = vld [vmem:[%s3015_s2 + $0x60] sm:$0xff]   ;;  %v2415_v49 = vld [vmem:[%s3015_s2 + $0x58] sm:$0xff]  }
  0x1b   : > { %2158 = vmatprep.subr.bf16.mxu1 %v2488_v1  ;;  %1371 = vperm.xlu0 %2381, %v1956_v29   ;;  %v2417_v50 = vld [vmem:[%s3015_s2 + $0x50] sm:$0xff]   ;;  %v2414_v51 = vld [vmem:[%s3015_s2 + $0x20] sm:$0xff]   ;;  %v2419_v52 = vld [vmem:[%s3015_s2 + $0x48] sm:$0xff]  }
  0x1c   : > { %1376 = vperm.xlu1 %2382, %v1957_v30   ;;  %v2416_v53 = vld [vmem:[%s3015_s2 + $0x18] sm:$0xff]   ;;  %v2421_v54 = vld [vmem:[%s3015_s2 + $0x40] sm:$0xff]   ;;  %v2418_v55 = vld [vmem:[%s3015_s2 + $0x10] sm:$0xff]  }
  0x1d   : > { %2139 = vmatpush3.bf16.msra.mxu0 %v2391_v10  ;;  %v2420_v56 = vld [vmem:[%s3015_s2 + $0x8] sm:$0xff]   ;;  %v2422_v57 = vld [vmem:[%s3015_s2] sm:$0xff]   ;;  %v2428_v30 = vld [vmem:[%s3015_s2 + $0x90] sm:$0xff]  }
  0x1e   : > { %2159 = vmatpush3.bf16.msra.mxu1 %v2392_v11  ;;  %2140 = vmatprep.subr.bf16.mxu0 %v2488_v1  ;;  %v1837_v5 = vld [vmem:[%s3018_s5] ss:$0 sm:$0xff]  ;;  %v2425_v26 = vld [vmem:[%s3015_s2 + $0xa8] sm:$0xff]   ;;  %v2433_v40 = vld [vmem:[%s3016_s3 + $0x78] sm:$0xff]  }
  0x1f   : > { %2160 = vmatprep.subr.bf16.mxu1 %v2488_v1  ;;  %1580 = vperm.xlu0 %2381, %v1958_v32  }
  0x20   : > { %1585 = vperm.xlu1 %2382, %v1959_v33  }
  0x21   : > { %2141 = vmatpush3.bf16.msra.mxu0 %v2393_v14 }
  0x22   : > { %2161 = vmatpush3.bf16.msra.mxu1 %v2394_v15  ;;  %2142 = vmatprep.subr.bf16.mxu0 %v2488_v1 }
  0x23   : > { %2162 = vmatprep.subr.bf16.mxu1 %v2488_v1 }
  0x25   : > { %2143 = vmatpush3.bf16.msra.mxu0 %v2395_v16 }
  0x26   : > { %2163 = vmatpush3.bf16.msra.mxu1 %v2396_v17  ;;  %2144 = vmatprep.subr.bf16.mxu0 %v2488_v1 }
  0x27   : > { %2164 = vmatprep.subr.bf16.mxu1 %v2488_v1 }
  0x29   : > { %2145 = vmatpush3.bf16.msra.mxu0 %v2397_v18 }
  0x2a   : > { %2165 = vmatpush3.bf16.msra.mxu1 %v2398_v23  ;;  %2170 = vmatprep.subr.bf16.mxu0 %v2488_v1  ;;  %v2423_v23 = vld [vmem:[%s3015_s2 + $0xb8] sm:$0xff]  }
  0x2b   : > { %2190 = vmatprep.subr.bf16.mxu1 %v2488_v1 }
  0x2c   : > { %2147 = vmatmul.mubr.bf16.vlgmr.msra.gmra.mxu0 %v310_v27  ;;  %v2426_v27 = vld [vmem:[%s3015_s2 + $0xa0] sm:$0xff]  }
  0x2d   : > { %2167 = vmatmul.mubr.bf16.vlgmr.msra.gmra.mxu1 %v290_v28  ;;  %2171 = vmatpush3.bf16.msra.mxu0 %v2399_v25  ;;  %v2424_v25 = vld [vmem:[%s3015_s2 + $0xb0] sm:$0xff]   ;;  %v2427_v28 = vld [vmem:[%s3015_s2 + $0x98] sm:$0xff]  }
  0x2e   : > { %2172 = vmatprep.subr.bf16.mxu0 %v2488_v1  ;;  %2186 = vmatprep.mubr.msk.bf16.mxu0 %vm2489_vm0, %v2488_v1 }
  0x2f   : > { %2206 = vmatprep.mubr.msk.bf16.mxu1 %vm2489_vm0, %v2488_v1  ;;  %2191 = vmatpush3.bf16.msra.mxu1 %v2408_v43  ;;  %v2434_v43 = vld [vmem:[%s3016_s3 + $0x28] sm:$0xff]  }
  0x30   : > { %2192 = vmatprep.subr.bf16.mxu1 %v2488_v1 }
  0x31   : > { %2173 = vmatpush3.bf16.msra.mxu0 %v2400_v31  ;;  %v2429_v31 = vld [vmem:[%s3015_s2 + $0x88] sm:$0xff]  }
  0x32   : > { %2174 = vmatprep.subr.bf16.mxu0 %v2488_v1 }
  0x33   : > { %2193 = vmatpush3.bf16.msra.mxu1 %v2410_v45  ;;  %v2436_v45 = vld [vmem:[%s3016_s3 + $0x20] sm:$0xff]  }
  0x34   : > { %2194 = vmatprep.subr.bf16.mxu1 %v2488_v1 }
  0x35   : > { %2175 = vmatpush3.bf16.msra.mxu0 %v2401_v34 }
  0x36   : > { %2176 = vmatprep.subr.bf16.mxu0 %v2488_v1 }
  0x37   : > { %2195 = vmatpush3.bf16.msra.mxu1 %v2412_v47  ;;  %v2439_v47 = vld [vmem:[%s3016_s3 + $0x60] sm:$0xff]  }
  0x38   : > { %2196 = vmatprep.subr.bf16.mxu1 %v2488_v1 }
  0x39   : > { %2177 = vmatpush3.bf16.msra.mxu0 %v2402_v35  ;;  %v2430_v35 = vld [vmem:[%s3015_s2 + $0x80] sm:$0xff]  }
  0x3a   : > { %2178 = vmatprep.subr.bf16.mxu0 %v2488_v1 }
  0x3b   : > { %2197 = vmatpush3.bf16.msra.mxu1 %v2414_v51  ;;  %v2443_v51 = vld [vmem:[%s3016_s3 + $0x50] sm:$0xff]  }
  0x3c   : > { %2198 = vmatprep.subr.bf16.mxu1 %v2488_v1 }
  0x3d   : > { %2179 = vmatpush3.bf16.msra.mxu0 %v2403_v36 }
  0x3e   : > { %2180 = vmatprep.subr.bf16.mxu0 %v2488_v1 }
  0x3f   : > { %2199 = vmatpush3.bf16.msra.mxu1 %v2416_v53  ;;  %v2445_v53 = vld [vmem:[%s3016_s3 + $0x48] sm:$0xff]  }
  0x40   : > { %2200 = vmatprep.subr.bf16.mxu1 %v2488_v1 }
  0x41   : > { %2181 = vmatpush3.bf16.msra.mxu0 %v2404_v37 }
  0x42   : > { %2182 = vmatprep.subr.bf16.mxu0 %v2488_v1 }
  0x43   : > { %2201 = vmatpush3.bf16.msra.mxu1 %v2418_v55 }
  0x44   : > { %2202 = vmatprep.subr.bf16.mxu1 %v2488_v1 }
  0x45   : > { %2183 = vmatpush3.bf16.msra.mxu0 %v2405_v38 }
  0x46   : > { %2184 = vmatprep.subr.bf16.mxu0 %v2488_v1 }
  0x47   : > { %2203 = vmatpush3.bf16.msra.mxu1 %v2420_v56 }
  0x48   : > { %2204 = vmatprep.subr.bf16.mxu1 %v2488_v1 }
  0x49   : > { %2185 = vmatpush3.bf16.msra.mxu0 %v2406_v39  ;;  %v2431_v39 = vld [vmem:[%s3016_s3 + $0x38] sm:$0xff]  }
  0x4a   : > { %2210 = vmatprep.subr.bf16.mxu0 %v2488_v1 }
  0x4b   : > { %2205 = vmatpush3.bf16.msra.mxu1 %v2422_v57 }
  0x4c   : > { %2187 = vmatmul.mubr.bf16.vlgmr.msra.gmra.mxu0 %v507_v41  ;;  %2230 = vmatprep.subr.bf16.mxu1 %v2488_v1  ;;  %v2432_v41 = vld [vmem:[%s3016_s3 + $0x30] sm:$0xff]  }
  0x4d   : > { %2226 = vmatprep.mubr.msk.bf16.mxu0 %vm2489_vm0, %v2488_v1  ;;  %2211 = vmatpush3.bf16.msra.mxu0 %v2407_v42  ;;  %v2435_v42 = vld [vmem:[%s3016_s3 + $0x70] sm:$0xff]  }
  0x4e   : > { %2212 = vmatprep.subr.bf16.mxu0 %v2488_v1 }
  0x51   : > { %2213 = vmatpush3.bf16.msra.mxu0 %v2409_v44  ;;  %v2437_v44 = vld [vmem:[%s3016_s3 + $0x68] sm:$0xff]  }
  0x52   : > { %2214 = vmatprep.subr.bf16.mxu0 %v2488_v1 }
  0x55   : > { %2215 = vmatpush3.bf16.msra.mxu0 %v2411_v46  ;;  %v2438_v46 = vld [vmem:[%s3016_s3 + $0x18] sm:$0xff]  }
  0x56   : > { %2216 = vmatprep.subr.bf16.mxu0 %v2488_v1 }
  0x59   : > { %2217 = vmatpush3.bf16.msra.mxu0 %v2413_v48  ;;  %v2440_v48 = vld [vmem:[%s3016_s3 + $0x10] sm:$0xff]  }
  0x5a   : > { %2218 = vmatprep.subr.bf16.mxu0 %v2488_v1 }
  0x5d   : > { %2219 = vmatpush3.bf16.msra.mxu0 %v2415_v49  ;;  %v2441_v49 = vld [vmem:[%s3016_s3 + $0x58] sm:$0xff]  }
  0x5e   : > { %2220 = vmatprep.subr.bf16.mxu0 %v2488_v1 }
  0x61   : > { %2221 = vmatpush3.bf16.msra.mxu0 %v2417_v50  ;;  %v2442_v50 = vld [vmem:[%s3016_s3 + $0x8] sm:$0xff]  }
  0x62   : > { %2222 = vmatprep.subr.bf16.mxu0 %v2488_v1 }
  0x65   : > { %2223 = vmatpush3.bf16.msra.mxu0 %v2419_v52  ;;  %v2444_v52 = vld [vmem:[%s3016_s3] sm:$0xff]  }
  0x66   : > { %2224 = vmatprep.subr.bf16.mxu0 %v2488_v1 }
  0x69   : > { %2225 = vmatpush3.bf16.msra.mxu0 %v2421_v54  ;;  %v2447_v54 = vld [vmem:[%s3016_s3 + $0x40] sm:$0xff]  }
  0x6a   : > { %2250 = vmatprep.subr.bf16.mxu0 %v2488_v1 }
  0x8e   : > { %v659_v17 = vpop.permute.xlu0 %658 }
  0x8f   : > { %v868_v29 = vpop.permute.xlu1 %867 }
  0x92   : > { %v664_v19 = vpop.permute.xlu0 %663 }
  0x93   : > { %v873_v33 = vpop.permute.xlu1 %872 }
  0xec   : > { %v409_v58 = vpop.f32.mrf.mxu0 }
  0xed   : > { %v498_v59 = vpop.f32.mrf.mxu1 }
  0xee   : > { %v2148_v60 = vpop.f32.mrf.mxu0  ;;  %v499_v3 = vadd.f32 %v498_v59, %v409_v58 }
  0xef   : > { %v2168_v61 = vpop.f32.mrf.mxu1 }
  0xf0   : > { %v412_v62 = vpop.f32.mrf.mxu0 }
  0xf1   : > { %v501_v63 = vpop.f32.mrf.mxu1 }
  0xf2   : > { %v2149_v0 = vpop.f32.mrf.mxu0  ;;  %v502_v8 = vadd.f32 %v501_v63, %v412_v62 }
  0xf3   : > { %v2169_v2 = vpop.f32.mrf.mxu1 }
  0xf4   : > { %v1897_v2 = vld [vmem:[%s3018_s5 + $0x1] ss:$0 sm:$0xff] }
 0x10c   : > { %v607_v4 = vpop.f32.mrf.mxu0 }
 0x10d   : > { %v614_v6 = vadd.f32 %v607_v4, %v499_v3 }
 0x10e   : > { %v2188_v7 = vpop.f32.mrf.mxu0 }
 0x10f   : > { %v623_v9 = vadd.f32 %v1837_v5, %v614_v6 }
 0x110   : > { %v610_v10 = vpop.f32.mrf.mxu0 }
 0x111   : > { %v625_v11 = vmax.f32 %v623_v9, 0.0  ;;  %v615_v12 = vadd.f32 %v610_v10, %v502_v8 }
 0x112   : > { %v2189_v13 = vpop.f32.mrf.mxu0 }
 0x113   : > { %627 = vst [vmem:[#allocation3 + $0x8] sm:$0xff] %v625_v11  ;;  %v624_v14 = vadd.f32 %v1837_v5, %v615_v12 }
 0x115   : > { %v626_v15 = vmax.f32 %v624_v14, 0.0 }
 0x117   : > { %628 = vst [vmem:[#allocation3 + $0x10] sm:$0xff] %v626_v15  ;;  %v636_v16 = vpack.c.bf16 %v626_v15, %v625_v11  ;;  %v2446_v11 = vld [vmem:[%s3016_s3 + $0xb8] sm:$0xff]   ;;  %v2448_v15 = vld [vmem:[%s3016_s3 + $0xb0] sm:$0xff]  }
 0x119   : > { %2227 = vmatmul.mubr.bf16.vlgmr.msra.gmra.mxu0 %v636_v16 }
 0x11a   : > { %2266 = vmatprep.mubr.msk.bf16.mxu0 %vm2489_vm0, %v2488_v1  ;;  %v654_v18 = vld [vmem:[#allocation3 + $0x7] sm:$0xff]  ;;  %2251 = vmatpush3.bf16.msra.mxu0 %v2431_v39 }
 0x11b   : > { %v666_v21 = vmul.f32 %v659_v17, %v654_v18  ;;  %2252 = vmatprep.subr.bf16.mxu0 %v2488_v1  ;;  %v2449_v17 = vld [vmem:[%s3016_s3 + $0xa8] sm:$0xff]   ;;  %v2450_v18 = vld [vmem:[%s3016_s3 + $0xa0] sm:$0xff]  }
 0x11c   : > { %v2470_v39 = vld [vmem:[%s3017_s4] sm:$0xff]  }
 0x11e   : > { %v655_v20 = vld [vmem:[#allocation3 + $0xf] sm:$0xff]  ;;  %2253 = vmatpush3.bf16.msra.mxu0 %v2432_v41 }
 0x11f   : > { %v667_v22 = vmul.f32 %v664_v19, %v655_v20  ;;  %v863_v32 = vld [vmem:[#allocation3 + $0x9] sm:$0xff]  ;;  %v864_v34 = vld [vmem:[#allocation3 + $0x11] sm:$0xff]  ;;  %2254 = vmatprep.subr.bf16.mxu0 %v2488_v1  ;;  %v2882_v20 = vld [vmem:[#allocation2] sm:$0xff] }
 0x120   : > { %v875_v36 = vmul.f32 %v868_v29, %v863_v32  ;;  %v876_v37 = vmul.f32 %v873_v33, %v864_v34  ;;  %v2451_v19 = vld [vmem:[%s3016_s3 + $0x98] sm:$0xff]   ;;  %v2460_v29 = vld [vmem:[%s3017_s4 + $0x28] sm:$0xff]   ;;  %v2465_v32 = vld [vmem:[%s3017_s4 + $0x50] sm:$0xff]  }
 0x121   : > { %v668_v24 = vpack.c.bf16 %v667_v22, %v666_v21  ;;  %v2452_v21 = vld [vmem:[%s3016_s3 + $0x90] sm:$0xff]   ;;  %v2454_v22 = vld [vmem:[%s3016_s3 + $0x80] sm:$0xff]   ;;  %v2467_v34 = vld [vmem:[%s3017_s4 + $0x48] sm:$0xff]  }
 0x122   : > { %v877_v38 = vpack.c.bf16 %v876_v37, %v875_v36  ;;  %2255 = vmatpush3.bf16.msra.mxu0 %v2434_v43  ;;  %v2462_v33 = vld [vmem:[%s3017_s4 + $0x20] sm:$0xff]   ;;  %v2466_v37 = vld [vmem:[%s3017_s4 + $0x10] sm:$0xff]  }
 0x123   : > { %2207 = vmatmul.mubr.bf16.vlgmr.msra.gmra.mxu1 %v668_v24  ;;  %2256 = vmatprep.subr.bf16.mxu0 %v2488_v1  ;;  %v2455_v24 = vld [vmem:[%s3017_s4 + $0x78] sm:$0xff]   ;;  %v2469_v36 = vld [vmem:[%s3017_s4 + $0x40] sm:$0xff]  }
 0x124   : > { %2231 = vmatpush3.bf16.msra.mxu1 %v2423_v23  ;;  %2246 = vmatprep.mubr.msk.bf16.mxu1 %vm2489_vm0, %v2488_v1 }
 0x125   : > { %2232 = vmatprep.subr.bf16.mxu1 %v2488_v1 }
 0x126   : > { %2257 = vmatpush3.bf16.msra.mxu0 %v2436_v45 }
 0x127   : > { %2258 = vmatprep.subr.bf16.mxu0 %v2488_v1 }
 0x128   : > { %2233 = vmatpush3.bf16.msra.mxu1 %v2424_v25  ;;  %v2456_v25 = vld [vmem:[%s3017_s4 + $0x38] sm:$0xff]  }
 0x129   : > { %2234 = vmatprep.subr.bf16.mxu1 %v2488_v1 }
 0x12a   : > { %2259 = vmatpush3.bf16.msra.mxu0 %v2438_v46 }
 0x12b   : > { %2260 = vmatprep.subr.bf16.mxu0 %v2488_v1 }
 0x12c   : > { %2235 = vmatpush3.bf16.msra.mxu1 %v2425_v26  ;;  %v2457_v26 = vld [vmem:[%s3017_s4 + $0x70] sm:$0xff]  }
 0x12d   : > { %2236 = vmatprep.subr.bf16.mxu1 %v2488_v1 }
 0x12e   : > { %2261 = vmatpush3.bf16.msra.mxu0 %v2440_v48 }
 0x12f   : > { %2262 = vmatprep.subr.bf16.mxu0 %v2488_v1 }
 0x130   : > { %2237 = vmatpush3.bf16.msra.mxu1 %v2426_v27  ;;  %v2458_v27 = vld [vmem:[%s3017_s4 + $0x30] sm:$0xff]  }
 0x131   : > { %2238 = vmatprep.subr.bf16.mxu1 %v2488_v1 }
 0x132   : > { %2263 = vmatpush3.bf16.msra.mxu0 %v2442_v50  ;;  %v1955_v50 = vld [vmem:[%s3018_s5 + $0x2] ss:$0 sm:$0xff] }
 0x133   : > { %2264 = vmatprep.subr.bf16.mxu0 %v2488_v1 }
 0x134   : > { %2239 = vmatpush3.bf16.msra.mxu1 %v2427_v28  ;;  %v2459_v28 = vld [vmem:[%s3017_s4 + $0x68] sm:$0xff]  }
 0x135   : > { %2240 = vmatprep.subr.bf16.mxu1 %v2488_v1 }
 0x136   : > { %2265 = vmatpush3.bf16.msra.mxu0 %v2444_v52 }
 0x137   : > { %2290 = vmatprep.subr.bf16.mxu0 %v2488_v1 }
 0x138   : > { %2241 = vmatpush3.bf16.msra.mxu1 %v2428_v30  ;;  %v2461_v30 = vld [vmem:[%s3017_s4 + $0x60] sm:$0xff]  }
 0x139   : > { %2242 = vmatprep.subr.bf16.mxu1 %v2488_v1 }
 0x13c   : > { %2243 = vmatpush3.bf16.msra.mxu1 %v2429_v31  ;;  %v2463_v31 = vld [vmem:[%s3017_s4 + $0x58] sm:$0xff]  }
 0x13d   : > { %2244 = vmatprep.subr.bf16.mxu1 %v2488_v1 }
 0x140   : > { %2245 = vmatpush3.bf16.msra.mxu1 %v2430_v35  ;;  %v2464_v35 = vld [vmem:[%s3017_s4 + $0x18] sm:$0xff]  }
 0x141   : > { %2270 = vmatprep.subr.bf16.mxu1 %v2488_v1 }
 0x143   : > { %2247 = vmatmul.mubr.bf16.vlgmr.msra.gmra.mxu1 %v877_v38  ;;  %v2468_v38 = vld [vmem:[%s3017_s4 + $0x8] sm:$0xff]  }
 0x144   : > { %2286 = vmatprep.mubr.msk.bf16.mxu1 %vm2489_vm0, %v2488_v1  ;;  %2271 = vmatpush3.bf16.msra.mxu1 %v2433_v40 }
 0x145   : > { %2272 = vmatprep.subr.bf16.mxu1 %v2488_v1 }
 0x148   : > { %2273 = vmatpush3.bf16.msra.mxu1 %v2435_v42 }
 0x149   : > { %2274 = vmatprep.subr.bf16.mxu1 %v2488_v1 }
 0x14c   : > { %2275 = vmatpush3.bf16.msra.mxu1 %v2437_v44 }
 0x14d   : > { %2276 = vmatprep.subr.bf16.mxu1 %v2488_v1 }
 0x150   : > { %2277 = vmatpush3.bf16.msra.mxu1 %v2439_v47 }
 0x151   : > { %2278 = vmatprep.subr.bf16.mxu1 %v2488_v1 }
 0x154   : > { %2279 = vmatpush3.bf16.msra.mxu1 %v2441_v49 }
 0x155   : > { %2280 = vmatprep.subr.bf16.mxu1 %v2488_v1 }
 0x158   : > { %2281 = vmatpush3.bf16.msra.mxu1 %v2443_v51 }
 0x159   : > { %2282 = vmatprep.subr.bf16.mxu1 %v2488_v1 }
 0x15c   : > { %2283 = vmatpush3.bf16.msra.mxu1 %v2445_v53 }
 0x15d   : > { %2284 = vmatprep.subr.bf16.mxu1 %v2488_v1 }
 0x160   : > { %2285 = vmatpush3.bf16.msra.mxu1 %v2447_v54 }
 0x161   : > { %2310 = vmatprep.subr.bf16.mxu1 %v2488_v1 }
 0x1d9   : > { %v856_v55 = vpop.f32.mrf.mxu0 }
 0x1db   : > { %v2228_v56 = vpop.f32.mrf.mxu0 }
 0x1dd   : > { %v859_v57 = vpop.f32.mrf.mxu0 }
 0x1df   : > { %v2229_v58 = vpop.f32.mrf.mxu0 }
 0x1e3   : > { %v767_v59 = vpop.f32.mrf.mxu1 }
 0x1e4   : > { %v857_v63 = vadd.f32 %v856_v55, %v767_v59 }
 0x1e5   : > { %v2208_v60 = vpop.f32.mrf.mxu1 }
 0x1e7   : > { %v770_v61 = vpop.f32.mrf.mxu1 }
 0x1e8   : > { %v860_v5 = vadd.f32 %v859_v57, %v770_v61 }
 0x1e9   : > { %v2209_v62 = vpop.f32.mrf.mxu1 }
 0x203   : > { %v977_v0 = vpop.f32.mrf.mxu1 }
 0x204   : > { %v984_v3 = vadd.f32 %v977_v0, %v857_v63  ;;  %v1372_v63 = vpop.permute.xlu0 %1371  ;;  %v1377_v0 = vpop.permute.xlu1 %1376 }
 0x205   : > { %v2248_v4 = vpop.f32.mrf.mxu1 }
 0x206   : > { %v994_v6 = vadd.f32 %v1897_v2, %v984_v3 }
 0x207   : > { %v980_v7 = vpop.f32.mrf.mxu1 }
 0x208   : > { %v996_v8 = vmax.f32 %v994_v6, 0.0  ;;  %v985_v9 = vadd.f32 %v980_v7, %v860_v5  ;;  %v2471_v5 = vld [vmem:[%s3017_s4 + $0xb8] sm:$0xff]   ;;  %v2472_v7 = vld [vmem:[%s3017_s4 + $0xb0] sm:$0xff]  }
 0x209   : > { %v2249_v10 = vpop.f32.mrf.mxu1 }
 0x20a   : > { %998 = vst [vmem:[#allocation2 + $0x8] sm:$0xff] %v996_v8  ;;  %v995_v12 = vadd.f32 %v1897_v2, %v985_v9  ;;  %v1021_v13 = vpack.c.bf16 %v996_v8, %v2488_v1  ;;  %v2474_v9 = vld [vmem:[%s3017_s4 + $0xa0] sm:$0xff]   ;;  %v2475_v10 = vld [vmem:[%s3017_s4 + $0x98] sm:$0xff]  }
 0x20c   : > { %v997_v14 = vmax.f32 %v995_v12, 0.0  ;;  %2267 = vmatmul.mubr.bf16.vlgmr.msra.gmra.mxu0 %v1021_v13  ;;  %v2477_v12 = vld [vmem:[%s3017_s4 + $0x88] sm:$0xff]  }
 0x20d   : > { %2291 = vmatpush3.bf16.msra.mxu0 %v2446_v11  ;;  %2306 = vmatprep.mubr.msk.bf16.mxu0 %vm2489_vm0, %v2488_v1  ;;  %v2476_v11 = vld [vmem:[%s3017_s4 + $0x90] sm:$0xff]  }
 0x20e   : > { %999 = vst [vmem:[#allocation2 + $0x10] sm:$0xff] %v997_v14  ;;  %2292 = vmatprep.subr.bf16.mxu0 %v2488_v1  ;;  %v1002_v16 = vpack.c.bf16 %v997_v14, %v996_v8  ;;  %v1218_v23 = vpack.c.bf16 %v2882_v20, %v997_v14  ;;  %v2473_v8 = vld [vmem:[%s3017_s4 + $0xa8] sm:$0xff]  }
 0x210   : > { %2287 = vmatmul.mubr.bf16.vlgmr.msra.gmra.mxu1 %v1002_v16  ;;  %v1586_v16 = vpop.permute.xlu1 %1585 }
 0x211   : > { %2293 = vmatpush3.bf16.msra.mxu0 %v2448_v15  ;;  %2326 = vmatprep.mubr.msk.bf16.mxu1 %vm2489_vm0, %v2488_v1  ;;  %v1581_v15 = vpop.permute.xlu0 %1580 }
 0x212   : > { %2294 = vmatprep.subr.bf16.mxu0 %v2488_v1  ;;  %2311 = vmatpush3.bf16.msra.mxu1 %v2456_v25 }
 0x213   : > { %2312 = vmatprep.subr.bf16.mxu1 %v2882_v20 }
 0x215   : > { %2295 = vmatpush3.bf16.msra.mxu0 %v2449_v17  ;;  %v2478_v17 = vld [vmem:[%s3017_s4 + $0x80] sm:$0xff]  }
 0x216   : > { %2296 = vmatprep.subr.bf16.mxu0 %v2488_v1  ;;  %v2453_v1 = vld [vmem:[%s3016_s3 + $0x88] sm:$0xff]   ;;  %2313 = vmatpush3.bf16.msra.mxu1 %v2458_v27 }
 0x217   : > { %2314 = vmatprep.subr.bf16.mxu1 %v2882_v20 }
 0x219   : > { %2297 = vmatpush3.bf16.msra.mxu0 %v2450_v18 }
 0x21a   : > { %2298 = vmatprep.subr.bf16.mxu0 %v2882_v20  ;;  %2315 = vmatpush3.bf16.msra.mxu1 %v2460_v29 }
 0x21b   : > { %2316 = vmatprep.subr.bf16.mxu1 %v2882_v20 }
 0x21d   : > { %2299 = vmatpush3.bf16.msra.mxu0 %v2451_v19 }
 0x21e   : > { %2300 = vmatprep.subr.bf16.mxu0 %v2882_v20  ;;  %2317 = vmatpush3.bf16.msra.mxu1 %v2462_v33 }
 0x21f   : > { %2318 = vmatprep.subr.bf16.mxu1 %v2882_v20 }
 0x221   : > { %2301 = vmatpush3.bf16.msra.mxu0 %v2452_v21 }
 0x222   : > { %2302 = vmatprep.subr.bf16.mxu0 %v2882_v20  ;;  %2319 = vmatpush3.bf16.msra.mxu1 %v2464_v35 }
 0x223   : > { %2320 = vmatprep.subr.bf16.mxu1 %v2882_v20 }
 0x225   : > { %2303 = vmatpush3.bf16.msra.mxu0 %v2453_v1 }
 0x226   : > { %2304 = vmatprep.subr.bf16.mxu0 %v2882_v20  ;;  %2321 = vmatpush3.bf16.msra.mxu1 %v2466_v37 }
 0x227   : > { %2322 = vmatprep.subr.bf16.mxu1 %v2882_v20 }
 0x229   : > { %2305 = vmatpush3.bf16.msra.mxu0 %v2454_v22 }
 0x22a   : > { %2330 = vmatprep.subr.bf16.mxu0 %v2882_v20  ;;  %2323 = vmatpush3.bf16.msra.mxu1 %v2468_v38 }
 0x22b   : > { %2324 = vmatprep.subr.bf16.mxu1 %v2882_v20 }
 0x22c   : > { %2307 = vmatmul.mubr.bf16.vlgmr.msra.gmra.mxu0 %v1218_v23 }
 0x22d   : > { %2346 = vmatprep.mubr.msk.bf16.mxu0 %vm2489_vm0, %v2882_v20  ;;  %2331 = vmatpush3.bf16.msra.mxu0 %v2455_v24 }
 0x22e   : > { %2332 = vmatprep.subr.bf16.mxu0 %v2882_v20  ;;  %2325 = vmatpush3.bf16.msra.mxu1 %v2470_v39  ;;  %v1710_v39 = vld [vmem:[%s2587_s22 + $0x8] sm:$0xff] }
 0x22f   : > { %2350 = vmatprep.subr.bf16.mxu1 %v2882_v20 }
 0x231   : > { %2333 = vmatpush3.bf16.msra.mxu0 %v2457_v26 }
 0x232   : > { %2334 = vmatprep.subr.bf16.mxu0 %v2882_v20 }
 0x235   : > { %2335 = vmatpush3.bf16.msra.mxu0 %v2459_v28 }
 0x236   : > { %2336 = vmatprep.subr.bf16.mxu0 %v2882_v20 }
 0x239   : > { %2337 = vmatpush3.bf16.msra.mxu0 %v2461_v30 }
 0x23a   : > { %2338 = vmatprep.subr.bf16.mxu0 %v2882_v20 }
 0x23d   : > { %2339 = vmatpush3.bf16.msra.mxu0 %v2463_v31 }
 0x23e   : > { %2340 = vmatprep.subr.bf16.mxu0 %v2882_v20 }
 0x241   : > { %2341 = vmatpush3.bf16.msra.mxu0 %v2465_v32  ;;  %v1709_v32 = vld [vmem:[%s2587_s22] sm:$0xff] }
 0x242   : > { %2342 = vmatprep.subr.bf16.mxu0 %v2882_v20 }
 0x245   : > { %2343 = vmatpush3.bf16.msra.mxu0 %v2467_v34 }
 0x246   : > { %2344 = vmatprep.subr.bf16.mxu0 %v2882_v20 }
 0x249   : > { %2345 = vmatpush3.bf16.msra.mxu0 %v2469_v36 }
 0x2cc   : > { %v1120_v40 = vpop.f32.mrf.mxu0 }
 0x2ce   : > { %v2268_v41 = vpop.f32.mrf.mxu0 }
 0x2d0   : > { %v1123_v42 = vpop.f32.mrf.mxu0  ;;  %v1209_v43 = vpop.f32.mrf.mxu1 }
 0x2d1   : > { %v1210_v48 = vadd.f32 %v1209_v43, %v1120_v40 }
 0x2d2   : > { %v2269_v44 = vpop.f32.mrf.mxu0  ;;  %v2288_v45 = vpop.f32.mrf.mxu1 }
 0x2d4   : > { %v1212_v46 = vpop.f32.mrf.mxu1 }
 0x2d5   : > { %v1213_v53 = vadd.f32 %v1212_v46, %v1123_v42 }
 0x2d6   : > { %v2289_v47 = vpop.f32.mrf.mxu1 }
 0x2ec   : > { %v1318_v49 = vpop.f32.mrf.mxu0 }
 0x2ed   : > { %v1325_v51 = vadd.f32 %v1318_v49, %v1210_v48 }
 0x2ee   : > { %v2308_v52 = vpop.f32.mrf.mxu0 }
 0x2ef   : > { %v1335_v54 = vadd.f32 %v1955_v50, %v1325_v51 }
 0x2f0   : > { %v1321_v55 = vpop.f32.mrf.mxu0 }
 0x2f1   : > { %v1337_v56 = vmax.f32 %v1335_v54, 0.0  ;;  %v1326_v57 = vadd.f32 %v1321_v55, %v1213_v53 }
 0x2f2   : > { %v2309_v58 = vpop.f32.mrf.mxu0 }
 0x2f3   : > { %1339 = vst [vmem:[#allocation3 + $0x8] sm:$0xff] %v1337_v56  ;;  %v1336_v59 = vadd.f32 %v1955_v50, %v1326_v57 }
 0x2f5   : > { %v1338_v60 = vmax.f32 %v1336_v59, 0.0 }
 0x2f7   : > { %1340 = vst [vmem:[#allocation3 + $0x10] sm:$0xff] %v1338_v60  ;;  %v1349_v61 = vpack.c.bf16 %v1338_v60, %v1337_v56 }
 0x2f9   : > { %2347 = vmatmul.mubr.bf16.vlgmr.msra.gmra.mxu0 %v1349_v61 }
 0x2fa   : > { %v1367_v62 = vld [vmem:[#allocation3 + $0x6] sm:$0xff] }
 0x2fb   : > { %v1379_v3 = vmul.f32 %v1372_v63, %v1367_v62 }
 0x2fe   : > { %v1368_v2 = vld [vmem:[#allocation3 + $0xe] sm:$0xff] }
 0x2ff   : > { %v1380_v4 = vmul.f32 %v1377_v0, %v1368_v2  ;;  %v1576_v13 = vld [vmem:[#allocation3 + $0xa] sm:$0xff]  ;;  %v1577_v14 = vld [vmem:[#allocation3 + $0x12] sm:$0xff] }
 0x300   : > { %v1588_v18 = vmul.f32 %v1581_v15, %v1576_v13  ;;  %v1589_v19 = vmul.f32 %v1586_v16, %v1577_v14 }
 0x301   : > { %v1381_v6 = vpack.c.bf16 %v1380_v4, %v1379_v3 }
 0x302   : > { %v1590_v21 = vpack.c.bf16 %v1589_v19, %v1588_v18 }
 0x303   : > { %2327 = vmatmul.mubr.bf16.vlgmr.msra.gmra.mxu1 %v1381_v6 }
 0x304   : > { %2351 = vmatpush3.bf16.msra.mxu1 %v2471_v5  ;;  %2366 = vmatprep.mubr.msk.bf16.mxu1 %vm2489_vm0, %v2882_v20 }
 0x305   : > { %2352 = vmatprep.subr.bf16.mxu1 %v2882_v20 }
 0x308   : > { %2353 = vmatpush3.bf16.msra.mxu1 %v2472_v7 }
 0x309   : > { %2354 = vmatprep.subr.bf16.mxu1 %v2882_v20 }
 0x30c   : > { %2355 = vmatpush3.bf16.msra.mxu1 %v2473_v8 }
 0x30d   : > { %2356 = vmatprep.subr.bf16.mxu1 %v2882_v20 }
 0x310   : > { %2357 = vmatpush3.bf16.msra.mxu1 %v2474_v9 }
 0x311   : > { %2358 = vmatprep.subr.bf16.mxu1 %v2882_v20 }
 0x314   : > { %2359 = vmatpush3.bf16.msra.mxu1 %v2475_v10 }
 0x315   : > { %2360 = vmatprep.subr.bf16.mxu1 %v2882_v20 }
 0x318   : > { %2361 = vmatpush3.bf16.msra.mxu1 %v2476_v11 }
 0x319   : > { %2362 = vmatprep.subr.bf16.mxu1 %v2882_v20 }
 0x31c   : > { %2363 = vmatpush3.bf16.msra.mxu1 %v2477_v12 }
 0x31d   : > { %2364 = vmatprep.subr.bf16.mxu1 %v2882_v20  ;;  %v2017_v20 = vld [vmem:[%s3018_s5 + $0x3] ss:$0 sm:$0xff] }
 0x320   : > { %2365 = vmatpush3.bf16.msra.mxu1 %v2478_v17 }
 0x323   : > { %2367 = vmatmul.mubr.bf16.vlgmr.msra.gmra.mxu1 %v1590_v21 }
 0x3b9   : > { %v1569_v1 = vpop.f32.mrf.mxu0 }
 0x3bb   : > { %v2348_v22 = vpop.f32.mrf.mxu0 }
 0x3bd   : > { %v1572_v23 = vpop.f32.mrf.mxu0 }
 0x3bf   : > { %v2349_v24 = vpop.f32.mrf.mxu0 }
 0x3c3   : > { %v1480_v25 = vpop.f32.mrf.mxu1 }
 0x3c4   : > { %v1570_v29 = vadd.f32 %v1569_v1, %v1480_v25 }
 0x3c5   : > { %v2328_v26 = vpop.f32.mrf.mxu1 }
 0x3c7   : > { %v1483_v27 = vpop.f32.mrf.mxu1 }
 0x3c8   : > { %v1573_v34 = vadd.f32 %v1572_v23, %v1483_v27 }
 0x3c9   : > { %v2329_v28 = vpop.f32.mrf.mxu1 }
 0x3e3   : > { %v1690_v30 = vpop.f32.mrf.mxu1 }
 0x3e4   : > { %v1697_v31 = vadd.f32 %v1690_v30, %v1570_v29 }
 0x3e5   : > { %v2368_v33 = vpop.f32.mrf.mxu1 }
 0x3e6   : > { %v1707_v35 = vadd.f32 %v2017_v20, %v1697_v31 }
 0x3e7   : > { %v1693_v36 = vpop.f32.mrf.mxu1 }
 0x3e8   : > { %v1711_v37 = vadd.f32 %v1709_v32, %v1707_v35  ;;  %v1698_v38 = vadd.f32 %v1693_v36, %v1573_v34 }
 0x3e9   : > { %v2369_v40 = vpop.f32.mrf.mxu1 }
 0x3ea   : > { %v1713_v41 = vmax.f32 %v1711_v37, 0.0  ;;  %v1708_v42 = vadd.f32 %v2017_v20, %v1698_v38 }
 0x3ec   : > { %1715 = vst [vmem:[%s278_s14] sm:$0xff] %v1713_v41  ;;  %v1712_v43 = vadd.f32 %v1710_v39, %v1708_v42 }
 0x3ee   : > { %v1714_v44 = vmax.f32 %v1712_v43, 0.0 }
 0x3f0   : > { %1716 = vst [vmem:[%s278_s14 + $0x8] sm:$0xff] %v1714_v44 }
 0x3f1 PF: > { %s17_s24 = sadd.s32 1, %s2486_s24  }
 0x3f2   : > { %p14_p4 = scmp.ge.s32.totalorder %s17_s24, 4  }
 0x3f4   :  { %16 = sbr.rel (!%p14_p4) target bundleno = 1 (0x1), region = 92 }

// kernel: _lambda_.25
= control target key start
LH: loop header
LB: loop body
LE: loop exit
PB: predicated region body
PF: predicated region fallthrough
CT: control target
= control target key end

     0   :  { %s1871_s24 = smov 0   ;;  %s2205_s0 = inlined_call_operand.vmem [shape: f32[2,16,128], index: 0, kind: input, shape index: {}]   ;;  %s2206_s1 = inlined_call_operand.vmem [shape: bf16[3,128,128], index: 1, kind: input, shape index: {}]   ;;  %s2207_s2 = inlined_call_operand.vmem [shape: bf16[3,128,128], index: 2, kind: input, shape index: {}]   ;;  %s2208_s3 = inlined_call_operand.vmem [shape: bf16[3,128,128], index: 3, kind: input, shape index: {}]   ;;  %s2209_s4 = inlined_call_operand.vmem [shape: bf16[3,128,128], index: 4, kind: input, shape index: {}]   ;;  %s2210_s5 = inlined_call_operand.vmem [shape: f32[4,1,128], index: 5, kind: input, shape index: {}]   ;;  %s2211_s6 = inlined_call_operand.vmem [shape: f32[4,16,1], index: 6, kind: input, shape index: {}]   ;;  %s2212_s7 = inlined_call_operand.vmem [shape: f32[2,16,128], index: 7, kind: output, shape index: {}]  }
   0x1 LB: > { %s1329_s25 = sadd.s32 4294967295, %s1826_s24   ;;  %p1333_p0 = scmp.ge.s32.totalorder %s1826_s24, 1  ;;  %s1826_s24 = sphi %s1871_s24, %s17_s24  }
   0x2   : > { %p237_p1 = scmp.lt.s32.totalorder %s1826_s24, 3 }
   0x4   : > { %p238_p2 = pnand %p1333_p0, %p237_p1 }
   0x5   : > { %p269_p3 = scmp.lt.s32.totalorder (!%p238_p2), %s1329_s25, 1 }
   0x6   : > { %241 = sbr.rel (%p238_p2) target bundleno = 935 (0x3a7), region = 48 }
   0xb   : > { %v1756_v0 = vld [vmem:[%s2206_s1 + $0x38] sm:$0xff]   ;;  %v1828_v1 = vmov 0.0   ;;  %v1758_v3 = vld [vmem:[%s2206_s1 + $0x30] sm:$0xff]   ;;  %vm1829_vm0 = vmmov 0   ;;  %v1830_v5 = vmov 0   ;;  %v1760_v6 = vld [vmem:[%s2206_s1 + $0x28] sm:$0xff]  }
   0xc   : > { %1583 = vmatprep.subr.bf16.mxu0 %v1828_v1  ;;  %287 = vst [vmem:[#allocation2 + $0x38] sm:$0xff] %v1828_v1  ;;  %288 = vst [vmem:[#allocation2 + $0x50] sm:$0xff] %v1828_v1  ;;  %1603 = vmatprep.subr.bf16.mxu1 %v1828_v1  ;;  %v1757_v2 = vld [vmem:[%s2206_s1 + $0x78] sm:$0xff]   ;;  %v1759_v4 = vld [vmem:[%s2206_s1 + $0x70] sm:$0xff]   ;;  %s2214_s25 = smov (!%p269_p3, %s1329_s25), 1 }
   0xd   : > { %303 = vst [vmem:[#allocation3 + $0x38] sm:$0xff] %v1828_v1  ;;  %304 = vst [vmem:[#allocation3 + $0x50] sm:$0xff] %v1828_v1  ;;  %1584 = vmatpush3.bf16.msra.mxu0 %v1756_v0  ;;  %1599 = vmatprep.mubr.msk.bf16.mxu0 %vm1829_vm0, %v1828_v1  ;;  %v1761_v7 = vld [vmem:[%s2206_s1 + $0x68] sm:$0xff]   ;;  %v1762_v8 = vld [vmem:[%s2206_s1 + $0x20] sm:$0xff]   ;;  %s1509_s17 = sshll.u32 %s2214_s25, 4 }
   0xe   : > { %1604 = vmatpush3.bf16.msra.mxu1 %v1757_v2  ;;  %1585 = vmatprep.subr.bf16.mxu0 %v1828_v1  ;;  %v1763_v9 = vld [vmem:[%s2206_s1 + $0x60] sm:$0xff]   ;;  %s273_s22 = scalar_lea.vmem %s2205_s0, %s1509_s17  ;;  %v1764_v10 = vld [vmem:[%s2206_s1 + $0x18] sm:$0xff]   ;;  %v1766_v14 = vld [vmem:[%s2206_s1 + $0x10] sm:$0xff]   ;;  %s278_s12 = scalar_lea.vmem %s2212_s7, %s1509_s17 }
   0xf   : > { %1605 = vmatprep.subr.bf16.mxu1 %v1828_v1  ;;  %1619 = vmatprep.mubr.msk.bf16.mxu1 %vm1829_vm0, %v1828_v1  ;;  %v1765_v11 = vld [vmem:[%s2206_s1 + $0x58] sm:$0xff]   ;;  %v1935_v12 = vld [vmem:[%s273_s22] sm:$0xff]  ;;  %v1937_v13 = vld [vmem:[%s273_s22 + $0x8] sm:$0xff] }
  0x10   : > { %1754 = vset.pattern.permute.xlu0 %v1830_v5  ;;  %1755 = vset.pattern.permute.xlu1 %v1830_v5  ;;  %314 = vst [vmem:[#allocation2 + $0x40] sm:$0xff] %v1935_v12  ;;  %315 = vst [vmem:[#allocation2 + $0x48] sm:$0xff] %v1937_v13  ;;  %v1767_v15 = vld [vmem:[%s2206_s1 + $0x50] sm:$0xff]   ;;  %v1768_v16 = vld [vmem:[%s2206_s1 + $0x8] sm:$0xff]   ;;  %v318_v28 = vpack.c.bf16 %v1937_v13, %v1935_v12 }
  0x11   : > { %1586 = vmatpush3.bf16.msra.mxu0 %v1758_v3  ;;  %v1769_v17 = vld [vmem:[%s2206_s1 + $0x48] sm:$0xff]   ;;  %v1770_v18 = vld [vmem:[%s2206_s1] sm:$0xff]   ;;  %v1395_v23 = vld [vmem:[%s2211_s6 + $0x10] sm:$0xff] }
  0x12   : > { %1606 = vmatpush3.bf16.msra.mxu1 %v1759_v4  ;;  %1587 = vmatprep.subr.bf16.mxu0 %v1828_v1  ;;  %v1771_v19 = vld [vmem:[%s2206_s1 + $0x40] sm:$0xff]   ;;  %v658_v24 = vld [vmem:[%s2211_s6 + $0x8] sm:$0xff]  ;;  %v1396_v25 = vld [vmem:[%s2211_s6 + $0x18] sm:$0xff] }
  0x13   : > { %1607 = vmatprep.subr.bf16.mxu1 %v1828_v1  ;;  %v657_v21 = vld [vmem:[%s2211_s6] sm:$0xff]  ;;  %v1772_v26 = vld [vmem:[%s2206_s1 + $0xb8] sm:$0xff]   ;;  %895 = vperm.xlu1 %1755, %v1395_v23   ;;  %v1773_v29 = vld [vmem:[%s2206_s1 + $0xb0] sm:$0xff]  }
  0x14   : > { %686 = vperm.xlu0 %1754, %v657_v21   ;;  %v1774_v30 = vld [vmem:[%s2206_s1 + $0xa8] sm:$0xff]   ;;  %v1775_v31 = vld [vmem:[%s2206_s1 + $0xa0] sm:$0xff]   ;;  %v1776_v32 = vld [vmem:[%s2206_s1 + $0x98] sm:$0xff]  }
  0x15   : > { %1588 = vmatpush3.bf16.msra.mxu0 %v1760_v6  ;;  %v1777_v33 = vld [vmem:[%s2206_s1 + $0x90] sm:$0xff]   ;;  %v1778_v34 = vld [vmem:[%s2206_s1 + $0x88] sm:$0xff]   ;;  %v1779_v35 = vld [vmem:[%s2206_s1 + $0x80] sm:$0xff]  }
  0x16   : > { %1608 = vmatpush3.bf16.msra.mxu1 %v1761_v7  ;;  %1589 = vmatprep.subr.bf16.mxu0 %v1828_v1  ;;  %v1780_v38 = vld [vmem:[%s2207_s2 + $0x78] sm:$0xff]   ;;  %v1782_v40 = vld [vmem:[%s2207_s2 + $0x70] sm:$0xff]   ;;  %v1784_v42 = vld [vmem:[%s2207_s2 + $0x68] sm:$0xff]  }
  0x17   : > { %1609 = vmatprep.subr.bf16.mxu1 %v1828_v1  ;;  %v336_v20 = vld [vmem:[#allocation2 + $0x3c] sm:$0xff]  ;;  %v337_v22 = vld [vmem:[#allocation2 + $0x44] sm:$0xff]  ;;  %900 = vperm.xlu1 %1755, %v1396_v25   ;;  %v534_v36 = vld [vmem:[#allocation2 + $0x4c] sm:$0xff] }
  0x18   : > { %v338_v27 = vpack.c.bf16 %v337_v22, %v336_v20  ;;  %691 = vperm.xlu0 %1754, %v658_v24   ;;  %v535_v37 = vpack.c.bf16 %v534_v36, %v337_v22  ;;  %v1781_v39 = vld [vmem:[%s2207_s2 + $0x38] sm:$0xff]   ;;  %v1783_v41 = vld [vmem:[%s2207_s2 + $0x30] sm:$0xff]   ;;  %v1785_v43 = vld [vmem:[%s2207_s2 + $0x28] sm:$0xff]  }
  0x19   : > { %1590 = vmatpush3.bf16.msra.mxu0 %v1762_v8  ;;  %v1786_v44 = vld [vmem:[%s2207_s2 + $0x60] sm:$0xff]   ;;  %v1788_v45 = vld [vmem:[%s2207_s2 + $0x58] sm:$0xff]   ;;  %v1790_v46 = vld [vmem:[%s2207_s2 + $0x50] sm:$0xff]  }
  0x1a   : > { %1610 = vmatpush3.bf16.msra.mxu1 %v1763_v9  ;;  %1591 = vmatprep.subr.bf16.mxu0 %v1828_v1  ;;  %v1787_v47 = vld [vmem:[%s2207_s2 + $0x20] sm:$0xff]   ;;  %v1792_v48 = vld [vmem:[%s2207_s2 + $0x48] sm:$0xff]   ;;  %v1789_v49 = vld [vmem:[%s2207_s2 + $0x18] sm:$0xff]  }
  0x1b   : > { %1611 = vmatprep.subr.bf16.mxu1 %v1828_v1  ;;  %v1794_v50 = vld [vmem:[%s2207_s2 + $0x40] sm:$0xff]   ;;  %v1791_v51 = vld [vmem:[%s2207_s2 + $0x10] sm:$0xff]   ;;  %v1793_v52 = vld [vmem:[%s2207_s2 + $0x8] sm:$0xff]  }
  0x1c   : > { %v1795_v53 = vld [vmem:[%s2207_s2] sm:$0xff]   ;;  %v1796_v21 = vld [vmem:[%s2207_s2 + $0xb8] sm:$0xff]   ;;  %v1797_v23 = vld [vmem:[%s2207_s2 + $0xb0] sm:$0xff]  }
  0x1d   : > { %1592 = vmatpush3.bf16.msra.mxu0 %v1764_v10  ;;  %v1394_v0 = vld [vmem:[%s2210_s5] ss:$0 sm:$0xff]  ;;  %v1798_v24 = vld [vmem:[%s2207_s2 + $0xa8] sm:$0xff]  }
  0x1e   : > { %1612 = vmatpush3.bf16.msra.mxu1 %v1765_v11  ;;  %1593 = vmatprep.subr.bf16.mxu0 %v1828_v1  ;;  %v1799_v25 = vld [vmem:[%s2207_s2 + $0xa0] sm:$0xff]  }
  0x1f   : > { %1613 = vmatprep.subr.bf16.mxu1 %v1828_v1 }
  0x21   : > { %1594 = vmatpush3.bf16.msra.mxu0 %v1766_v14 }
  0x22   : > { %1614 = vmatpush3.bf16.msra.mxu1 %v1767_v15  ;;  %1595 = vmatprep.subr.bf16.mxu0 %v1828_v1 }
  0x23   : > { %1615 = vmatprep.subr.bf16.mxu1 %v1828_v1 }
  0x25   : > { %1596 = vmatpush3.bf16.msra.mxu0 %v1768_v16 }
  0x26   : > { %1616 = vmatpush3.bf16.msra.mxu1 %v1769_v17  ;;  %1597 = vmatprep.subr.bf16.mxu0 %v1828_v1 }
  0x27   : > { %1617 = vmatprep.subr.bf16.mxu1 %v1828_v1 }
  0x29   : > { %1598 = vmatpush3.bf16.msra.mxu0 %v1770_v18 }
  0x2a   : > { %1618 = vmatpush3.bf16.msra.mxu1 %v1771_v19  ;;  %1623 = vmatprep.subr.bf16.mxu0 %v1828_v1 }
  0x2b   : > { %1643 = vmatprep.subr.bf16.mxu1 %v1828_v1 }
  0x2c   : > { %1600 = vmatmul.mubr.bf16.vlgmr.msra.gmra.mxu0 %v338_v27 }
  0x2d   : > { %1620 = vmatmul.mubr.bf16.vlgmr.msra.gmra.mxu1 %v318_v28  ;;  %1624 = vmatpush3.bf16.msra.mxu0 %v1772_v26  ;;  %v1800_v26 = vld [vmem:[%s2207_s2 + $0x98] sm:$0xff]   ;;  %v1801_v28 = vld [vmem:[%s2207_s2 + $0x90] sm:$0xff]  }
  0x2e   : > { %1625 = vmatprep.subr.bf16.mxu0 %v1828_v1  ;;  %1639 = vmatprep.mubr.msk.bf16.mxu0 %vm1829_vm0, %v1828_v1 }
  0x2f   : > { %1659 = vmatprep.mubr.msk.bf16.mxu1 %vm1829_vm0, %v1828_v1  ;;  %1644 = vmatpush3.bf16.msra.mxu1 %v1781_v39  ;;  %v1806_v39 = vld [vmem:[%s2208_s3 + $0x68] sm:$0xff]  }
  0x30   : > { %1645 = vmatprep.subr.bf16.mxu1 %v1828_v1 }
  0x31   : > { %1626 = vmatpush3.bf16.msra.mxu0 %v1773_v29  ;;  %v1802_v29 = vld [vmem:[%s2207_s2 + $0x88] sm:$0xff]  }
  0x32   : > { %1627 = vmatprep.subr.bf16.mxu0 %v1828_v1 }
  0x33   : > { %1646 = vmatpush3.bf16.msra.mxu1 %v1783_v41  ;;  %v1808_v41 = vld [vmem:[%s2208_s3 + $0x58] sm:$0xff]  }
  0x34   : > { %1647 = vmatprep.subr.bf16.mxu1 %v1828_v1 }
  0x35   : > { %1628 = vmatpush3.bf16.msra.mxu0 %v1774_v30 }
  0x36   : > { %1629 = vmatprep.subr.bf16.mxu0 %v1828_v1 }
  0x37   : > { %1648 = vmatpush3.bf16.msra.mxu1 %v1785_v43  ;;  %v1810_v43 = vld [vmem:[%s2208_s3 + $0x48] sm:$0xff]  }
  0x38   : > { %1649 = vmatprep.subr.bf16.mxu1 %v1828_v1 }
  0x39   : > { %1630 = vmatpush3.bf16.msra.mxu0 %v1775_v31 }
  0x3a   : > { %1631 = vmatprep.subr.bf16.mxu0 %v1828_v1 }
  0x3b   : > { %1650 = vmatpush3.bf16.msra.mxu1 %v1787_v47  ;;  %v1814_v47 = vld [vmem:[%s2209_s4 + $0x68] sm:$0xff]  }
  0x3c   : > { %1651 = vmatprep.subr.bf16.mxu1 %v1828_v1 }
  0x3d   : > { %1632 = vmatpush3.bf16.msra.mxu0 %v1776_v32 }
  0x3e   : > { %1633 = vmatprep.subr.bf16.mxu0 %v1828_v1 }
  0x3f   : > { %1652 = vmatpush3.bf16.msra.mxu1 %v1789_v49 }
  0x40   : > { %1653 = vmatprep.subr.bf16.mxu1 %v1828_v1 }
  0x41   : > { %1634 = vmatpush3.bf16.msra.mxu0 %v1777_v33  ;;  %v1803_v33 = vld [vmem:[%s2207_s2 + $0x80] sm:$0xff]  }
  0x42   : > { %1635 = vmatprep.subr.bf16.mxu0 %v1828_v1 }
  0x43   : > { %1654 = vmatpush3.bf16.msra.mxu1 %v1791_v51 }
  0x44   : > { %1655 = vmatprep.subr.bf16.mxu1 %v1828_v1 }
  0x45   : > { %1636 = vmatpush3.bf16.msra.mxu0 %v1778_v34 }
  0x46   : > { %1637 = vmatprep.subr.bf16.mxu0 %v1828_v1 }
  0x47   : > { %1656 = vmatpush3.bf16.msra.mxu1 %v1793_v52 }
  0x48   : > { %1657 = vmatprep.subr.bf16.mxu1 %v1828_v1 }
  0x49   : > { %1638 = vmatpush3.bf16.msra.mxu0 %v1779_v35 }
  0x4a   : > { %1663 = vmatprep.subr.bf16.mxu0 %v1828_v1 }
  0x4b   : > { %1658 = vmatpush3.bf16.msra.mxu1 %v1795_v53 }
  0x4c   : > { %1640 = vmatmul.mubr.bf16.vlgmr.msra.gmra.mxu0 %v535_v37  ;;  %1683 = vmatprep.subr.bf16.mxu1 %v1828_v1  ;;  %v1804_v37 = vld [vmem:[%s2208_s3 + $0x78] sm:$0xff]  }
  0x4d   : > { %1679 = vmatprep.mubr.msk.bf16.mxu0 %vm1829_vm0, %v1828_v1  ;;  %1664 = vmatpush3.bf16.msra.mxu0 %v1780_v38  ;;  %v1805_v38 = vld [vmem:[%s2208_s3 + $0x70] sm:$0xff]  }
  0x4e   : > { %1665 = vmatprep.subr.bf16.mxu0 %v1828_v1 }
  0x51   : > { %1666 = vmatpush3.bf16.msra.mxu0 %v1782_v40  ;;  %v1807_v40 = vld [vmem:[%s2208_s3 + $0x60] sm:$0xff]  }
  0x52   : > { %1667 = vmatprep.subr.bf16.mxu0 %v1828_v1 }
  0x55   : > { %1668 = vmatpush3.bf16.msra.mxu0 %v1784_v42  ;;  %v1809_v42 = vld [vmem:[%s2208_s3 + $0x50] sm:$0xff]  }
  0x56   : > { %1669 = vmatprep.subr.bf16.mxu0 %v1828_v1 }
  0x59   : > { %1670 = vmatpush3.bf16.msra.mxu0 %v1786_v44  ;;  %v1811_v44 = vld [vmem:[%s2208_s3 + $0x40] sm:$0xff]  }
  0x5a   : > { %1671 = vmatprep.subr.bf16.mxu0 %v1828_v1 }
  0x5d   : > { %1672 = vmatpush3.bf16.msra.mxu0 %v1788_v45  ;;  %v1812_v45 = vld [vmem:[%s2209_s4 + $0x78] sm:$0xff]  }
  0x5e   : > { %1673 = vmatprep.subr.bf16.mxu0 %v1828_v1 }
  0x61   : > { %1674 = vmatpush3.bf16.msra.mxu0 %v1790_v46  ;;  %v1813_v46 = vld [vmem:[%s2209_s4 + $0x70] sm:$0xff]  }
  0x62   : > { %1675 = vmatprep.subr.bf16.mxu0 %v1828_v1 }
  0x65   : > { %1676 = vmatpush3.bf16.msra.mxu0 %v1792_v48 }
  0x66   : > { %1677 = vmatprep.subr.bf16.mxu0 %v1828_v1 }
  0x69   : > { %1678 = vmatpush3.bf16.msra.mxu0 %v1794_v50 }
  0x6a   : > { %1703 = vmatprep.subr.bf16.mxu0 %v1828_v1 }
  0x8e   : > { %v896_v27 = vpop.permute.xlu1 %895 }
  0x8f   : > { %v687_v15 = vpop.permute.xlu0 %686 }
  0x92   : > { %v901_v31 = vpop.permute.xlu1 %900 }
  0x93   : > { %v692_v17 = vpop.permute.xlu0 %691 }
  0xec   : > { %v437_v54 = vpop.f32.mrf.mxu0 }
  0xed   : > { %v526_v55 = vpop.f32.mrf.mxu1 }
  0xee   : > { %v1601_v56 = vpop.f32.mrf.mxu0  ;;  %v527_v62 = vadd.f32 %v526_v55, %v437_v54 }
  0xef   : > { %v1621_v57 = vpop.f32.mrf.mxu1 }
  0xf0   : > { %v440_v58 = vpop.f32.mrf.mxu0 }
  0xf1   : > { %v529_v59 = vpop.f32.mrf.mxu1 }
  0xf2   : > { %v1602_v60 = vpop.f32.mrf.mxu0  ;;  %v530_v4 = vadd.f32 %v529_v59, %v440_v58  ;;  %v1454_v58 = vld [vmem:[%s2210_s5 + $0x1] ss:$0 sm:$0xff] }
  0xf3   : > { %v1622_v61 = vpop.f32.mrf.mxu1 }
 0x10c   : > { %v635_v63 = vpop.f32.mrf.mxu0 }
 0x10d   : > { %v642_v2 = vadd.f32 %v635_v63, %v527_v62 }
 0x10e   : > { %v1641_v3 = vpop.f32.mrf.mxu0 }
 0x10f   : > { %v651_v5 = vadd.f32 %v1394_v0, %v642_v2 }
 0x110   : > { %v638_v6 = vpop.f32.mrf.mxu0 }
 0x111   : > { %v653_v7 = vmax.f32 %v651_v5, 0.0  ;;  %v643_v8 = vadd.f32 %v638_v6, %v530_v4 }
 0x112   : > { %v1642_v9 = vpop.f32.mrf.mxu0 }
 0x113   : > { %655 = vst [vmem:[#allocation3 + $0x40] sm:$0xff] %v653_v7  ;;  %v652_v10 = vadd.f32 %v1394_v0, %v643_v8  ;;  %v1816_v8 = vld [vmem:[%s2209_s4 + $0x58] sm:$0xff]   ;;  %v1817_v9 = vld [vmem:[%s2209_s4 + $0x50] sm:$0xff]  }
 0x115   : > { %v654_v11 = vmax.f32 %v652_v10, 0.0  ;;  %v1818_v10 = vld [vmem:[%s2209_s4 + $0x48] sm:$0xff]  }
 0x117   : > { %656 = vst [vmem:[#allocation3 + $0x48] sm:$0xff] %v654_v11  ;;  %v664_v14 = vpack.c.bf16 %v654_v11, %v653_v7  ;;  %v1815_v7 = vld [vmem:[%s2209_s4 + $0x60] sm:$0xff]  }
 0x118   : > { %v1819_v11 = vld [vmem:[%s2209_s4 + $0x40] sm:$0xff]  }
 0x119   : > { %1680 = vmatmul.mubr.bf16.vlgmr.msra.gmra.mxu0 %v664_v14  ;;  %v1472_v14 = vld [vmem:[%s2210_s5 + $0x2] ss:$0 sm:$0xff] }
 0x11a   : > { %1719 = vmatprep.mubr.msk.bf16.mxu0 %vm1829_vm0, %v1828_v1  ;;  %v682_v16 = vld [vmem:[#allocation3 + $0x3f] sm:$0xff]  ;;  %1704 = vmatpush3.bf16.msra.mxu0 %v1804_v37 }
 0x11b   : > { %v694_v19 = vmul.f32 %v687_v15, %v682_v16  ;;  %1705 = vmatprep.subr.bf16.mxu0 %v1828_v1 }
 0x11e   : > { %v683_v18 = vld [vmem:[#allocation3 + $0x47] sm:$0xff]  ;;  %1706 = vmatpush3.bf16.msra.mxu0 %v1805_v38 }
 0x11f   : > { %v695_v20 = vmul.f32 %v692_v17, %v683_v18  ;;  %v891_v30 = vld [vmem:[#allocation3 + $0x41] sm:$0xff]  ;;  %v892_v32 = vld [vmem:[#allocation3 + $0x49] sm:$0xff]  ;;  %1707 = vmatprep.subr.bf16.mxu0 %v1828_v1 }
 0x120   : > { %v903_v34 = vmul.f32 %v896_v27, %v891_v30  ;;  %v904_v35 = vmul.f32 %v901_v31, %v892_v32 }
 0x121   : > { %v696_v22 = vpack.c.bf16 %v695_v20, %v694_v19 }
 0x122   : > { %v905_v36 = vpack.c.bf16 %v904_v35, %v903_v34  ;;  %1708 = vmatpush3.bf16.msra.mxu0 %v1806_v39 }
 0x123   : > { %1660 = vmatmul.mubr.bf16.vlgmr.msra.gmra.mxu1 %v696_v22  ;;  %1709 = vmatprep.subr.bf16.mxu0 %v1828_v1 }
 0x124   : > { %1684 = vmatpush3.bf16.msra.mxu1 %v1796_v21  ;;  %1699 = vmatprep.mubr.msk.bf16.mxu1 %vm1829_vm0, %v1828_v1 }
 0x125   : > { %1685 = vmatprep.subr.bf16.mxu1 %v1828_v1 }
 0x126   : > { %1710 = vmatpush3.bf16.msra.mxu0 %v1807_v40 }
 0x127   : > { %1711 = vmatprep.subr.bf16.mxu0 %v1828_v1 }
 0x128   : > { %1686 = vmatpush3.bf16.msra.mxu1 %v1797_v23  ;;  %v1498_v23 = vld [vmem:[%s2210_s5 + $0x3] ss:$0 sm:$0xff] }
 0x129   : > { %1687 = vmatprep.subr.bf16.mxu1 %v1828_v1 }
 0x12a   : > { %1712 = vmatpush3.bf16.msra.mxu0 %v1808_v41 }
 0x12b   : > { %1713 = vmatprep.subr.bf16.mxu0 %v1828_v1 }
 0x12c   : > { %1688 = vmatpush3.bf16.msra.mxu1 %v1798_v24 }
 0x12d   : > { %1689 = vmatprep.subr.bf16.mxu1 %v1828_v1 }
 0x12e   : > { %1714 = vmatpush3.bf16.msra.mxu0 %v1809_v42 }
 0x12f   : > { %1715 = vmatprep.subr.bf16.mxu0 %v1828_v1 }
 0x130   : > { %1690 = vmatpush3.bf16.msra.mxu1 %v1799_v25 }
 0x131   : > { %1691 = vmatprep.subr.bf16.mxu1 %v1828_v1 }
 0x132   : > { %1716 = vmatpush3.bf16.msra.mxu0 %v1810_v43 }
 0x133   : > { %1717 = vmatprep.subr.bf16.mxu0 %v1828_v1 }
 0x134   : > { %1692 = vmatpush3.bf16.msra.mxu1 %v1800_v26 }
 0x135   : > { %1693 = vmatprep.subr.bf16.mxu1 %v1828_v1 }
 0x136   : > { %1718 = vmatpush3.bf16.msra.mxu0 %v1811_v44 }
 0x138   : > { %1694 = vmatpush3.bf16.msra.mxu1 %v1801_v28 }
 0x139   : > { %1695 = vmatprep.subr.bf16.mxu1 %v1828_v1 }
 0x13c   : > { %1696 = vmatpush3.bf16.msra.mxu1 %v1802_v29 }
 0x13d   : > { %1697 = vmatprep.subr.bf16.mxu1 %v1828_v1 }
 0x140   : > { %1698 = vmatpush3.bf16.msra.mxu1 %v1803_v33 }
 0x141   : > { %1723 = vmatprep.subr.bf16.mxu1 %v1828_v1 }
 0x143   : > { %1700 = vmatmul.mubr.bf16.vlgmr.msra.gmra.mxu1 %v905_v36 }
 0x144   : > { %1739 = vmatprep.mubr.msk.bf16.mxu1 %vm1829_vm0, %v1828_v1  ;;  %1724 = vmatpush3.bf16.msra.mxu1 %v1812_v45 }
 0x145   : > { %1725 = vmatprep.subr.bf16.mxu1 %v1828_v1 }
 0x148   : > { %1726 = vmatpush3.bf16.msra.mxu1 %v1813_v46 }
 0x149   : > { %1727 = vmatprep.subr.bf16.mxu1 %v1828_v1 }
 0x14c   : > { %1728 = vmatpush3.bf16.msra.mxu1 %v1814_v47 }
 0x14d   : > { %1729 = vmatprep.subr.bf16.mxu1 %v1828_v1 }
 0x150   : > { %1730 = vmatpush3.bf16.msra.mxu1 %v1815_v7 }
 0x151   : > { %1731 = vmatprep.subr.bf16.mxu1 %v1828_v1 }
 0x154   : > { %1732 = vmatpush3.bf16.msra.mxu1 %v1816_v8 }
 0x155   : > { %1733 = vmatprep.subr.bf16.mxu1 %v1828_v1 }
 0x158   : > { %1734 = vmatpush3.bf16.msra.mxu1 %v1817_v9 }
 0x159   : > { %1735 = vmatprep.subr.bf16.mxu1 %v1828_v1 }
 0x15c   : > { %1736 = vmatpush3.bf16.msra.mxu1 %v1818_v10 }
 0x15d   : > { %1737 = vmatprep.subr.bf16.mxu1 %v1828_v1 }
 0x160   : > { %1738 = vmatpush3.bf16.msra.mxu1 %v1819_v11 }
 0x1d9   : > { %v884_v48 = vpop.f32.mrf.mxu0 }
 0x1db   : > { %v1681_v49 = vpop.f32.mrf.mxu0 }
 0x1dd   : > { %v887_v50 = vpop.f32.mrf.mxu0 }
 0x1df   : > { %v1682_v51 = vpop.f32.mrf.mxu0 }
 0x1e3   : > { %v795_v52 = vpop.f32.mrf.mxu1 }
 0x1e4   : > { %v885_v56 = vadd.f32 %v884_v48, %v795_v52 }
 0x1e5   : > { %v1661_v53 = vpop.f32.mrf.mxu1 }
 0x1e7   : > { %v798_v54 = vpop.f32.mrf.mxu1 }
 0x1e8   : > { %v888_v61 = vadd.f32 %v887_v50, %v798_v54 }
 0x1e9   : > { %v1662_v55 = vpop.f32.mrf.mxu1 }
 0x203   : > { %v1005_v57 = vpop.f32.mrf.mxu1 }
 0x204   : > { %v1012_v59 = vadd.f32 %v1005_v57, %v885_v56 }
 0x205   : > { %v1701_v60 = vpop.f32.mrf.mxu1 }
 0x206   : > { %v1022_v62 = vadd.f32 %v1454_v58, %v1012_v59 }
 0x207   : > { %v1008_v63 = vpop.f32.mrf.mxu1 }
 0x208   : > { %v1024_v0 = vmax.f32 %v1022_v62, 0.0  ;;  %v1013_v2 = vadd.f32 %v1008_v63, %v888_v61 }
 0x209   : > { %v1702_v3 = vpop.f32.mrf.mxu1 }
 0x20a   : > { %1026 = vst [vmem:[#allocation2 + $0x40] sm:$0xff] %v1024_v0  ;;  %v1023_v4 = vadd.f32 %v1454_v58, %v1013_v2 }
 0x20c   : > { %v1025_v5 = vmax.f32 %v1023_v4, 0.0 }
 0x20e   : > { %1027 = vst [vmem:[#allocation2 + $0x48] sm:$0xff] %v1025_v5  ;;  %v1030_v6 = vpack.c.bf16 %v1025_v5, %v1024_v0 }
 0x210   : > { %1720 = vmatmul.mubr.bf16.vlgmr.msra.gmra.mxu0 %v1030_v6 }
 0x2d0   : > { %v1138_v15 = vpop.f32.mrf.mxu0 }
 0x2d1   : > { %v1139_v16 = vadd.f32 %v1472_v14, %v1138_v15 }
 0x2d2   : > { %v1721_v17 = vpop.f32.mrf.mxu0 }
 0x2d3   : > { %v1145_v18 = vmax.f32 %v1139_v16, 0.0 }
 0x2d4   : > { %v1141_v19 = vpop.f32.mrf.mxu0 }
 0x2d5   : > { %1147 = vst [vmem:[#allocation3 + $0x40] sm:$0xff] %v1145_v18  ;;  %v1142_v20 = vadd.f32 %v1472_v14, %v1141_v19 }
 0x2d6   : > { %v1722_v21 = vpop.f32.mrf.mxu0 }
 0x2d7   : > { %v1146_v22 = vmax.f32 %v1142_v20, 0.0 }
 0x2d9   : > { %1148 = vst [vmem:[#allocation3 + $0x48] sm:$0xff] %v1146_v22  ;;  %v1151_v1 = vpack.c.bf16 %v1146_v22, %v1145_v18 }
 0x2db   : > { %1740 = vmatmul.mubr.bf16.vlgmr.msra.gmra.mxu1 %v1151_v1 }
 0x39b   : > { %v1259_v24 = vpop.f32.mrf.mxu1 }
 0x39c   : > { %v1260_v25 = vadd.f32 %v1498_v23, %v1259_v24 }
 0x39d   : > { %v1741_v26 = vpop.f32.mrf.mxu1 }
 0x39e   : > { %v1268_v27 = vadd.f32 %v1260_v25, %v1935_v12 }
 0x39f   : > { %v1262_v28 = vpop.f32.mrf.mxu1 }
 0x3a0   : > { %v1270_v29 = vmax.f32 %v1268_v27, 0.0  ;;  %v1263_v30 = vadd.f32 %v1498_v23, %v1262_v28 }
 0x3a1   : > { %v1742_v31 = vpop.f32.mrf.mxu1 }
 0x3a2   : > { %1272 = vst [vmem:[%s278_s12] sm:$0xff] %v1270_v29  ;;  %v1269_v32 = vadd.f32 %v1263_v30, %v1937_v13 }
 0x3a4   : > { %v1271_v33 = vmax.f32 %v1269_v32, 0.0 }
 0x3a6   : > { %1273 = vst [vmem:[%s278_s12 + $0x8] sm:$0xff] %v1271_v33 }
 0x3a7 PF: > { %s17_s24 = sadd.s32 1, %s1826_s24  }
 0x3a8   : > { %p14_p4 = scmp.ge.s32.totalorder %s17_s24, 4  }
 0x3aa   :  { %16 = sbr.rel (!%p14_p4) target bundleno = 1 (0x1), region = 88 }

// kernel: _lambda_.23
= control target key start
LH: loop header
LB: loop body
LE: loop exit
PB: predicated region body
PF: predicated region fallthrough
CT: control target
= control target key end

     0   :  { %s1847_s24 = smov 0   ;;  %s2181_s0 = inlined_call_operand.vmem [shape: f32[2,16,128], index: 0, kind: input, shape index: {}]   ;;  %s2182_s1 = inlined_call_operand.vmem [shape: bf16[3,128,128], index: 1, kind: input, shape index: {}]   ;;  %s2183_s2 = inlined_call_operand.vmem [shape: bf16[3,128,128], index: 2, kind: input, shape index: {}]   ;;  %s2184_s3 = inlined_call_operand.vmem [shape: bf16[3,128,128], index: 3, kind: input, shape index: {}]   ;;  %s2185_s4 = inlined_call_operand.vmem [shape: bf16[3,128,128], index: 4, kind: input, shape index: {}]   ;;  %s2186_s5 = inlined_call_operand.vmem [shape: f32[4,1,128], index: 5, kind: input, shape index: {}]   ;;  %s2187_s6 = inlined_call_operand.vmem [shape: f32[4,16,1], index: 6, kind: input, shape index: {}]   ;;  %s2188_s7 = inlined_call_operand.vmem [shape: f32[2,16,128], index: 7, kind: output, shape index: {}]  }
   0x1 LB: > { %s1305_s25 = sadd.s32 4294967295, %s1802_s24   ;;  %p1309_p0 = scmp.ge.s32.totalorder %s1802_s24, 1  ;;  %s1802_s24 = sphi %s1847_s24, %s17_s24  }
   0x2   : > { %p237_p1 = scmp.lt.s32.totalorder %s1802_s24, 3 }
   0x4   : > { %p238_p2 = pnand %p1309_p0, %p237_p1 }
   0x5   : > { %p269_p3 = scmp.lt.s32.totalorder (!%p238_p2), %s1305_s25, 1 }
   0x6   : > { %241 = sbr.rel (%p238_p2) target bundleno = 935 (0x3a7), region = 48 }
   0xb   : > { %v1732_v0 = vld [vmem:[%s2182_s1 + $0x38] sm:$0xff]   ;;  %v1804_v1 = vmov 0.0   ;;  %v1734_v3 = vld [vmem:[%s2182_s1 + $0x30] sm:$0xff]   ;;  %vm1805_vm0 = vmmov 0   ;;  %v1806_v5 = vmov 0   ;;  %v1736_v6 = vld [vmem:[%s2182_s1 + $0x28] sm:$0xff]  }
   0xc   : > { %1559 = vmatprep.subr.bf16.mxu0 %v1804_v1  ;;  %281 = vst [vmem:[#allocation2 + $0x8] sm:$0xff] %v1804_v1  ;;  %282 = vst [vmem:[#allocation2 + $0x20] sm:$0xff] %v1804_v1  ;;  %1579 = vmatprep.subr.bf16.mxu1 %v1804_v1  ;;  %v1733_v2 = vld [vmem:[%s2182_s1 + $0x78] sm:$0xff]   ;;  %v1735_v4 = vld [vmem:[%s2182_s1 + $0x70] sm:$0xff]   ;;  %s2190_s25 = smov (!%p269_p3, %s1305_s25), 1 }
   0xd   : > { %285 = vst [vmem:[#allocation3 + $0x8] sm:$0xff] %v1804_v1  ;;  %286 = vst [vmem:[#allocation3 + $0x20] sm:$0xff] %v1804_v1  ;;  %1560 = vmatpush3.bf16.msra.mxu0 %v1732_v0  ;;  %1575 = vmatprep.mubr.msk.bf16.mxu0 %vm1805_vm0, %v1804_v1  ;;  %v1737_v7 = vld [vmem:[%s2182_s1 + $0x68] sm:$0xff]   ;;  %v1738_v8 = vld [vmem:[%s2182_s1 + $0x20] sm:$0xff]   ;;  %s1485_s17 = sshll.u32 %s2190_s25, 4 }
   0xe   : > { %1580 = vmatpush3.bf16.msra.mxu1 %v1733_v2  ;;  %1561 = vmatprep.subr.bf16.mxu0 %v1804_v1  ;;  %v1739_v9 = vld [vmem:[%s2182_s1 + $0x60] sm:$0xff]   ;;  %s273_s22 = scalar_lea.vmem %s2181_s0, %s1485_s17  ;;  %v1740_v10 = vld [vmem:[%s2182_s1 + $0x18] sm:$0xff]   ;;  %v1742_v14 = vld [vmem:[%s2182_s1 + $0x10] sm:$0xff]   ;;  %s278_s12 = scalar_lea.vmem %s2188_s7, %s1485_s17 }
   0xf   : > { %1581 = vmatprep.subr.bf16.mxu1 %v1804_v1  ;;  %1595 = vmatprep.mubr.msk.bf16.mxu1 %vm1805_vm0, %v1804_v1  ;;  %v1741_v11 = vld [vmem:[%s2182_s1 + $0x58] sm:$0xff]   ;;  %v1911_v12 = vld [vmem:[%s273_s22] sm:$0xff]  ;;  %v1913_v13 = vld [vmem:[%s273_s22 + $0x8] sm:$0xff] }
  0x10   : > { %1730 = vset.pattern.permute.xlu0 %v1806_v5  ;;  %1731 = vset.pattern.permute.xlu1 %v1806_v5  ;;  %290 = vst [vmem:[#allocation2 + $0x10] sm:$0xff] %v1911_v12  ;;  %291 = vst [vmem:[#allocation2 + $0x18] sm:$0xff] %v1913_v13  ;;  %v1743_v15 = vld [vmem:[%s2182_s1 + $0x50] sm:$0xff]   ;;  %v1744_v16 = vld [vmem:[%s2182_s1 + $0x8] sm:$0xff]   ;;  %v294_v28 = vpack.c.bf16 %v1913_v13, %v1911_v12 }
  0x11   : > { %1562 = vmatpush3.bf16.msra.mxu0 %v1734_v3  ;;  %v1745_v17 = vld [vmem:[%s2182_s1 + $0x48] sm:$0xff]   ;;  %v1746_v18 = vld [vmem:[%s2182_s1] sm:$0xff]   ;;  %v1371_v23 = vld [vmem:[%s2187_s6 + $0x10] sm:$0xff] }
  0x12   : > { %1582 = vmatpush3.bf16.msra.mxu1 %v1735_v4  ;;  %1563 = vmatprep.subr.bf16.mxu0 %v1804_v1  ;;  %v1747_v19 = vld [vmem:[%s2182_s1 + $0x40] sm:$0xff]   ;;  %v634_v24 = vld [vmem:[%s2187_s6 + $0x8] sm:$0xff]  ;;  %v1372_v25 = vld [vmem:[%s2187_s6 + $0x18] sm:$0xff] }
  0x13   : > { %1583 = vmatprep.subr.bf16.mxu1 %v1804_v1  ;;  %v633_v21 = vld [vmem:[%s2187_s6] sm:$0xff]  ;;  %v1748_v26 = vld [vmem:[%s2182_s1 + $0xb8] sm:$0xff]   ;;  %871 = vperm.xlu1 %1731, %v1371_v23   ;;  %v1749_v29 = vld [vmem:[%s2182_s1 + $0xb0] sm:$0xff]  }
  0x14   : > { %662 = vperm.xlu0 %1730, %v633_v21   ;;  %v1750_v30 = vld [vmem:[%s2182_s1 + $0xa8] sm:$0xff]   ;;  %v1751_v31 = vld [vmem:[%s2182_s1 + $0xa0] sm:$0xff]   ;;  %v1752_v32 = vld [vmem:[%s2182_s1 + $0x98] sm:$0xff]  }
  0x15   : > { %1564 = vmatpush3.bf16.msra.mxu0 %v1736_v6  ;;  %v1753_v33 = vld [vmem:[%s2182_s1 + $0x90] sm:$0xff]   ;;  %v1754_v34 = vld [vmem:[%s2182_s1 + $0x88] sm:$0xff]   ;;  %v1755_v35 = vld [vmem:[%s2182_s1 + $0x80] sm:$0xff]  }
  0x16   : > { %1584 = vmatpush3.bf16.msra.mxu1 %v1737_v7  ;;  %1565 = vmatprep.subr.bf16.mxu0 %v1804_v1  ;;  %v1756_v38 = vld [vmem:[%s2183_s2 + $0x78] sm:$0xff]   ;;  %v1758_v40 = vld [vmem:[%s2183_s2 + $0x70] sm:$0xff]   ;;  %v1760_v42 = vld [vmem:[%s2183_s2 + $0x68] sm:$0xff]  }
  0x17   : > { %1585 = vmatprep.subr.bf16.mxu1 %v1804_v1  ;;  %v312_v20 = vld [vmem:[#allocation2 + $0xc] sm:$0xff]  ;;  %v313_v22 = vld [vmem:[#allocation2 + $0x14] sm:$0xff]  ;;  %876 = vperm.xlu1 %1731, %v1372_v25   ;;  %v510_v36 = vld [vmem:[#allocation2 + $0x1c] sm:$0xff] }
  0x18   : > { %v314_v27 = vpack.c.bf16 %v313_v22, %v312_v20  ;;  %667 = vperm.xlu0 %1730, %v634_v24   ;;  %v511_v37 = vpack.c.bf16 %v510_v36, %v313_v22  ;;  %v1757_v39 = vld [vmem:[%s2183_s2 + $0x38] sm:$0xff]   ;;  %v1759_v41 = vld [vmem:[%s2183_s2 + $0x30] sm:$0xff]   ;;  %v1761_v43 = vld [vmem:[%s2183_s2 + $0x28] sm:$0xff]  }
  0x19   : > { %1566 = vmatpush3.bf16.msra.mxu0 %v1738_v8  ;;  %v1762_v44 = vld [vmem:[%s2183_s2 + $0x60] sm:$0xff]   ;;  %v1764_v45 = vld [vmem:[%s2183_s2 + $0x58] sm:$0xff]   ;;  %v1766_v46 = vld [vmem:[%s2183_s2 + $0x50] sm:$0xff]  }
  0x1a   : > { %1586 = vmatpush3.bf16.msra.mxu1 %v1739_v9  ;;  %1567 = vmatprep.subr.bf16.mxu0 %v1804_v1  ;;  %v1763_v47 = vld [vmem:[%s2183_s2 + $0x20] sm:$0xff]   ;;  %v1768_v48 = vld [vmem:[%s2183_s2 + $0x48] sm:$0xff]   ;;  %v1765_v49 = vld [vmem:[%s2183_s2 + $0x18] sm:$0xff]  }
  0x1b   : > { %1587 = vmatprep.subr.bf16.mxu1 %v1804_v1  ;;  %v1770_v50 = vld [vmem:[%s2183_s2 + $0x40] sm:$0xff]   ;;  %v1767_v51 = vld [vmem:[%s2183_s2 + $0x10] sm:$0xff]   ;;  %v1769_v52 = vld [vmem:[%s2183_s2 + $0x8] sm:$0xff]  }
  0x1c   : > { %v1771_v53 = vld [vmem:[%s2183_s2] sm:$0xff]   ;;  %v1772_v21 = vld [vmem:[%s2183_s2 + $0xb8] sm:$0xff]   ;;  %v1773_v23 = vld [vmem:[%s2183_s2 + $0xb0] sm:$0xff]  }
  0x1d   : > { %1568 = vmatpush3.bf16.msra.mxu0 %v1740_v10  ;;  %v1370_v0 = vld [vmem:[%s2186_s5] ss:$0 sm:$0xff]  ;;  %v1774_v24 = vld [vmem:[%s2183_s2 + $0xa8] sm:$0xff]  }
  0x1e   : > { %1588 = vmatpush3.bf16.msra.mxu1 %v1741_v11  ;;  %1569 = vmatprep.subr.bf16.mxu0 %v1804_v1  ;;  %v1775_v25 = vld [vmem:[%s2183_s2 + $0xa0] sm:$0xff]  }
  0x1f   : > { %1589 = vmatprep.subr.bf16.mxu1 %v1804_v1 }
  0x21   : > { %1570 = vmatpush3.bf16.msra.mxu0 %v1742_v14 }
  0x22   : > { %1590 = vmatpush3.bf16.msra.mxu1 %v1743_v15  ;;  %1571 = vmatprep.subr.bf16.mxu0 %v1804_v1 }
  0x23   : > { %1591 = vmatprep.subr.bf16.mxu1 %v1804_v1 }
  0x25   : > { %1572 = vmatpush3.bf16.msra.mxu0 %v1744_v16 }
  0x26   : > { %1592 = vmatpush3.bf16.msra.mxu1 %v1745_v17  ;;  %1573 = vmatprep.subr.bf16.mxu0 %v1804_v1 }
  0x27   : > { %1593 = vmatprep.subr.bf16.mxu1 %v1804_v1 }
  0x29   : > { %1574 = vmatpush3.bf16.msra.mxu0 %v1746_v18 }
  0x2a   : > { %1594 = vmatpush3.bf16.msra.mxu1 %v1747_v19  ;;  %1599 = vmatprep.subr.bf16.mxu0 %v1804_v1 }
  0x2b   : > { %1619 = vmatprep.subr.bf16.mxu1 %v1804_v1 }
  0x2c   : > { %1576 = vmatmul.mubr.bf16.vlgmr.msra.gmra.mxu0 %v314_v27 }
  0x2d   : > { %1596 = vmatmul.mubr.bf16.vlgmr.msra.gmra.mxu1 %v294_v28  ;;  %1600 = vmatpush3.bf16.msra.mxu0 %v1748_v26  ;;  %v1776_v26 = vld [vmem:[%s2183_s2 + $0x98] sm:$0xff]   ;;  %v1777_v28 = vld [vmem:[%s2183_s2 + $0x90] sm:$0xff]  }
  0x2e   : > { %1601 = vmatprep.subr.bf16.mxu0 %v1804_v1  ;;  %1615 = vmatprep.mubr.msk.bf16.mxu0 %vm1805_vm0, %v1804_v1 }
  0x2f   : > { %1635 = vmatprep.mubr.msk.bf16.mxu1 %vm1805_vm0, %v1804_v1  ;;  %1620 = vmatpush3.bf16.msra.mxu1 %v1757_v39  ;;  %v1782_v39 = vld [vmem:[%s2184_s3 + $0x68] sm:$0xff]  }
  0x30   : > { %1621 = vmatprep.subr.bf16.mxu1 %v1804_v1 }
  0x31   : > { %1602 = vmatpush3.bf16.msra.mxu0 %v1749_v29  ;;  %v1778_v29 = vld [vmem:[%s2183_s2 + $0x88] sm:$0xff]  }
  0x32   : > { %1603 = vmatprep.subr.bf16.mxu0 %v1804_v1 }
  0x33   : > { %1622 = vmatpush3.bf16.msra.mxu1 %v1759_v41  ;;  %v1784_v41 = vld [vmem:[%s2184_s3 + $0x58] sm:$0xff]  }
  0x34   : > { %1623 = vmatprep.subr.bf16.mxu1 %v1804_v1 }
  0x35   : > { %1604 = vmatpush3.bf16.msra.mxu0 %v1750_v30 }
  0x36   : > { %1605 = vmatprep.subr.bf16.mxu0 %v1804_v1 }
  0x37   : > { %1624 = vmatpush3.bf16.msra.mxu1 %v1761_v43  ;;  %v1786_v43 = vld [vmem:[%s2184_s3 + $0x48] sm:$0xff]  }
  0x38   : > { %1625 = vmatprep.subr.bf16.mxu1 %v1804_v1 }
  0x39   : > { %1606 = vmatpush3.bf16.msra.mxu0 %v1751_v31 }
  0x3a   : > { %1607 = vmatprep.subr.bf16.mxu0 %v1804_v1 }
  0x3b   : > { %1626 = vmatpush3.bf16.msra.mxu1 %v1763_v47  ;;  %v1790_v47 = vld [vmem:[%s2185_s4 + $0x68] sm:$0xff]  }
  0x3c   : > { %1627 = vmatprep.subr.bf16.mxu1 %v1804_v1 }
  0x3d   : > { %1608 = vmatpush3.bf16.msra.mxu0 %v1752_v32 }
  0x3e   : > { %1609 = vmatprep.subr.bf16.mxu0 %v1804_v1 }
  0x3f   : > { %1628 = vmatpush3.bf16.msra.mxu1 %v1765_v49 }
  0x40   : > { %1629 = vmatprep.subr.bf16.mxu1 %v1804_v1 }
  0x41   : > { %1610 = vmatpush3.bf16.msra.mxu0 %v1753_v33  ;;  %v1779_v33 = vld [vmem:[%s2183_s2 + $0x80] sm:$0xff]  }
  0x42   : > { %1611 = vmatprep.subr.bf16.mxu0 %v1804_v1 }
  0x43   : > { %1630 = vmatpush3.bf16.msra.mxu1 %v1767_v51 }
  0x44   : > { %1631 = vmatprep.subr.bf16.mxu1 %v1804_v1 }
  0x45   : > { %1612 = vmatpush3.bf16.msra.mxu0 %v1754_v34 }
  0x46   : > { %1613 = vmatprep.subr.bf16.mxu0 %v1804_v1 }
  0x47   : > { %1632 = vmatpush3.bf16.msra.mxu1 %v1769_v52 }
  0x48   : > { %1633 = vmatprep.subr.bf16.mxu1 %v1804_v1 }
  0x49   : > { %1614 = vmatpush3.bf16.msra.mxu0 %v1755_v35 }
  0x4a   : > { %1639 = vmatprep.subr.bf16.mxu0 %v1804_v1 }
  0x4b   : > { %1634 = vmatpush3.bf16.msra.mxu1 %v1771_v53 }
  0x4c   : > { %1616 = vmatmul.mubr.bf16.vlgmr.msra.gmra.mxu0 %v511_v37  ;;  %1659 = vmatprep.subr.bf16.mxu1 %v1804_v1  ;;  %v1780_v37 = vld [vmem:[%s2184_s3 + $0x78] sm:$0xff]  }
  0x4d   : > { %1655 = vmatprep.mubr.msk.bf16.mxu0 %vm1805_vm0, %v1804_v1  ;;  %1640 = vmatpush3.bf16.msra.mxu0 %v1756_v38  ;;  %v1781_v38 = vld [vmem:[%s2184_s3 + $0x70] sm:$0xff]  }
  0x4e   : > { %1641 = vmatprep.subr.bf16.mxu0 %v1804_v1 }
  0x51   : > { %1642 = vmatpush3.bf16.msra.mxu0 %v1758_v40  ;;  %v1783_v40 = vld [vmem:[%s2184_s3 + $0x60] sm:$0xff]  }
  0x52   : > { %1643 = vmatprep.subr.bf16.mxu0 %v1804_v1 }
  0x55   : > { %1644 = vmatpush3.bf16.msra.mxu0 %v1760_v42  ;;  %v1785_v42 = vld [vmem:[%s2184_s3 + $0x50] sm:$0xff]  }
  0x56   : > { %1645 = vmatprep.subr.bf16.mxu0 %v1804_v1 }
  0x59   : > { %1646 = vmatpush3.bf16.msra.mxu0 %v1762_v44  ;;  %v1787_v44 = vld [vmem:[%s2184_s3 + $0x40] sm:$0xff]  }
  0x5a   : > { %1647 = vmatprep.subr.bf16.mxu0 %v1804_v1 }
  0x5d   : > { %1648 = vmatpush3.bf16.msra.mxu0 %v1764_v45  ;;  %v1788_v45 = vld [vmem:[%s2185_s4 + $0x78] sm:$0xff]  }
  0x5e   : > { %1649 = vmatprep.subr.bf16.mxu0 %v1804_v1 }
  0x61   : > { %1650 = vmatpush3.bf16.msra.mxu0 %v1766_v46  ;;  %v1789_v46 = vld [vmem:[%s2185_s4 + $0x70] sm:$0xff]  }
  0x62   : > { %1651 = vmatprep.subr.bf16.mxu0 %v1804_v1 }
  0x65   : > { %1652 = vmatpush3.bf16.msra.mxu0 %v1768_v48 }
  0x66   : > { %1653 = vmatprep.subr.bf16.mxu0 %v1804_v1 }
  0x69   : > { %1654 = vmatpush3.bf16.msra.mxu0 %v1770_v50 }
  0x6a   : > { %1679 = vmatprep.subr.bf16.mxu0 %v1804_v1 }
  0x8e   : > { %v872_v27 = vpop.permute.xlu1 %871 }
  0x8f   : > { %v663_v15 = vpop.permute.xlu0 %662 }
  0x92   : > { %v877_v31 = vpop.permute.xlu1 %876 }
  0x93   : > { %v668_v17 = vpop.permute.xlu0 %667 }
  0xec   : > { %v413_v54 = vpop.f32.mrf.mxu0 }
  0xed   : > { %v502_v55 = vpop.f32.mrf.mxu1 }
  0xee   : > { %v1577_v56 = vpop.f32.mrf.mxu0  ;;  %v503_v62 = vadd.f32 %v502_v55, %v413_v54 }
  0xef   : > { %v1597_v57 = vpop.f32.mrf.mxu1 }
  0xf0   : > { %v416_v58 = vpop.f32.mrf.mxu0 }
  0xf1   : > { %v505_v59 = vpop.f32.mrf.mxu1 }
  0xf2   : > { %v1578_v60 = vpop.f32.mrf.mxu0  ;;  %v506_v4 = vadd.f32 %v505_v59, %v416_v58  ;;  %v1430_v58 = vld [vmem:[%s2186_s5 + $0x1] ss:$0 sm:$0xff] }
  0xf3   : > { %v1598_v61 = vpop.f32.mrf.mxu1 }
 0x10c   : > { %v611_v63 = vpop.f32.mrf.mxu0 }
 0x10d   : > { %v618_v2 = vadd.f32 %v611_v63, %v503_v62 }
 0x10e   : > { %v1617_v3 = vpop.f32.mrf.mxu0 }
 0x10f   : > { %v627_v5 = vadd.f32 %v1370_v0, %v618_v2 }
 0x110   : > { %v614_v6 = vpop.f32.mrf.mxu0 }
 0x111   : > { %v629_v7 = vmax.f32 %v627_v5, 0.0  ;;  %v619_v8 = vadd.f32 %v614_v6, %v506_v4 }
 0x112   : > { %v1618_v9 = vpop.f32.mrf.mxu0 }
 0x113   : > { %631 = vst [vmem:[#allocation3 + $0x10] sm:$0xff] %v629_v7  ;;  %v628_v10 = vadd.f32 %v1370_v0, %v619_v8  ;;  %v1792_v8 = vld [vmem:[%s2185_s4 + $0x58] sm:$0xff]   ;;  %v1793_v9 = vld [vmem:[%s2185_s4 + $0x50] sm:$0xff]  }
 0x115   : > { %v630_v11 = vmax.f32 %v628_v10, 0.0  ;;  %v1794_v10 = vld [vmem:[%s2185_s4 + $0x48] sm:$0xff]  }
 0x117   : > { %632 = vst [vmem:[#allocation3 + $0x18] sm:$0xff] %v630_v11  ;;  %v640_v14 = vpack.c.bf16 %v630_v11, %v629_v7  ;;  %v1791_v7 = vld [vmem:[%s2185_s4 + $0x60] sm:$0xff]  }
 0x118   : > { %v1795_v11 = vld [vmem:[%s2185_s4 + $0x40] sm:$0xff]  }
 0x119   : > { %1656 = vmatmul.mubr.bf16.vlgmr.msra.gmra.mxu0 %v640_v14  ;;  %v1448_v14 = vld [vmem:[%s2186_s5 + $0x2] ss:$0 sm:$0xff] }
 0x11a   : > { %1695 = vmatprep.mubr.msk.bf16.mxu0 %vm1805_vm0, %v1804_v1  ;;  %v658_v16 = vld [vmem:[#allocation3 + $0xf] sm:$0xff]  ;;  %1680 = vmatpush3.bf16.msra.mxu0 %v1780_v37 }
 0x11b   : > { %v670_v19 = vmul.f32 %v663_v15, %v658_v16  ;;  %1681 = vmatprep.subr.bf16.mxu0 %v1804_v1 }
 0x11e   : > { %v659_v18 = vld [vmem:[#allocation3 + $0x17] sm:$0xff]  ;;  %1682 = vmatpush3.bf16.msra.mxu0 %v1781_v38 }
 0x11f   : > { %v671_v20 = vmul.f32 %v668_v17, %v659_v18  ;;  %v867_v30 = vld [vmem:[#allocation3 + $0x11] sm:$0xff]  ;;  %v868_v32 = vld [vmem:[#allocation3 + $0x19] sm:$0xff]  ;;  %1683 = vmatprep.subr.bf16.mxu0 %v1804_v1 }
 0x120   : > { %v879_v34 = vmul.f32 %v872_v27, %v867_v30  ;;  %v880_v35 = vmul.f32 %v877_v31, %v868_v32 }
 0x121   : > { %v672_v22 = vpack.c.bf16 %v671_v20, %v670_v19 }
 0x122   : > { %v881_v36 = vpack.c.bf16 %v880_v35, %v879_v34  ;;  %1684 = vmatpush3.bf16.msra.mxu0 %v1782_v39 }
 0x123   : > { %1636 = vmatmul.mubr.bf16.vlgmr.msra.gmra.mxu1 %v672_v22  ;;  %1685 = vmatprep.subr.bf16.mxu0 %v1804_v1 }
 0x124   : > { %1660 = vmatpush3.bf16.msra.mxu1 %v1772_v21  ;;  %1675 = vmatprep.mubr.msk.bf16.mxu1 %vm1805_vm0, %v1804_v1 }
 0x125   : > { %1661 = vmatprep.subr.bf16.mxu1 %v1804_v1 }
 0x126   : > { %1686 = vmatpush3.bf16.msra.mxu0 %v1783_v40 }
 0x127   : > { %1687 = vmatprep.subr.bf16.mxu0 %v1804_v1 }
 0x128   : > { %1662 = vmatpush3.bf16.msra.mxu1 %v1773_v23  ;;  %v1474_v23 = vld [vmem:[%s2186_s5 + $0x3] ss:$0 sm:$0xff] }
 0x129   : > { %1663 = vmatprep.subr.bf16.mxu1 %v1804_v1 }
 0x12a   : > { %1688 = vmatpush3.bf16.msra.mxu0 %v1784_v41 }
 0x12b   : > { %1689 = vmatprep.subr.bf16.mxu0 %v1804_v1 }
 0x12c   : > { %1664 = vmatpush3.bf16.msra.mxu1 %v1774_v24 }
 0x12d   : > { %1665 = vmatprep.subr.bf16.mxu1 %v1804_v1 }
 0x12e   : > { %1690 = vmatpush3.bf16.msra.mxu0 %v1785_v42 }
 0x12f   : > { %1691 = vmatprep.subr.bf16.mxu0 %v1804_v1 }
 0x130   : > { %1666 = vmatpush3.bf16.msra.mxu1 %v1775_v25 }
 0x131   : > { %1667 = vmatprep.subr.bf16.mxu1 %v1804_v1 }
 0x132   : > { %1692 = vmatpush3.bf16.msra.mxu0 %v1786_v43 }
 0x133   : > { %1693 = vmatprep.subr.bf16.mxu0 %v1804_v1 }
 0x134   : > { %1668 = vmatpush3.bf16.msra.mxu1 %v1776_v26 }
 0x135   : > { %1669 = vmatprep.subr.bf16.mxu1 %v1804_v1 }
 0x136   : > { %1694 = vmatpush3.bf16.msra.mxu0 %v1787_v44 }
 0x138   : > { %1670 = vmatpush3.bf16.msra.mxu1 %v1777_v28 }
 0x139   : > { %1671 = vmatprep.subr.bf16.mxu1 %v1804_v1 }
 0x13c   : > { %1672 = vmatpush3.bf16.msra.mxu1 %v1778_v29 }
 0x13d   : > { %1673 = vmatprep.subr.bf16.mxu1 %v1804_v1 }
 0x140   : > { %1674 = vmatpush3.bf16.msra.mxu1 %v1779_v33 }
 0x141   : > { %1699 = vmatprep.subr.bf16.mxu1 %v1804_v1 }
 0x143   : > { %1676 = vmatmul.mubr.bf16.vlgmr.msra.gmra.mxu1 %v881_v36 }
 0x144   : > { %1715 = vmatprep.mubr.msk.bf16.mxu1 %vm1805_vm0, %v1804_v1  ;;  %1700 = vmatpush3.bf16.msra.mxu1 %v1788_v45 }
 0x145   : > { %1701 = vmatprep.subr.bf16.mxu1 %v1804_v1 }
 0x148   : > { %1702 = vmatpush3.bf16.msra.mxu1 %v1789_v46 }
 0x149   : > { %1703 = vmatprep.subr.bf16.mxu1 %v1804_v1 }
 0x14c   : > { %1704 = vmatpush3.bf16.msra.mxu1 %v1790_v47 }
 0x14d   : > { %1705 = vmatprep.subr.bf16.mxu1 %v1804_v1 }
 0x150   : > { %1706 = vmatpush3.bf16.msra.mxu1 %v1791_v7 }
 0x151   : > { %1707 = vmatprep.subr.bf16.mxu1 %v1804_v1 }
 0x154   : > { %1708 = vmatpush3.bf16.msra.mxu1 %v1792_v8 }
 0x155   : > { %1709 = vmatprep.subr.bf16.mxu1 %v1804_v1 }
 0x158   : > { %1710 = vmatpush3.bf16.msra.mxu1 %v1793_v9 }
 0x159   : > { %1711 = vmatprep.subr.bf16.mxu1 %v1804_v1 }
 0x15c   : > { %1712 = vmatpush3.bf16.msra.mxu1 %v1794_v10 }
 0x15d   : > { %1713 = vmatprep.subr.bf16.mxu1 %v1804_v1 }
 0x160   : > { %1714 = vmatpush3.bf16.msra.mxu1 %v1795_v11 }
 0x1d9   : > { %v860_v48 = vpop.f32.mrf.mxu0 }
 0x1db   : > { %v1657_v49 = vpop.f32.mrf.mxu0 }
 0x1dd   : > { %v863_v50 = vpop.f32.mrf.mxu0 }
 0x1df   : > { %v1658_v51 = vpop.f32.mrf.mxu0 }
 0x1e3   : > { %v771_v52 = vpop.f32.mrf.mxu1 }
 0x1e4   : > { %v861_v56 = vadd.f32 %v860_v48, %v771_v52 }
 0x1e5   : > { %v1637_v53 = vpop.f32.mrf.mxu1 }
 0x1e7   : > { %v774_v54 = vpop.f32.mrf.mxu1 }
 0x1e8   : > { %v864_v61 = vadd.f32 %v863_v50, %v774_v54 }
 0x1e9   : > { %v1638_v55 = vpop.f32.mrf.mxu1 }
 0x203   : > { %v981_v57 = vpop.f32.mrf.mxu1 }
 0x204   : > { %v988_v59 = vadd.f32 %v981_v57, %v861_v56 }
 0x205   : > { %v1677_v60 = vpop.f32.mrf.mxu1 }
 0x206   : > { %v998_v62 = vadd.f32 %v1430_v58, %v988_v59 }
 0x207   : > { %v984_v63 = vpop.f32.mrf.mxu1 }
 0x208   : > { %v1000_v0 = vmax.f32 %v998_v62, 0.0  ;;  %v989_v2 = vadd.f32 %v984_v63, %v864_v61 }
 0x209   : > { %v1678_v3 = vpop.f32.mrf.mxu1 }
 0x20a   : > { %1002 = vst [vmem:[#allocation2 + $0x10] sm:$0xff] %v1000_v0  ;;  %v999_v4 = vadd.f32 %v1430_v58, %v989_v2 }
 0x20c   : > { %v1001_v5 = vmax.f32 %v999_v4, 0.0 }
 0x20e   : > { %1003 = vst [vmem:[#allocation2 + $0x18] sm:$0xff] %v1001_v5  ;;  %v1006_v6 = vpack.c.bf16 %v1001_v5, %v1000_v0 }
 0x210   : > { %1696 = vmatmul.mubr.bf16.vlgmr.msra.gmra.mxu0 %v1006_v6 }
 0x2d0   : > { %v1114_v15 = vpop.f32.mrf.mxu0 }
 0x2d1   : > { %v1115_v16 = vadd.f32 %v1448_v14, %v1114_v15 }
 0x2d2   : > { %v1697_v17 = vpop.f32.mrf.mxu0 }
 0x2d3   : > { %v1121_v18 = vmax.f32 %v1115_v16, 0.0 }
 0x2d4   : > { %v1117_v19 = vpop.f32.mrf.mxu0 }
 0x2d5   : > { %1123 = vst [vmem:[#allocation3 + $0x10] sm:$0xff] %v1121_v18  ;;  %v1118_v20 = vadd.f32 %v1448_v14, %v1117_v19 }
 0x2d6   : > { %v1698_v21 = vpop.f32.mrf.mxu0 }
 0x2d7   : > { %v1122_v22 = vmax.f32 %v1118_v20, 0.0 }
 0x2d9   : > { %1124 = vst [vmem:[#allocation3 + $0x18] sm:$0xff] %v1122_v22  ;;  %v1127_v1 = vpack.c.bf16 %v1122_v22, %v1121_v18 }
 0x2db   : > { %1716 = vmatmul.mubr.bf16.vlgmr.msra.gmra.mxu1 %v1127_v1 }
 0x39b   : > { %v1235_v24 = vpop.f32.mrf.mxu1 }
 0x39c   : > { %v1236_v25 = vadd.f32 %v1474_v23, %v1235_v24 }
 0x39d   : > { %v1717_v26 = vpop.f32.mrf.mxu1 }
 0x39e   : > { %v1244_v27 = vadd.f32 %v1236_v25, %v1911_v12 }
 0x39f   : > { %v1238_v28 = vpop.f32.mrf.mxu1 }
 0x3a0   : > { %v1246_v29 = vmax.f32 %v1244_v27, 0.0  ;;  %v1239_v30 = vadd.f32 %v1474_v23, %v1238_v28 }
 0x3a1   : > { %v1718_v31 = vpop.f32.mrf.mxu1 }
 0x3a2   : > { %1248 = vst [vmem:[%s278_s12] sm:$0xff] %v1246_v29  ;;  %v1245_v32 = vadd.f32 %v1239_v30, %v1913_v13 }
 0x3a4   : > { %v1247_v33 = vmax.f32 %v1245_v32, 0.0 }
 0x3a6   : > { %1249 = vst [vmem:[%s278_s12 + $0x8] sm:$0xff] %v1247_v33 }
 0x3a7 PF: > { %s17_s24 = sadd.s32 1, %s1802_s24  }
 0x3a8   : > { %p14_p4 = scmp.ge.s32.totalorder %s17_s24, 4  }
 0x3aa   :  { %16 = sbr.rel (!%p14_p4) target bundleno = 1 (0x1), region = 88 }

// kernel: _lambda_.29
= control target key start
LH: loop header
LB: loop body
LE: loop exit
PB: predicated region body
PF: predicated region fallthrough
CT: control target
= control target key end

     0   :  { %12 = vsyncpa [#allocation5], 0  ;;  %s2393_s0 = inlined_call_operand.vmem [shape: f32[2,16,128], index: 0, kind: input, shape index: {}]   ;;  %s2394_s1 = inlined_call_operand.vmem [shape: bf16[3,128,128], index: 1, kind: input, shape index: {}]   ;;  %s2395_s2 = inlined_call_operand.vmem [shape: bf16[3,128,128], index: 2, kind: input, shape index: {}]   ;;  %s2396_s3 = inlined_call_operand.vmem [shape: bf16[3,128,128], index: 3, kind: input, shape index: {}]   ;;  %s2397_s4 = inlined_call_operand.vmem [shape: bf16[3,128,128], index: 4, kind: input, shape index: {}]   ;;  %s2398_s5 = inlined_call_operand.vmem [shape: f32[4,1,128], index: 5, kind: input, shape index: {}]   ;;  %s2399_s6 = inlined_call_operand.vmem [shape: f32[4,16,1], index: 6, kind: input, shape index: {}]   ;;  %s2400_s7 = inlined_call_operand.hbm [shape: f32[2,16,128], index: 7, kind: output, shape index: {}]  }
   0x1   :  { %14 = vsyncpa [#allocation5 + $0x1], 0  ;;  %s1981_s24 = smov 0   ;;  %s1983_s25 = smov 0  }
   0x2   :  { %s1985_s26 = smov 0   ;;  %s1987_s27 = smov 0  }
   0x3 LB: > { %s2002_s28 = sadd.s32 4294967295, %s1933_s27   ;;  %s1348_s29 = sadd.s32 4294967294, %s1933_s27   ;;  %s1933_s27 = sphi %s1987_s27, %s2406_s27   ;;  %s1929_s26 = sphi %s1985_s26, %s2405_s26   ;;  %s1925_s25 = sphi %s1983_s25, %s2404_s25   ;;  %s1921_s24 = sphi %s1981_s24, %s2403_s24  }
   0x4   : > { %s2006_s30 = sadd.s32 1, %s1933_s27   ;;  %s179_s8 = sadd.s32 1, %s1929_s26 }
   0x5   : > { %s176_s9 = ssub.s32 %s1933_s27, %s2006_s30  ;;  %p189_p0 = scmp.ne.s32.totalorder %s1929_s26, %s1925_s25 }
   0x6   : > { %p177_p1 = scmp.eq.s32.totalorder %s176_s9, 0  ;;  %p190_p2 = scmp.eq.s32.totalorder %s2002_s28, 1 }
   0x7   : > { %p195_p3 = scmp.ne.s32.totalorder %s1925_s25, %s1921_s24  ;;  %p196_p4 = scmp.eq.s32.totalorder %s1348_s29, 1 }
   0x8   : > { %s2017_s10 = scalar_select %p177_p1, %s1929_s26, %s179_s8  }
   0x9   : > { %p2019_p5 = por %p190_p2, %p189_p0  ;;  %p2023_p6 = por %p196_p4, %p195_p3 }
   0xa   : > { %p1351_p7 = scmp.ge.s32.totalorder %s1933_s27, 1  ;;  %p240_p8 = scmp.lt.s32.totalorder %s1933_s27, 3 }
   0xc   : > { %p241_p9 = pnand %p1351_p7, %p240_p8 }
   0xd   : > { %p272_p10 = scmp.lt.s32.totalorder (!%p241_p9), %s2002_s28, 1  ;;  %s269_s20 = sand.u32 (!%p241_p9), 1, %s1925_s25  }
   0xe   : > { %244 = sbr.rel (%p241_p9) target bundleno = 956 (0x3bc), region = 48  ;;  %s1530_s9 = sshll.u32 (!%p241_p9), %s2002_s28, 8 }
   0xf   : > { %s2351_s15 = scalar_lea.hbm (!%p241_p9), %s2400_s7, %s1530_s9  ;;  %s2353_s16 = scalar_lea.sflag (!%p241_p9), [#allocation5], %s269_s20 }
  0x13   : > { %v1809_v0 = vld [vmem:[%s2394_s1 + $0x38] sm:$0xff]   ;;  %v1935_v1 = vmov 0.0   ;;  %v1811_v3 = vld [vmem:[%s2394_s1 + $0x30] sm:$0xff]   ;;  %vm1936_vm0 = vmmov 0   ;;  %v1937_v5 = vmov 0   ;;  %v1813_v6 = vld [vmem:[%s2394_s1 + $0x28] sm:$0xff]  }
  0x14   : > { %1603 = vmatprep.subr.bf16.mxu0 %v1935_v1  ;;  %285 = vst [vmem:[#allocation2 + $0x38] sm:$0xff] %v1935_v1  ;;  %286 = vst [vmem:[#allocation2 + $0x50] sm:$0xff] %v1935_v1  ;;  %1623 = vmatprep.subr.bf16.mxu1 %v1935_v1  ;;  %v1810_v2 = vld [vmem:[%s2394_s1 + $0x78] sm:$0xff]   ;;  %v1812_v4 = vld [vmem:[%s2394_s1 + $0x70] sm:$0xff]   ;;  %s273_s23 = scalar_select %p272_p10, %s2002_s28, 1 }
  0x15   : > { %301 = vst [vmem:[#allocation3 + $0x38] sm:$0xff] %v1935_v1  ;;  %302 = vst [vmem:[#allocation3 + $0x50] sm:$0xff] %v1935_v1  ;;  %1604 = vmatpush3.bf16.msra.mxu0 %v1809_v0  ;;  %1619 = vmatprep.mubr.msk.bf16.mxu0 %vm1936_vm0, %v1935_v1  ;;  %v1814_v7 = vld [vmem:[%s2394_s1 + $0x68] sm:$0xff]   ;;  %v1815_v8 = vld [vmem:[%s2394_s1 + $0x20] sm:$0xff]   ;;  %s1938_s28 = smov [#allocation4]  }
  0x16   : > { %1624 = vmatpush3.bf16.msra.mxu1 %v1810_v2  ;;  %1605 = vmatprep.subr.bf16.mxu0 %v1935_v1  ;;  %s1529_s14 = sshll.u32 %s273_s23, 4  ;;  %v1816_v9 = vld [vmem:[%s2394_s1 + $0x60] sm:$0xff]   ;;  %v1817_v10 = vld [vmem:[%s2394_s1 + $0x18] sm:$0xff]   ;;  %v1819_v14 = vld [vmem:[%s2394_s1 + $0x10] sm:$0xff]   ;;  %s1352_s23 = sshll.u32 %s269_s20, 4 }
  0x17   : > { %1625 = vmatprep.subr.bf16.mxu1 %v1935_v1  ;;  %1639 = vmatprep.mubr.msk.bf16.mxu1 %vm1936_vm0, %v1935_v1  ;;  %s276_s19 = scalar_lea.vmem %s2393_s0, %s1529_s14  ;;  %v1818_v11 = vld [vmem:[%s2394_s1 + $0x58] sm:$0xff]   ;;  %v1820_v15 = vld [vmem:[%s2394_s1 + $0x50] sm:$0xff]   ;;  %v1821_v16 = vld [vmem:[%s2394_s1 + $0x8] sm:$0xff]   ;;  %s271_s29 = scalar_lea.vmem [#allocation4], %s1352_s23 }
  0x18   : > { %1807 = vset.pattern.permute.xlu0 %v1937_v5  ;;  %1808 = vset.pattern.permute.xlu1 %v1937_v5  ;;  %v2082_v12 = vld [vmem:[%s276_s19] sm:$0xff]  ;;  %v2084_v13 = vld [vmem:[%s276_s19 + $0x8] sm:$0xff]  ;;  %v1412_v23 = vld [vmem:[%s2399_s6 + $0x10] sm:$0xff]  ;;  %s1286_s8 = sshll.u32 %s271_s29, 4  ;;  %s1877_s18 = sshll.u32 %s1938_s28, 4  ;;  %s2346_s8 = int_to_ptr.vmem [resolvable:$true] %s1286_s8  ;;  %s1878_s18 = int_to_ptr.vmem [resolvable:$false] %s1877_s18 }
  0x19   : > { %1606 = vmatpush3.bf16.msra.mxu0 %v1811_v3  ;;  %312 = vst [vmem:[#allocation2 + $0x40] sm:$0xff] %v2082_v12  ;;  %313 = vst [vmem:[#allocation2 + $0x48] sm:$0xff] %v2084_v13  ;;  %v1822_v17 = vld [vmem:[%s2394_s1 + $0x48] sm:$0xff]   ;;  %v1823_v18 = vld [vmem:[%s2394_s1] sm:$0xff]   ;;  %893 = vperm.xlu1 %1808, %v1412_v23   ;;  %v316_v28 = vpack.c.bf16 %v2084_v13, %v2082_v12  ;;  %s1873_s17 = scalar_lea.vmem %s2346_s8, 256  ;;  %s1879_s19 = scalar_lea.vmem %s1878_s18, 512 }
  0x1a   : > { %1626 = vmatpush3.bf16.msra.mxu1 %v1812_v4  ;;  %1607 = vmatprep.subr.bf16.mxu0 %v1935_v1  ;;  %v1824_v19 = vld [vmem:[%s2394_s1 + $0x40] sm:$0xff]   ;;  %v656_v24 = vld [vmem:[%s2399_s6 + $0x8] sm:$0xff]  ;;  %v1413_v25 = vld [vmem:[%s2399_s6 + $0x18] sm:$0xff]  ;;  %p1874_p11 = scmp.ne.s32.totalorder %s2346_s8, %s1873_s17  ;;  %p1880_p0 = scmp.lt.s32.totalorder %s2346_s8, %s1878_s18 }
  0x1b   : > { %1627 = vmatprep.subr.bf16.mxu1 %v1935_v1  ;;  %v655_v21 = vld [vmem:[%s2399_s6] sm:$0xff]  ;;  %v1825_v26 = vld [vmem:[%s2394_s1 + $0xb8] sm:$0xff]   ;;  %v1826_v29 = vld [vmem:[%s2394_s1 + $0xb0] sm:$0xff]   ;;  %p1881_p1 = scmp.lt.s32.totalorder %s1879_s19, %s1873_s17 }
  0x1c   : > { %684 = vperm.xlu0 %1807, %v655_v21   ;;  %v1827_v30 = vld [vmem:[%s2394_s1 + $0xa8] sm:$0xff]   ;;  %v1828_v31 = vld [vmem:[%s2394_s1 + $0xa0] sm:$0xff]   ;;  %v1829_v32 = vld [vmem:[%s2394_s1 + $0x98] sm:$0xff]   ;;  %p1875_p12 = pnand %p1874_p11, %p2019_p5 }
  0x1d   : > { %1608 = vmatpush3.bf16.msra.mxu0 %v1813_v6  ;;  %898 = vperm.xlu1 %1808, %v1413_v25   ;;  %v1830_v33 = vld [vmem:[%s2394_s1 + $0x90] sm:$0xff]   ;;  %v1831_v34 = vld [vmem:[%s2394_s1 + $0x88] sm:$0xff]   ;;  %v1832_v35 = vld [vmem:[%s2394_s1 + $0x80] sm:$0xff]   ;;  %p1882_p2 = por %p1881_p1, %p1880_p0 }
  0x1e   : > { %1628 = vmatpush3.bf16.msra.mxu1 %v1814_v7  ;;  %1609 = vmatprep.subr.bf16.mxu0 %v1935_v1  ;;  %v1833_v38 = vld [vmem:[%s2395_s2 + $0x78] sm:$0xff]   ;;  %v1835_v40 = vld [vmem:[%s2395_s2 + $0x70] sm:$0xff]   ;;  %v1837_v42 = vld [vmem:[%s2395_s2 + $0x68] sm:$0xff]   ;;  %p1876_p13 = pneg %p1875_p12 }
  0x1f   : > { %1629 = vmatprep.subr.bf16.mxu1 %v1935_v1  ;;  %v1834_v39 = vld [vmem:[%s2395_s2 + $0x38] sm:$0xff]   ;;  %v1836_v41 = vld [vmem:[%s2395_s2 + $0x30] sm:$0xff]   ;;  %v1838_v43 = vld [vmem:[%s2395_s2 + $0x28] sm:$0xff]  }
  0x20   : > { %v334_v20 = vld [vmem:[#allocation2 + $0x3c] sm:$0xff]  ;;  %v335_v22 = vld [vmem:[#allocation2 + $0x44] sm:$0xff]  ;;  %689 = vperm.xlu0 %1807, %v656_v24   ;;  %v532_v36 = vld [vmem:[#allocation2 + $0x4c] sm:$0xff]  ;;  %p1883_p3 = pnand %p1882_p2, %p1876_p13 }
  0x21   : > { %1610 = vmatpush3.bf16.msra.mxu0 %v1815_v8  ;;  %v336_v27 = vpack.c.bf16 %v335_v22, %v334_v20  ;;  %v533_v37 = vpack.c.bf16 %v532_v36, %v335_v22  ;;  %v1839_v44 = vld [vmem:[%s2395_s2 + $0x60] sm:$0xff]   ;;  %v1841_v45 = vld [vmem:[%s2395_s2 + $0x58] sm:$0xff]   ;;  %v1843_v46 = vld [vmem:[%s2395_s2 + $0x50] sm:$0xff]  }
  0x22   : > { %1630 = vmatpush3.bf16.msra.mxu1 %v1816_v9  ;;  %1611 = vmatprep.subr.bf16.mxu0 %v1935_v1  ;;  %v1840_v47 = vld [vmem:[%s2395_s2 + $0x20] sm:$0xff]   ;;  %v1845_v48 = vld [vmem:[%s2395_s2 + $0x48] sm:$0xff]   ;;  %v1842_v49 = vld [vmem:[%s2395_s2 + $0x18] sm:$0xff]  }
  0x23   : > { %1631 = vmatprep.subr.bf16.mxu1 %v1935_v1  ;;  %v1847_v50 = vld [vmem:[%s2395_s2 + $0x40] sm:$0xff]   ;;  %v1844_v51 = vld [vmem:[%s2395_s2 + $0x10] sm:$0xff]   ;;  %v1846_v52 = vld [vmem:[%s2395_s2 + $0x8] sm:$0xff]  }
  0x24   : > { %v1848_v53 = vld [vmem:[%s2395_s2] sm:$0xff]   ;;  %v1849_v21 = vld [vmem:[%s2395_s2 + $0xb8] sm:$0xff]   ;;  %v1850_v23 = vld [vmem:[%s2395_s2 + $0xb0] sm:$0xff]  }
  0x25   : > { %1612 = vmatpush3.bf16.msra.mxu0 %v1817_v10  ;;  %v1411_v0 = vld [vmem:[%s2398_s5] ss:$0 sm:$0xff]  ;;  %v1851_v24 = vld [vmem:[%s2395_s2 + $0xa8] sm:$0xff]  }
  0x26   : > { %1632 = vmatpush3.bf16.msra.mxu1 %v1818_v11  ;;  %1613 = vmatprep.subr.bf16.mxu0 %v1935_v1  ;;  %v1852_v25 = vld [vmem:[%s2395_s2 + $0xa0] sm:$0xff]  }
  0x27   : > { %1633 = vmatprep.subr.bf16.mxu1 %v1935_v1 }
  0x29   : > { %1614 = vmatpush3.bf16.msra.mxu0 %v1819_v14 }
  0x2a   : > { %1634 = vmatpush3.bf16.msra.mxu1 %v1820_v15  ;;  %1615 = vmatprep.subr.bf16.mxu0 %v1935_v1 }
  0x2b   : > { %1635 = vmatprep.subr.bf16.mxu1 %v1935_v1 }
  0x2d   : > { %1616 = vmatpush3.bf16.msra.mxu0 %v1821_v16 }
  0x2e   : > { %1636 = vmatpush3.bf16.msra.mxu1 %v1822_v17  ;;  %1617 = vmatprep.subr.bf16.mxu0 %v1935_v1 }
  0x2f   : > { %1637 = vmatprep.subr.bf16.mxu1 %v1935_v1 }
  0x31   : > { %1618 = vmatpush3.bf16.msra.mxu0 %v1823_v18 }
  0x32   : > { %1638 = vmatpush3.bf16.msra.mxu1 %v1824_v19  ;;  %1643 = vmatprep.subr.bf16.mxu0 %v1935_v1 }
  0x33   : > { %1663 = vmatprep.subr.bf16.mxu1 %v1935_v1 }
  0x34   : > { %1620 = vmatmul.mubr.bf16.vlgmr.msra.gmra.mxu0 %v336_v27 }
  0x35   : > { %1640 = vmatmul.mubr.bf16.vlgmr.msra.gmra.mxu1 %v316_v28  ;;  %1644 = vmatpush3.bf16.msra.mxu0 %v1825_v26  ;;  %v1853_v26 = vld [vmem:[%s2395_s2 + $0x98] sm:$0xff]   ;;  %v1854_v28 = vld [vmem:[%s2395_s2 + $0x90] sm:$0xff]  }
  0x36   : > { %1645 = vmatprep.subr.bf16.mxu0 %v1935_v1  ;;  %1659 = vmatprep.mubr.msk.bf16.mxu0 %vm1936_vm0, %v1935_v1 }
  0x37   : > { %1679 = vmatprep.mubr.msk.bf16.mxu1 %vm1936_vm0, %v1935_v1  ;;  %1664 = vmatpush3.bf16.msra.mxu1 %v1834_v39  ;;  %v1859_v39 = vld [vmem:[%s2396_s3 + $0x68] sm:$0xff]  }
  0x38   : > { %1665 = vmatprep.subr.bf16.mxu1 %v1935_v1 }
  0x39   : > { %1646 = vmatpush3.bf16.msra.mxu0 %v1826_v29  ;;  %v1855_v29 = vld [vmem:[%s2395_s2 + $0x88] sm:$0xff]  }
  0x3a   : > { %1647 = vmatprep.subr.bf16.mxu0 %v1935_v1 }
  0x3b   : > { %1666 = vmatpush3.bf16.msra.mxu1 %v1836_v41  ;;  %v1861_v41 = vld [vmem:[%s2396_s3 + $0x58] sm:$0xff]  }
  0x3c   : > { %1667 = vmatprep.subr.bf16.mxu1 %v1935_v1 }
  0x3d   : > { %1648 = vmatpush3.bf16.msra.mxu0 %v1827_v30 }
  0x3e   : > { %1649 = vmatprep.subr.bf16.mxu0 %v1935_v1 }
  0x3f   : > { %1668 = vmatpush3.bf16.msra.mxu1 %v1838_v43  ;;  %v1863_v43 = vld [vmem:[%s2396_s3 + $0x48] sm:$0xff]  }
  0x40   : > { %1669 = vmatprep.subr.bf16.mxu1 %v1935_v1 }
  0x41   : > { %1650 = vmatpush3.bf16.msra.mxu0 %v1828_v31 }
  0x42   : > { %1651 = vmatprep.subr.bf16.mxu0 %v1935_v1 }
  0x43   : > { %1670 = vmatpush3.bf16.msra.mxu1 %v1840_v47  ;;  %v1867_v47 = vld [vmem:[%s2397_s4 + $0x68] sm:$0xff]  }
  0x44   : > { %1671 = vmatprep.subr.bf16.mxu1 %v1935_v1 }
  0x45   : > { %1652 = vmatpush3.bf16.msra.mxu0 %v1829_v32 }
  0x46   : > { %1653 = vmatprep.subr.bf16.mxu0 %v1935_v1 }
  0x47   : > { %1672 = vmatpush3.bf16.msra.mxu1 %v1842_v49 }
  0x48   : > { %1673 = vmatprep.subr.bf16.mxu1 %v1935_v1 }
  0x49   : > { %1654 = vmatpush3.bf16.msra.mxu0 %v1830_v33  ;;  %v1856_v33 = vld [vmem:[%s2395_s2 + $0x80] sm:$0xff]  }
  0x4a   : > { %1655 = vmatprep.subr.bf16.mxu0 %v1935_v1 }
  0x4b   : > { %1674 = vmatpush3.bf16.msra.mxu1 %v1844_v51 }
  0x4c   : > { %1675 = vmatprep.subr.bf16.mxu1 %v1935_v1 }
  0x4d   : > { %1656 = vmatpush3.bf16.msra.mxu0 %v1831_v34 }
  0x4e   : > { %1657 = vmatprep.subr.bf16.mxu0 %v1935_v1 }
  0x4f   : > { %1676 = vmatpush3.bf16.msra.mxu1 %v1846_v52 }
  0x50   : > { %1677 = vmatprep.subr.bf16.mxu1 %v1935_v1 }
  0x51   : > { %1658 = vmatpush3.bf16.msra.mxu0 %v1832_v35 }
  0x52   : > { %1683 = vmatprep.subr.bf16.mxu0 %v1935_v1 }
  0x53   : > { %1678 = vmatpush3.bf16.msra.mxu1 %v1848_v53 }
  0x54   : > { %1660 = vmatmul.mubr.bf16.vlgmr.msra.gmra.mxu0 %v533_v37  ;;  %1703 = vmatprep.subr.bf16.mxu1 %v1935_v1  ;;  %v1857_v37 = vld [vmem:[%s2396_s3 + $0x78] sm:$0xff]  }
  0x55   : > { %1699 = vmatprep.mubr.msk.bf16.mxu0 %vm1936_vm0, %v1935_v1  ;;  %1684 = vmatpush3.bf16.msra.mxu0 %v1833_v38  ;;  %v1858_v38 = vld [vmem:[%s2396_s3 + $0x70] sm:$0xff]  }
  0x56   : > { %1685 = vmatprep.subr.bf16.mxu0 %v1935_v1 }
  0x59   : > { %1686 = vmatpush3.bf16.msra.mxu0 %v1835_v40  ;;  %v1860_v40 = vld [vmem:[%s2396_s3 + $0x60] sm:$0xff]  }
  0x5a   : > { %1687 = vmatprep.subr.bf16.mxu0 %v1935_v1 }
  0x5d   : > { %1688 = vmatpush3.bf16.msra.mxu0 %v1837_v42  ;;  %v1862_v42 = vld [vmem:[%s2396_s3 + $0x50] sm:$0xff]  }
  0x5e   : > { %1689 = vmatprep.subr.bf16.mxu0 %v1935_v1 }
  0x61   : > { %1690 = vmatpush3.bf16.msra.mxu0 %v1839_v44  ;;  %v1864_v44 = vld [vmem:[%s2396_s3 + $0x40] sm:$0xff]  }
  0x62   : > { %1691 = vmatprep.subr.bf16.mxu0 %v1935_v1 }
  0x65   : > { %1692 = vmatpush3.bf16.msra.mxu0 %v1841_v45  ;;  %v1865_v45 = vld [vmem:[%s2397_s4 + $0x78] sm:$0xff]  }
  0x66   : > { %1693 = vmatprep.subr.bf16.mxu0 %v1935_v1 }
  0x69   : > { %1694 = vmatpush3.bf16.msra.mxu0 %v1843_v46  ;;  %v1866_v46 = vld [vmem:[%s2397_s4 + $0x70] sm:$0xff]  }
  0x6a   : > { %1695 = vmatprep.subr.bf16.mxu0 %v1935_v1 }
  0x6d   : > { %1696 = vmatpush3.bf16.msra.mxu0 %v1845_v48 }
  0x6e   : > { %1697 = vmatprep.subr.bf16.mxu0 %v1935_v1 }
  0x71   : > { %1698 = vmatpush3.bf16.msra.mxu0 %v1847_v50 }
  0x72   : > { %1723 = vmatprep.subr.bf16.mxu0 %v1935_v1 }
  0x94   : > { %v894_v27 = vpop.permute.xlu1 %893 }
  0x97   : > { %v685_v15 = vpop.permute.xlu0 %684 }
  0x98   : > { %v899_v31 = vpop.permute.xlu1 %898 }
  0x9b   : > { %v690_v17 = vpop.permute.xlu0 %689 }
  0xf4   : > { %v435_v54 = vpop.f32.mrf.mxu0 }
  0xf5   : > { %v524_v55 = vpop.f32.mrf.mxu1 }
  0xf6   : > { %v1621_v56 = vpop.f32.mrf.mxu0  ;;  %v525_v62 = vadd.f32 %v524_v55, %v435_v54 }
  0xf7   : > { %v1641_v57 = vpop.f32.mrf.mxu1 }
  0xf8   : > { %v438_v58 = vpop.f32.mrf.mxu0 }
  0xf9   : > { %v527_v59 = vpop.f32.mrf.mxu1 }
  0xfa   : > { %v1622_v60 = vpop.f32.mrf.mxu0  ;;  %v528_v4 = vadd.f32 %v527_v59, %v438_v58  ;;  %v1471_v58 = vld [vmem:[%s2398_s5 + $0x1] ss:$0 sm:$0xff] }
  0xfb   : > { %v1642_v61 = vpop.f32.mrf.mxu1 }
 0x114   : > { %v633_v63 = vpop.f32.mrf.mxu0 }
 0x115   : > { %v640_v2 = vadd.f32 %v633_v63, %v525_v62 }
 0x116   : > { %v1661_v3 = vpop.f32.mrf.mxu0 }
 0x117   : > { %v649_v5 = vadd.f32 %v1411_v0, %v640_v2 }
 0x118   : > { %v636_v6 = vpop.f32.mrf.mxu0 }
 0x119   : > { %v651_v7 = vmax.f32 %v649_v5, 0.0  ;;  %v641_v8 = vadd.f32 %v636_v6, %v528_v4 }
 0x11a   : > { %v1662_v9 = vpop.f32.mrf.mxu0 }
 0x11b   : > { %653 = vst [vmem:[#allocation3 + $0x40] sm:$0xff] %v651_v7  ;;  %v650_v10 = vadd.f32 %v1411_v0, %v641_v8  ;;  %v1869_v8 = vld [vmem:[%s2397_s4 + $0x58] sm:$0xff]   ;;  %v1870_v9 = vld [vmem:[%s2397_s4 + $0x50] sm:$0xff]  }
 0x11d   : > { %v652_v11 = vmax.f32 %v650_v10, 0.0  ;;  %v1871_v10 = vld [vmem:[%s2397_s4 + $0x48] sm:$0xff]  }
 0x11f   : > { %654 = vst [vmem:[#allocation3 + $0x48] sm:$0xff] %v652_v11  ;;  %v662_v14 = vpack.c.bf16 %v652_v11, %v651_v7  ;;  %v1868_v7 = vld [vmem:[%s2397_s4 + $0x60] sm:$0xff]  }
 0x120   : > { %v1872_v11 = vld [vmem:[%s2397_s4 + $0x40] sm:$0xff]  }
 0x121   : > { %1700 = vmatmul.mubr.bf16.vlgmr.msra.gmra.mxu0 %v662_v14  ;;  %v1489_v14 = vld [vmem:[%s2398_s5 + $0x2] ss:$0 sm:$0xff] }
 0x122   : > { %1739 = vmatprep.mubr.msk.bf16.mxu0 %vm1936_vm0, %v1935_v1  ;;  %v680_v16 = vld [vmem:[#allocation3 + $0x3f] sm:$0xff]  ;;  %1724 = vmatpush3.bf16.msra.mxu0 %v1857_v37 }
 0x123   : > { %v692_v19 = vmul.f32 %v685_v15, %v680_v16  ;;  %1725 = vmatprep.subr.bf16.mxu0 %v1935_v1 }
 0x126   : > { %v681_v18 = vld [vmem:[#allocation3 + $0x47] sm:$0xff]  ;;  %1726 = vmatpush3.bf16.msra.mxu0 %v1858_v38 }
 0x127   : > { %v693_v20 = vmul.f32 %v690_v17, %v681_v18  ;;  %v889_v30 = vld [vmem:[#allocation3 + $0x41] sm:$0xff]  ;;  %v890_v32 = vld [vmem:[#allocation3 + $0x49] sm:$0xff]  ;;  %1727 = vmatprep.subr.bf16.mxu0 %v1935_v1 }
 0x128   : > { %v901_v34 = vmul.f32 %v894_v27, %v889_v30  ;;  %v902_v35 = vmul.f32 %v899_v31, %v890_v32 }
 0x129   : > { %v694_v22 = vpack.c.bf16 %v693_v20, %v692_v19 }
 0x12a   : > { %v903_v36 = vpack.c.bf16 %v902_v35, %v901_v34  ;;  %1728 = vmatpush3.bf16.msra.mxu0 %v1859_v39 }
 0x12b   : > { %1680 = vmatmul.mubr.bf16.vlgmr.msra.gmra.mxu1 %v694_v22  ;;  %1729 = vmatprep.subr.bf16.mxu0 %v1935_v1 }
 0x12c   : > { %1704 = vmatpush3.bf16.msra.mxu1 %v1849_v21  ;;  %1719 = vmatprep.mubr.msk.bf16.mxu1 %vm1936_vm0, %v1935_v1 }
 0x12d   : > { %1705 = vmatprep.subr.bf16.mxu1 %v1935_v1 }
 0x12e   : > { %1730 = vmatpush3.bf16.msra.mxu0 %v1860_v40 }
 0x12f   : > { %1731 = vmatprep.subr.bf16.mxu0 %v1935_v1 }
 0x130   : > { %1706 = vmatpush3.bf16.msra.mxu1 %v1850_v23  ;;  %v1515_v23 = vld [vmem:[%s2398_s5 + $0x3] ss:$0 sm:$0xff] }
 0x131   : > { %1707 = vmatprep.subr.bf16.mxu1 %v1935_v1 }
 0x132   : > { %1732 = vmatpush3.bf16.msra.mxu0 %v1861_v41 }
 0x133   : > { %1733 = vmatprep.subr.bf16.mxu0 %v1935_v1 }
 0x134   : > { %1708 = vmatpush3.bf16.msra.mxu1 %v1851_v24 }
 0x135   : > { %1709 = vmatprep.subr.bf16.mxu1 %v1935_v1 }
 0x136   : > { %1734 = vmatpush3.bf16.msra.mxu0 %v1862_v42 }
 0x137   : > { %1735 = vmatprep.subr.bf16.mxu0 %v1935_v1 }
 0x138   : > { %1710 = vmatpush3.bf16.msra.mxu1 %v1852_v25 }
 0x139   : > { %1711 = vmatprep.subr.bf16.mxu1 %v1935_v1 }
 0x13a   : > { %1736 = vmatpush3.bf16.msra.mxu0 %v1863_v43 }
 0x13b   : > { %1737 = vmatprep.subr.bf16.mxu0 %v1935_v1 }
 0x13c   : > { %1712 = vmatpush3.bf16.msra.mxu1 %v1853_v26 }
 0x13d   : > { %1713 = vmatprep.subr.bf16.mxu1 %v1935_v1 }
 0x13e   : > { %1738 = vmatpush3.bf16.msra.mxu0 %v1864_v44 }
 0x140   : > { %1714 = vmatpush3.bf16.msra.mxu1 %v1854_v28 }
 0x141   : > { %1715 = vmatprep.subr.bf16.mxu1 %v1935_v1 }
 0x144   : > { %1716 = vmatpush3.bf16.msra.mxu1 %v1855_v29 }
 0x145   : > { %1717 = vmatprep.subr.bf16.mxu1 %v1935_v1 }
 0x148   : > { %1718 = vmatpush3.bf16.msra.mxu1 %v1856_v33 }
 0x149   : > { %1743 = vmatprep.subr.bf16.mxu1 %v1935_v1 }
 0x14b   : > { %1720 = vmatmul.mubr.bf16.vlgmr.msra.gmra.mxu1 %v903_v36 }
 0x14c   : > { %1759 = vmatprep.mubr.msk.bf16.mxu1 %vm1936_vm0, %v1935_v1  ;;  %1744 = vmatpush3.bf16.msra.mxu1 %v1865_v45 }
 0x14d   : > { %1745 = vmatprep.subr.bf16.mxu1 %v1935_v1 }
 0x150   : > { %1746 = vmatpush3.bf16.msra.mxu1 %v1866_v46 }
 0x151   : > { %1747 = vmatprep.subr.bf16.mxu1 %v1935_v1 }
 0x154   : > { %1748 = vmatpush3.bf16.msra.mxu1 %v1867_v47 }
 0x155   : > { %1749 = vmatprep.subr.bf16.mxu1 %v1935_v1 }
 0x158   : > { %1750 = vmatpush3.bf16.msra.mxu1 %v1868_v7 }
 0x159   : > { %1751 = vmatprep.subr.bf16.mxu1 %v1935_v1 }
 0x15c   : > { %1752 = vmatpush3.bf16.msra.mxu1 %v1869_v8 }
 0x15d   : > { %1753 = vmatprep.subr.bf16.mxu1 %v1935_v1 }
 0x160   : > { %1754 = vmatpush3.bf16.msra.mxu1 %v1870_v9 }
 0x161   : > { %1755 = vmatprep.subr.bf16.mxu1 %v1935_v1 }
 0x164   : > { %1756 = vmatpush3.bf16.msra.mxu1 %v1871_v10 }
 0x165   : > { %1757 = vmatprep.subr.bf16.mxu1 %v1935_v1 }
 0x168   : > { %1758 = vmatpush3.bf16.msra.mxu1 %v1872_v11 }
 0x1e1   : > { %v882_v48 = vpop.f32.mrf.mxu0 }
 0x1e3   : > { %v1701_v49 = vpop.f32.mrf.mxu0 }
 0x1e5   : > { %v885_v50 = vpop.f32.mrf.mxu0 }
 0x1e7   : > { %v1702_v51 = vpop.f32.mrf.mxu0 }
 0x1eb   : > { %v793_v52 = vpop.f32.mrf.mxu1 }
 0x1ec   : > { %v883_v56 = vadd.f32 %v882_v48, %v793_v52 }
 0x1ed   : > { %v1681_v53 = vpop.f32.mrf.mxu1 }
 0x1ef   : > { %v796_v54 = vpop.f32.mrf.mxu1 }
 0x1f0   : > { %v886_v61 = vadd.f32 %v885_v50, %v796_v54 }
 0x1f1   : > { %v1682_v55 = vpop.f32.mrf.mxu1 }
 0x20b   : > { %v1003_v57 = vpop.f32.mrf.mxu1 }
 0x20c   : > { %v1010_v59 = vadd.f32 %v1003_v57, %v883_v56 }
 0x20d   : > { %v1721_v60 = vpop.f32.mrf.mxu1 }
 0x20e   : > { %v1020_v62 = vadd.f32 %v1471_v58, %v1010_v59 }
 0x20f   : > { %v1006_v63 = vpop.f32.mrf.mxu1 }
 0x210   : > { %v1022_v0 = vmax.f32 %v1020_v62, 0.0  ;;  %v1011_v2 = vadd.f32 %v1006_v63, %v886_v61 }
 0x211   : > { %v1722_v3 = vpop.f32.mrf.mxu1 }
 0x212   : > { %1024 = vst [vmem:[#allocation2 + $0x40] sm:$0xff] %v1022_v0  ;;  %v1021_v4 = vadd.f32 %v1471_v58, %v1011_v2 }
 0x214   : > { %v1023_v5 = vmax.f32 %v1021_v4, 0.0 }
 0x216   : > { %1025 = vst [vmem:[#allocation2 + $0x48] sm:$0xff] %v1023_v5  ;;  %v1028_v6 = vpack.c.bf16 %v1023_v5, %v1022_v0 }
 0x218   : > { %1740 = vmatmul.mubr.bf16.vlgmr.msra.gmra.mxu0 %v1028_v6 }
 0x2d8   : > { %v1136_v15 = vpop.f32.mrf.mxu0 }
 0x2d9   : > { %v1137_v16 = vadd.f32 %v1489_v14, %v1136_v15 }
 0x2da   : > { %v1741_v17 = vpop.f32.mrf.mxu0 }
 0x2db   : > { %v1143_v18 = vmax.f32 %v1137_v16, 0.0 }
 0x2dc   : > { %v1139_v19 = vpop.f32.mrf.mxu0 }
 0x2dd   : > { %1145 = vst [vmem:[#allocation3 + $0x40] sm:$0xff] %v1143_v18  ;;  %v1140_v20 = vadd.f32 %v1489_v14, %v1139_v19 }
 0x2de   : > { %v1742_v21 = vpop.f32.mrf.mxu0 }
 0x2df   : > { %v1144_v22 = vmax.f32 %v1140_v20, 0.0 }
 0x2e1   : > { %1146 = vst [vmem:[#allocation3 + $0x48] sm:$0xff] %v1144_v22  ;;  %v1149_v1 = vpack.c.bf16 %v1144_v22, %v1143_v18 }
 0x2e3   : > { %1760 = vmatmul.mubr.bf16.vlgmr.msra.gmra.mxu1 %v1149_v1 }
 0x3a3   : > { %v1257_v24 = vpop.f32.mrf.mxu1 }
 0x3a4   : > { %v1258_v25 = vadd.f32 %v1515_v23, %v1257_v24 }
 0x3a5   : > { %v1761_v26 = vpop.f32.mrf.mxu1 }
 0x3a6   : > { %v1266_v27 = vadd.f32 %v1258_v25, %v2082_v12 }
 0x3a7   : > { %v1260_v28 = vpop.f32.mrf.mxu1 }
 0x3a8   : > { %v1268_v29 = vmax.f32 %v1266_v27, 0.0  ;;  %v1261_v30 = vadd.f32 %v1515_v23, %v1260_v28 }
 0x3a9   : > { %v1762_v31 = vpop.f32.mrf.mxu1 }
 0x3aa   : > { %1270 = vst [vmem:[%s271_s29] sm:$0xff] %v1268_v29  ;;  %v1267_v32 = vadd.f32 %v1261_v30, %v2084_v13 }
 0x3ac   : > { %v1269_v12 = vmax.f32 %v1267_v32, 0.0 }
 0x3ae   : > { %1271 = vst [vmem:[%s271_s29 + $0x8] sm:$0xff] %v1269_v12 }
 0x3af   : > { %1886 = shalt.err (!%p1883_p3)
}
 0x3b0   : > { %s1887_s20 = scalar_lea.hbm %s2351_s15, 256  ;;  %s1891_s23 = scalar_lea.hbm %s2400_s7, 512 }
 0x3b1   : > { %p1888_p4 = scmp.ne.s32.totalorder %s2351_s15, %s1887_s20  ;;  %p1892_p9 = scmp.lt.s32.totalorder %s2351_s15, %s2400_s7 }
 0x3b2   : > { %p1893_p10 = scmp.lt.s32.totalorder %s1891_s23, %s1887_s20 }
 0x3b3   : > { %p1889_p7 = pnand %p1888_p4, %p2019_p5 }
 0x3b4   : > { %p1894_p11 = por %p1893_p10, %p1892_p9 }
 0x3b5   : > { %p1890_p8 = pneg %p1889_p7 }
 0x3b7   : > { %p1895_p12 = pnand %p1894_p11, %p1890_p8 }
 0x3b9   : > { %1898 = shalt.err (!%p1895_p12)
}
 0x3ba   : > { %s1939_s13 = smov 128   ;;  %s1940_s14 = smov 8  }
 0x3bb   : > { %1763 = dma.vmem_to_hbm [thread:$0]  (%p2019_p5), %s2346_s8, 256, %s2351_s15, %s2353_s16, %s1939_s13, %s1939_s13, %s1940_s14  }
 0x3bc PF: > { %p1769_p13 = scmp.ge.s32.totalorder %s1933_s27, 2  ;;  %s1301_s17 = sand.u32 1, %s1921_s24  }
 0x3bd   : > { %s1302_s28 = scalar_lea.sflag [#allocation5], %s1301_s17 }
 0x3be   : > { %p1766_p0 = pnand %p1769_p13, %p2023_p6 }
 0x3c0   : > { %p1767_p1 = pneg %p1766_p0 }
 0x3c2   : > { %1916 = dma.done.wait (%p1767_p1), %s1302_s28, 256  }
 0x3c3   : > { %1918 = vsyncadd (%p1767_p1), %s1302_s28, 4294967040  ;;  %p17_p2 = scmp.ge.s32.totalorder %s2006_s30, 4   ;;  %s2403_s24 = smov %s1925_s25 }
 0x3c4   : > { %s2404_s25 = smov %s1929_s26  ;;  %s2405_s26 = smov %s2017_s10 }
 0x3c5   : > { %s2406_s27 = smov %s2006_s30  ;;  %19 = sbr.rel (!%p17_p2) target bundleno = 3 (0x3), region = 93 }
 0x3ca   :  { %1307 = vsyncpa [#allocation5], 1 }
 0x3cb   :  { %1309 = vsyncpa [#allocation5 + $0x1], 1 }

</bundles_post_ra>
